<compile_context>
chip_gen: v7x
topology: tpu7x:2x2x1
jax: 0.10.0
libtpu: 0.0.40
codegen_flags: <defaults>
</compile_context>

<pallas_src>
import functools
import math

import jax
import jax.numpy as jnp
from jax.experimental import pallas as pl
from jax.experimental.pallas import tpu as pltpu


# ----------------------------- Pallas kernels -----------------------------

def _stem_pool_kernel(x_ref, w_ref, o_ref, *, n_pixels):
    """Fused pointwise conv (ReLU6) + spatial max pool.

    x_ref: (1, tm, Cin) pixel tile of one image
    w_ref: (Cin, Cout) pointwise weights
    o_ref: (1, 1, Cout) running-max accumulator (resident across pixel-tile axis)
    """
    j = pl.program_id(1)

    @pl.when(j == 0)
    def _():
        o_ref[...] = jnp.full(o_ref.shape, -jnp.inf, dtype=o_ref.dtype)

    x = x_ref[0]            # (tm, Cin)
    w = w_ref[...]          # (Cin, Cout)
    tm, cin = x.shape

    # Cin is tiny (3): skip the MXU, use VPU broadcast-FMAs.
    y = x[:, 0:1] * w[0:1, :]
    for c in range(1, cin):
        y = y + x[:, c:c + 1] * w[c:c + 1, :]
    y = jnp.clip(y, 0.0, 6.0)                      # ReLU6 (MobileNetV2-style stand-in)

    # Mask rows past the end of the image (partial last tile) to -inf before the max.
    row = jax.lax.broadcasted_iota(jnp.int32, (tm, 1), 0) + j * tm
    y = jnp.where(row < n_pixels, y, -jnp.inf)

    o_ref[0] = jnp.maximum(o_ref[0], jnp.max(y, axis=0, keepdims=True))


def _gcn_head_kernel(x_ref, feat_ref, adj_ref, w1_ref, w2_ref, fcw_ref, fcb_ref,
                     logit_ref, sig_ref, *, negative_slope):
    """Fused GCN1 + LeakyReLU + GCN2 + LeakyReLU + (x @ g.T) + fc + sigmoid."""
    # GraphConvolution 1 (no bias) + LeakyReLU(0.2)
    s1 = jnp.dot(feat_ref[...], w1_ref[...], preferred_element_type=jnp.float32)   # (nl, 512)
    g1 = jnp.dot(adj_ref[...], s1, preferred_element_type=jnp.float32)
    g1 = jnp.where(g1 >= 0.0, g1, negative_slope * g1)

    # GraphConvolution 2 (no bias) + LeakyReLU(0.2)
    s2 = jnp.dot(g1, w2_ref[...], preferred_element_type=jnp.float32)              # (nl, 1280)
    g2 = jnp.dot(adj_ref[...], s2, preferred_element_type=jnp.float32)
    g2 = jnp.where(g2 >= 0.0, g2, negative_slope * g2)

    # x @ g2.T without materializing the transpose: contract the last (1280) dims.
    s = jax.lax.dot_general(
        x_ref[...], g2,
        dimension_numbers=(((1,), (1,)), ((), ())),
        preferred_element_type=jnp.float32)                                        # (B, nl)

    # fc(nlabel -> 1): degenerate (K=nl, N=1) matmul done as a VPU row reduction.
    fcw = fcw_ref[...]                                                             # (1, nl)
    logit = jnp.sum(s * fcw, axis=-1, keepdims=True) + fcb_ref[0]                  # (B, 1)
    logit_ref[...] = logit
    sig_ref[...] = jax.nn.sigmoid(logit)


# ----------------------------- kernel wrappers -----------------------------

_VMEM_SPEC = pl.BlockSpec(memory_space=pltpu.MemorySpace.VMEM)
_SMEM_SPEC = pl.BlockSpec(memory_space=pltpu.MemorySpace.SMEM)


def stem_and_pool(x_pix, w, *, tm=512):
    """Fused pointwise conv + ReLU6 + AdaptiveMaxPool2d((1,1)).

    x_pix: (B, H*W, Cin)  ->  (B, Cout)
    """
    B, P, Cin = x_pix.shape
    Cout = w.shape[1]
    tm = max(1, min(tm, P))
    grid = (B, pl.cdiv(P, tm))

    out = pl.pallas_call(
        functools.partial(_stem_pool_kernel, n_pixels=P),
        out_shape=jax.ShapeDtypeStruct((B, 1, Cout), jnp.float32),
        grid=grid,
        in_specs=[
            pl.BlockSpec((1, tm, Cin), lambda i, j: (i, j, 0)),
            pl.BlockSpec((Cin, Cout), lambda i, j: (0, 0)),
        ],
        # Output block ignores the pixel-tile axis -> resident accumulator.
        out_specs=pl.BlockSpec((1, 1, Cout), lambda i, j: (i, 0, 0)),
        compiler_params=pltpu.CompilerParams(
            dimension_semantics=("parallel", "arbitrary")),
    )(x_pix, w)
    return out.reshape(B, Cout)


def gcn_head(x, feature, adj, w1, w2, fc_w, fc_b, *, negative_slope=0.2):
    """Fused GCN x2 + head. x:(B, last_channel) -> (logits (B,), sigmoid (B,))."""
    B = x.shape[0]
    logit, sig = pl.pallas_call(
        functools.partial(_gcn_head_kernel, negative_slope=negative_slope),
        out_shape=(
            jax.ShapeDtypeStruct((B, 1), jnp.float32),
            jax.ShapeDtypeStruct((B, 1), jnp.float32),
        ),
        in_specs=[_VMEM_SPEC, _VMEM_SPEC, _VMEM_SPEC, _VMEM_SPEC, _VMEM_SPEC,
                  _VMEM_SPEC, _SMEM_SPEC],
        out_specs=(_VMEM_SPEC, _VMEM_SPEC),
    )(x, feature, adj, w1, w2, fc_w, fc_b)
    # squeeze(-1) is glue
    return logit[:, 0], sig[:, 0]


# ----------------------------- model forward -----------------------------

def multi_output_forward(params, x_nchw, feature, adj):
    """Deterministic (eval-mode) forward of MultiOutputModel."""
    B, C, H, W = x_nchw.shape
    # NCHW -> NHWC -> (B, pixels, channels) for the fused Pallas stem+pool kernel.
    x_pix = jnp.transpose(x_nchw, (0, 2, 3, 1)).reshape(B, H * W, C)

    # TODO(synk): the full torchvision MobileNetV2 feature stack is not defined in the
    # provided source; stand-in is a single Pallas pointwise conv + ReLU6 projecting
    # to last_channel (the downstream pool/GCN/head semantics are exact).
    pooled = stem_and_pool(x_pix, params["stem_w"])     # (B, last_channel): conv+ReLU6+max fused
    # nn.Dropout(0.2) -> identity in deterministic/eval mode; flatten(x,1) is a no-op here.

    logits, sig = gcn_head(pooled, feature, adj,
                           params["gc1_w"], params["gc2_w"],
                           params["fc_w"], params["fc_b"])
    return {"class": logits, "sigmoid": sig}


# ----------------------------- demo -----------------------------

if __name__ == "__main__":
    key = jax.random.PRNGKey(0)
    B, Cin, H, W = 2, 3, 16, 16          # small image batch (MobileNetV2 takes 3-channel input)
    nfeat, nlabel = 16, 8                # GCN node-feature dim / number of labels
    hidden = 512                         # gc1 output dim (fixed by the module)
    last_channel = 1280                  # MobileNetV2().last_channel

    ks = jax.random.split(key, 8)
    x = jax.random.normal(ks[0], (B, Cin, H, W), jnp.float32)
    feature = jax.random.normal(ks[1], (nlabel, nfeat), jnp.float32)
    adj = jax.random.uniform(ks[2], (nlabel, nlabel), jnp.float32)

    stdv1 = 1.0 / math.sqrt(hidden)          # GraphConvolution.reset_parameters: 1/sqrt(out_features)
    stdv2 = 1.0 / math.sqrt(last_channel)
    stdv_fc = 1.0 / math.sqrt(nlabel)        # nn.Linear default-style bound

    params = {
        "stem_w": 0.05 * jax.random.normal(ks[3], (Cin, last_channel), jnp.float32),
        "gc1_w": jax.random.uniform(ks[4], (nfeat, hidden), jnp.float32, -stdv1, stdv1),
        "gc2_w": jax.random.uniform(ks[5], (hidden, last_channel), jnp.float32, -stdv2, stdv2),
        # nn.Linear(nlabel, 1).weight has shape (1, nlabel); used directly as a row vector.
        "fc_w": jax.random.uniform(ks[6], (1, nlabel), jnp.float32, -stdv_fc, stdv_fc),
        "fc_b": jax.random.uniform(ks[7], (1,), jnp.float32, -stdv_fc, stdv_fc),
    }

    out = jax.jit(multi_output_forward)(params, x, feature, adj)
    out = jax.block_until_ready(out)

    assert out["class"].shape == (B,) and out["class"].dtype == jnp.float32
    assert out["sigmoid"].shape == (B,) and out["sigmoid"].dtype == jnp.float32
    assert bool(jnp.all(jnp.isfinite(out["class"])))
    assert bool(jnp.all((out["sigmoid"] > 0.0) & (out["sigmoid"] < 1.0)))
    print("KERNEL_OK")
</pallas_src>

<mosaic_0001>
module attributes {stable_mosaic.version = 11 : i64} {
  func.func @_gcn_head_kernel(%arg0: memref<2x1280xf32, #tpu.memory_space<vmem>>, %arg1: memref<8x16xf32, #tpu.memory_space<vmem>>, %arg2: memref<8x8xf32, #tpu.memory_space<vmem>>, %arg3: memref<16x512xf32, #tpu.memory_space<vmem>>, %arg4: memref<512x1280xf32, #tpu.memory_space<vmem>>, %arg5: memref<1x8xf32, #tpu.memory_space<vmem>>, %arg6: memref<1xf32, #tpu.memory_space<smem>>, %arg7: memref<2x1xf32, #tpu.memory_space<vmem>>, %arg8: memref<2x1xf32, #tpu.memory_space<vmem>>) attributes {dimension_semantics = [], scalar_prefetch = 0 : i64, scratch_operands = 0 : i64, tpu.core_type = #tpu.core_type<tc>} {
    %c0 = arith.constant 0 : index
    %c0_0 = arith.constant 0 : index
    %0 = vector.load %arg1[%c0, %c0_0] : memref<8x16xf32, #tpu.memory_space<vmem>>, vector<8x16xf32>
    %c0_1 = arith.constant 0 : index
    %c0_2 = arith.constant 0 : index
    %1 = vector.load %arg3[%c0_1, %c0_2] : memref<16x512xf32, #tpu.memory_space<vmem>>, vector<16x512xf32>
    %cst = arith.constant dense<0.000000e+00> : vector<8x512xf32>
    %2 = tpu.matmul %0, %1, %cst {dimension_numbers = #tpu.dot_dimension_numbers<[1], [0], [0], [1], [0, 0, 1, 1], [], []>} : vector<8x16xf32>, vector<16x512xf32>, vector<8x512xf32> -> vector<8x512xf32>
    %c0_3 = arith.constant 0 : index
    %c0_4 = arith.constant 0 : index
    %3 = vector.load %arg2[%c0_3, %c0_4] : memref<8x8xf32, #tpu.memory_space<vmem>>, vector<8x8xf32>
    %cst_5 = arith.constant dense<0.000000e+00> : vector<8x512xf32>
    %4 = tpu.matmul %3, %2, %cst_5 {dimension_numbers = #tpu.dot_dimension_numbers<[1], [0], [0], [1], [0, 0, 1, 1], [], []>} : vector<8x8xf32>, vector<8x512xf32>, vector<8x512xf32> -> vector<8x512xf32>
    %cst_6 = arith.constant 0.000000e+00 : f32
    %5 = vector.broadcast %cst_6 : f32 to vector<8x512xf32>
    %6 = arith.cmpf oge, %4, %5 : vector<8x512xf32>
    %cst_7 = arith.constant 2.000000e-01 : f32
    %7 = vector.broadcast %cst_7 : f32 to vector<8x512xf32>
    %8 = arith.mulf %7, %4 : vector<8x512xf32>
    %9 = arith.select %6, %4, %8 : vector<8x512xi1>, vector<8x512xf32>
    %c0_8 = arith.constant 0 : index
    %c0_9 = arith.constant 0 : index
    %10 = vector.load %arg4[%c0_8, %c0_9] : memref<512x1280xf32, #tpu.memory_space<vmem>>, vector<512x1280xf32>
    %cst_10 = arith.constant dense<0.000000e+00> : vector<8x1280xf32>
    %11 = tpu.matmul %9, %10, %cst_10 {dimension_numbers = #tpu.dot_dimension_numbers<[1], [0], [0], [1], [0, 0, 1, 1], [], []>} : vector<8x512xf32>, vector<512x1280xf32>, vector<8x1280xf32> -> vector<8x1280xf32>
    %c0_11 = arith.constant 0 : index
    %c0_12 = arith.constant 0 : index
    %12 = vector.load %arg2[%c0_11, %c0_12] : memref<8x8xf32, #tpu.memory_space<vmem>>, vector<8x8xf32>
    %cst_13 = arith.constant dense<0.000000e+00> : vector<8x1280xf32>
    %13 = tpu.matmul %12, %11, %cst_13 {dimension_numbers = #tpu.dot_dimension_numbers<[1], [0], [0], [1], [0, 0, 1, 1], [], []>} : vector<8x8xf32>, vector<8x1280xf32>, vector<8x1280xf32> -> vector<8x1280xf32>
    %cst_14 = arith.constant 0.000000e+00 : f32
    %14 = vector.broadcast %cst_14 : f32 to vector<8x1280xf32>
    %15 = arith.cmpf oge, %13, %14 : vector<8x1280xf32>
    %cst_15 = arith.constant 2.000000e-01 : f32
    %16 = vector.broadcast %cst_15 : f32 to vector<8x1280xf32>
    %17 = arith.mulf %16, %13 : vector<8x1280xf32>
    %18 = arith.select %15, %13, %17 : vector<8x1280xi1>, vector<8x1280xf32>
    %c0_16 = arith.constant 0 : index
    %c0_17 = arith.constant 0 : index
    %19 = vector.load %arg0[%c0_16, %c0_17] : memref<2x1280xf32, #tpu.memory_space<vmem>>, vector<2x1280xf32>
    %cst_18 = arith.constant dense<0.000000e+00> : vector<2x8xf32>
    %20 = tpu.matmul %19, %18, %cst_18 {dimension_numbers = #tpu.dot_dimension_numbers<[1], [1], [0], [0], [0, 0, 1, 0], [], []>} : vector<2x1280xf32>, vector<8x1280xf32>, vector<2x8xf32> -> vector<2x8xf32>
    %c0_19 = arith.constant 0 : index
    %c0_20 = arith.constant 0 : index
    %21 = vector.load %arg5[%c0_19, %c0_20] : memref<1x8xf32, #tpu.memory_space<vmem>>, vector<1x8xf32>
    %22 = vector.broadcast %21 : vector<1x8xf32> to vector<2x8xf32>
    %23 = arith.mulf %20, %22 : vector<2x8xf32>
    %cst_21 = arith.constant dense<0.000000e+00> : vector<2xf32>
    %24 = vector.multi_reduction <add>, %23, %cst_21 [1] : vector<2x8xf32> to vector<2xf32>
    %25 = vector.shape_cast %24 : vector<2xf32> to vector<2x1xf32>
    %c0_22 = arith.constant 0 : index
    %26 = memref.load %arg6[%c0_22] : memref<1xf32, #tpu.memory_space<smem>>
    %27 = vector.broadcast %26 : f32 to vector<2x1xf32>
    %28 = arith.addf %25, %27 : vector<2x1xf32>
    %c0_23 = arith.constant 0 : index
    %c0_24 = arith.constant 0 : index
    %29 = vector.load %arg7[%c0_23, %c0_24] : memref<2x1xf32, #tpu.memory_space<vmem>>, vector<2x1xf32>
    tpu.vector_store %arg7[%c0_23, %c0_24], %28 {strides = array<i32>} : memref<2x1xf32, #tpu.memory_space<vmem>>, vector<2x1xf32>,
    %30 = arith.negf %28 : vector<2x1xf32>
    %31 = math.exp %30 : vector<2x1xf32>
    %cst_25 = arith.constant 1.000000e+00 : f32
    %32 = vector.broadcast %cst_25 : f32 to vector<2x1xf32>
    %33 = arith.addf %32, %31 : vector<2x1xf32>
    %34 = arith.divf %32, %33 : vector<2x1xf32>
    %c0_26 = arith.constant 0 : index
    %c0_27 = arith.constant 0 : index
    %35 = vector.load %arg8[%c0_26, %c0_27] : memref<2x1xf32, #tpu.memory_space<vmem>>, vector<2x1xf32>
    tpu.vector_store %arg8[%c0_26, %c0_27], %34 {strides = array<i32>} : memref<2x1xf32, #tpu.memory_space<vmem>>, vector<2x1xf32>,
    return
  }
}

module attributes {stable_mosaic.version = 11 : i64} {
  func.func @_stem_pool_kernel(%arg0: i32, %arg1: i32, %arg2: memref<1x256x3xf32, #tpu.memory_space<vmem>>, %arg3: memref<3x1280xf32, #tpu.memory_space<vmem>>, %arg4: memref<1x1x1280xf32, #tpu.memory_space<vmem>>) attributes {dimension_semantics = [#tpu.dimension_semantics<parallel>, #tpu.dimension_semantics<arbitrary>], iteration_bounds = array<i64: 2, 1>, scalar_prefetch = 0 : i64, scratch_operands = 0 : i64, tpu.core_type = #tpu.core_type<tc>, window_params = [{transform_indices = @transform_0, window_bounds = array<i64: 1, 256, 3>}, {pipeline_mode = #tpu.pipeline_mode<synchronous>, transform_indices = @transform_1, window_bounds = array<i64: 3, 1280>}, {transform_indices = @transform_2, window_bounds = array<i64: 1, 1, 1280>}]} {
    %c0_i32 = arith.constant 0 : i32
    %0 = arith.cmpi eq, %arg1, %c0_i32 : i32
    %1 = arith.extui %0 : i1 to i32
    %c0_i32_0 = arith.constant 0 : i32
    %2 = arith.cmpi ne, %1, %c0_i32_0 : i32
    scf.if %2 {
      %cst_15 = arith.constant 0xFF800000 : f32
      %45 = vector.broadcast %cst_15 : f32 to vector<1x1x1280xf32>
      %c0_16 = arith.constant 0 : index
      %c0_17 = arith.constant 0 : index
      %c0_18 = arith.constant 0 : index
      %46 = vector.load %arg4[%c0_16, %c0_17, %c0_18] : memref<1x1x1280xf32, #tpu.memory_space<vmem>>, vector<1x1x1280xf32>
      tpu.vector_store %arg4[%c0_16, %c0_17, %c0_18], %45 {strides = array<i32>} : memref<1x1x1280xf32, #tpu.memory_space<vmem>>, vector<1x1x1280xf32>,
    } else {
    }
    %c0 = arith.constant 0 : index
    %c0_1 = arith.constant 0 : index
    %c0_2 = arith.constant 0 : index
    %3 = vector.load %arg2[%c0, %c0_1, %c0_2] : memref<1x256x3xf32, #tpu.memory_space<vmem>>, vector<1x256x3xf32>
    %4 = vector.shape_cast %3 : vector<1x256x3xf32> to vector<256x3xf32>
    %c0_3 = arith.constant 0 : index
    %c0_4 = arith.constant 0 : index
    %5 = vector.load %arg3[%c0_3, %c0_4] : memref<3x1280xf32, #tpu.memory_space<vmem>>, vector<3x1280xf32>
    %6 = vector.extract_strided_slice %4 {offsets = [0, 0], sizes = [256, 1], strides = [1, 1]} : vector<256x3xf32> to vector<256x1xf32>
    %7 = vector.extract_strided_slice %5 {offsets = [0, 0], sizes = [1, 1280], strides = [1, 1]} : vector<3x1280xf32> to vector<1x1280xf32>
    %8 = vector.broadcast %6 : vector<256x1xf32> to vector<256x1280xf32>
    %9 = vector.broadcast %7 : vector<1x1280xf32> to vector<256x1280xf32>
    %10 = arith.mulf %8, %9 : vector<256x1280xf32>
    %11 = vector.extract_strided_slice %4 {offsets = [0, 1], sizes = [256, 1], strides = [1, 1]} : vector<256x3xf32> to vector<256x1xf32>
    %12 = vector.extract_strided_slice %5 {offsets = [1, 0], sizes = [1, 1280], strides = [1, 1]} : vector<3x1280xf32> to vector<1x1280xf32>
    %13 = vector.broadcast %11 : vector<256x1xf32> to vector<256x1280xf32>
    %14 = vector.broadcast %12 : vector<1x1280xf32> to vector<256x1280xf32>
    %15 = arith.mulf %13, %14 : vector<256x1280xf32>
    %16 = arith.addf %10, %15 : vector<256x1280xf32>
    %17 = vector.extract_strided_slice %4 {offsets = [0, 2], sizes = [256, 1], strides = [1, 1]} : vector<256x3xf32> to vector<256x1xf32>
    %18 = vector.extract_strided_slice %5 {offsets = [2, 0], sizes = [1, 1280], strides = [1, 1]} : vector<3x1280xf32> to vector<1x1280xf32>
    %19 = vector.broadcast %17 : vector<256x1xf32> to vector<256x1280xf32>
    %20 = vector.broadcast %18 : vector<1x1280xf32> to vector<256x1280xf32>
    %21 = arith.mulf %19, %20 : vector<256x1280xf32>
    %22 = arith.addf %16, %21 : vector<256x1280xf32>
    %cst = arith.constant 0.000000e+00 : f32
    %cst_5 = arith.constant 6.000000e+00 : f32
    %23 = vector.broadcast %cst : f32 to vector<256x1280xf32>
    %24 = arith.maximumf %23, %22 : vector<256x1280xf32>
    %25 = vector.broadcast %cst_5 : f32 to vector<256x1280xf32>
    %26 = arith.minimumf %25, %24 : vector<256x1280xf32>
    %27 = tpu.iota {dimensions = array<i32: 0>} : vector<256x1xi32>
    %c256_i32 = arith.constant 256 : i32
    %28 = arith.muli %arg1, %c256_i32 : i32
    %29 = vector.broadcast %28 : i32 to vector<256x1xi32>
    %30 = arith.addi %27, %29 : vector<256x1xi32>
    %c256_i32_6 = arith.constant 256 : i32
    %31 = vector.broadcast %c256_i32_6 : i32 to vector<256x1xi32>
    %32 = arith.cmpi slt, %30, %31 : vector<256x1xi32>
    %cst_7 = arith.constant 0xFF800000 : f32
    %33 = vector.shape_cast %32 : vector<256x1xi1> to vector<256x1xi1>
    %34 = vector.broadcast %33 : vector<256x1xi1> to vector<256x1280xi1>
    %35 = vector.broadcast %cst_7 : f32 to vector<256x1280xf32>
    %36 = arith.select %34, %26, %35 : vector<256x1280xi1>, vector<256x1280xf32>
    %c0_8 = arith.constant 0 : index
    %c0_9 = arith.constant 0 : index
    %c0_10 = arith.constant 0 : index
    %37 = vector.load %arg4[%c0_8, %c0_9, %c0_10] : memref<1x1x1280xf32, #tpu.memory_space<vmem>>, vector<1x1x1280xf32>
    %38 = vector.shape_cast %37 : vector<1x1x1280xf32> to vector<1x1280xf32>
    %cst_11 = arith.constant dense<0xFF800000> : vector<1280xf32>
    %39 = vector.multi_reduction <maximumf>, %36, %cst_11 [0] : vector<256x1280xf32> to vector<1280xf32>
    %40 = vector.shape_cast %39 : vector<1280xf32> to vector<1x1280xf32>
    %41 = arith.maximumf %38, %40 : vector<1x1280xf32>
    %c0_12 = arith.constant 0 : index
    %c0_13 = arith.constant 0 : index
    %c0_14 = arith.constant 0 : index
    %42 = vector.load %arg4[%c0_12, %c0_13, %c0_14] : memref<1x1x1280xf32, #tpu.memory_space<vmem>>, vector<1x1x1280xf32>
    %43 = vector.shape_cast %42 : vector<1x1x1280xf32> to vector<1x1280xf32>
    %44 = vector.shape_cast %41 : vector<1x1280xf32> to vector<1x1x1280xf32>
    tpu.vector_store %arg4[%c0_12, %c0_13, %c0_14], %44 {strides = array<i32>} : memref<1x1x1280xf32, #tpu.memory_space<vmem>>, vector<1x1x1280xf32>,
    return
  }
  func.func @transform_0(%arg0: i32, %arg1: i32) -> (i32, i32, i32) {
    %c0_i32 = arith.constant 0 : i32
    %c0_i32_0 = arith.constant 0 : i32
    return %arg0, %arg1, %c0_i32 : i32, i32, i32
  }
  func.func @transform_1(%arg0: i32, %arg1: i32) -> (i32, i32) {
    %c0_i32 = arith.constant 0 : i32
    %c0_i32_0 = arith.constant 0 : i32
    %c0_i32_1 = arith.constant 0 : i32
    return %c0_i32, %c0_i32_0 : i32, i32
  }
  func.func @transform_2(%arg0: i32, %arg1: i32) -> (i32, i32, i32) {
    %c0_i32 = arith.constant 0 : i32
    %c0_i32_0 = arith.constant 0 : i32
    %c0_i32_1 = arith.constant 0 : i32
    return %arg0, %c0_i32, %c0_i32_0 : i32, i32, i32
  }
}

</mosaic_0001>

<bundles_post_ra>
// kernel: multi_output_forward.3
= control target key start
LH: loop header
LB: loop body
LE: loop exit
PB: predicated region body
PF: predicated region fallthrough
CT: control target
= control target key end

     0   :  { %15 = vsyncpa [#allocation4], 0  ;;  %s3593_s0 = inlined_call_operand.vmem [shape: f32[2,1280], index: 0, kind: input, shape index: {}]   ;;  %s3594_s1 = inlined_call_operand.hbm [shape: f32[8,16], index: 1, kind: input, shape index: {}]   ;;  %s3595_s2 = inlined_call_operand.hbm [shape: f32[8,8], index: 2, kind: input, shape index: {}]   ;;  %s3596_s3 = inlined_call_operand.hbm [shape: f32[16,512], index: 3, kind: input, shape index: {}]   ;;  %s3597_s4 = inlined_call_operand.hbm [shape: f32[512,1280], index: 4, kind: input, shape index: {}]   ;;  %s3598_s5 = inlined_call_operand.hbm [shape: f32[1,8], index: 5, kind: input, shape index: {}]   ;;  %s3599_s6 = inlined_call_operand.<no memory space> [shape: f32[1], index: 6, kind: input, shape index: {}]   ;;  %s3600_s7 = inlined_call_operand.vmem [shape: f32[2,1], index: 7, kind: output, shape index: {0}]   ;;  %s3601_s8 = inlined_call_operand.vmem [shape: f32[2,1], index: 8, kind: output, shape index: {1}]  }
   0x1   :  { %16 = vsyncpa [#allocation6], 0 }
   0x2   :  { %17 = vsyncpa [#allocation9], 0  ;;  %s3395_s27 = smov [#allocation5]   ;;  %s3396_s29 = smov [#allocation8]  }
   0x3   :  { %s36_s28 = sshll.u32 %s3395_s27, 4  ;;  %s57_s30 = sshll.u32 %s3396_s29, 4  ;;  %s37_s28 = int_to_ptr.vmem [resolvable:$true] %s36_s28  ;;  %s3451_s30 = int_to_ptr.vmem [resolvable:$true] %s57_s30 }
   0x4   :  { %s3279_s11 = scalar_lea.hbm %s3595_s2, 128 }
   0x5   :  { %p3280_p0 = scmp.ne.s32.totalorder %s3595_s2, %s3279_s11  ;;  %p3283_p1 = scmp.lt.u32.totalorder %s3279_s11, %s3595_s2 }
   0x7   :  { %p3285_p2 = pnand %p3283_p1, %p3280_p0 }
   0x9   :  { %3288 = shalt.err (!%p3285_p2)
}
   0xa   :  { %s3289_s16 = scalar_lea.vmem %s37_s28, 128  ;;  %p3294_p4 = scmp.lt.s32.totalorder %s37_s28, %s37_s28 }
   0xb   :  { %p3290_p3 = scmp.ne.s32.totalorder %s37_s28, %s3289_s16  ;;  %p3295_p5 = scmp.lt.s32.totalorder %s3289_s16, %s3289_s16 }
   0xd   :  { %p3296_p6 = por %p3295_p5, %p3294_p4 }
   0xf   :  { %p3297_p7 = pnand %p3296_p6, %p3290_p3 }
  0x11   :  { %3300 = shalt.err (!%p3297_p7)
}
  0x12   :  { %39 = dma.hbm_to_vmem [thread:$0]  %s3595_s2, 128, %s37_s28, [#allocation6]  }
  0x13   :  { %s3301_s21 = scalar_lea.hbm %s3597_s4, 81920 }
  0x14   :  { %p3302_p8 = scmp.ne.s32.totalorder %s3597_s4, %s3301_s21  ;;  %p3305_p9 = scmp.lt.u32.totalorder %s3301_s21, %s3597_s4 }
  0x16   :  { %p3307_p10 = pnand %p3305_p9, %p3302_p8 }
  0x18   :  { %3310 = shalt.err (!%p3307_p10)
}
  0x19   :  { %s3311_s26 = scalar_lea.vmem %s3451_s30, 81920  ;;  %p3316_p12 = scmp.lt.s32.totalorder %s3451_s30, %s3451_s30 }
  0x1a   :  { %p3312_p11 = scmp.ne.s32.totalorder %s3451_s30, %s3311_s26  ;;  %p3317_p13 = scmp.lt.s32.totalorder %s3311_s26, %s3311_s26 }
  0x1c   :  { %p3318_p0 = por %p3317_p13, %p3316_p12 }
  0x1e   :  { %p3319_p1 = pnand %p3318_p0, %p3312_p11 }
  0x20   :  { %3322 = shalt.err (!%p3319_p1)
}
  0x21   :  { %s3397_s2 = smov 1280   ;;  %s3398_s27 = smov 80  }
  0x22   :  { %63 = dma.hbm_to_vmem [thread:$0]  %s3597_s4, 81920, %s3451_s30, [#allocation9], %s3397_s2, %s3397_s2, %s3398_s27  }
  0x23   :  { %s3399_s9 = smov [#allocation3]   ;;  %s3400_s11 = smov [#allocation7]  }
  0x24   :  { %s26_s10 = sshll.u32 %s3399_s9, 4  ;;  %s45_s12 = sshll.u32 %s3400_s11, 4  ;;  %s27_s10 = int_to_ptr.vmem [resolvable:$true] %s26_s10  ;;  %s3482_s12 = int_to_ptr.vmem [resolvable:$true] %s45_s12 }
  0x25   :  { %s3323_s15 = scalar_lea.hbm %s3594_s1, 128 }
  0x26   :  { %p3324_p2 = scmp.ne.s32.totalorder %s3594_s1, %s3323_s15  ;;  %p3327_p3 = scmp.lt.u32.totalorder %s3323_s15, %s3594_s1 }
  0x28   :  { %p3329_p4 = pnand %p3327_p3, %p3324_p2 }
  0x2a   :  { %3332 = shalt.err (!%p3329_p4)
}
  0x2b   :  { %s3333_s4 = scalar_lea.vmem %s27_s10, 128  ;;  %p3338_p6 = scmp.lt.s32.totalorder %s27_s10, %s27_s10 }
  0x2c   :  { %p3334_p5 = scmp.ne.s32.totalorder %s27_s10, %s3333_s4  ;;  %p3339_p7 = scmp.lt.s32.totalorder %s3333_s4, %s3333_s4 }
  0x2e   :  { %p3340_p8 = por %p3339_p7, %p3338_p6 }
  0x30   :  { %p3341_p9 = pnand %p3340_p8, %p3334_p5 }
  0x32   :  { %3344 = shalt.err (!%p3341_p9)
}
  0x33   :  { %29 = dma.hbm_to_vmem [thread:$0]  %s3594_s1, 128, %s27_s10, [#allocation4]  }
  0x34   :  { %s3345_s23 = scalar_lea.hbm %s3596_s3, 1024 }
  0x35   :  { %p3346_p10 = scmp.ne.s32.totalorder %s3596_s3, %s3345_s23  ;;  %p3349_p11 = scmp.lt.u32.totalorder %s3345_s23, %s3596_s3 }
  0x37   :  { %p3351_p12 = pnand %p3349_p11, %p3346_p10 }
  0x39   :  { %3354 = shalt.err (!%p3351_p12)
}
  0x3a   :  { %s3355_s27 = scalar_lea.vmem %s3482_s12, 1024  ;;  %p3360_p0 = scmp.lt.s32.totalorder %s3482_s12, %s3482_s12 }
  0x3b   :  { %p3356_p13 = scmp.ne.s32.totalorder %s3482_s12, %s3355_s27  ;;  %p3361_p1 = scmp.lt.s32.totalorder %s3355_s27, %s3355_s27 }
  0x3d   :  { %p3362_p2 = por %p3361_p1, %p3360_p0 }
  0x3f   :  { %p3363_p3 = pnand %p3362_p2, %p3356_p13 }
  0x41   :  { %3366 = shalt.err (!%p3363_p3)
}
  0x42   :  { %s3401_s1 = smov 512   ;;  %s3402_s28 = smov 32  }
  0x43   :  { %51 = dma.hbm_to_vmem [thread:$0]  %s3596_s3, 1024, %s3482_s12, [#allocation6], %s3401_s1, %s3401_s1, %s3402_s28  }
  0x44   :  { %s3403_s10 = smov [#allocation10]   ;;  %s3367_s15 = scalar_lea.hbm %s3598_s5, 16 }
  0x45   :  { %s70_s11 = sshll.u32 %s3403_s10, 4  ;;  %p3368_p4 = scmp.ne.s32.totalorder %s3598_s5, %s3367_s15  ;;  %s71_s11 = int_to_ptr.vmem [resolvable:$true] %s70_s11 }
  0x46   :  { %p3371_p5 = scmp.lt.u32.totalorder %s3367_s15, %s3598_s5 }
  0x48   :  { %p3373_p6 = pnand %p3371_p5, %p3368_p4 }
  0x4a   :  { %3376 = shalt.err (!%p3373_p6)
}
  0x4b   :  { %s3377_s4 = scalar_lea.vmem %s71_s11, 16  ;;  %s3381_s3 = scalar_lea.vmem %s71_s11, 32 }
  0x4c   :  { %p3378_p7 = scmp.ne.s32.totalorder %s71_s11, %s3377_s4  ;;  %p3382_p8 = scmp.lt.s32.totalorder %s71_s11, %s71_s11 }
  0x4d   :  { %p3383_p9 = scmp.lt.s32.totalorder %s3381_s3, %s3377_s4 }
  0x4f   :  { %p3384_p10 = por %p3383_p9, %p3382_p8 }
  0x51   :  { %p3385_p11 = pnand %p3384_p10, %p3378_p7 }
  0x53   :  { %3388 = shalt.err (!%p3385_p11)
}
  0x54   :  { %73 = dma.hbm_to_vmem [thread:$0]  %s3598_s5, 16, %s71_s11, [#allocation9]  }
  0x55   :  { %3389 = dma.done.wait [#allocation4], 128  }
  0x56   :  { %3390 = vsyncadd [#allocation4], 4294967168 }
  0x57   :  { %3391 = dma.done.wait [#allocation6], 1152  }
  0x58   :  { %3392 = vsyncadd [#allocation6], 4294966144 }
  0x59   :  { %3393 = dma.done.wait [#allocation9], 81936  }
  0x5a   :  { %3394 = vsyncadd [#allocation9], 4294885360  ;;  %v3404_v0 = vmov 0.0   ;;  %v93_v1 = vld [vmem:[#allocation7 + $0x8] sm:$0xff]  ;;  %v92_v3 = vld [vmem:[#allocation7] sm:$0xff]  ;;  %vm100_vm0 = vcmask 130048  }
  0x5b   :  { %168 = vmatprep.mubr.f32.mxu0 %v3404_v0  ;;  %v97_v2 = vld [vmem:[#allocation7 + $0x28] sm:$0xff]  ;;  %v96_v5 = vld [vmem:[#allocation7 + $0x20] sm:$0xff]  ;;  %v95_v6 = vld [vmem:[#allocation7 + $0x18] sm:$0xff]  ;;  %vm247_vm1 = vcmask 64512  }
  0x5c   :  { %v2595_v4 = vpack.c.bf16 %v97_v2, %v93_v1  ;;  %v2597_v7 = vpack.c.bf16 %v96_v5, %v92_v3  ;;  %v99_v8 = vld [vmem:[#allocation7 + $0x38] sm:$0xff]  ;;  %v94_v9 = vld [vmem:[#allocation7 + $0x10] sm:$0xff]  ;;  %v406_v14 = vld [vmem:[#allocation8 + $0x8] sm:$0xff] }
  0x5d   :  { %v98_v10 = vld [vmem:[#allocation7 + $0x30] sm:$0xff]  ;;  %v2599_v11 = vpack.c.bf16 %v99_v8, %v95_v6  ;;  %v416_v15 = vld [vmem:[#allocation8 + $0x58] sm:$0xff]  ;;  %v405_v16 = vld [vmem:[#allocation8] sm:$0xff] }
  0x5e   :  { %2596 = vmatprep.subr.bf16.mxu0 %v2595_v4  ;;  %v91_v12 = vld [vmem:[#allocation3] sm:$0xff]  ;;  %v2601_v13 = vpack.c.bf16 %v98_v10, %v94_v9  ;;  %v2603_v17 = vpack.c.bf16 %v416_v15, %v406_v14  ;;  %v426_v19 = vld [vmem:[#allocation8 + $0xa8] sm:$0xff]  ;;  %v436_v20 = vld [vmem:[#allocation8 + $0xf8] sm:$0xff] }
  0x5f   :  { %2598 = vmatpush1.bf16.msra.mxu0 %v2597_v7  ;;  %v415_v18 = vld [vmem:[#allocation8 + $0x50] sm:$0xff]  ;;  %v2607_v22 = vpack.c.bf16 %v436_v20, %v426_v19  ;;  %v425_v23 = vld [vmem:[#allocation8 + $0xa0] sm:$0xff]  ;;  %v446_v26 = vld [vmem:[#allocation8 + $0x148] sm:$0xff] }
  0x60   :  { %2600 = vmatprep.subr.bf16.mxu0 %v2599_v11  ;;  %v2605_v21 = vpack.c.bf16 %v415_v18, %v405_v16  ;;  %2604 = vmatprep.subr.bf16.mxu1 %v2603_v17  ;;  %v435_v24 = vld [vmem:[#allocation8 + $0xf0] sm:$0xff]  ;;  %v456_v27 = vld [vmem:[#allocation8 + $0x198] sm:$0xff]  ;;  %v445_v29 = vld [vmem:[#allocation8 + $0x140] sm:$0xff] }
  0x61   :  { %v2609_v25 = vpack.c.bf16 %v435_v24, %v425_v23  ;;  %v2611_v28 = vpack.c.bf16 %v456_v27, %v446_v26  ;;  %v455_v30 = vld [vmem:[#allocation8 + $0x190] sm:$0xff]  ;;  %v466_v31 = vld [vmem:[#allocation8 + $0x1e8] sm:$0xff]  ;;  %v476_v32 = vld [vmem:[#allocation8 + $0x238] sm:$0xff] }
  0x62   :  { %2583 = vmatmul.mubr.msk.f32.vlgmr.msra.gmra.mrb[0].mxu0 %vm100_vm0, %v91_v12  ;;  %2606 = vmatpush1.bf16.msra.mxu1 %v2605_v21  ;;  %v2613_v33 = vpack.c.bf16 %v455_v30, %v445_v29  ;;  %v2615_v34 = vpack.c.bf16 %v476_v32, %v466_v31  ;;  %v465_v35 = vld [vmem:[#allocation8 + $0x1e0] sm:$0xff]  ;;  %v475_v36 = vld [vmem:[#allocation8 + $0x230] sm:$0xff]  ;;  %v486_v37 = vld [vmem:[#allocation8 + $0x288] sm:$0xff] }
  0x63   :  { %2602 = vmatpush1.bf16.msra.mxu0 %v2601_v13  ;;  %239 = vmatprep.mubr.f32.mxu0 %v3404_v0  ;;  %v496_v38 = vld [vmem:[#allocation8 + $0x2d8] sm:$0xff]  ;;  %v2617_v39 = vpack.c.bf16 %v475_v36, %v465_v35  ;;  %v485_v41 = vld [vmem:[#allocation8 + $0x280] sm:$0xff]  ;;  %v495_v42 = vld [vmem:[#allocation8 + $0x2d0] sm:$0xff] }
  0x64   :  { %2608 = vmatprep.subr.bf16.mxu1 %v2607_v22  ;;  %v2619_v40 = vpack.c.bf16 %v496_v38, %v486_v37  ;;  %v506_v43 = vld [vmem:[#allocation8 + $0x328] sm:$0xff]  ;;  %v516_v44 = vld [vmem:[#allocation8 + $0x378] sm:$0xff]  ;;  %v2621_v45 = vpack.c.bf16 %v495_v42, %v485_v41  ;;  %v505_v47 = vld [vmem:[#allocation8 + $0x320] sm:$0xff] }
  0x65   :  { %v2623_v46 = vpack.c.bf16 %v516_v44, %v506_v43  ;;  %v515_v48 = vld [vmem:[#allocation8 + $0x370] sm:$0xff]  ;;  %v526_v49 = vld [vmem:[#allocation8 + $0x3c8] sm:$0xff]  ;;  %v536_v50 = vld [vmem:[#allocation8 + $0x418] sm:$0xff] }
  0x66   :  { %2584 = vmatmul.mubr.msk.f32.vlgmr.msra.gmra.mrb[2].mxu0 %vm100_vm0, %v91_v12  ;;  %2610 = vmatpush1.bf16.msra.mxu1 %v2609_v25  ;;  %v2625_v51 = vpack.c.bf16 %v515_v48, %v505_v47  ;;  %v2627_v52 = vpack.c.bf16 %v536_v50, %v526_v49  ;;  %v525_v53 = vld [vmem:[#allocation8 + $0x3c0] sm:$0xff]  ;;  %v535_v54 = vld [vmem:[#allocation8 + $0x410] sm:$0xff]  ;;  %v546_v55 = vld [vmem:[#allocation8 + $0x468] sm:$0xff]  ;;  %vm2556_vm0 = vcmask 58368  }
  0x67   :  { %315 = vmatprep.mubr.f32.mxu0 %v3404_v0  ;;  %2612 = vmatprep.subr.bf16.mxu1 %v2611_v28  ;;  %v556_v56 = vld [vmem:[#allocation8 + $0x4b8] sm:$0xff]  ;;  %v2629_v57 = vpack.c.bf16 %v535_v54, %v525_v53  ;;  %v545_v59 = vld [vmem:[#allocation8 + $0x460] sm:$0xff]  ;;  %v555_v60 = vld [vmem:[#allocation8 + $0x4b0] sm:$0xff] }
  0x68   :  { %v2631_v58 = vpack.c.bf16 %v556_v56, %v546_v55  ;;  %v566_v61 = vld [vmem:[#allocation8 + $0x508] sm:$0xff]  ;;  %v576_v62 = vld [vmem:[#allocation8 + $0x558] sm:$0xff]  ;;  %v2633_v63 = vpack.c.bf16 %v555_v60, %v545_v59  ;;  %v565_v2 = vld [vmem:[#allocation8 + $0x500] sm:$0xff] }
  0x69   :  { %v2635_v1 = vpack.c.bf16 %v576_v62, %v566_v61  ;;  %v575_v3 = vld [vmem:[#allocation8 + $0x550] sm:$0xff]  ;;  %v586_v4 = vld [vmem:[#allocation8 + $0x5a8] sm:$0xff]  ;;  %v596_v5 = vld [vmem:[#allocation8 + $0x5f8] sm:$0xff] }
  0x6a   :  { %2614 = vmatpush1.bf16.msra.mxu1 %v2613_v33  ;;  %v2637_v6 = vpack.c.bf16 %v575_v3, %v565_v2  ;;  %v2639_v7 = vpack.c.bf16 %v596_v5, %v586_v4  ;;  %v585_v8 = vld [vmem:[#allocation8 + $0x5a0] sm:$0xff]  ;;  %v595_v9 = vld [vmem:[#allocation8 + $0x5f0] sm:$0xff]  ;;  %v606_v10 = vld [vmem:[#allocation8 + $0x648] sm:$0xff] }
  0x6b   :  { %2616 = vmatprep.subr.bf16.mxu1 %v2615_v34  ;;  %v616_v11 = vld [vmem:[#allocation8 + $0x698] sm:$0xff]  ;;  %v2641_v12 = vpack.c.bf16 %v595_v9, %v585_v8  ;;  %v605_v14 = vld [vmem:[#allocation8 + $0x640] sm:$0xff]  ;;  %v615_v15 = vld [vmem:[#allocation8 + $0x690] sm:$0xff] }
  0x6c   :  { %v2643_v13 = vpack.c.bf16 %v616_v11, %v606_v10  ;;  %v626_v16 = vld [vmem:[#allocation8 + $0x6e8] sm:$0xff]  ;;  %v636_v17 = vld [vmem:[#allocation8 + $0x738] sm:$0xff]  ;;  %v2645_v18 = vpack.c.bf16 %v615_v15, %v605_v14  ;;  %v625_v20 = vld [vmem:[#allocation8 + $0x6e0] sm:$0xff] }
  0x6d   :  { %v2647_v19 = vpack.c.bf16 %v636_v17, %v626_v16  ;;  %v635_v21 = vld [vmem:[#allocation8 + $0x730] sm:$0xff]  ;;  %v646_v22 = vld [vmem:[#allocation8 + $0x788] sm:$0xff]  ;;  %v656_v23 = vld [vmem:[#allocation8 + $0x7d8] sm:$0xff] }
  0x6e   :  { %2618 = vmatpush1.bf16.msra.mxu1 %v2617_v39  ;;  %v2649_v24 = vpack.c.bf16 %v635_v21, %v625_v20  ;;  %v2651_v25 = vpack.c.bf16 %v656_v23, %v646_v22  ;;  %v645_v26 = vld [vmem:[#allocation8 + $0x780] sm:$0xff]  ;;  %v655_v27 = vld [vmem:[#allocation8 + $0x7d0] sm:$0xff]  ;;  %v666_v28 = vld [vmem:[#allocation8 + $0x828] sm:$0xff] }
  0x6f   :  { %2620 = vmatprep.subr.bf16.mxu1 %v2619_v40  ;;  %v676_v29 = vld [vmem:[#allocation8 + $0x878] sm:$0xff]  ;;  %v2653_v30 = vpack.c.bf16 %v655_v27, %v645_v26  ;;  %v665_v32 = vld [vmem:[#allocation8 + $0x820] sm:$0xff]  ;;  %v675_v33 = vld [vmem:[#allocation8 + $0x870] sm:$0xff] }
  0x70   :  { %v2655_v31 = vpack.c.bf16 %v676_v29, %v666_v28  ;;  %v686_v34 = vld [vmem:[#allocation8 + $0x8c8] sm:$0xff]  ;;  %v696_v35 = vld [vmem:[#allocation8 + $0x918] sm:$0xff]  ;;  %v2657_v36 = vpack.c.bf16 %v675_v33, %v665_v32  ;;  %v685_v38 = vld [vmem:[#allocation8 + $0x8c0] sm:$0xff] }
  0x71   :  { %v2659_v37 = vpack.c.bf16 %v696_v35, %v686_v34  ;;  %v695_v39 = vld [vmem:[#allocation8 + $0x910] sm:$0xff]  ;;  %v246_v43 = vld [vmem:[#allocation5] sm:$0xff]  ;;  %v726_v44 = vld [vmem:[#allocation8 + $0xa08] sm:$0xff] }
  0x72   :  { %2622 = vmatpush1.bf16.msra.mxu1 %v2621_v45  ;;  %v2661_v40 = vpack.c.bf16 %v695_v39, %v685_v38  ;;  %v736_v45 = vld [vmem:[#allocation8 + $0xa58] sm:$0xff]  ;;  %v735_v47 = vld [vmem:[#allocation8 + $0xa50] sm:$0xff]  ;;  %v746_v48 = vld [vmem:[#allocation8 + $0xaa8] sm:$0xff] }
  0x73   :  { %2624 = vmatprep.subr.bf16.mxu1 %v2623_v46  ;;  %v725_v46 = vld [vmem:[#allocation8 + $0xa00] sm:$0xff]  ;;  %v756_v49 = vld [vmem:[#allocation8 + $0xaf8] sm:$0xff]  ;;  %v755_v56 = vld [vmem:[#allocation8 + $0xaf0] sm:$0xff] }
  0x74   :  { %v2669_v53 = vpack.c.bf16 %v735_v47, %v725_v46  ;;  %v2671_v54 = vpack.c.bf16 %v756_v49, %v746_v48  ;;  %v745_v55 = vld [vmem:[#allocation8 + $0xaa0] sm:$0xff]  ;;  %v775_v62 = vld [vmem:[#allocation8 + $0xb90] sm:$0xff]  ;;  %v946_v48 = vld [vmem:[#allocation8 + $0x10e8] sm:$0xff] }
  0x75   :  { %v2673_v59 = vpack.c.bf16 %v755_v56, %v745_v55  ;;  %v765_v61 = vld [vmem:[#allocation8 + $0xb40] sm:$0xff]  ;;  %v795_v5 = vld [vmem:[#allocation8 + $0xc30] sm:$0xff]  ;;  %v956_v49 = vld [vmem:[#allocation8 + $0x1138] sm:$0xff] }
  0x76   :  { %2626 = vmatpush1.bf16.msra.mxu1 %v2625_v51  ;;  %v2667_v51 = vpack.c.bf16 %v736_v45, %v726_v44  ;;  %v2677_v2 = vpack.c.bf16 %v775_v62, %v765_v61  ;;  %v785_v4 = vld [vmem:[#allocation8 + $0xbe0] sm:$0xff]  ;;  %v815_v11 = vld [vmem:[#allocation8 + $0xcd0] sm:$0xff]  ;;  %v976_v55 = vld [vmem:[#allocation8 + $0x11d8] sm:$0xff] }
  0x77   :  { %2628 = vmatprep.subr.bf16.mxu1 %v2627_v52  ;;  %v2681_v8 = vpack.c.bf16 %v795_v5, %v785_v4  ;;  %v805_v10 = vld [vmem:[#allocation8 + $0xc80] sm:$0xff]  ;;  %v835_v17 = vld [vmem:[#allocation8 + $0xd70] sm:$0xff]  ;;  %v996_v61 = vld [vmem:[#allocation8 + $0x1278] sm:$0xff] }
  0x78   :  { %v2685_v14 = vpack.c.bf16 %v815_v11, %v805_v10  ;;  %v825_v16 = vld [vmem:[#allocation8 + $0xd20] sm:$0xff]  ;;  %v855_v23 = vld [vmem:[#allocation8 + $0xe10] sm:$0xff]  ;;  %v706_v4 = vld [vmem:[#allocation8 + $0x968] sm:$0xff] }
  0x79   :  { %v2689_v20 = vpack.c.bf16 %v835_v17, %v825_v16  ;;  %v845_v22 = vld [vmem:[#allocation8 + $0xdc0] sm:$0xff]  ;;  %v875_v29 = vld [vmem:[#allocation8 + $0xeb0] sm:$0xff]  ;;  %v716_v5 = vld [vmem:[#allocation8 + $0x9b8] sm:$0xff] }
  0x7a   :  { %2630 = vmatpush1.bf16.msra.mxu1 %v2629_v57  ;;  %v766_v57 = vld [vmem:[#allocation8 + $0xb48] sm:$0xff]  ;;  %v2693_v26 = vpack.c.bf16 %v855_v23, %v845_v22  ;;  %v865_v28 = vld [vmem:[#allocation8 + $0xe60] sm:$0xff]  ;;  %v895_v35 = vld [vmem:[#allocation8 + $0xf50] sm:$0xff] }
  0x7b   :  { %2632 = vmatprep.subr.bf16.mxu1 %v2631_v58  ;;  %v776_v58 = vld [vmem:[#allocation8 + $0xb98] sm:$0xff]  ;;  %v2697_v32 = vpack.c.bf16 %v875_v29, %v865_v28  ;;  %v885_v34 = vld [vmem:[#allocation8 + $0xf00] sm:$0xff]  ;;  %v935_v47 = vld [vmem:[#allocation8 + $0x1090] sm:$0xff] }
  0x7c   :  { %v2675_v60 = vpack.c.bf16 %v776_v58, %v766_v57  ;;  %v2701_v38 = vpack.c.bf16 %v895_v35, %v885_v34  ;;  %v925_v46 = vld [vmem:[#allocation8 + $0x1040] sm:$0xff]  ;;  %v715_v10 = vld [vmem:[#allocation8 + $0x9b0] sm:$0xff]  ;;  %v1026_v16 = vld [vmem:[#allocation8 + $0x1368] sm:$0xff] }
  0x7d   :  { %v965_v58 = vld [vmem:[#allocation8 + $0x1180] sm:$0xff]  ;;  %v1036_v17 = vld [vmem:[#allocation8 + $0x13b8] sm:$0xff]  ;;  %v1035_v22 = vld [vmem:[#allocation8 + $0x13b0] sm:$0xff] }
  0x7e   :  { %2634 = vmatpush1.bf16.msra.mxu1 %v2633_v63  ;;  %v786_v63 = vld [vmem:[#allocation8 + $0xbe8] sm:$0xff]  ;;  %v407_v29 = vld [vmem:[#allocation8 + $0x10] sm:$0xff] }
  0x7f   :  { %2636 = vmatprep.subr.bf16.mxu1 %v2635_v1  ;;  %v796_v1 = vld [vmem:[#allocation8 + $0xc38] sm:$0xff]  ;;  %v438_v34 = vld [vmem:[#allocation8 + $0x108] sm:$0xff] }
  0x80   :  { %v2679_v3 = vpack.c.bf16 %v796_v1, %v786_v63  ;;  %v985_v1 = vld [vmem:[#allocation8 + $0x1220] sm:$0xff] }
  0x82   :  { %2638 = vmatpush1.bf16.msra.mxu1 %v2637_v6  ;;  %v806_v6 = vld [vmem:[#allocation8 + $0xc88] sm:$0xff] }
  0x83   :  { %2640 = vmatprep.subr.bf16.mxu1 %v2639_v7  ;;  %v816_v7 = vld [vmem:[#allocation8 + $0xcd8] sm:$0xff] }
  0x84   :  { %v2683_v9 = vpack.c.bf16 %v816_v7, %v806_v6  ;;  %v1006_v6 = vld [vmem:[#allocation8 + $0x12c8] sm:$0xff]  ;;  %v2663_v7 = vpack.c.bf16 %v716_v5, %v706_v4  ;;  %v467_v5 = vld [vmem:[#allocation8 + $0x1f0] sm:$0xff] }
  0x86   :  { %2642 = vmatpush1.bf16.msra.mxu1 %v2641_v12  ;;  %v826_v12 = vld [vmem:[#allocation8 + $0xd28] sm:$0xff] }
  0x87   :  { %2644 = vmatprep.subr.bf16.mxu1 %v2643_v13  ;;  %v836_v13 = vld [vmem:[#allocation8 + $0xd78] sm:$0xff] }
  0x88   :  { %v2687_v15 = vpack.c.bf16 %v836_v13, %v826_v12  ;;  %v1005_v13 = vld [vmem:[#allocation8 + $0x12c0] sm:$0xff] }
  0x8a   :  { %2646 = vmatpush1.bf16.msra.mxu1 %v2645_v18  ;;  %v846_v18 = vld [vmem:[#allocation8 + $0xdc8] sm:$0xff] }
  0x8b   :  { %2648 = vmatprep.subr.bf16.mxu1 %v2647_v19  ;;  %v856_v19 = vld [vmem:[#allocation8 + $0xe18] sm:$0xff] }
  0x8c   :  { %v2691_v21 = vpack.c.bf16 %v856_v19, %v846_v18  ;;  %v408_v18 = vld [vmem:[#allocation8 + $0x18] sm:$0xff]  ;;  %v2727_v19 = vpack.c.bf16 %v1036_v17, %v1026_v16  ;;  %v487_v17 = vld [vmem:[#allocation8 + $0x290] sm:$0xff] }
  0x8e   :  { %2650 = vmatpush1.bf16.msra.mxu1 %v2649_v24  ;;  %v866_v24 = vld [vmem:[#allocation8 + $0xe68] sm:$0xff] }
  0x8f   :  { %2652 = vmatprep.subr.bf16.mxu1 %v2651_v25  ;;  %v876_v25 = vld [vmem:[#allocation8 + $0xeb8] sm:$0xff] }
  0x90   :  { %v2695_v27 = vpack.c.bf16 %v876_v25, %v866_v24  ;;  %v410_v25 = vld [vmem:[#allocation8 + $0x28] sm:$0xff] }
  0x92   :  { %2654 = vmatpush1.bf16.msra.mxu1 %v2653_v30  ;;  %v886_v30 = vld [vmem:[#allocation8 + $0xf08] sm:$0xff] }
  0x93   :  { %2656 = vmatprep.subr.bf16.mxu1 %v2655_v31  ;;  %v896_v31 = vld [vmem:[#allocation8 + $0xf58] sm:$0xff] }
  0x94   :  { %v2699_v33 = vpack.c.bf16 %v896_v31, %v886_v30  ;;  %v417_v30 = vld [vmem:[#allocation8 + $0x60] sm:$0xff] }
  0x96   :  { %2658 = vmatpush1.bf16.msra.mxu1 %v2657_v36  ;;  %v906_v36 = vld [vmem:[#allocation8 + $0xfa8] sm:$0xff] }
  0x97   :  { %2660 = vmatprep.subr.bf16.mxu1 %v2659_v37  ;;  %v916_v37 = vld [vmem:[#allocation8 + $0xff8] sm:$0xff] }
  0x98   :  { %v2703_v39 = vpack.c.bf16 %v916_v37, %v906_v36  ;;  %v2733_v36 = vpack.c.bf16 %v417_v30, %v407_v29  ;;  %v427_v37 = vld [vmem:[#allocation8 + $0xb0] sm:$0xff]  ;;  %v517_v30 = vld [vmem:[#allocation8 + $0x380] sm:$0xff] }
  0x99   :  { %v507_v29 = vld [vmem:[#allocation8 + $0x330] sm:$0xff] }
  0x9a   :  { %2662 = vmatpush1.bf16.msra.mxu1 %v2661_v40  ;;  %v905_v40 = vld [vmem:[#allocation8 + $0xfa0] sm:$0xff] }
  0x9b   :  { %2664 = vmatprep.subr.bf16.mxu1 %v2663_v7 }
 0x135   :  { %v170_v41 = vpop.f32.mrb[0].mxu0 }
 0x136   :  { %v172_v42 = vpop.f32.mrb[1].mxu0 }
 0x137   :  { %251 = vmatprep.subr.mxu0 %v172_v42  ;;  %v926_v42 = vld [vmem:[#allocation8 + $0x1048] sm:$0xff] }
 0x138   :  { %252 = vmatpush1.msra.mxu0 %v170_v41  ;;  %v915_v41 = vld [vmem:[#allocation8 + $0xff0] sm:$0xff] }
 0x139   :  { %v241_v50 = vpop.f32.mrb[2].mxu0  ;;  %2585 = vmatmul.mubr.msk.f32.vlgmr.msra.gmra.mrb[4].mxu0 %vm247_vm1, %v246_v43  ;;  %v2705_v44 = vpack.c.bf16 %v915_v41, %v905_v40  ;;  %v437_v41 = vld [vmem:[#allocation8 + $0x100] sm:$0xff] }
 0x13a   :  { %v243_v52 = vpop.f32.mrb[3].mxu0  ;;  %386 = vmatprep.mubr.f32.mxu0 %v3404_v0 }
 0x13b   :  { %322 = vmatprep.subr.mxu0 %v243_v52  ;;  %v945_v52 = vld [vmem:[#allocation8 + $0x10e0] sm:$0xff] }
 0x13c   :  { %323 = vmatpush1.msra.mxu0 %v241_v50  ;;  %v2709_v50 = vpack.c.bf16 %v935_v47, %v925_v46  ;;  %v448_v47 = vld [vmem:[#allocation8 + $0x158] sm:$0xff] }
 0x13d   :  { %2586 = vmatmul.mubr.msk.f32.vlgmr.msra.gmra.mrb[6].mxu0 %vm247_vm1, %v246_v43  ;;  %2668 = vmatprep.subr.bf16.mxu0 %v2667_v51  ;;  %v936_v43 = vld [vmem:[#allocation8 + $0x1098] sm:$0xff]  ;;  %v2711_v51 = vpack.c.bf16 %v956_v49, %v946_v48  ;;  %v458_v48 = vld [vmem:[#allocation8 + $0x1a8] sm:$0xff] }
 0x13e   :  { %2670 = vmatpush1.bf16.msra.mxu0 %v2669_v53  ;;  %v2707_v45 = vpack.c.bf16 %v936_v43, %v926_v42  ;;  %v955_v53 = vld [vmem:[#allocation8 + $0x1130] sm:$0xff]  ;;  %v409_v42 = vld [vmem:[#allocation8 + $0x20] sm:$0xff] }
 0x13f   :  { %2672 = vmatprep.subr.bf16.mxu0 %v2671_v54  ;;  %v966_v54 = vld [vmem:[#allocation8 + $0x1188] sm:$0xff]  ;;  %v2713_v56 = vpack.c.bf16 %v955_v53, %v945_v52  ;;  %v419_v43 = vld [vmem:[#allocation8 + $0x70] sm:$0xff]  ;;  %v2737_v53 = vpack.c.bf16 %v437_v41, %v427_v37 }
 0x140   :  { %v2715_v57 = vpack.c.bf16 %v976_v55, %v966_v54  ;;  %v2861_v54 = vpack.c.bf16 %v419_v43, %v409_v42  ;;  %v447_v55 = vld [vmem:[#allocation8 + $0x150] sm:$0xff]  ;;  %v510_v37 = vld [vmem:[#allocation8 + $0x348] sm:$0xff]  ;;  %v537_v43 = vld [vmem:[#allocation8 + $0x420] sm:$0xff] }
 0x141   :  { %v527_v42 = vld [vmem:[#allocation8 + $0x3d0] sm:$0xff] }
 0x142   :  { %2674 = vmatpush1.bf16.msra.mxu0 %v2673_v59  ;;  %v975_v59 = vld [vmem:[#allocation8 + $0x11d0] sm:$0xff] }
 0x143   :  { %2676 = vmatprep.subr.bf16.mxu0 %v2675_v60  ;;  %v986_v60 = vld [vmem:[#allocation8 + $0x1228] sm:$0xff]  ;;  %v2717_v62 = vpack.c.bf16 %v975_v59, %v965_v58  ;;  %v2739_v58 = vpack.c.bf16 %v458_v48, %v448_v47  ;;  %v429_v59 = vld [vmem:[#allocation8 + $0xc0] sm:$0xff]  ;;  %v519_v48 = vld [vmem:[#allocation8 + $0x390] sm:$0xff] }
 0x144   :  { %v2719_v63 = vpack.c.bf16 %v996_v61, %v986_v60  ;;  %v439_v60 = vld [vmem:[#allocation8 + $0x110] sm:$0xff]  ;;  %v468_v61 = vld [vmem:[#allocation8 + $0x1f8] sm:$0xff]  ;;  %v509_v47 = vld [vmem:[#allocation8 + $0x340] sm:$0xff] }
 0x145   :  { %v2865_v4 = vpack.c.bf16 %v439_v60, %v429_v59 }
 0x146   :  { %2678 = vmatpush1.bf16.msra.mxu0 %v2677_v2  ;;  %v995_v2 = vld [vmem:[#allocation8 + $0x1270] sm:$0xff] }
 0x147   :  { %2680 = vmatprep.subr.bf16.mxu0 %v2679_v3  ;;  %v2721_v3 = vpack.c.bf16 %v995_v2, %v985_v1  ;;  %v450_v1 = vld [vmem:[#allocation8 + $0x168] sm:$0xff]  ;;  %v460_v2 = vld [vmem:[#allocation8 + $0x1b8] sm:$0xff] }
 0x14a   :  { %2682 = vmatpush1.bf16.msra.mxu0 %v2681_v8  ;;  %v1016_v8 = vld [vmem:[#allocation8 + $0x1318] sm:$0xff] }
 0x14b   :  { %2684 = vmatprep.subr.bf16.mxu0 %v2683_v9  ;;  %v705_v9 = vld [vmem:[#allocation8 + $0x960] sm:$0xff]  ;;  %v2723_v11 = vpack.c.bf16 %v1016_v8, %v1006_v6  ;;  %v2867_v8 = vpack.c.bf16 %v460_v2, %v450_v1  ;;  %v578_v1 = vld [vmem:[#allocation8 + $0x568] sm:$0xff] }
 0x14c   :  { %v2665_v12 = vpack.c.bf16 %v715_v10, %v705_v9  ;;  %v477_v6 = vld [vmem:[#allocation8 + $0x240] sm:$0xff]  ;;  %v459_v10 = vld [vmem:[#allocation8 + $0x1b0] sm:$0xff]  ;;  %v550_v2 = vld [vmem:[#allocation8 + $0x488] sm:$0xff] }
 0x14d   :  { %v449_v9 = vld [vmem:[#allocation8 + $0x160] sm:$0xff] }
 0x14e   :  { %2686 = vmatpush1.bf16.msra.mxu0 %v2685_v14  ;;  %v1015_v14 = vld [vmem:[#allocation8 + $0x1310] sm:$0xff]  ;;  %2666 = vmatpush1.bf16.msra.mxu1 %v2665_v12  ;;  %v498_v12 = vld [vmem:[#allocation8 + $0x2e8] sm:$0xff]  ;;  %v2869_v16 = vpack.c.bf16 %v459_v10, %v449_v9  ;;  %v549_v10 = vld [vmem:[#allocation8 + $0x480] sm:$0xff] }
 0x14f   :  { %2688 = vmatprep.subr.bf16.mxu0 %v2687_v15  ;;  %v2725_v15 = vpack.c.bf16 %v1015_v14, %v1005_v13  ;;  %v470_v13 = vld [vmem:[#allocation8 + $0x208] sm:$0xff]  ;;  %v480_v14 = vld [vmem:[#allocation8 + $0x258] sm:$0xff] }
 0x152   :  { %2690 = vmatpush1.bf16.msra.mxu0 %v2689_v20  ;;  %v418_v20 = vld [vmem:[#allocation8 + $0x68] sm:$0xff] }
 0x153   :  { %2692 = vmatprep.subr.bf16.mxu0 %v2691_v21  ;;  %v1025_v21 = vld [vmem:[#allocation8 + $0x1360] sm:$0xff]  ;;  %v2731_v23 = vpack.c.bf16 %v418_v20, %v408_v18  ;;  %v2871_v20 = vpack.c.bf16 %v480_v14, %v470_v13  ;;  %v598_v13 = vld [vmem:[#allocation8 + $0x608] sm:$0xff] }
 0x154   :  { %v2729_v24 = vpack.c.bf16 %v1035_v22, %v1025_v21  ;;  %v497_v18 = vld [vmem:[#allocation8 + $0x2e0] sm:$0xff]  ;;  %v479_v22 = vld [vmem:[#allocation8 + $0x250] sm:$0xff]  ;;  %v570_v14 = vld [vmem:[#allocation8 + $0x528] sm:$0xff] }
 0x155   :  { %2732 = vmatprep.subr.bf16.mxu1 %v2731_v23  ;;  %v469_v21 = vld [vmem:[#allocation8 + $0x200] sm:$0xff]  ;;  %v508_v23 = vld [vmem:[#allocation8 + $0x338] sm:$0xff] }
 0x156   :  { %2694 = vmatpush1.bf16.msra.mxu0 %v2693_v26  ;;  %v420_v26 = vld [vmem:[#allocation8 + $0x78] sm:$0xff] }
 0x157   :  { %2696 = vmatprep.subr.bf16.mxu0 %v2695_v27  ;;  %v2859_v27 = vpack.c.bf16 %v420_v26, %v410_v25  ;;  %v490_v25 = vld [vmem:[#allocation8 + $0x2a8] sm:$0xff]  ;;  %v500_v26 = vld [vmem:[#allocation8 + $0x2f8] sm:$0xff] }
 0x15a   :  { %2698 = vmatpush1.bf16.msra.mxu0 %v2697_v32 }
 0x15b   :  { %2700 = vmatprep.subr.bf16.mxu0 %v2699_v33  ;;  %v428_v33 = vld [vmem:[#allocation8 + $0xb8] sm:$0xff] }
 0x15c   :  { %v2735_v40 = vpack.c.bf16 %v438_v34, %v428_v33  ;;  %v489_v33 = vld [vmem:[#allocation8 + $0x2a0] sm:$0xff]  ;;  %v499_v34 = vld [vmem:[#allocation8 + $0x2f0] sm:$0xff] }
 0x15d   :  { %v2877_v41 = vpack.c.bf16 %v499_v34, %v489_v33  ;;  %v589_v34 = vld [vmem:[#allocation8 + $0x5c0] sm:$0xff] }
 0x15e   :  { %2702 = vmatpush1.bf16.msra.mxu0 %v2701_v38 }
 0x15f   :  { %2704 = vmatprep.subr.bf16.mxu0 %v2703_v39 }
 0x162   :  { %2706 = vmatpush1.bf16.msra.mxu0 %v2705_v44 }
 0x163   :  { %2708 = vmatprep.subr.bf16.mxu0 %v2707_v45 }
 0x166   :  { %2710 = vmatpush1.bf16.msra.mxu0 %v2709_v50  ;;  %v430_v50 = vld [vmem:[#allocation8 + $0xc8] sm:$0xff] }
 0x167   :  { %2712 = vmatprep.subr.bf16.mxu0 %v2711_v51  ;;  %v440_v51 = vld [vmem:[#allocation8 + $0x118] sm:$0xff] }
 0x16a   :  { %2714 = vmatpush1.bf16.msra.mxu0 %v2713_v56  ;;  %v457_v56 = vld [vmem:[#allocation8 + $0x1a0] sm:$0xff] }
 0x16b   :  { %2716 = vmatprep.subr.bf16.mxu0 %v2715_v57 }
 0x16e   :  { %2718 = vmatpush1.bf16.msra.mxu0 %v2717_v62  ;;  %v2863_v62 = vpack.c.bf16 %v440_v51, %v430_v50  ;;  %v558_v50 = vld [vmem:[#allocation8 + $0x4c8] sm:$0xff] }
 0x16f   :  { %2720 = vmatprep.subr.bf16.mxu0 %v2719_v63  ;;  %v478_v63 = vld [vmem:[#allocation8 + $0x248] sm:$0xff] }
 0x170   :  { %v2743_v7 = vpack.c.bf16 %v478_v63, %v468_v61  ;;  %v530_v51 = vld [vmem:[#allocation8 + $0x3e8] sm:$0xff]  ;;  %v529_v61 = vld [vmem:[#allocation8 + $0x3e0] sm:$0xff]  ;;  %v568_v63 = vld [vmem:[#allocation8 + $0x518] sm:$0xff] }
 0x172   :  { %2722 = vmatpush1.bf16.msra.mxu0 %v2721_v3  ;;  %v2741_v3 = vpack.c.bf16 %v457_v56, %v447_v55  ;;  %v2881_v55 = vpack.c.bf16 %v519_v48, %v509_v47  ;;  %v547_v56 = vld [vmem:[#allocation8 + $0x470] sm:$0xff]  ;;  %v609_v48 = vld [vmem:[#allocation8 + $0x660] sm:$0xff] }
 0x173   :  { %2724 = vmatprep.subr.bf16.mxu0 %v2723_v11  ;;  %v488_v11 = vld [vmem:[#allocation8 + $0x298] sm:$0xff] }
 0x176   :  { %2726 = vmatpush1.bf16.msra.mxu0 %v2725_v15  ;;  %v2745_v15 = vpack.c.bf16 %v477_v6, %v467_v5  ;;  %v567_v6 = vld [vmem:[#allocation8 + $0x510] sm:$0xff] }
 0x177   :  { %2728 = vmatprep.subr.bf16.mxu0 %v2727_v19  ;;  %v2747_v19 = vpack.c.bf16 %v498_v12, %v488_v11  ;;  %v559_v11 = vld [vmem:[#allocation8 + $0x4d0] sm:$0xff]  ;;  %v588_v12 = vld [vmem:[#allocation8 + $0x5b8] sm:$0xff] }
 0x17a   :  { %2730 = vmatpush1.bf16.msra.mxu0 %v2729_v24  ;;  %v518_v24 = vld [vmem:[#allocation8 + $0x388] sm:$0xff] }
 0x17b   :  { %2860 = vmatprep.subr.bf16.mxu0 %v2859_v27  ;;  %v2749_v27 = vpack.c.bf16 %v497_v18, %v487_v17  ;;  %v2889_v17 = vpack.c.bf16 %v559_v11, %v549_v10  ;;  %v587_v18 = vld [vmem:[#allocation8 + $0x5b0] sm:$0xff]  ;;  %v649_v11 = vld [vmem:[#allocation8 + $0x7a0] sm:$0xff] }
 0x20c   :  { %v317_v28 = vpop.f32.mrb[4].mxu0 }
 0x20d   :  { %v397_v31 = vmul.f32 0.2, %v317_v28  ;;  %v319_v32 = vpop.f32.mrb[5].mxu0  ;;  %vm393_vm2 = vcmp.ge.f32.partialorder %v317_v28, 0.0 }
 0x20e   :  { %vm394_vm3 = vcmp.ge.f32.partialorder %v319_v32, 0.0  ;;  %v398_v35 = vmul.f32 0.2, %v319_v32 }
 0x20f   :  { %v3533_v44 = vsel %vm393_vm2, %v317_v28, %v397_v31  ;;  %v2873_v28 = vpack.c.bf16 %v479_v22, %v469_v21  ;;  %v2751_v31 = vpack.c.bf16 %v518_v24, %v508_v23  ;;  %v569_v22 = vld [vmem:[#allocation8 + $0x520] sm:$0xff]  ;;  %v579_v23 = vld [vmem:[#allocation8 + $0x570] sm:$0xff]  ;;  %v608_v24 = vld [vmem:[#allocation8 + $0x658] sm:$0xff] }
 0x210   :  { %v3531_v38 = vsel %vm394_vm3, %v319_v32, %v398_v35  ;;  %v388_v39 = vpop.f32.mrb[6].mxu0  ;;  %v2875_v32 = vpack.c.bf16 %v500_v26, %v490_v25  ;;  %v528_v35 = vld [vmem:[#allocation8 + $0x3d8] sm:$0xff]  ;;  %v618_v25 = vld [vmem:[#allocation8 + $0x6a8] sm:$0xff] }
 0x211   :  { %vm395_vm4 = vcmp.ge.f32.partialorder %v388_v39, 0.0  ;;  %v399_v45 = vmul.f32 0.2, %v388_v39  ;;  %v390_v46 = vpop.f32.mrb[7].mxu0  ;;  %1109 = vmatprep.mubr.f32.mxu1 %v3531_v38  ;;  %v590_v26 = vld [vmem:[#allocation8 + $0x5c8] sm:$0xff] }
 0x212   :  { %vm396_vm5 = vcmp.ge.f32.partialorder %v390_v46, 0.0  ;;  %v400_v49 = vmul.f32 0.2, %v390_v46  ;;  %1110 = vmatmul.mubr.f32.vlgmr.msra.gmra.mrb[0].mxu1 %v3533_v44 }
 0x213   :  { %v3537_v52 = vsel %vm395_vm4, %v388_v39, %v399_v45  ;;  %2734 = vmatpush1.bf16.msra.mxu1 %v2733_v36  ;;  %1251 = vmatprep.mubr.f32.mxu1 %v3531_v38  ;;  %v538_v36 = vld [vmem:[#allocation8 + $0x428] sm:$0xff]  ;;  %v520_v39 = vld [vmem:[#allocation8 + $0x398] sm:$0xff] }
 0x214   :  { %v3540_v57 = vsel %vm396_vm5, %v390_v46, %v400_v49  ;;  %2736 = vmatprep.subr.bf16.mxu1 %v2735_v40  ;;  %v2753_v40 = vpack.c.bf16 %v517_v30, %v507_v29  ;;  %v2755_v45 = vpack.c.bf16 %v538_v36, %v528_v35  ;;  %v2879_v46 = vpack.c.bf16 %v520_v39, %v510_v37  ;;  %v548_v49 = vld [vmem:[#allocation8 + $0x478] sm:$0xff]  ;;  %v607_v30 = vld [vmem:[#allocation8 + $0x650] sm:$0xff]  ;;  %v638_v37 = vld [vmem:[#allocation8 + $0x748] sm:$0xff] }
 0x215   :  { %1180 = vmatprep.mubr.f32.mxu0 %v3540_v57  ;;  %v2759_v59 = vpack.c.bf16 %v558_v50, %v548_v49  ;;  %v2893_v29 = vpack.c.bf16 %v579_v23, %v569_v22  ;;  %v599_v35 = vld [vmem:[#allocation8 + $0x610] sm:$0xff]  ;;  %v628_v36 = vld [vmem:[#allocation8 + $0x6f8] sm:$0xff]  ;;  %v610_v39 = vld [vmem:[#allocation8 + $0x668] sm:$0xff] }
 0x216   :  { %1181 = vmatmul.mubr.f32.vlgmr.msra.gmra.mrb[8].mxu0 %v3537_v52  ;;  %v619_v49 = vld [vmem:[#allocation8 + $0x6b0] sm:$0xff]  ;;  %v648_v50 = vld [vmem:[#allocation8 + $0x798] sm:$0xff]  ;;  %v669_v23 = vld [vmem:[#allocation8 + $0x840] sm:$0xff] }
 0x217   :  { %2738 = vmatpush1.bf16.msra.mxu1 %v2737_v53  ;;  %2862 = vmatpush1.bf16.msra.mxu0 %v2861_v54  ;;  %v540_v53 = vld [vmem:[#allocation8 + $0x438] sm:$0xff]  ;;  %v2757_v54 = vpack.c.bf16 %v537_v43, %v527_v42  ;;  %v2897_v42 = vpack.c.bf16 %v599_v35, %v589_v34  ;;  %v627_v43 = vld [vmem:[#allocation8 + $0x6f0] sm:$0xff]  ;;  %v689_v35 = vld [vmem:[#allocation8 + $0x8e0] sm:$0xff] }
 0x218   :  { %1393 = vmatprep.mubr.f32.mxu0 %v3531_v38  ;;  %2740 = vmatprep.subr.bf16.mxu1 %v2739_v58  ;;  %v557_v58 = vld [vmem:[#allocation8 + $0x4c0] sm:$0xff]  ;;  %v2883_v60 = vpack.c.bf16 %v540_v53, %v530_v51  ;;  %v658_v51 = vld [vmem:[#allocation8 + $0x7e8] sm:$0xff] }
 0x219   :  { %2864 = vmatprep.subr.bf16.mxu0 %v2863_v62  ;;  %v539_v62 = vld [vmem:[#allocation8 + $0x430] sm:$0xff]  ;;  %v630_v53 = vld [vmem:[#allocation8 + $0x708] sm:$0xff] }
 0x21a   :  { %v2885_v5 = vpack.c.bf16 %v539_v62, %v529_v61  ;;  %v629_v62 = vld [vmem:[#allocation8 + $0x700] sm:$0xff] }
 0x21b   :  { %2742 = vmatpush1.bf16.msra.mxu1 %v2741_v3  ;;  %2866 = vmatpush1.bf16.msra.mxu0 %v2865_v4  ;;  %v560_v3 = vld [vmem:[#allocation8 + $0x4d8] sm:$0xff]  ;;  %v2761_v4 = vpack.c.bf16 %v557_v58, %v547_v56  ;;  %v2901_v56 = vpack.c.bf16 %v619_v49, %v609_v48  ;;  %v647_v58 = vld [vmem:[#allocation8 + $0x790] sm:$0xff]  ;;  %v737_v48 = vld [vmem:[#allocation8 + $0xa60] sm:$0xff] }
 0x21c   :  { %2744 = vmatprep.subr.bf16.mxu1 %v2743_v7  ;;  %2868 = vmatprep.subr.bf16.mxu0 %v2867_v8  ;;  %v577_v7 = vld [vmem:[#allocation8 + $0x560] sm:$0xff]  ;;  %v2763_v8 = vpack.c.bf16 %v578_v1, %v568_v63  ;;  %v2887_v9 = vpack.c.bf16 %v560_v3, %v550_v2  ;;  %v639_v63 = vld [vmem:[#allocation8 + $0x750] sm:$0xff]  ;;  %v668_v1 = vld [vmem:[#allocation8 + $0x838] sm:$0xff] }
 0x21d   :  { %v678_v2 = vld [vmem:[#allocation8 + $0x888] sm:$0xff]  ;;  %v709_v49 = vld [vmem:[#allocation8 + $0x980] sm:$0xff] }
 0x21e   :  { %v650_v3 = vld [vmem:[#allocation8 + $0x7a8] sm:$0xff] }
 0x21f   :  { %2746 = vmatpush1.bf16.msra.mxu1 %v2745_v15  ;;  %2870 = vmatpush1.bf16.msra.mxu0 %v2869_v16  ;;  %v580_v15 = vld [vmem:[#allocation8 + $0x578] sm:$0xff]  ;;  %v2765_v16 = vpack.c.bf16 %v577_v7, %v567_v6  ;;  %v2905_v6 = vpack.c.bf16 %v639_v63, %v629_v62  ;;  %v667_v7 = vld [vmem:[#allocation8 + $0x830] sm:$0xff]  ;;  %v729_v63 = vld [vmem:[#allocation8 + $0xa20] sm:$0xff] }
 0x220   :  { %2748 = vmatprep.subr.bf16.mxu1 %v2747_v19  ;;  %2872 = vmatprep.subr.bf16.mxu0 %v2871_v20  ;;  %v597_v19 = vld [vmem:[#allocation8 + $0x600] sm:$0xff]  ;;  %v2767_v20 = vpack.c.bf16 %v598_v13, %v588_v12  ;;  %v2891_v21 = vpack.c.bf16 %v580_v15, %v570_v14  ;;  %v659_v12 = vld [vmem:[#allocation8 + $0x7f0] sm:$0xff]  ;;  %v688_v13 = vld [vmem:[#allocation8 + $0x8d8] sm:$0xff] }
 0x221   :  { %v698_v14 = vld [vmem:[#allocation8 + $0x928] sm:$0xff] }
 0x222   :  { %v670_v15 = vld [vmem:[#allocation8 + $0x848] sm:$0xff] }
 0x223   :  { %2750 = vmatpush1.bf16.msra.mxu1 %v2749_v27  ;;  %2874 = vmatpush1.bf16.msra.mxu0 %v2873_v28  ;;  %v600_v27 = vld [vmem:[#allocation8 + $0x618] sm:$0xff]  ;;  %v2769_v28 = vpack.c.bf16 %v597_v19, %v587_v18  ;;  %v2909_v18 = vpack.c.bf16 %v659_v12, %v649_v11  ;;  %v687_v19 = vld [vmem:[#allocation8 + $0x8d0] sm:$0xff] }
 0x224   :  { %2752 = vmatprep.subr.bf16.mxu1 %v2751_v31  ;;  %2876 = vmatprep.subr.bf16.mxu0 %v2875_v32  ;;  %v617_v31 = vld [vmem:[#allocation8 + $0x6a0] sm:$0xff]  ;;  %v2771_v32 = vpack.c.bf16 %v618_v25, %v608_v24  ;;  %v2895_v33 = vpack.c.bf16 %v600_v27, %v590_v26  ;;  %v679_v24 = vld [vmem:[#allocation8 + $0x890] sm:$0xff]  ;;  %v708_v25 = vld [vmem:[#allocation8 + $0x978] sm:$0xff] }
 0x225   :  { %v718_v26 = vld [vmem:[#allocation8 + $0x9c8] sm:$0xff] }
 0x226   :  { %v690_v27 = vld [vmem:[#allocation8 + $0x8e8] sm:$0xff] }
 0x227   :  { %2754 = vmatpush1.bf16.msra.mxu1 %v2753_v40  ;;  %2878 = vmatpush1.bf16.msra.mxu0 %v2877_v41  ;;  %v620_v40 = vld [vmem:[#allocation8 + $0x6b8] sm:$0xff]  ;;  %v2773_v41 = vpack.c.bf16 %v617_v31, %v607_v30  ;;  %v2913_v30 = vpack.c.bf16 %v679_v24, %v669_v23  ;;  %v707_v31 = vld [vmem:[#allocation8 + $0x970] sm:$0xff]  ;;  %v769_v23 = vld [vmem:[#allocation8 + $0xb60] sm:$0xff] }
 0x228   :  { %2756 = vmatprep.subr.bf16.mxu1 %v2755_v45  ;;  %2880 = vmatprep.subr.bf16.mxu0 %v2879_v46  ;;  %v637_v45 = vld [vmem:[#allocation8 + $0x740] sm:$0xff]  ;;  %v2775_v46 = vpack.c.bf16 %v638_v37, %v628_v36  ;;  %v2899_v47 = vpack.c.bf16 %v620_v40, %v610_v39  ;;  %v699_v36 = vld [vmem:[#allocation8 + $0x930] sm:$0xff]  ;;  %v728_v37 = vld [vmem:[#allocation8 + $0xa18] sm:$0xff] }
 0x229   :  { %v738_v39 = vld [vmem:[#allocation8 + $0xa68] sm:$0xff] }
 0x22a   :  { %v710_v40 = vld [vmem:[#allocation8 + $0x988] sm:$0xff] }
 0x22b   :  { %2758 = vmatpush1.bf16.msra.mxu1 %v2757_v54  ;;  %2882 = vmatpush1.bf16.msra.mxu0 %v2881_v55  ;;  %v640_v54 = vld [vmem:[#allocation8 + $0x758] sm:$0xff]  ;;  %v2777_v55 = vpack.c.bf16 %v637_v45, %v627_v43  ;;  %v2917_v43 = vpack.c.bf16 %v699_v36, %v689_v35  ;;  %v2795_v45 = vpack.c.bf16 %v738_v39, %v728_v37  ;;  %v789_v35 = vld [vmem:[#allocation8 + $0xc00] sm:$0xff]  ;;  %v799_v37 = vld [vmem:[#allocation8 + $0xc50] sm:$0xff] }
 0x22c   :  { %2760 = vmatprep.subr.bf16.mxu1 %v2759_v59  ;;  %2884 = vmatprep.subr.bf16.mxu0 %v2883_v60  ;;  %v657_v59 = vld [vmem:[#allocation8 + $0x7e0] sm:$0xff]  ;;  %v2779_v60 = vpack.c.bf16 %v658_v51, %v648_v50  ;;  %v2903_v61 = vpack.c.bf16 %v640_v54, %v630_v53  ;;  %v719_v50 = vld [vmem:[#allocation8 + $0x9d0] sm:$0xff]  ;;  %v748_v51 = vld [vmem:[#allocation8 + $0xab8] sm:$0xff] }
 0x22d   :  { %v758_v53 = vld [vmem:[#allocation8 + $0xb08] sm:$0xff]  ;;  %v828_v39 = vld [vmem:[#allocation8 + $0xd38] sm:$0xff] }
 0x22e   :  { %v730_v54 = vld [vmem:[#allocation8 + $0xa28] sm:$0xff] }
 0x22f   :  { %2762 = vmatpush1.bf16.msra.mxu1 %v2761_v4  ;;  %2886 = vmatpush1.bf16.msra.mxu0 %v2885_v5  ;;  %v660_v4 = vld [vmem:[#allocation8 + $0x7f8] sm:$0xff]  ;;  %v2781_v5 = vpack.c.bf16 %v657_v59, %v647_v58  ;;  %v2921_v58 = vpack.c.bf16 %v719_v50, %v709_v49  ;;  %v2799_v59 = vpack.c.bf16 %v758_v53, %v748_v51  ;;  %v809_v49 = vld [vmem:[#allocation8 + $0xca0] sm:$0xff]  ;;  %v819_v51 = vld [vmem:[#allocation8 + $0xcf0] sm:$0xff] }
 0x230   :  { %2764 = vmatprep.subr.bf16.mxu1 %v2763_v8  ;;  %2888 = vmatprep.subr.bf16.mxu0 %v2887_v9  ;;  %v677_v8 = vld [vmem:[#allocation8 + $0x880] sm:$0xff]  ;;  %v2783_v9 = vpack.c.bf16 %v678_v2, %v668_v1  ;;  %v2907_v10 = vpack.c.bf16 %v660_v4, %v650_v3  ;;  %v739_v1 = vld [vmem:[#allocation8 + $0xa70] sm:$0xff]  ;;  %v768_v2 = vld [vmem:[#allocation8 + $0xb58] sm:$0xff] }
 0x231   :  { %v778_v3 = vld [vmem:[#allocation8 + $0xba8] sm:$0xff]  ;;  %v848_v53 = vld [vmem:[#allocation8 + $0xdd8] sm:$0xff] }
 0x232   :  { %v750_v4 = vld [vmem:[#allocation8 + $0xac8] sm:$0xff]  ;;  %v2803_v11 = vpack.c.bf16 %v778_v3, %v768_v2  ;;  %v839_v2 = vld [vmem:[#allocation8 + $0xd90] sm:$0xff]  ;;  %v868_v3 = vld [vmem:[#allocation8 + $0xe78] sm:$0xff] }
 0x233   :  { %2766 = vmatpush1.bf16.msra.mxu1 %v2765_v16  ;;  %2890 = vmatpush1.bf16.msra.mxu0 %v2889_v17  ;;  %v680_v16 = vld [vmem:[#allocation8 + $0x898] sm:$0xff]  ;;  %v2785_v17 = vpack.c.bf16 %v677_v8, %v667_v7  ;;  %v2925_v7 = vpack.c.bf16 %v739_v1, %v729_v63  ;;  %v767_v8 = vld [vmem:[#allocation8 + $0xb50] sm:$0xff]  ;;  %v829_v63 = vld [vmem:[#allocation8 + $0xd40] sm:$0xff] }
 0x234   :  { %2768 = vmatprep.subr.bf16.mxu1 %v2767_v20  ;;  %2892 = vmatprep.subr.bf16.mxu0 %v2891_v21  ;;  %v697_v20 = vld [vmem:[#allocation8 + $0x920] sm:$0xff]  ;;  %v2787_v21 = vpack.c.bf16 %v698_v14, %v688_v13  ;;  %v2911_v22 = vpack.c.bf16 %v680_v16, %v670_v15  ;;  %v759_v13 = vld [vmem:[#allocation8 + $0xb10] sm:$0xff]  ;;  %v788_v14 = vld [vmem:[#allocation8 + $0xbf8] sm:$0xff] }
 0x235   :  { %v798_v15 = vld [vmem:[#allocation8 + $0xc48] sm:$0xff] }
 0x236   :  { %v770_v16 = vld [vmem:[#allocation8 + $0xb68] sm:$0xff] }
 0x237   :  { %2770 = vmatpush1.bf16.msra.mxu1 %v2769_v28  ;;  %2894 = vmatpush1.bf16.msra.mxu0 %v2893_v29  ;;  %v700_v28 = vld [vmem:[#allocation8 + $0x938] sm:$0xff]  ;;  %v2789_v29 = vpack.c.bf16 %v697_v20, %v687_v19  ;;  %v2807_v20 = vpack.c.bf16 %v798_v15, %v788_v14  ;;  %v859_v14 = vld [vmem:[#allocation8 + $0xe30] sm:$0xff] }
 0x238   :  { %2772 = vmatprep.subr.bf16.mxu1 %v2771_v32  ;;  %2896 = vmatprep.subr.bf16.mxu0 %v2895_v33  ;;  %v717_v32 = vld [vmem:[#allocation8 + $0x9c0] sm:$0xff]  ;;  %v2791_v33 = vpack.c.bf16 %v718_v26, %v708_v25  ;;  %v2915_v34 = vpack.c.bf16 %v700_v28, %v690_v27  ;;  %v779_v25 = vld [vmem:[#allocation8 + $0xbb0] sm:$0xff]  ;;  %v808_v26 = vld [vmem:[#allocation8 + $0xc98] sm:$0xff] }
 0x239   :  { %v818_v27 = vld [vmem:[#allocation8 + $0xce8] sm:$0xff]  ;;  %v888_v15 = vld [vmem:[#allocation8 + $0xf18] sm:$0xff] }
 0x23a   :  { %v790_v28 = vld [vmem:[#allocation8 + $0xc08] sm:$0xff] }
 0x23b   :  { %2774 = vmatpush1.bf16.msra.mxu1 %v2773_v41  ;;  %2898 = vmatpush1.bf16.msra.mxu0 %v2897_v42  ;;  %v720_v41 = vld [vmem:[#allocation8 + $0x9d8] sm:$0xff]  ;;  %v2793_v42 = vpack.c.bf16 %v717_v32, %v707_v31  ;;  %v2933_v31 = vpack.c.bf16 %v779_v25, %v769_v23  ;;  %v2811_v32 = vpack.c.bf16 %v818_v27, %v808_v26  ;;  %v897_v23 = vld [vmem:[#allocation8 + $0xf60] sm:$0xff]  ;;  %v879_v26 = vld [vmem:[#allocation8 + $0xed0] sm:$0xff] }
 0x23c   :  { %2776 = vmatprep.subr.bf16.mxu1 %v2775_v46  ;;  %2900 = vmatprep.subr.bf16.mxu0 %v2899_v47  ;;  %v2919_v46 = vpack.c.bf16 %v720_v41, %v710_v40  ;;  %v727_v47 = vld [vmem:[#allocation8 + $0xa10] sm:$0xff]  ;;  %v838_v40 = vld [vmem:[#allocation8 + $0xd88] sm:$0xff]  ;;  %v908_v27 = vld [vmem:[#allocation8 + $0xfb8] sm:$0xff] }
 0x23d   :  { %v810_v41 = vld [vmem:[#allocation8 + $0xca8] sm:$0xff] }
 0x23f   :  { %2778 = vmatpush1.bf16.msra.mxu1 %v2777_v55  ;;  %2902 = vmatpush1.bf16.msra.mxu0 %v2901_v56  ;;  %v740_v55 = vld [vmem:[#allocation8 + $0xa78] sm:$0xff]  ;;  %v2797_v56 = vpack.c.bf16 %v737_v48, %v727_v47  ;;  %v827_v47 = vld [vmem:[#allocation8 + $0xd30] sm:$0xff]  ;;  %v837_v48 = vld [vmem:[#allocation8 + $0xd80] sm:$0xff] }
 0x240   :  { %2780 = vmatprep.subr.bf16.mxu1 %v2779_v60  ;;  %2904 = vmatprep.subr.bf16.mxu0 %v2903_v61  ;;  %v747_v60 = vld [vmem:[#allocation8 + $0xab0] sm:$0xff]  ;;  %v757_v61 = vld [vmem:[#allocation8 + $0xb00] sm:$0xff]  ;;  %v2923_v62 = vpack.c.bf16 %v740_v55, %v730_v54  ;;  %v858_v54 = vld [vmem:[#allocation8 + $0xe28] sm:$0xff] }
 0x241   :  { %v830_v55 = vld [vmem:[#allocation8 + $0xd48] sm:$0xff] }
 0x243   :  { %2782 = vmatpush1.bf16.msra.mxu1 %v2781_v5  ;;  %2906 = vmatpush1.bf16.msra.mxu0 %v2905_v6  ;;  %v760_v5 = vld [vmem:[#allocation8 + $0xb18] sm:$0xff]  ;;  %v2801_v6 = vpack.c.bf16 %v757_v61, %v747_v60  ;;  %v2819_v60 = vpack.c.bf16 %v858_v54, %v848_v53  ;;  %v847_v61 = vld [vmem:[#allocation8 + $0xdd0] sm:$0xff] }
 0x244   :  { %2784 = vmatprep.subr.bf16.mxu1 %v2783_v9  ;;  %2908 = vmatprep.subr.bf16.mxu0 %v2907_v10  ;;  %v777_v9 = vld [vmem:[#allocation8 + $0xba0] sm:$0xff]  ;;  %v2927_v12 = vpack.c.bf16 %v760_v5, %v750_v4  ;;  %v878_v4 = vld [vmem:[#allocation8 + $0xec8] sm:$0xff]  ;;  %v919_v53 = vld [vmem:[#allocation8 + $0x1010] sm:$0xff] }
 0x245   :  { %v749_v10 = vld [vmem:[#allocation8 + $0xac0] sm:$0xff]  ;;  %v850_v5 = vld [vmem:[#allocation8 + $0xde8] sm:$0xff]  ;;  %v948_v54 = vld [vmem:[#allocation8 + $0x10f8] sm:$0xff] }
 0x246   :  { %v2929_v19 = vpack.c.bf16 %v759_v13, %v749_v10  ;;  %v867_v10 = vld [vmem:[#allocation8 + $0xe70] sm:$0xff] }
 0x247   :  { %2786 = vmatpush1.bf16.msra.mxu1 %v2785_v17  ;;  %2910 = vmatpush1.bf16.msra.mxu0 %v2909_v18  ;;  %v780_v17 = vld [vmem:[#allocation8 + $0xbb8] sm:$0xff]  ;;  %v2805_v18 = vpack.c.bf16 %v777_v9, %v767_v8  ;;  %v2945_v8 = vpack.c.bf16 %v839_v2, %v829_v63  ;;  %v2823_v9 = vpack.c.bf16 %v878_v4, %v868_v3  ;;  %v957_v63 = vld [vmem:[#allocation8 + $0x1140] sm:$0xff]  ;;  %v939_v3 = vld [vmem:[#allocation8 + $0x10b0] sm:$0xff] }
 0x248   :  { %2788 = vmatprep.subr.bf16.mxu1 %v2787_v21  ;;  %2912 = vmatprep.subr.bf16.mxu0 %v2911_v22  ;;  %v787_v21 = vld [vmem:[#allocation8 + $0xbf0] sm:$0xff]  ;;  %v797_v22 = vld [vmem:[#allocation8 + $0xc40] sm:$0xff]  ;;  %v2931_v24 = vpack.c.bf16 %v780_v17, %v770_v16  ;;  %v898_v16 = vld [vmem:[#allocation8 + $0xf68] sm:$0xff] }
 0x249   :  { %v870_v17 = vld [vmem:[#allocation8 + $0xe88] sm:$0xff]  ;;  %v968_v4 = vld [vmem:[#allocation8 + $0x1198] sm:$0xff] }
 0x24b   :  { %2790 = vmatpush1.bf16.msra.mxu1 %v2789_v29  ;;  %2914 = vmatpush1.bf16.msra.mxu0 %v2913_v30  ;;  %v800_v29 = vld [vmem:[#allocation8 + $0xc58] sm:$0xff]  ;;  %v2809_v30 = vpack.c.bf16 %v797_v22, %v787_v21  ;;  %v2827_v21 = vpack.c.bf16 %v898_v16, %v888_v15  ;;  %v887_v22 = vld [vmem:[#allocation8 + $0xf10] sm:$0xff] }
 0x24c   :  { %2792 = vmatprep.subr.bf16.mxu1 %v2791_v33  ;;  %2916 = vmatprep.subr.bf16.mxu0 %v2915_v34  ;;  %v807_v33 = vld [vmem:[#allocation8 + $0xc90] sm:$0xff]  ;;  %v817_v34 = vld [vmem:[#allocation8 + $0xce0] sm:$0xff]  ;;  %v2935_v36 = vpack.c.bf16 %v800_v29, %v790_v28  ;;  %v918_v28 = vld [vmem:[#allocation8 + $0x1008] sm:$0xff] }
 0x24d   :  { %v890_v29 = vld [vmem:[#allocation8 + $0xf28] sm:$0xff]  ;;  %v959_v15 = vld [vmem:[#allocation8 + $0x1150] sm:$0xff]  ;;  %v988_v16 = vld [vmem:[#allocation8 + $0x1238] sm:$0xff] }
 0x24f   :  { %2794 = vmatpush1.bf16.msra.mxu1 %v2793_v42  ;;  %2918 = vmatpush1.bf16.msra.mxu0 %v2917_v43  ;;  %v820_v42 = vld [vmem:[#allocation8 + $0xcf8] sm:$0xff]  ;;  %v2813_v43 = vpack.c.bf16 %v817_v34, %v807_v33  ;;  %v2831_v33 = vpack.c.bf16 %v918_v28, %v908_v27  ;;  %v907_v34 = vld [vmem:[#allocation8 + $0xfb0] sm:$0xff] }
 0x250   :  { %2796 = vmatprep.subr.bf16.mxu1 %v2795_v45  ;;  %2920 = vmatprep.subr.bf16.mxu0 %v2919_v46  ;;  %v2937_v45 = vpack.c.bf16 %v799_v37, %v789_v35  ;;  %v2815_v46 = vpack.c.bf16 %v838_v40, %v828_v39  ;;  %v2939_v50 = vpack.c.bf16 %v820_v42, %v810_v41  ;;  %v917_v35 = vld [vmem:[#allocation8 + $0x1000] sm:$0xff]  ;;  %v899_v39 = vld [vmem:[#allocation8 + $0xf70] sm:$0xff]  ;;  %v928_v40 = vld [vmem:[#allocation8 + $0x1058] sm:$0xff] }
 0x251   :  { %v938_v41 = vld [vmem:[#allocation8 + $0x10a8] sm:$0xff]  ;;  %v979_v27 = vld [vmem:[#allocation8 + $0x11f0] sm:$0xff]  ;;  %v1008_v28 = vld [vmem:[#allocation8 + $0x12d8] sm:$0xff] }
 0x252   :  { %1252 = vmatmul.mubr.f32.vlgmr.msra.gmra.mrb[2].mxu1 %v3533_v44  ;;  %v910_v42 = vld [vmem:[#allocation8 + $0xfc8] sm:$0xff] }
 0x253   :  { %2798 = vmatpush1.bf16.msra.mxu1 %v2797_v56  ;;  %1322 = vmatprep.mubr.f32.mxu1 %v3540_v57  ;;  %v840_v56 = vld [vmem:[#allocation8 + $0xd98] sm:$0xff] }
 0x254   :  { %2922 = vmatpush1.bf16.msra.mxu0 %v2921_v58  ;;  %2800 = vmatprep.subr.bf16.mxu1 %v2799_v59  ;;  %v2817_v58 = vpack.c.bf16 %v837_v48, %v827_v47  ;;  %v2941_v59 = vpack.c.bf16 %v819_v51, %v809_v49  ;;  %v2943_v1 = vpack.c.bf16 %v840_v56, %v830_v55  ;;  %v927_v48 = vld [vmem:[#allocation8 + $0x1050] sm:$0xff]  ;;  %v937_v49 = vld [vmem:[#allocation8 + $0x10a0] sm:$0xff]  ;;  %v958_v55 = vld [vmem:[#allocation8 + $0x1148] sm:$0xff] }
 0x255   :  { %2924 = vmatprep.subr.bf16.mxu0 %v2923_v62  ;;  %v857_v62 = vld [vmem:[#allocation8 + $0xe20] sm:$0xff]  ;;  %v2835_v47 = vpack.c.bf16 %v938_v41, %v928_v40  ;;  %v930_v56 = vld [vmem:[#allocation8 + $0x1068] sm:$0xff]  ;;  %v999_v40 = vld [vmem:[#allocation8 + $0x1290] sm:$0xff] }
 0x256   :  { %v1028_v41 = vld [vmem:[#allocation8 + $0x1378] sm:$0xff] }
 0x257   :  { %1394 = vmatmul.mubr.f32.vlgmr.msra.gmra.mrb[10].mxu0 %v3533_v44  ;;  %2802 = vmatpush1.bf16.msra.mxu1 %v2801_v6  ;;  %v860_v6 = vld [vmem:[#allocation8 + $0xe38] sm:$0xff] }
 0x258   :  { %2926 = vmatpush1.bf16.msra.mxu0 %v2925_v7  ;;  %1464 = vmatprep.mubr.f32.mxu0 %v3540_v57  ;;  %v2821_v7 = vpack.c.bf16 %v857_v62, %v847_v61  ;;  %v2947_v13 = vpack.c.bf16 %v860_v6, %v850_v5  ;;  %v2839_v61 = vpack.c.bf16 %v958_v55, %v948_v54  ;;  %v947_v62 = vld [vmem:[#allocation8 + $0x10f0] sm:$0xff]  ;;  %v978_v5 = vld [vmem:[#allocation8 + $0x11e8] sm:$0xff]  ;;  %v412_v55 = vld [vmem:[#allocation8 + $0x38] sm:$0xff] }
 0x259   :  { %2804 = vmatprep.subr.bf16.mxu1 %v2803_v11  ;;  %2928 = vmatprep.subr.bf16.mxu0 %v2927_v12  ;;  %v877_v11 = vld [vmem:[#allocation8 + $0xec0] sm:$0xff]  ;;  %v950_v6 = vld [vmem:[#allocation8 + $0x1108] sm:$0xff]  ;;  %v1019_v54 = vld [vmem:[#allocation8 + $0x1330] sm:$0xff] }
 0x25a   :  { %v849_v12 = vld [vmem:[#allocation8 + $0xde0] sm:$0xff] }
 0x25b   :  { %2806 = vmatpush1.bf16.msra.mxu1 %v2805_v18  ;;  %v880_v18 = vld [vmem:[#allocation8 + $0xed8] sm:$0xff] }
 0x25c   :  { %2930 = vmatpush1.bf16.msra.mxu0 %v2929_v19  ;;  %2808 = vmatprep.subr.bf16.mxu1 %v2807_v20  ;;  %v2825_v19 = vpack.c.bf16 %v877_v11, %v867_v10  ;;  %v2949_v20 = vpack.c.bf16 %v859_v14, %v849_v12  ;;  %v2951_v25 = vpack.c.bf16 %v880_v18, %v870_v17  ;;  %v967_v11 = vld [vmem:[#allocation8 + $0x1190] sm:$0xff]  ;;  %v977_v12 = vld [vmem:[#allocation8 + $0x11e0] sm:$0xff]  ;;  %v998_v17 = vld [vmem:[#allocation8 + $0x1288] sm:$0xff] }
 0x25d   :  { %2932 = vmatprep.subr.bf16.mxu0 %v2931_v24  ;;  %v869_v24 = vld [vmem:[#allocation8 + $0xe80] sm:$0xff]  ;;  %v2843_v10 = vpack.c.bf16 %v978_v5, %v968_v4  ;;  %v970_v18 = vld [vmem:[#allocation8 + $0x11a8] sm:$0xff]  ;;  %v1039_v4 = vld [vmem:[#allocation8 + $0x13d0] sm:$0xff] }
 0x25e   :  { %v432_v5 = vld [vmem:[#allocation8 + $0xd8] sm:$0xff] }
 0x25f   :  { %2810 = vmatpush1.bf16.msra.mxu1 %v2809_v30  ;;  %v900_v30 = vld [vmem:[#allocation8 + $0xf78] sm:$0xff] }
 0x260   :  { %2934 = vmatpush1.bf16.msra.mxu0 %v2933_v31  ;;  %2812 = vmatprep.subr.bf16.mxu1 %v2811_v32  ;;  %v2829_v31 = vpack.c.bf16 %v897_v23, %v887_v22  ;;  %v2953_v32 = vpack.c.bf16 %v879_v26, %v869_v24  ;;  %v2955_v37 = vpack.c.bf16 %v900_v30, %v890_v29  ;;  %v987_v23 = vld [vmem:[#allocation8 + $0x1230] sm:$0xff]  ;;  %v997_v24 = vld [vmem:[#allocation8 + $0x1280] sm:$0xff]  ;;  %v1018_v29 = vld [vmem:[#allocation8 + $0x1328] sm:$0xff] }
 0x261   :  { %2936 = vmatprep.subr.bf16.mxu0 %v2935_v36  ;;  %v889_v36 = vld [vmem:[#allocation8 + $0xf20] sm:$0xff]  ;;  %v2847_v22 = vpack.c.bf16 %v998_v17, %v988_v16  ;;  %v990_v30 = vld [vmem:[#allocation8 + $0x1248] sm:$0xff]  ;;  %v423_v16 = vld [vmem:[#allocation8 + $0x90] sm:$0xff] }
 0x262   :  { %v452_v17 = vld [vmem:[#allocation8 + $0x178] sm:$0xff] }
 0x263   :  { %2814 = vmatpush1.bf16.msra.mxu1 %v2813_v43  ;;  %v920_v43 = vld [vmem:[#allocation8 + $0x1018] sm:$0xff] }
 0x264   :  { %2938 = vmatpush1.bf16.msra.mxu0 %v2937_v45  ;;  %2816 = vmatprep.subr.bf16.mxu1 %v2815_v46  ;;  %v2833_v45 = vpack.c.bf16 %v917_v35, %v907_v34  ;;  %v2957_v46 = vpack.c.bf16 %v899_v39, %v889_v36  ;;  %v2959_v51 = vpack.c.bf16 %v920_v43, %v910_v42  ;;  %v1007_v35 = vld [vmem:[#allocation8 + $0x12d0] sm:$0xff]  ;;  %v1017_v36 = vld [vmem:[#allocation8 + $0x1320] sm:$0xff]  ;;  %v1038_v42 = vld [vmem:[#allocation8 + $0x13c8] sm:$0xff] }
 0x265   :  { %2940 = vmatprep.subr.bf16.mxu0 %v2939_v50  ;;  %v909_v50 = vld [vmem:[#allocation8 + $0xfc0] sm:$0xff]  ;;  %v2851_v34 = vpack.c.bf16 %v1018_v29, %v1008_v28  ;;  %v1010_v43 = vld [vmem:[#allocation8 + $0x12e8] sm:$0xff]  ;;  %v443_v28 = vld [vmem:[#allocation8 + $0x130] sm:$0xff] }
 0x266   :  { %v472_v29 = vld [vmem:[#allocation8 + $0x218] sm:$0xff] }
 0x267   :  { %2818 = vmatpush1.bf16.msra.mxu1 %v2817_v58  ;;  %v940_v58 = vld [vmem:[#allocation8 + $0x10b8] sm:$0xff] }
 0x268   :  { %2942 = vmatpush1.bf16.msra.mxu0 %v2941_v59  ;;  %2820 = vmatprep.subr.bf16.mxu1 %v2819_v60  ;;  %v2837_v59 = vpack.c.bf16 %v937_v49, %v927_v48  ;;  %v2961_v60 = vpack.c.bf16 %v919_v53, %v909_v50  ;;  %v2963_v2 = vpack.c.bf16 %v940_v58, %v930_v56  ;;  %v1027_v49 = vld [vmem:[#allocation8 + $0x1370] sm:$0xff]  ;;  %v1037_v50 = vld [vmem:[#allocation8 + $0x13c0] sm:$0xff]  ;;  %v422_v56 = vld [vmem:[#allocation8 + $0x88] sm:$0xff] }
 0x269   :  { %2944 = vmatprep.subr.bf16.mxu0 %v2943_v1  ;;  %v929_v1 = vld [vmem:[#allocation8 + $0x1060] sm:$0xff]  ;;  %v2855_v48 = vpack.c.bf16 %v1038_v42, %v1028_v41  ;;  %v1030_v58 = vld [vmem:[#allocation8 + $0x1388] sm:$0xff]  ;;  %v463_v41 = vld [vmem:[#allocation8 + $0x1d0] sm:$0xff] }
 0x26a   :  { %v492_v42 = vld [vmem:[#allocation8 + $0x2b8] sm:$0xff] }
 0x26b   :  { %2822 = vmatpush1.bf16.msra.mxu1 %v2821_v7  ;;  %v960_v7 = vld [vmem:[#allocation8 + $0x1158] sm:$0xff] }
 0x26c   :  { %2946 = vmatpush1.bf16.msra.mxu0 %v2945_v8  ;;  %2824 = vmatprep.subr.bf16.mxu1 %v2823_v9  ;;  %v2841_v8 = vpack.c.bf16 %v957_v63, %v947_v62  ;;  %v2965_v9 = vpack.c.bf16 %v939_v3, %v929_v1  ;;  %v2967_v14 = vpack.c.bf16 %v960_v7, %v950_v6  ;;  %v1029_v63 = vld [vmem:[#allocation8 + $0x1380] sm:$0xff]  ;;  %v411_v1 = vld [vmem:[#allocation8 + $0x30] sm:$0xff]  ;;  %v442_v6 = vld [vmem:[#allocation8 + $0x128] sm:$0xff] }
 0x26d   :  { %2948 = vmatprep.subr.bf16.mxu0 %v2947_v13  ;;  %v949_v13 = vld [vmem:[#allocation8 + $0x1100] sm:$0xff]  ;;  %v2987_v62 = vpack.c.bf16 %v422_v56, %v412_v55  ;;  %v414_v7 = vld [vmem:[#allocation8 + $0x48] sm:$0xff]  ;;  %v512_v55 = vld [vmem:[#allocation8 + $0x358] sm:$0xff] }
 0x26e   :  { %v522_v56 = vld [vmem:[#allocation8 + $0x3a8] sm:$0xff] }
 0x26f   :  { %2826 = vmatpush1.bf16.msra.mxu1 %v2825_v19  ;;  %v980_v19 = vld [vmem:[#allocation8 + $0x11f8] sm:$0xff] }
 0x270   :  { %2950 = vmatpush1.bf16.msra.mxu0 %v2949_v20  ;;  %2828 = vmatprep.subr.bf16.mxu1 %v2827_v21  ;;  %v2845_v20 = vpack.c.bf16 %v977_v12, %v967_v11  ;;  %v2969_v21 = vpack.c.bf16 %v959_v15, %v949_v13  ;;  %v2971_v26 = vpack.c.bf16 %v980_v19, %v970_v18  ;;  %v431_v12 = vld [vmem:[#allocation8 + $0xd0] sm:$0xff]  ;;  %v441_v13 = vld [vmem:[#allocation8 + $0x120] sm:$0xff]  ;;  %v462_v18 = vld [vmem:[#allocation8 + $0x1c8] sm:$0xff] }
 0x271   :  { %2952 = vmatprep.subr.bf16.mxu0 %v2951_v25  ;;  %v969_v25 = vld [vmem:[#allocation8 + $0x11a0] sm:$0xff]  ;;  %v2991_v11 = vpack.c.bf16 %v442_v6, %v432_v5  ;;  %v434_v19 = vld [vmem:[#allocation8 + $0xe8] sm:$0xff]  ;;  %v532_v5 = vld [vmem:[#allocation8 + $0x3f8] sm:$0xff] }
 0x272   :  { %v413_v15 = vld [vmem:[#allocation8 + $0x40] sm:$0xff]  ;;  %v542_v6 = vld [vmem:[#allocation8 + $0x448] sm:$0xff] }
 0x273   :  { %2830 = vmatpush1.bf16.msra.mxu1 %v2829_v31  ;;  %v1000_v31 = vld [vmem:[#allocation8 + $0x1298] sm:$0xff] }
 0x274   :  { %2954 = vmatpush1.bf16.msra.mxu0 %v2953_v32  ;;  %2832 = vmatprep.subr.bf16.mxu1 %v2831_v33  ;;  %v2849_v32 = vpack.c.bf16 %v997_v24, %v987_v23  ;;  %v2973_v33 = vpack.c.bf16 %v979_v27, %v969_v25  ;;  %v2975_v39 = vpack.c.bf16 %v1000_v31, %v990_v30  ;;  %v451_v23 = vld [vmem:[#allocation8 + $0x170] sm:$0xff]  ;;  %v461_v24 = vld [vmem:[#allocation8 + $0x1c0] sm:$0xff]  ;;  %v482_v30 = vld [vmem:[#allocation8 + $0x268] sm:$0xff] }
 0x275   :  { %2956 = vmatprep.subr.bf16.mxu0 %v2955_v37  ;;  %v989_v37 = vld [vmem:[#allocation8 + $0x1240] sm:$0xff]  ;;  %v454_v31 = vld [vmem:[#allocation8 + $0x188] sm:$0xff] }
 0x276   :  { %v433_v25 = vld [vmem:[#allocation8 + $0xe0] sm:$0xff] }
 0x277   :  { %2834 = vmatpush1.bf16.msra.mxu1 %v2833_v45  ;;  %v1020_v45 = vld [vmem:[#allocation8 + $0x1338] sm:$0xff] }
 0x278   :  { %2958 = vmatpush1.bf16.msra.mxu0 %v2957_v46  ;;  %2836 = vmatprep.subr.bf16.mxu1 %v2835_v47  ;;  %v2853_v46 = vpack.c.bf16 %v1017_v36, %v1007_v35  ;;  %v2977_v47 = vpack.c.bf16 %v999_v40, %v989_v37  ;;  %v2979_v53 = vpack.c.bf16 %v1020_v45, %v1010_v43  ;;  %v471_v36 = vld [vmem:[#allocation8 + $0x210] sm:$0xff]  ;;  %v481_v37 = vld [vmem:[#allocation8 + $0x260] sm:$0xff]  ;;  %v502_v43 = vld [vmem:[#allocation8 + $0x308] sm:$0xff] }
 0x279   :  { %2960 = vmatprep.subr.bf16.mxu0 %v2959_v51  ;;  %v1009_v51 = vld [vmem:[#allocation8 + $0x12e0] sm:$0xff]  ;;  %v2999_v35 = vpack.c.bf16 %v482_v30, %v472_v29  ;;  %v474_v45 = vld [vmem:[#allocation8 + $0x228] sm:$0xff]  ;;  %v572_v29 = vld [vmem:[#allocation8 + $0x538] sm:$0xff] }
 0x27a   :  { %v582_v30 = vld [vmem:[#allocation8 + $0x588] sm:$0xff] }
 0x27b   :  { %2838 = vmatpush1.bf16.msra.mxu1 %v2837_v59  ;;  %v1040_v59 = vld [vmem:[#allocation8 + $0x13d8] sm:$0xff] }
 0x27c   :  { %2962 = vmatpush1.bf16.msra.mxu0 %v2961_v60  ;;  %2840 = vmatprep.subr.bf16.mxu1 %v2839_v61  ;;  %v2857_v60 = vpack.c.bf16 %v1037_v50, %v1027_v49  ;;  %v2981_v61 = vpack.c.bf16 %v1019_v54, %v1009_v51  ;;  %v2983_v3 = vpack.c.bf16 %v1040_v59, %v1030_v58  ;;  %v501_v50 = vld [vmem:[#allocation8 + $0x300] sm:$0xff]  ;;  %v483_v54 = vld [vmem:[#allocation8 + $0x270] sm:$0xff]  ;;  %v494_v58 = vld [vmem:[#allocation8 + $0x2c8] sm:$0xff] }
 0x27d   :  { %2964 = vmatprep.subr.bf16.mxu0 %v2963_v2  ;;  %v421_v2 = vld [vmem:[#allocation8 + $0x80] sm:$0xff]  ;;  %v3003_v49 = vpack.c.bf16 %v502_v43, %v492_v42  ;;  %v504_v59 = vld [vmem:[#allocation8 + $0x318] sm:$0xff]  ;;  %v602_v43 = vld [vmem:[#allocation8 + $0x628] sm:$0xff] }
 0x27e   :  { %v473_v51 = vld [vmem:[#allocation8 + $0x220] sm:$0xff]  ;;  %v592_v42 = vld [vmem:[#allocation8 + $0x5d8] sm:$0xff] }
 0x27f   :  { %2842 = vmatpush1.bf16.msra.mxu1 %v2841_v8  ;;  %v424_v8 = vld [vmem:[#allocation8 + $0x98] sm:$0xff] }
 0x280   :  { %2966 = vmatpush1.bf16.msra.mxu0 %v2965_v9  ;;  %2844 = vmatprep.subr.bf16.mxu1 %v2843_v10  ;;  %v2989_v9 = vpack.c.bf16 %v421_v2, %v411_v1  ;;  %v2985_v10 = vpack.c.bf16 %v1039_v4, %v1029_v63  ;;  %v511_v63 = vld [vmem:[#allocation8 + $0x350] sm:$0xff]  ;;  %v521_v1 = vld [vmem:[#allocation8 + $0x3a0] sm:$0xff] }
 0x281   :  { %2968 = vmatprep.subr.bf16.mxu0 %v2967_v14  ;;  %v3115_v14 = vpack.c.bf16 %v424_v8, %v414_v7  ;;  %v493_v2 = vld [vmem:[#allocation8 + $0x2c0] sm:$0xff]  ;;  %v503_v4 = vld [vmem:[#allocation8 + $0x310] sm:$0xff]  ;;  %v514_v7 = vld [vmem:[#allocation8 + $0x368] sm:$0xff] }
 0x282   :  { %v524_v8 = vld [vmem:[#allocation8 + $0x3b8] sm:$0xff] }
 0x283   :  { %2846 = vmatpush1.bf16.msra.mxu1 %v2845_v20  ;;  %v444_v20 = vld [vmem:[#allocation8 + $0x138] sm:$0xff] }
 0x284   :  { %2970 = vmatpush1.bf16.msra.mxu0 %v2969_v21  ;;  %2848 = vmatprep.subr.bf16.mxu1 %v2847_v22  ;;  %v2993_v21 = vpack.c.bf16 %v441_v13, %v431_v12  ;;  %v3117_v22 = vpack.c.bf16 %v423_v16, %v413_v15  ;;  %v3119_v27 = vpack.c.bf16 %v444_v20, %v434_v19  ;;  %v531_v12 = vld [vmem:[#allocation8 + $0x3f0] sm:$0xff]  ;;  %v541_v13 = vld [vmem:[#allocation8 + $0x440] sm:$0xff]  ;;  %v534_v19 = vld [vmem:[#allocation8 + $0x408] sm:$0xff] }
 0x285   :  { %2972 = vmatprep.subr.bf16.mxu0 %v2971_v26  ;;  %v2995_v26 = vpack.c.bf16 %v462_v18, %v452_v17  ;;  %v3135_v15 = vpack.c.bf16 %v524_v8, %v514_v7  ;;  %v523_v16 = vld [vmem:[#allocation8 + $0x3b0] sm:$0xff]  ;;  %v552_v17 = vld [vmem:[#allocation8 + $0x498] sm:$0xff]  ;;  %v562_v18 = vld [vmem:[#allocation8 + $0x4e8] sm:$0xff] }
 0x286   :  { %v544_v20 = vld [vmem:[#allocation8 + $0x458] sm:$0xff]  ;;  %v614_v7 = vld [vmem:[#allocation8 + $0x688] sm:$0xff] }
 0x287   :  { %2850 = vmatpush1.bf16.msra.mxu1 %v2849_v32  ;;  %v464_v32 = vld [vmem:[#allocation8 + $0x1d8] sm:$0xff] }
 0x288   :  { %2974 = vmatpush1.bf16.msra.mxu0 %v2973_v33  ;;  %2852 = vmatprep.subr.bf16.mxu1 %v2851_v34  ;;  %v2997_v33 = vpack.c.bf16 %v461_v24, %v451_v23  ;;  %v3121_v34 = vpack.c.bf16 %v443_v28, %v433_v25  ;;  %v3123_v40 = vpack.c.bf16 %v464_v32, %v454_v31  ;;  %v551_v24 = vld [vmem:[#allocation8 + $0x490] sm:$0xff]  ;;  %v561_v25 = vld [vmem:[#allocation8 + $0x4e0] sm:$0xff]  ;;  %v554_v31 = vld [vmem:[#allocation8 + $0x4a8] sm:$0xff] }
 0x289   :  { %2976 = vmatprep.subr.bf16.mxu0 %v2975_v39  ;;  %v453_v39 = vld [vmem:[#allocation8 + $0x180] sm:$0xff]  ;;  %v3015_v23 = vpack.c.bf16 %v562_v18, %v552_v17  ;;  %v543_v28 = vld [vmem:[#allocation8 + $0x450] sm:$0xff]  ;;  %v564_v32 = vld [vmem:[#allocation8 + $0x4f8] sm:$0xff] }
 0x28a   :  { %v624_v8 = vld [vmem:[#allocation8 + $0x6d8] sm:$0xff]  ;;  %v662_v18 = vld [vmem:[#allocation8 + $0x808] sm:$0xff] }
 0x28b   :  { %2854 = vmatpush1.bf16.msra.mxu1 %v2853_v46  ;;  %v484_v46 = vld [vmem:[#allocation8 + $0x278] sm:$0xff] }
 0x28c   :  { %2978 = vmatpush1.bf16.msra.mxu0 %v2977_v47  ;;  %2856 = vmatprep.subr.bf16.mxu1 %v2855_v48  ;;  %v3001_v47 = vpack.c.bf16 %v481_v37, %v471_v36  ;;  %v3125_v48 = vpack.c.bf16 %v463_v41, %v453_v39  ;;  %v571_v36 = vld [vmem:[#allocation8 + $0x530] sm:$0xff]  ;;  %v581_v37 = vld [vmem:[#allocation8 + $0x580] sm:$0xff]  ;;  %v652_v17 = vld [vmem:[#allocation8 + $0x7b8] sm:$0xff] }
 0x28d   :  { %2980 = vmatprep.subr.bf16.mxu0 %v2979_v53  ;;  %v3127_v53 = vpack.c.bf16 %v484_v46, %v474_v45  ;;  %v553_v39 = vld [vmem:[#allocation8 + $0x4a0] sm:$0xff]  ;;  %v563_v41 = vld [vmem:[#allocation8 + $0x4f0] sm:$0xff]  ;;  %v574_v45 = vld [vmem:[#allocation8 + $0x548] sm:$0xff] }
 0x28e   :  { %v584_v46 = vld [vmem:[#allocation8 + $0x598] sm:$0xff] }
 0x28f   :  { %2858 = vmatpush1.bf16.msra.mxu1 %v2857_v60 }
 0x290   :  { %2982 = vmatpush1.bf16.msra.mxu0 %v2981_v61  ;;  %2988 = vmatprep.subr.bf16.mxu1 %v2987_v62  ;;  %v3129_v61 = vpack.c.bf16 %v483_v54, %v473_v51  ;;  %v3007_v62 = vpack.c.bf16 %v522_v56, %v512_v55  ;;  %v573_v51 = vld [vmem:[#allocation8 + $0x540] sm:$0xff]  ;;  %v583_v54 = vld [vmem:[#allocation8 + $0x590] sm:$0xff]  ;;  %v612_v55 = vld [vmem:[#allocation8 + $0x678] sm:$0xff] }
 0x291   :  { %2984 = vmatprep.subr.bf16.mxu0 %v2983_v3  ;;  %v3131_v3 = vpack.c.bf16 %v504_v59, %v494_v58  ;;  %v622_v56 = vld [vmem:[#allocation8 + $0x6c8] sm:$0xff]  ;;  %v604_v59 = vld [vmem:[#allocation8 + $0x638] sm:$0xff] }
 0x292   :  { %1323 = vmatmul.mubr.f32.vlgmr.msra.gmra.mrb[2].mxu1 %v3537_v52  ;;  %v594_v58 = vld [vmem:[#allocation8 + $0x5e8] sm:$0xff] }
 0x293   :  { %2990 = vmatpush1.bf16.msra.mxu1 %v2989_v9  ;;  %1535 = vmatprep.mubr.f32.mxu1 %v3531_v38  ;;  %v3009_v9 = vpack.c.bf16 %v521_v1, %v511_v63  ;;  %v611_v63 = vld [vmem:[#allocation8 + $0x670] sm:$0xff]  ;;  %v621_v1 = vld [vmem:[#allocation8 + $0x6c0] sm:$0xff] }
 0x294   :  { %2986 = vmatpush1.bf16.msra.mxu0 %v2985_v10  ;;  %2992 = vmatprep.subr.bf16.mxu1 %v2991_v11  ;;  %v3133_v10 = vpack.c.bf16 %v503_v4, %v493_v2  ;;  %v3011_v11 = vpack.c.bf16 %v542_v6, %v532_v5  ;;  %v593_v2 = vld [vmem:[#allocation8 + $0x5e0] sm:$0xff]  ;;  %v603_v4 = vld [vmem:[#allocation8 + $0x630] sm:$0xff]  ;;  %v632_v5 = vld [vmem:[#allocation8 + $0x718] sm:$0xff] }
 0x295   :  { %3116 = vmatprep.subr.bf16.mxu0 %v3115_v14  ;;  %v513_v14 = vld [vmem:[#allocation8 + $0x360] sm:$0xff]  ;;  %v642_v6 = vld [vmem:[#allocation8 + $0x768] sm:$0xff] }
 0x297   :  { %1465 = vmatmul.mubr.f32.vlgmr.msra.gmra.mrb[10].mxu0 %v3537_v52  ;;  %2994 = vmatpush1.bf16.msra.mxu1 %v2993_v21  ;;  %v3013_v21 = vpack.c.bf16 %v541_v13, %v531_v12  ;;  %v631_v12 = vld [vmem:[#allocation8 + $0x710] sm:$0xff]  ;;  %v641_v13 = vld [vmem:[#allocation8 + $0x760] sm:$0xff] }
 0x298   :  { %3118 = vmatpush1.bf16.msra.mxu0 %v3117_v22  ;;  %1677 = vmatprep.mubr.f32.mxu0 %v3531_v38  ;;  %v491_v38 = vld [vmem:[#allocation8 + $0x2b0] sm:$0xff]  ;;  %v3137_v22 = vpack.c.bf16 %v523_v16, %v513_v14  ;;  %v613_v14 = vld [vmem:[#allocation8 + $0x680] sm:$0xff] }
 0x299   :  { %2996 = vmatprep.subr.bf16.mxu1 %v2995_v26  ;;  %3120 = vmatprep.subr.bf16.mxu0 %v3119_v27  ;;  %v3005_v60 = vpack.c.bf16 %v501_v50, %v491_v38  ;;  %v533_v26 = vld [vmem:[#allocation8 + $0x400] sm:$0xff]  ;;  %v3139_v27 = vpack.c.bf16 %v544_v20, %v534_v19  ;;  %v591_v38 = vld [vmem:[#allocation8 + $0x5d0] sm:$0xff]  ;;  %v634_v19 = vld [vmem:[#allocation8 + $0x728] sm:$0xff] }
 0x29a   :  { %v601_v50 = vld [vmem:[#allocation8 + $0x620] sm:$0xff]  ;;  %v623_v16 = vld [vmem:[#allocation8 + $0x6d0] sm:$0xff]  ;;  %v644_v20 = vld [vmem:[#allocation8 + $0x778] sm:$0xff] }
 0x29b   :  { %2998 = vmatpush1.bf16.msra.mxu1 %v2997_v33  ;;  %v3017_v33 = vpack.c.bf16 %v561_v25, %v551_v24  ;;  %v651_v24 = vld [vmem:[#allocation8 + $0x7b0] sm:$0xff]  ;;  %v661_v25 = vld [vmem:[#allocation8 + $0x800] sm:$0xff] }
 0x29c   :  { %3122 = vmatpush1.bf16.msra.mxu0 %v3121_v34  ;;  %3000 = vmatprep.subr.bf16.mxu1 %v2999_v35  ;;  %v3141_v34 = vpack.c.bf16 %v543_v28, %v533_v26  ;;  %v3019_v35 = vpack.c.bf16 %v582_v30, %v572_v29  ;;  %v633_v26 = vld [vmem:[#allocation8 + $0x720] sm:$0xff]  ;;  %v643_v28 = vld [vmem:[#allocation8 + $0x770] sm:$0xff]  ;;  %v672_v29 = vld [vmem:[#allocation8 + $0x858] sm:$0xff] }
 0x29d   :  { %3124 = vmatprep.subr.bf16.mxu0 %v3123_v40  ;;  %v3143_v40 = vpack.c.bf16 %v564_v32, %v554_v31  ;;  %v682_v30 = vld [vmem:[#allocation8 + $0x8a8] sm:$0xff]  ;;  %v664_v32 = vld [vmem:[#allocation8 + $0x818] sm:$0xff] }
 0x29e   :  { %v654_v31 = vld [vmem:[#allocation8 + $0x7c8] sm:$0xff] }
 0x29f   :  { %3002 = vmatpush1.bf16.msra.mxu1 %v3001_v47  ;;  %v3021_v47 = vpack.c.bf16 %v581_v37, %v571_v36  ;;  %v671_v36 = vld [vmem:[#allocation8 + $0x850] sm:$0xff]  ;;  %v681_v37 = vld [vmem:[#allocation8 + $0x8a0] sm:$0xff] }
 0x2a0   :  { %3126 = vmatpush1.bf16.msra.mxu0 %v3125_v48  ;;  %3004 = vmatprep.subr.bf16.mxu1 %v3003_v49  ;;  %v3145_v48 = vpack.c.bf16 %v563_v41, %v553_v39  ;;  %v3023_v49 = vpack.c.bf16 %v602_v43, %v592_v42  ;;  %v653_v39 = vld [vmem:[#allocation8 + $0x7c0] sm:$0xff]  ;;  %v663_v41 = vld [vmem:[#allocation8 + $0x810] sm:$0xff]  ;;  %v692_v42 = vld [vmem:[#allocation8 + $0x8f8] sm:$0xff] }
 0x2a1   :  { %3128 = vmatprep.subr.bf16.mxu0 %v3127_v53  ;;  %v3147_v53 = vpack.c.bf16 %v584_v46, %v574_v45  ;;  %v702_v43 = vld [vmem:[#allocation8 + $0x948] sm:$0xff]  ;;  %v684_v46 = vld [vmem:[#allocation8 + $0x8b8] sm:$0xff] }
 0x2a2   :  { %v674_v45 = vld [vmem:[#allocation8 + $0x868] sm:$0xff] }
 0x2a3   :  { %3006 = vmatpush1.bf16.msra.mxu1 %v3005_v60  ;;  %v3025_v60 = vpack.c.bf16 %v601_v50, %v591_v38  ;;  %v691_v38 = vld [vmem:[#allocation8 + $0x8f0] sm:$0xff]  ;;  %v701_v50 = vld [vmem:[#allocation8 + $0x940] sm:$0xff] }
 0x2a4   :  { %3130 = vmatpush1.bf16.msra.mxu0 %v3129_v61  ;;  %3008 = vmatprep.subr.bf16.mxu1 %v3007_v62  ;;  %v3149_v61 = vpack.c.bf16 %v583_v54, %v573_v51  ;;  %v3027_v62 = vpack.c.bf16 %v622_v56, %v612_v55  ;;  %v673_v51 = vld [vmem:[#allocation8 + $0x860] sm:$0xff]  ;;  %v683_v54 = vld [vmem:[#allocation8 + $0x8b0] sm:$0xff]  ;;  %v712_v55 = vld [vmem:[#allocation8 + $0x998] sm:$0xff] }
 0x2a5   :  { %3132 = vmatprep.subr.bf16.mxu0 %v3131_v3  ;;  %v3151_v3 = vpack.c.bf16 %v604_v59, %v594_v58  ;;  %v722_v56 = vld [vmem:[#allocation8 + $0x9e8] sm:$0xff]  ;;  %v704_v59 = vld [vmem:[#allocation8 + $0x958] sm:$0xff] }
 0x2a6   :  { %v694_v58 = vld [vmem:[#allocation8 + $0x908] sm:$0xff] }
 0x2a7   :  { %3010 = vmatpush1.bf16.msra.mxu1 %v3009_v9  ;;  %v3029_v9 = vpack.c.bf16 %v621_v1, %v611_v63  ;;  %v711_v63 = vld [vmem:[#allocation8 + $0x990] sm:$0xff]  ;;  %v721_v1 = vld [vmem:[#allocation8 + $0x9e0] sm:$0xff] }
 0x2a8   :  { %3134 = vmatpush1.bf16.msra.mxu0 %v3133_v10  ;;  %3012 = vmatprep.subr.bf16.mxu1 %v3011_v11  ;;  %v3153_v10 = vpack.c.bf16 %v603_v4, %v593_v2  ;;  %v3031_v11 = vpack.c.bf16 %v642_v6, %v632_v5  ;;  %v693_v2 = vld [vmem:[#allocation8 + $0x900] sm:$0xff]  ;;  %v703_v4 = vld [vmem:[#allocation8 + $0x950] sm:$0xff]  ;;  %v732_v5 = vld [vmem:[#allocation8 + $0xa38] sm:$0xff] }
 0x2a9   :  { %3136 = vmatprep.subr.bf16.mxu0 %v3135_v15  ;;  %v3155_v15 = vpack.c.bf16 %v624_v8, %v614_v7  ;;  %v742_v6 = vld [vmem:[#allocation8 + $0xa88] sm:$0xff]  ;;  %v724_v8 = vld [vmem:[#allocation8 + $0x9f8] sm:$0xff] }
 0x2aa   :  { %v714_v7 = vld [vmem:[#allocation8 + $0x9a8] sm:$0xff] }
 0x2ab   :  { %3014 = vmatpush1.bf16.msra.mxu1 %v3013_v21  ;;  %v3033_v21 = vpack.c.bf16 %v641_v13, %v631_v12  ;;  %v731_v12 = vld [vmem:[#allocation8 + $0xa30] sm:$0xff]  ;;  %v741_v13 = vld [vmem:[#allocation8 + $0xa80] sm:$0xff] }
 0x2ac   :  { %3138 = vmatpush1.bf16.msra.mxu0 %v3137_v22  ;;  %3016 = vmatprep.subr.bf16.mxu1 %v3015_v23  ;;  %v3157_v22 = vpack.c.bf16 %v623_v16, %v613_v14  ;;  %v3035_v23 = vpack.c.bf16 %v662_v18, %v652_v17  ;;  %v713_v14 = vld [vmem:[#allocation8 + $0x9a0] sm:$0xff]  ;;  %v723_v16 = vld [vmem:[#allocation8 + $0x9f0] sm:$0xff]  ;;  %v752_v17 = vld [vmem:[#allocation8 + $0xad8] sm:$0xff] }
 0x2ad   :  { %3140 = vmatprep.subr.bf16.mxu0 %v3139_v27  ;;  %v3159_v27 = vpack.c.bf16 %v644_v20, %v634_v19  ;;  %v762_v18 = vld [vmem:[#allocation8 + $0xb28] sm:$0xff]  ;;  %v744_v20 = vld [vmem:[#allocation8 + $0xa98] sm:$0xff] }
 0x2ae   :  { %v734_v19 = vld [vmem:[#allocation8 + $0xa48] sm:$0xff] }
 0x2af   :  { %3018 = vmatpush1.bf16.msra.mxu1 %v3017_v33  ;;  %v3037_v33 = vpack.c.bf16 %v661_v25, %v651_v24  ;;  %v751_v24 = vld [vmem:[#allocation8 + $0xad0] sm:$0xff]  ;;  %v761_v25 = vld [vmem:[#allocation8 + $0xb20] sm:$0xff] }
 0x2b0   :  { %3142 = vmatpush1.bf16.msra.mxu0 %v3141_v34  ;;  %3020 = vmatprep.subr.bf16.mxu1 %v3019_v35  ;;  %v3161_v34 = vpack.c.bf16 %v643_v28, %v633_v26  ;;  %v3039_v35 = vpack.c.bf16 %v682_v30, %v672_v29  ;;  %v3179_v26 = vpack.c.bf16 %v744_v20, %v734_v19  ;;  %v743_v28 = vld [vmem:[#allocation8 + $0xa90] sm:$0xff]  ;;  %v772_v29 = vld [vmem:[#allocation8 + $0xb78] sm:$0xff]  ;;  %v782_v30 = vld [vmem:[#allocation8 + $0xbc8] sm:$0xff] }
 0x2b1   :  { %3144 = vmatprep.subr.bf16.mxu0 %v3143_v40  ;;  %v3163_v40 = vpack.c.bf16 %v664_v32, %v654_v31  ;;  %v754_v31 = vld [vmem:[#allocation8 + $0xae8] sm:$0xff]  ;;  %v764_v32 = vld [vmem:[#allocation8 + $0xb38] sm:$0xff] }
 0x2b3   :  { %3022 = vmatpush1.bf16.msra.mxu1 %v3021_v47  ;;  %v3041_v47 = vpack.c.bf16 %v681_v37, %v671_v36  ;;  %v781_v36 = vld [vmem:[#allocation8 + $0xbc0] sm:$0xff] }
 0x2b4   :  { %3146 = vmatpush1.bf16.msra.mxu0 %v3145_v48  ;;  %3024 = vmatprep.subr.bf16.mxu1 %v3023_v49  ;;  %v3165_v48 = vpack.c.bf16 %v663_v41, %v653_v39  ;;  %v3043_v49 = vpack.c.bf16 %v702_v43, %v692_v42  ;;  %v753_v37 = vld [vmem:[#allocation8 + $0xae0] sm:$0xff]  ;;  %v3059_v39 = vpack.c.bf16 %v782_v30, %v772_v29  ;;  %v763_v41 = vld [vmem:[#allocation8 + $0xb30] sm:$0xff]  ;;  %v792_v42 = vld [vmem:[#allocation8 + $0xc18] sm:$0xff] }
 0x2b5   :  { %3148 = vmatprep.subr.bf16.mxu0 %v3147_v53  ;;  %v3167_v53 = vpack.c.bf16 %v684_v46, %v674_v45  ;;  %v802_v43 = vld [vmem:[#allocation8 + $0xc68] sm:$0xff]  ;;  %v784_v46 = vld [vmem:[#allocation8 + $0xbd8] sm:$0xff] }
 0x2b6   :  { %v774_v45 = vld [vmem:[#allocation8 + $0xb88] sm:$0xff] }
 0x2b7   :  { %3026 = vmatpush1.bf16.msra.mxu1 %v3025_v60  ;;  %v3045_v60 = vpack.c.bf16 %v701_v50, %v691_v38  ;;  %v791_v38 = vld [vmem:[#allocation8 + $0xc10] sm:$0xff]  ;;  %v801_v50 = vld [vmem:[#allocation8 + $0xc60] sm:$0xff]  ;;  %v882_v29 = vld [vmem:[#allocation8 + $0xee8] sm:$0xff] }
 0x2b8   :  { %3150 = vmatpush1.bf16.msra.mxu0 %v3149_v61  ;;  %3028 = vmatprep.subr.bf16.mxu1 %v3027_v62  ;;  %v3169_v61 = vpack.c.bf16 %v683_v54, %v673_v51  ;;  %v3047_v62 = vpack.c.bf16 %v722_v56, %v712_v55  ;;  %v773_v51 = vld [vmem:[#allocation8 + $0xb80] sm:$0xff]  ;;  %v783_v54 = vld [vmem:[#allocation8 + $0xbd0] sm:$0xff]  ;;  %v812_v55 = vld [vmem:[#allocation8 + $0xcb8] sm:$0xff] }
 0x2b9   :  { %3152 = vmatprep.subr.bf16.mxu0 %v3151_v3  ;;  %v3171_v3 = vpack.c.bf16 %v704_v59, %v694_v58  ;;  %v822_v56 = vld [vmem:[#allocation8 + $0xd08] sm:$0xff]  ;;  %v804_v59 = vld [vmem:[#allocation8 + $0xc78] sm:$0xff] }
 0x2ba   :  { %v794_v58 = vld [vmem:[#allocation8 + $0xc28] sm:$0xff] }
 0x2bb   :  { %3030 = vmatpush1.bf16.msra.mxu1 %v3029_v9  ;;  %v3049_v9 = vpack.c.bf16 %v721_v1, %v711_v63  ;;  %v793_v63 = vld [vmem:[#allocation8 + $0xc20] sm:$0xff]  ;;  %v3191_v1 = vpack.c.bf16 %v804_v59, %v794_v58  ;;  %v883_v59 = vld [vmem:[#allocation8 + $0xef0] sm:$0xff] }
 0x2bc   :  { %3154 = vmatpush1.bf16.msra.mxu0 %v3153_v10  ;;  %3032 = vmatprep.subr.bf16.mxu1 %v3031_v11  ;;  %v3173_v10 = vpack.c.bf16 %v703_v4, %v693_v2  ;;  %v3051_v11 = vpack.c.bf16 %v742_v6, %v732_v5  ;;  %v803_v2 = vld [vmem:[#allocation8 + $0xc70] sm:$0xff]  ;;  %v842_v4 = vld [vmem:[#allocation8 + $0xda8] sm:$0xff]  ;;  %v824_v6 = vld [vmem:[#allocation8 + $0xd18] sm:$0xff] }
 0x2bd   :  { %3156 = vmatprep.subr.bf16.mxu0 %v3155_v15  ;;  %v3175_v15 = vpack.c.bf16 %v724_v8, %v714_v7  ;;  %v814_v5 = vld [vmem:[#allocation8 + $0xcc8] sm:$0xff]  ;;  %v3193_v8 = vpack.c.bf16 %v803_v2, %v793_v63  ;;  %v911_v2 = vld [vmem:[#allocation8 + $0xfd0] sm:$0xff] }
 0x2bf   :  { %3034 = vmatpush1.bf16.msra.mxu1 %v3033_v21  ;;  %v3053_v21 = vpack.c.bf16 %v741_v13, %v731_v12  ;;  %v813_v12 = vld [vmem:[#allocation8 + $0xcc0] sm:$0xff]  ;;  %v3195_v13 = vpack.c.bf16 %v824_v6, %v814_v5  ;;  %v903_v6 = vld [vmem:[#allocation8 + $0xf90] sm:$0xff] }
 0x2c0   :  { %3158 = vmatpush1.bf16.msra.mxu0 %v3157_v22  ;;  %3036 = vmatprep.subr.bf16.mxu1 %v3035_v23  ;;  %v3177_v22 = vpack.c.bf16 %v723_v16, %v713_v14  ;;  %v3055_v23 = vpack.c.bf16 %v762_v18, %v752_v17  ;;  %v823_v14 = vld [vmem:[#allocation8 + $0xd10] sm:$0xff]  ;;  %v862_v16 = vld [vmem:[#allocation8 + $0xe48] sm:$0xff]  ;;  %v844_v18 = vld [vmem:[#allocation8 + $0xdb8] sm:$0xff] }
 0x2c1   :  { %3160 = vmatprep.subr.bf16.mxu0 %v3159_v27  ;;  %v733_v27 = vld [vmem:[#allocation8 + $0xa40] sm:$0xff]  ;;  %v834_v17 = vld [vmem:[#allocation8 + $0xd68] sm:$0xff]  ;;  %v3197_v20 = vpack.c.bf16 %v823_v14, %v813_v12  ;;  %v931_v14 = vld [vmem:[#allocation8 + $0x1070] sm:$0xff] }
 0x2c3   :  { %3038 = vmatpush1.bf16.msra.mxu1 %v3037_v33  ;;  %v3057_v33 = vpack.c.bf16 %v761_v25, %v751_v24  ;;  %v833_v24 = vld [vmem:[#allocation8 + $0xd60] sm:$0xff] }
 0x2c4   :  { %3162 = vmatpush1.bf16.msra.mxu0 %v3161_v34  ;;  %3040 = vmatprep.subr.bf16.mxu1 %v3039_v35  ;;  %v3181_v34 = vpack.c.bf16 %v743_v28, %v733_v27  ;;  %v771_v35 = vld [vmem:[#allocation8 + $0xb70] sm:$0xff]  ;;  %v872_v28 = vld [vmem:[#allocation8 + $0xe98] sm:$0xff] }
 0x2c5   :  { %3164 = vmatprep.subr.bf16.mxu0 %v3163_v40  ;;  %v3183_v40 = vpack.c.bf16 %v764_v32, %v754_v31  ;;  %v843_v27 = vld [vmem:[#allocation8 + $0xdb0] sm:$0xff]  ;;  %v854_v31 = vld [vmem:[#allocation8 + $0xe08] sm:$0xff]  ;;  %v864_v32 = vld [vmem:[#allocation8 + $0xe58] sm:$0xff] }
 0x2c7   :  { %3042 = vmatpush1.bf16.msra.mxu1 %v3041_v47  ;;  %v3061_v47 = vpack.c.bf16 %v781_v36, %v771_v35  ;;  %v3079_v35 = vpack.c.bf16 %v882_v29, %v872_v28  ;;  %v871_v36 = vld [vmem:[#allocation8 + $0xe90] sm:$0xff]  ;;  %v933_v28 = vld [vmem:[#allocation8 + $0x1080] sm:$0xff] }
 0x2c8   :  { %3166 = vmatpush1.bf16.msra.mxu0 %v3165_v48  ;;  %3044 = vmatprep.subr.bf16.mxu1 %v3043_v49  ;;  %v3185_v48 = vpack.c.bf16 %v763_v41, %v753_v37  ;;  %v3063_v49 = vpack.c.bf16 %v802_v43, %v792_v42  ;;  %v881_v37 = vld [vmem:[#allocation8 + $0xee0] sm:$0xff]  ;;  %v3203_v41 = vpack.c.bf16 %v864_v32, %v854_v31  ;;  %v863_v42 = vld [vmem:[#allocation8 + $0xe50] sm:$0xff]  ;;  %v892_v43 = vld [vmem:[#allocation8 + $0xf38] sm:$0xff] }
 0x2c9   :  { %3168 = vmatprep.subr.bf16.mxu0 %v3167_v53  ;;  %v3187_v53 = vpack.c.bf16 %v784_v46, %v774_v45  ;;  %v902_v45 = vld [vmem:[#allocation8 + $0xf88] sm:$0xff]  ;;  %v972_v31 = vld [vmem:[#allocation8 + $0x11b8] sm:$0xff] }
 0x2ca   :  { %v982_v32 = vld [vmem:[#allocation8 + $0x1208] sm:$0xff] }
 0x2cb   :  { %3046 = vmatpush1.bf16.msra.mxu1 %v3045_v60  ;;  %v3189_v60 = vpack.c.bf16 %v783_v54, %v773_v51  ;;  %v891_v54 = vld [vmem:[#allocation8 + $0xf30] sm:$0xff] }
 0x2cc   :  { %3170 = vmatpush1.bf16.msra.mxu0 %v3169_v61  ;;  %3048 = vmatprep.subr.bf16.mxu1 %v3047_v62  ;;  %v3067_v61 = vpack.c.bf16 %v822_v56, %v812_v55  ;;  %v821_v62 = vld [vmem:[#allocation8 + $0xd00] sm:$0xff] }
 0x2cd   :  { %3172 = vmatprep.subr.bf16.mxu0 %v3171_v3  ;;  %v832_v3 = vld [vmem:[#allocation8 + $0xd58] sm:$0xff]  ;;  %v901_v55 = vld [vmem:[#allocation8 + $0xf80] sm:$0xff] }
 0x2ce   :  { %v873_v56 = vld [vmem:[#allocation8 + $0xea0] sm:$0xff] }
 0x2cf   :  { %3050 = vmatpush1.bf16.msra.mxu1 %v3049_v9  ;;  %v3071_v9 = vpack.c.bf16 %v842_v4, %v832_v3  ;;  %v3209_v63 = vpack.c.bf16 %v883_v59, %v873_v56  ;;  %v921_v3 = vld [vmem:[#allocation8 + $0x1020] sm:$0xff]  ;;  %v983_v59 = vld [vmem:[#allocation8 + $0x1210] sm:$0xff] }
 0x2d0   :  { %3174 = vmatpush1.bf16.msra.mxu0 %v3173_v10  ;;  %3052 = vmatprep.subr.bf16.mxu1 %v3051_v11  ;;  %v831_v10 = vld [vmem:[#allocation8 + $0xd50] sm:$0xff]  ;;  %v841_v11 = vld [vmem:[#allocation8 + $0xda0] sm:$0xff] }
 0x2d1   :  { %3176 = vmatprep.subr.bf16.mxu0 %v3175_v15  ;;  %v852_v15 = vld [vmem:[#allocation8 + $0xdf8] sm:$0xff]  ;;  %v3073_v19 = vpack.c.bf16 %v841_v11, %v831_v10  ;;  %v893_v4 = vld [vmem:[#allocation8 + $0xf40] sm:$0xff]  ;;  %v3089_v11 = vpack.c.bf16 %v921_v3, %v911_v2  ;;  %v1011_v2 = vld [vmem:[#allocation8 + $0x12f0] sm:$0xff] }
 0x2d2   :  { %1536 = vmatmul.mubr.f32.vlgmr.msra.gmra.mrb[4].mxu1 %v3533_v44  ;;  %v924_v10 = vld [vmem:[#allocation8 + $0x1038] sm:$0xff]  ;;  %v3213_v12 = vpack.c.bf16 %v903_v6, %v893_v4  ;;  %v973_v56 = vld [vmem:[#allocation8 + $0x11c0] sm:$0xff]  ;;  %v1003_v6 = vld [vmem:[#allocation8 + $0x12b0] sm:$0xff] }
 0x2d3   :  { %3054 = vmatpush1.bf16.msra.mxu1 %v3053_v21  ;;  %1606 = vmatprep.mubr.f32.mxu1 %v3540_v57  ;;  %v3075_v21 = vpack.c.bf16 %v862_v16, %v852_v15  ;;  %v941_v15 = vld [vmem:[#allocation8 + $0x10c0] sm:$0xff] }
 0x2d4   :  { %3178 = vmatpush1.bf16.msra.mxu0 %v3177_v22  ;;  %3056 = vmatprep.subr.bf16.mxu1 %v3055_v23  ;;  %v851_v22 = vld [vmem:[#allocation8 + $0xdf0] sm:$0xff]  ;;  %v861_v23 = vld [vmem:[#allocation8 + $0xe40] sm:$0xff] }
 0x2d5   :  { %3180 = vmatprep.subr.bf16.mxu0 %v3179_v26  ;;  %v3199_v26 = vpack.c.bf16 %v844_v18, %v834_v17  ;;  %v913_v16 = vld [vmem:[#allocation8 + $0xfe0] sm:$0xff]  ;;  %v923_v18 = vld [vmem:[#allocation8 + $0x1030] sm:$0xff] }
 0x2d6   :  { %v1021_v3 = vld [vmem:[#allocation8 + $0x1340] sm:$0xff] }
 0x2d7   :  { %1678 = vmatmul.mubr.f32.vlgmr.msra.gmra.mrb[12].mxu0 %v3533_v44  ;;  %3058 = vmatpush1.bf16.msra.mxu1 %v3057_v33  ;;  %v3065_v44 = vpack.c.bf16 %v801_v50, %v791_v38  ;;  %v3077_v33 = vpack.c.bf16 %v861_v23, %v851_v22  ;;  %v3081_v50 = vpack.c.bf16 %v881_v37, %v871_v36  ;;  %v944_v22 = vld [vmem:[#allocation8 + $0x10d8] sm:$0xff]  ;;  %v993_v4 = vld [vmem:[#allocation8 + $0x1260] sm:$0xff] }
 0x2d8   :  { %3182 = vmatpush1.bf16.msra.mxu0 %v3181_v34  ;;  %1748 = vmatprep.mubr.f32.mxu0 %v3540_v57  ;;  %v811_v57 = vld [vmem:[#allocation8 + $0xcb0] sm:$0xff]  ;;  %v3201_v34 = vpack.c.bf16 %v843_v27, %v833_v24  ;;  %v3093_v23 = vpack.c.bf16 %v941_v15, %v931_v14  ;;  %v3217_v24 = vpack.c.bf16 %v923_v18, %v913_v16  ;;  %v961_v27 = vld [vmem:[#allocation8 + $0x1160] sm:$0xff] }
 0x2d9   :  { %3060 = vmatprep.subr.bf16.mxu1 %v3059_v39  ;;  %3184 = vmatprep.subr.bf16.mxu0 %v3183_v40  ;;  %v3069_v7 = vpack.c.bf16 %v821_v62, %v811_v57  ;;  %v853_v39 = vld [vmem:[#allocation8 + $0xe00] sm:$0xff]  ;;  %v904_v57 = vld [vmem:[#allocation8 + $0xf98] sm:$0xff]  ;;  %v3085_v62 = vpack.c.bf16 %v901_v55, %v891_v54  ;;  %v3099_v37 = vpack.c.bf16 %v982_v32, %v972_v31  ;;  %v991_v54 = vld [vmem:[#allocation8 + $0x1250] sm:$0xff]  ;;  %v2150_v31 = vlaneseq }
 0x2da   :  { %v3205_v51 = vpack.c.bf16 %v863_v42, %v853_v39  ;;  %v971_v39 = vld [vmem:[#allocation8 + $0x11b0] sm:$0xff]  ;;  %v1001_v55 = vld [vmem:[#allocation8 + $0x12a0] sm:$0xff] }
 0x2db   :  { %3062 = vmatpush1.bf16.msra.mxu1 %v3061_v47  ;;  %v1031_v14 = vld [vmem:[#allocation8 + $0x1390] sm:$0xff]  ;;  %v1041_v15 = vld [vmem:[#allocation8 + $0x13e0] sm:$0xff] }
 0x2dc   :  { %3186 = vmatpush1.bf16.msra.mxu0 %v3185_v48  ;;  %3064 = vmatprep.subr.bf16.mxu1 %v3063_v49  ;;  %v874_v48 = vld [vmem:[#allocation8 + $0xea8] sm:$0xff]  ;;  %v884_v49 = vld [vmem:[#allocation8 + $0xef8] sm:$0xff]  ;;  %v1023_v18 = vld [vmem:[#allocation8 + $0x1350] sm:$0xff] }
 0x2dd   :  { %3188 = vmatprep.subr.bf16.mxu0 %v3187_v53  ;;  %v3083_v53 = vpack.c.bf16 %v902_v45, %v892_v43  ;;  %v3207_v58 = vpack.c.bf16 %v884_v49, %v874_v48  ;;  %v963_v43 = vld [vmem:[#allocation8 + $0x1170] sm:$0xff]  ;;  %v992_v45 = vld [vmem:[#allocation8 + $0x1258] sm:$0xff]  ;;  %v974_v48 = vld [vmem:[#allocation8 + $0x11c8] sm:$0xff] }
 0x2de   :  { %v984_v49 = vld [vmem:[#allocation8 + $0x1218] sm:$0xff] }
 0x2df   :  { %3066 = vmatpush1.bf16.msra.mxu1 %v3065_v44  ;;  %v912_v44 = vld [vmem:[#allocation8 + $0xfd8] sm:$0xff] }
 0x2e0   :  { %3190 = vmatpush1.bf16.msra.mxu0 %v3189_v60  ;;  %3068 = vmatprep.subr.bf16.mxu1 %v3067_v61  ;;  %v922_v60 = vld [vmem:[#allocation8 + $0x1028] sm:$0xff] }
 0x2e1   :  { %3192 = vmatprep.subr.bf16.mxu0 %v3191_v1  ;;  %v894_v61 = vld [vmem:[#allocation8 + $0xf48] sm:$0xff]  ;;  %v3087_v1 = vpack.c.bf16 %v922_v60, %v912_v44  ;;  %v1012_v44 = vld [vmem:[#allocation8 + $0x12f8] sm:$0xff] }
 0x2e2   :  { %v3211_v5 = vpack.c.bf16 %v904_v57, %v894_v61  ;;  %v1022_v60 = vld [vmem:[#allocation8 + $0x1348] sm:$0xff]  ;;  %v1004_v57 = vld [vmem:[#allocation8 + $0x12b8] sm:$0xff] }
 0x2e3   :  { %3070 = vmatpush1.bf16.msra.mxu1 %v3069_v7  ;;  %v932_v7 = vld [vmem:[#allocation8 + $0x1078] sm:$0xff]  ;;  %v994_v61 = vld [vmem:[#allocation8 + $0x1268] sm:$0xff] }
 0x2e4   :  { %3194 = vmatpush1.bf16.msra.mxu0 %v3193_v8  ;;  %3072 = vmatprep.subr.bf16.mxu1 %v3071_v9  ;;  %v942_v8 = vld [vmem:[#allocation8 + $0x10c8] sm:$0xff] }
 0x2e5   :  { %v1111_v25 = vpop.f32.mrb[0].mxu1  ;;  %3196 = vmatprep.subr.bf16.mxu0 %v3195_v13  ;;  %v914_v9 = vld [vmem:[#allocation8 + $0xfe8] sm:$0xff]  ;;  %v3091_v13 = vpack.c.bf16 %v942_v8, %v932_v7  ;;  %v1032_v7 = vld [vmem:[#allocation8 + $0x1398] sm:$0xff] }
 0x2e6   :  { %v1113_v30 = vpop.f32.mrb[1].mxu1  ;;  %v3215_v17 = vpack.c.bf16 %v924_v10, %v914_v9  ;;  %v1042_v8 = vld [vmem:[#allocation8 + $0x13e8] sm:$0xff]  ;;  %v1024_v10 = vld [vmem:[#allocation8 + $0x1358] sm:$0xff] }
 0x2e7   :  { %3074 = vmatpush1.bf16.msra.mxu1 %v3073_v19  ;;  %v952_v19 = vld [vmem:[#allocation8 + $0x1118] sm:$0xff]  ;;  %v1014_v9 = vld [vmem:[#allocation8 + $0x1308] sm:$0xff] }
 0x2e8   :  { %3198 = vmatpush1.bf16.msra.mxu0 %v3197_v20  ;;  %3076 = vmatprep.subr.bf16.mxu1 %v3075_v21  ;;  %v962_v20 = vld [vmem:[#allocation8 + $0x1168] sm:$0xff]  ;;  %v3235_v16 = vpack.c.bf16 %v1024_v10, %v1014_v9 }
 0x2e9   :  { %v1182_v40 = vpop.f32.mrb[8].mxu0  ;;  %3200 = vmatprep.subr.bf16.mxu0 %v3199_v26  ;;  %v934_v21 = vld [vmem:[#allocation8 + $0x1088] sm:$0xff]  ;;  %v951_v26 = vld [vmem:[#allocation8 + $0x1110] sm:$0xff] }
 0x2ea   :  { %v3557_v46 = vadd.f32 %v1182_v40, %v1111_v25  ;;  %v1184_v47 = vpop.f32.mrb[9].mxu0  ;;  %v3095_v25 = vpack.c.bf16 %v962_v20, %v952_v19  ;;  %v3219_v29 = vpack.c.bf16 %v944_v22, %v934_v21  ;;  %v981_v40 = vld [vmem:[#allocation8 + $0x1200] sm:$0xff]  ;;  %v1034_v19 = vld [vmem:[#allocation8 + $0x13a8] sm:$0xff]  ;;  %v1044_v20 = vld [vmem:[#allocation8 + $0x13f8] sm:$0xff]  ;;  %v3113_v21 = vpack.c.bf16 %v1041_v15, %v1031_v14 }
 0x2eb   :  { %v3559_v38 = vadd.f32 %v1184_v47, %v1113_v30  ;;  %3078 = vmatpush1.bf16.msra.mxu1 %v3077_v33  ;;  %v943_v30 = vld [vmem:[#allocation8 + $0x10d0] sm:$0xff]  ;;  %v954_v33 = vld [vmem:[#allocation8 + $0x1128] sm:$0xff] }
 0x2ec   :  { %3202 = vmatpush1.bf16.msra.mxu0 %v3201_v34  ;;  %3080 = vmatprep.subr.bf16.mxu1 %v3079_v35  ;;  %v964_v34 = vld [vmem:[#allocation8 + $0x1178] sm:$0xff]  ;;  %v3097_v35 = vpack.c.bf16 %v961_v27, %v951_v26  ;;  %v3221_v36 = vpack.c.bf16 %v943_v30, %v933_v28  ;;  %v1002_v47 = vld [vmem:[#allocation8 + $0x12a8] sm:$0xff] }
 0x2ed   :  { %3204 = vmatprep.subr.bf16.mxu0 %v3203_v41  ;;  %v953_v41 = vld [vmem:[#allocation8 + $0x1120] sm:$0xff]  ;;  %v3223_v42 = vpack.c.bf16 %v964_v34, %v954_v33  ;;  %v3278_v27 = vld [vmem:[#allocation5] sm:$0xff]  ;;  %v2151_v33 = vshrl.u32 %v2150_v31, 7 }
 0x2ef   :  { %3082 = vmatpush1.bf16.msra.mxu1 %v3081_v50  ;;  %v3101_v50 = vpack.c.bf16 %v981_v40, %v971_v39 }
 0x2f0   :  { %3206 = vmatpush1.bf16.msra.mxu0 %v3205_v51  ;;  %3084 = vmatprep.subr.bf16.mxu1 %v3083_v53  ;;  %v3225_v51 = vpack.c.bf16 %v963_v43, %v953_v41  ;;  %v3103_v53 = vpack.c.bf16 %v1002_v47, %v992_v45 }
 0x2f1   :  { %3208 = vmatprep.subr.bf16.mxu0 %v3207_v58  ;;  %v3227_v58 = vpack.c.bf16 %v984_v49, %v974_v48 }
 0x2f3   :  { %3086 = vmatpush1.bf16.msra.mxu1 %v3085_v62  ;;  %v3105_v62 = vpack.c.bf16 %v1001_v55, %v991_v54  ;;  %v2141_v54 = vld [vmem:[%s3593_s0 + $0x8] sm:$0xff] }
 0x2f4   :  { %3210 = vmatpush1.bf16.msra.mxu0 %v3209_v63  ;;  %3088 = vmatprep.subr.bf16.mxu1 %v3087_v1  ;;  %v3229_v63 = vpack.c.bf16 %v983_v59, %v973_v56  ;;  %v3107_v1 = vpack.c.bf16 %v1022_v60, %v1012_v44 }
 0x2f5   :  { %3212 = vmatprep.subr.bf16.mxu0 %v3211_v5  ;;  %v3231_v5 = vpack.c.bf16 %v1004_v57, %v994_v61 }
 0x2f7   :  { %3090 = vmatpush1.bf16.msra.mxu1 %v3089_v11  ;;  %v3109_v11 = vpack.c.bf16 %v1021_v3, %v1011_v2  ;;  %v2163_v2 = vcombine.high %v2141_v54, %v2141_v54 }
 0x2f8   :  { %3214 = vmatpush1.bf16.msra.mxu0 %v3213_v12  ;;  %3092 = vmatprep.subr.bf16.mxu1 %v3091_v13  ;;  %v3233_v12 = vpack.c.bf16 %v1003_v6, %v993_v4  ;;  %v3111_v13 = vpack.c.bf16 %v1042_v8, %v1032_v7 }
 0x2f9   :  { %3216 = vmatprep.subr.bf16.mxu0 %v3215_v17  ;;  %v1013_v17 = vld [vmem:[#allocation8 + $0x1300] sm:$0xff] }
 0x2fa   :  { %v3237_v22 = vpack.c.bf16 %v1023_v18, %v1013_v17 }
 0x2fb   :  { %3094 = vmatpush1.bf16.msra.mxu1 %v3093_v23  ;;  %v3239_v23 = vpack.c.bf16 %v1044_v20, %v1034_v19 }
 0x2fc   :  { %3218 = vmatpush1.bf16.msra.mxu0 %v3217_v24  ;;  %3096 = vmatprep.subr.bf16.mxu1 %v3095_v25  ;;  %v1033_v24 = vld [vmem:[#allocation8 + $0x13a0] sm:$0xff]  ;;  %v1043_v25 = vld [vmem:[#allocation8 + $0x13f0] sm:$0xff] }
 0x2fd   :  { %3220 = vmatprep.subr.bf16.mxu0 %v3219_v29  ;;  %v3241_v26 = vpack.c.bf16 %v1043_v25, %v1033_v24 }
 0x2ff   :  { %3098 = vmatpush1.bf16.msra.mxu1 %v3097_v35  ;;  %v2140_v35 = vld [vmem:[%s3593_s0] sm:$0xff] }
 0x300   :  { %3222 = vmatpush1.bf16.msra.mxu0 %v3221_v36  ;;  %3100 = vmatprep.subr.bf16.mxu1 %v3099_v37  ;;  %v2146_v43 = vcombine.high %v2140_v35, %v2140_v35 }
 0x301   :  { %3224 = vmatprep.subr.bf16.mxu0 %v3223_v42 }
 0x303   :  { %3102 = vmatpush1.bf16.msra.mxu1 %v3101_v50 }
 0x304   :  { %3226 = vmatpush1.bf16.msra.mxu0 %v3225_v51  ;;  %3104 = vmatprep.subr.bf16.mxu1 %v3103_v53 }
 0x305   :  { %3228 = vmatprep.subr.bf16.mxu0 %v3227_v58 }
 0x307   :  { %3106 = vmatpush1.bf16.msra.mxu1 %v3105_v62 }
 0x308   :  { %3230 = vmatpush1.bf16.msra.mxu0 %v3229_v63  ;;  %3108 = vmatprep.subr.bf16.mxu1 %v3107_v1 }
 0x309   :  { %3232 = vmatprep.subr.bf16.mxu0 %v3231_v5 }
 0x30b   :  { %3110 = vmatpush1.bf16.msra.mxu1 %v3109_v11 }
 0x30c   :  { %3234 = vmatpush1.bf16.msra.mxu0 %v3233_v12  ;;  %3112 = vmatprep.subr.bf16.mxu1 %v3111_v13  ;;  %v2592_v12 = vld.sshfl [vmem:[%s3593_s0 + $0x10] sm:$0x33 pattern:$0x76325410] }
 0x30d   :  { %3236 = vmatprep.subr.bf16.mxu0 %v3235_v16  ;;  %v2187_v18 = vcombine.high %v2592_v12, %v2592_v12 }
 0x30f   :  { %3114 = vmatpush1.bf16.msra.mxu1 %v3113_v21 }
 0x310   :  { %3238 = vmatpush1.bf16.msra.mxu0 %v3237_v22  ;;  %v2593_v22 = vld [vmem:[#allocation10] ss:$0 sm:$0xff] }
 0x311   :  { %3240 = vmatprep.subr.bf16.mxu0 %v3239_v23 }
 0x312   :  { %1607 = vmatmul.mubr.f32.vlgmr.msra.gmra.mrb[4].mxu1 %v3537_v52 }
 0x313   :  { %2032 = vmatprep.mubr.f32.mxu1 %v3404_v0 }
 0x314   :  { %3242 = vmatpush1.bf16.msra.mxu0 %v3241_v26 }
 0x315   :  { %1755 = vmatprep.subr.mxu0 %v3559_v38 }
 0x317   :  { %1749 = vmatmul.mubr.f32.vlgmr.msra.gmra.mrb[12].mxu0 %v3537_v52  ;;  %v3405_v52 = vmov 1983009808  }
 0x318   :  { %1756 = vmatpush1.msra.mxu0 %v3557_v46  ;;  %1819 = vmatprep.mubr.f32.mxu0 %v3404_v0  ;;  %v2148_v46 = vunpack.c.l.s4 %v3405_v52 }
 0x31a   :  { %v2149_v32 = vunpack.c.0.s8 %v2148_v46 }
 0x31b   :  { %2587 = vmatmul.mubr.msk.f32.vlgmr.msra.gmra.mrb[14].mxu0 %vm247_vm1, %v3278_v27 }
 0x31c   :  { %1890 = vmatprep.mubr.f32.mxu0 %v3404_v0  ;;  %v2152_v34 = vsub.s32 %v2149_v32, %v2151_v33 }
 0x31e   :  { %v2153_v39 = vrot.slane %v2140_v35, %v2152_v34  ;;  %v2160_v50 = vrot.slane %v2146_v43, %v2152_v34  ;;  %v2170_v44 = vrot.slane %v2141_v54, %v2152_v34  ;;  %v2177_v6 = vrot.slane %v2163_v2, %v2152_v34 }
 0x320   :  { %v2161_v42 = vcombine.high %v2153_v39, %v2153_v39  ;;  %v2178_v1 = vcombine.high %v2170_v44, %v2170_v44  ;;  %v2179_v7 = vcombine.high %v2177_v6, %v2177_v6 }
 0x365   :  { %v1324_v28 = vpop.f32.mrb[2].mxu1 }
 0x366   :  { %v1326_v29 = vpop.f32.mrb[3].mxu1 }
 0x367   :  { %1826 = vmatprep.subr.mxu0 %v1326_v29 }
 0x368   :  { %1827 = vmatpush1.msra.mxu0 %v1324_v28 }
 0x369   :  { %2588 = vmatmul.mubr.msk.f32.vlgmr.msra.gmra.mrb[16].mxu0 %vm247_vm1, %v3278_v27 }
 0x36a   :  { %v1466_v30 = vpop.f32.mrb[10].mxu0  ;;  %1961 = vmatprep.mubr.f32.mxu0 %v3404_v0 }
 0x36b   :  { %v1468_v38 = vpop.f32.mrb[11].mxu0 }
 0x36c   :  { %1897 = vmatprep.subr.mxu0 %v1468_v38 }
 0x36d   :  { %1898 = vmatpush1.msra.mxu0 %v1466_v30 }
 0x36e   :  { %2589 = vmatmul.mubr.msk.f32.vlgmr.msra.gmra.mrb[18].mxu0 %vm247_vm1, %v3278_v27 }
 0x3e5   :  { %v1608_v36 = vpop.f32.mrb[4].mxu1 }
 0x3e6   :  { %v1610_v37 = vpop.f32.mrb[5].mxu1 }
 0x3e7   :  { %1968 = vmatprep.subr.mxu1 %v1610_v37 }
 0x3e8   :  { %1969 = vmatpush1.msra.mxu1 %v1608_v36 }
 0x3e9   :  { %2590 = vmatmul.mubr.msk.f32.vlgmr.msra.gmra.mrb[6].mxu1 %vm247_vm1, %v3278_v27 }
 0x3ea   :  { %v1750_v40 = vpop.f32.mrb[12].mxu0  ;;  %2103 = vmatprep.mubr.f32.mxu1 %v3404_v0  ;;  %v2162_v0 = vcombine.high %v2160_v50, %v2160_v50 }
 0x3eb   :  { %v1752_v41 = vpop.f32.mrb[13].mxu0 }
 0x3ec   :  { %2039 = vmatprep.subr.mxu1 %v1752_v41 }
 0x3ed   :  { %2040 = vmatpush1.msra.mxu1 %v1750_v40 }
 0x3ee   :  { %2591 = vmatmul.mubr.msk.f32.vlgmr.msra.gmra.mrb[8].mxu1 %vm247_vm1, %v3278_v27  ;;  %v1821_v45 = vpop.f32.mrb[14].mxu0  ;;  %v2561_v27 = vstv %s3599_s6  ;;  %vm2563_vm1 = vcmask 1024  }
 0x3ef   :  { %vm2110_vm6 = vcmp.ge.f32.partialorder %v1821_v45, 0.0  ;;  %v2120_v47 = vmul.f32 0.2, %v1821_v45  ;;  %v1823_v48 = vpop.f32.mrb[15].mxu0  ;;  %2262 = vmatprep.mubr.f32.mxu1 %v2161_v42 }
 0x3f0   :  { %vm2111_vm7 = vcmp.ge.f32.partialorder %v1823_v48, 0.0  ;;  %v2121_v49 = vmul.f32 0.2, %v1823_v48 }
 0x3f1   :  { %v2130_v51 = vsel %vm2110_vm6, %v1821_v45, %v2120_v47 }
 0x3f2   :  { %v2131_v53 = vsel %vm2111_vm7, %v1823_v48, %v2121_v49 }
 0x3f3   :  { %2198 = vmatprep.subr.mxu1 %v2131_v53 }
 0x3f4   :  { %2199 = vmatpush1.xpose.msra.mxu1 %v2130_v51 }
 0x3f7   :  { %2263 = vmatmul.mubr.f32.vlgmr.msra.gmra.mrb[10].mxu1 %v2153_v39 }
 0x3f8   :  { %2332 = vmatprep.mubr.f32.mxu1 %v2162_v0 }
 0x43c   :  { %v1892_v55 = vpop.f32.mrb[16].mxu0 }
 0x43d   :  { %vm2112_vm8 = vcmp.ge.f32.partialorder %v1892_v55, 0.0  ;;  %v2122_v56 = vmul.f32 0.2, %v1892_v55  ;;  %v1894_v58 = vpop.f32.mrb[17].mxu0 }
 0x43e   :  { %vm2113_vm9 = vcmp.ge.f32.partialorder %v1894_v58, 0.0  ;;  %v2123_v59 = vmul.f32 0.2, %v1894_v58 }
 0x43f   :  { %v2132_v60 = vsel %vm2112_vm8, %v1892_v55, %v2122_v56 }
 0x440   :  { %v2133_v61 = vsel %vm2113_vm9, %v1894_v58, %v2123_v59 }
 0x441   :  { %2268 = vmatprep.subr.mxu1 %v2133_v61  ;;  %v1963_v57 = vpop.f32.mrb[18].mxu0 }
 0x442   :  { %2269 = vmatpush1.xpose.msra.mxu1 %v2132_v60  ;;  %vm2114_vm10 = vcmp.ge.f32.partialorder %v1963_v57, 0.0  ;;  %v2124_v62 = vmul.f32 0.2, %v1963_v57  ;;  %v1965_v63 = vpop.f32.mrb[19].mxu0 }
 0x443   :  { %vm2115_vm11 = vcmp.ge.f32.partialorder %v1965_v63, 0.0  ;;  %v2125_v3 = vmul.f32 0.2, %v1965_v63 }
 0x444   :  { %v2134_v4 = vsel %vm2114_vm10, %v1963_v57, %v2124_v62 }
 0x445   :  { %2333 = vmatmul.mubr.f32.vlgmr.msra.gmra.mrb[10].mxu1 %v2160_v50  ;;  %v2135_v5 = vsel %vm2115_vm11, %v1965_v63, %v2125_v3 }
 0x446   :  { %2338 = vmatprep.subr.mxu1 %v2135_v5  ;;  %2402 = vmatprep.mubr.f32.mxu1 %v2178_v1 }
 0x447   :  { %2339 = vmatpush1.xpose.msra.mxu1 %v2134_v4 }
 0x44d   :  { %2403 = vmatmul.mubr.f32.vlgmr.msra.gmra.mrb[10].mxu1 %v2170_v44 }
 0x44e   :  { %2472 = vmatprep.mubr.f32.mxu1 %v2179_v7 }
 0x4bc   :  { %v2034_v8 = vpop.f32.mrb[6].mxu1 }
 0x4bd   :  { %v2126_v9 = vmul.f32 0.2, %v2034_v8  ;;  %v2036_v10 = vpop.f32.mrb[7].mxu1  ;;  %vm2116_vm12 = vcmp.ge.f32.partialorder %v2034_v8, 0.0 }
 0x4be   :  { %vm2117_vm13 = vcmp.ge.f32.partialorder %v2036_v10, 0.0  ;;  %v2127_v11 = vmul.f32 0.2, %v2036_v10 }
 0x4bf   :  { %v2136_v15 = vsel %vm2116_vm12, %v2034_v8, %v2126_v9 }
 0x4c0   :  { %v2137_v13 = vsel %vm2117_vm13, %v2036_v10, %v2127_v11 }
 0x4c1   :  { %v2105_v14 = vpop.f32.mrb[8].mxu1  ;;  %2408 = vmatprep.subr.mxu1 %v2137_v13 }
 0x4c2   :  { %vm2118_vm14 = vcmp.ge.f32.partialorder %v2105_v14, 0.0  ;;  %v2128_v16 = vmul.f32 0.2, %v2105_v14  ;;  %v2107_v17 = vpop.f32.mrb[9].mxu1  ;;  %2409 = vmatpush1.xpose.msra.mxu1 %v2136_v15 }
 0x4c3   :  { %vm2119_vm15 = vcmp.ge.f32.partialorder %v2107_v17, 0.0  ;;  %v2129_v19 = vmul.f32 0.2, %v2107_v17 }
 0x4c4   :  { %v2138_v20 = vsel %vm2118_vm14, %v2105_v14, %v2128_v16 }
 0x4c5   :  { %2473 = vmatmul.mubr.f32.vlgmr.msra.gmra.mrb[10].mxu1 %v2177_v6  ;;  %v2139_v21 = vsel %vm2119_vm15, %v2107_v17, %v2129_v19 }
 0x4c6   :  { %2478 = vmatprep.subr.mxu1 %v2139_v21  ;;  %2542 = vmatprep.mubr.f32.mxu1 %v2187_v18 }
 0x4c7   :  { %2479 = vmatpush1.xpose.msra.mxu1 %v2138_v20 }
 0x4cd   :  { %2543 = vmatmul.mubr.f32.vlgmr.msra.gmra.mrb[10].mxu1 %v2592_v12 }
 0x5a0   :  { %v2544_v23 = vpop.f32.mrb[10].mxu1 }
 0x5a1   :  { %v2555_v24 = vmul.f32 %v2593_v22, %v2544_v23  ;;  %v2546_v25 = vpop.f32.mrb[11].mxu1 }
 0x5a3   :  { %v2557_v26 = vsel %vm2556_vm0, %v2555_v24, 0.0 }
 0x5a4   :  { %2558 = vadd.xlane.f32.xlu0 %v2557_v26 }
 0x631   :  { %v2559_v28 = vpop.xlane.xlu0 %2558 }
 0x632   :  { %v2562_v29 = vadd.f32 %v2561_v27, %v2559_v28 }
 0x634   :  { %2564 = vst.msk [vmem:[%s3600_s7] sm:$0x3] %vm2563_vm1, %v2562_v29  ;;  %v2594_v30 = vmul.f32 -1.442695, %v2562_v29 }
 0x636   :  { %3274 = vpow2.f32 %v2594_v30 }
 0x640   :  { %v3275_v38 = vpop.eup %3274 }
 0x641   :  { %v2568_v52 = vadd.f32 1.0, %v3275_v38 }
 0x643   :  { %3276 = vrcp.f32 %v2568_v52 }
 0x64d   :  { %v3277_v46 = vpop.eup %3276 }
 0x64e   :  { %2571 = vst.msk [vmem:[%s3601_s8] sm:$0x3] %vm2563_vm1, %v3277_v46 }
 0x64f   :  { %2580 = vsyncpa [#allocation4], 1 }
 0x650   :  { %2581 = vsyncpa [#allocation6], 1 }
 0x651   :  { %2582 = vsyncpa [#allocation9], 1 }

// kernel: multi_output_forward.2
= control target key start
LH: loop header
LB: loop body
LE: loop exit
PB: predicated region body
PF: predicated region fallthrough
CT: control target
= control target key end

     0   :  { %7 = vsyncpa [#allocation3], 0  ;;  %s4323_s9 = smov 0   ;;  %s4325_s10 = smov 0   ;;  %s8452_s0 = inlined_call_operand.vmem [shape: f32[2,256,3], index: 0, kind: input, shape index: {}]   ;;  %s8453_s1 = inlined_call_operand.hbm [shape: f32[3,1280], index: 1, kind: input, shape index: {}]   ;;  %s8454_s2 = inlined_call_operand.vmem [shape: f32[2,1,1280], index: 2, kind: output, shape index: {}]  }
   0x1   :  { %s4327_s11 = smov 0  }
   0x2 LB: > { %s4180_s12 = sadd.s32 4294967295, %s4300_s11   ;;  %s25_s13 = sadd.s32 1, %s4296_s10  ;;  %s4300_s11 = sphi %s4327_s11, %s13_s11   ;;  %s4296_s10 = sphi %s4325_s10, %s9845_s10   ;;  %s4292_s9 = sphi %s4323_s9, %s9844_s9  }
   0x3   : > { %p27_p0 = scmp.ge.s32.totalorder %s25_s13, 2  ;;  %p4182_p1 = scmp.ge.s32.totalorder %s4300_s11, 1 }
   0x4   : > { %p105_p2 = scmp.lt.s32.totalorder %s4300_s11, 3  ;;  %p4348_p4 = scmp.eq.s32.totalorder %s4180_s12, 0 }
   0x5   : > { %s9847_s13 = smov (%p27_p0, %s25_s13), 0  ;;  %s4302_s16 = smov [#allocation2]  }
   0x6   : > { %p4344_p3 = pnand %p4182_p1, %p105_p2  ;;  %s118_s17 = sshll.u32 %s4302_s16, 4  ;;  %s119_s17 = int_to_ptr.vmem [resolvable:$true] %s118_s17 }
   0x7   : > { %s8532_s15 = scalar_select %p4348_p4, 1, 0 }
   0x8   : > { %s8531_s14 = scalar_select %p4344_p3, 1, 0 }
   0x9   : > { %p4197_p5 = pneg %p4344_p3  ;;  %s4246_s21 = scalar_lea.hbm %s8453_s1, 640 }
   0xa   : > { %p4247_p7 = scmp.ne.s32.totalorder %s8453_s1, %s4246_s21  ;;  %p4253_p11 = scmp.lt.u32.totalorder %s4246_s21, %s8453_s1 }
   0xb   : > { %p4356_p6 = pnand %p4348_p4, %p4197_p5 }
   0xd   : > { %p4248_p8 = pneg %p4356_p6 }
   0xf   : > { %p4249_p9 = pnand %p4248_p8, %p4247_p7 }
  0x11   : > { %p4250_p10 = pneg %p4249_p9 }
  0x13   : > { %p4255_p12 = pnand %p4253_p11, %p4250_p10 }
  0x15   : > { %4258 = shalt.err (!%p4255_p12)
}
  0x16   : > { %s4259_s26 = scalar_lea.vmem %s119_s17, 640  ;;  %p4267_p2 = scmp.lt.s32.totalorder %s119_s17, %s119_s17 }
  0x17   : > { %p4260_p13 = scmp.ne.s32.totalorder %s119_s17, %s4259_s26  ;;  %p4268_p5 = scmp.lt.s32.totalorder %s4259_s26, %s4259_s26 }
  0x19   : > { %p4262_p0 = pnand %p4260_p13, %p4248_p8  ;;  %p4269_p4 = por %p4268_p5, %p4267_p2 }
  0x1b   : > { %p4263_p1 = pneg %p4262_p0 }
  0x1d   : > { %p4270_p3 = pnand %p4269_p4, %p4263_p1 }
  0x1f   : > { %4273 = shalt.err (!%p4270_p3)
}
  0x20   : > { %4200 = dma.hbm_to_vmem [thread:$0]  (!%p4356_p6), %s8453_s1, 640, %s119_s17, [#allocation3]  }
  0x21   : > { %p8534_p7 = scmp.ne.s32.totalorder %s8531_s14, 0 }
  0x23   : > { %144 = sbr.rel (%p8534_p7) target bundleno = 962 (0x3c2), region = 28 }
  0x2a   : > { %p8535_p9 = scmp.ne.s32.totalorder %s8532_s15, 0 }
  0x2c   : > { %4287 = dma.done.wait (%p8535_p9), [#allocation3], 640  }
  0x2d   : > { %4289 = vsyncadd (%p8535_p9), [#allocation3], 4294966656  ;;  %p170_p8 = scmp.lt.s32.totalorder %s4292_s9, 1  ;;  %v4303_v0 = vmov 0   ;;  %v8460_v33 = vmov 1   ;;  %v8458_v34 = vlaneseq  ;;  %v8459_v36 = vmov 2  }
  0x2e   : > { %4234 = vset.pattern.permute.xlu1 %v4303_v0  ;;  %4233 = vset.pattern.permute.xlu0 %v4303_v0  ;;  %v225_v39 = vld [vmem:[#allocation2] sm:$0x77]  ;;  %v226_v40 = vld [vmem:[#allocation2 + $0x8] sm:$0x77]  ;;  %v227_v41 = vld [vmem:[#allocation2 + $0x10] sm:$0x77] }
  0x2f   : > { %s9849_s9 = smov (!%p170_p8, %s4292_s9), 1  ;;  %v4547_v35 = vshrl.u32 %v8458_v34, 7  ;;  %v228_v42 = vld [vmem:[#allocation2 + $0x18] sm:$0x77]  ;;  %v229_v43 = vld [vmem:[#allocation2 + $0x20] sm:$0x77] }
  0x30   : > { %s4191_s29 = sshll.u32 %s9849_s9, 8  ;;  %s4192_s5 = smul.u32 10, %s9849_s9 }
  0x31   : > { %s4390_s4 = scalar_lea.vmem %s8452_s0, %s4191_s29  ;;  %8536 = vst [vmem:[#allocation5_spill] sm:$0xff] %v4547_v35  ;;  %v397_v37 = vsub.s32 0, %v4547_v35  ;;  %v401_v38 = vsub.s32 4, %v4547_v35  ;;  %v935_v49 = vsub.s32 1, %v4547_v35  ;;  %v939_v50 = vsub.s32 5, %v4547_v35 }
  0x32   : > { %v4393_v1 = vld [vmem:[%s4390_s4 + $0x10] sm:$0xff]  ;;  %v4396_v2 = vld [vmem:[%s4390_s4] sm:$0xff]  ;;  %v4401_v3 = vld [vmem:[%s4390_s4 + $0x18] sm:$0xff]  ;;  %s8313_s8 = scalar_lea.vmem %s8454_s2, %s4192_s5 }
  0x33   : > { %242 = vperm.xlu1 %4234, %v4393_v1   ;;  %232 = vperm.xlu0 %4233, %v4396_v2   ;;  %v4404_v4 = vld [vmem:[%s4390_s4 + $0x8] sm:$0xff]  ;;  %v4412_v6 = vld [vmem:[%s4390_s4 + $0x20] sm:$0xff]  ;;  %v4417_v7 = vld [vmem:[%s4390_s4 + $0x38] sm:$0xff]  ;;  %v398_v44 = vrot.slane %v225_v39, %v397_v37  ;;  %v402_v45 = vrot.slane %v225_v39, %v401_v38  ;;  %v406_v46 = vrot.slane %v226_v40, %v397_v37 }
  0x34   : > { %v4409_v5 = vld [vmem:[%s4390_s4 + $0x28] sm:$0xff]  ;;  %v4420_v8 = vld [vmem:[%s4390_s4 + $0x30] sm:$0xff]  ;;  %v4428_v10 = vld [vmem:[%s4390_s4 + $0x40] sm:$0xff]  ;;  %v410_v47 = vrot.slane %v226_v40, %v401_v38  ;;  %v414_v48 = vrot.slane %v227_v41, %v397_v37  ;;  %v418_v51 = vrot.slane %v227_v41, %v401_v38  ;;  %v422_v52 = vrot.slane %v228_v42, %v397_v37 }
  0x35   : > { %v4425_v9 = vld [vmem:[%s4390_s4 + $0x48] sm:$0xff]  ;;  %v4433_v11 = vld [vmem:[%s4390_s4 + $0x58] sm:$0xff]  ;;  %v4436_v12 = vld [vmem:[%s4390_s4 + $0x50] sm:$0xff]  ;;  %v426_v53 = vrot.slane %v228_v42, %v401_v38  ;;  %v430_v54 = vrot.slane %v229_v43, %v397_v37  ;;  %v434_v55 = vrot.slane %v229_v43, %v401_v38  ;;  %v4561_v56 = vrot.slane %v398_v44, %v397_v37 }
  0x36   : > { %v4441_v13 = vld [vmem:[%s4390_s4 + $0x68] sm:$0xff]  ;;  %v4444_v14 = vld [vmem:[%s4390_s4 + $0x60] sm:$0xff]  ;;  %v4449_v15 = vld [vmem:[%s4390_s4 + $0x78] sm:$0xff]  ;;  %v4563_v57 = vrot.slane %v402_v45, %v397_v37  ;;  %v4565_v58 = vrot.slane %v406_v46, %v397_v37  ;;  %v4567_v59 = vrot.slane %v410_v47, %v397_v37  ;;  %v4569_v60 = vrot.slane %v414_v48, %v397_v37 }
  0x37   : > { %247 = vperm.xlu1 %4234, %v4401_v3   ;;  %237 = vperm.xlu0 %4233, %v4404_v4   ;;  %v4452_v16 = vld [vmem:[%s4390_s4 + $0x70] sm:$0xff]  ;;  %v4457_v17 = vld [vmem:[%s4390_s4 + $0x88] sm:$0xff]  ;;  %v4460_v18 = vld [vmem:[%s4390_s4 + $0x80] sm:$0xff]  ;;  %v936_v61 = vrot.slane %v225_v39, %v935_v49  ;;  %v940_v62 = vrot.slane %v225_v39, %v939_v50  ;;  %v944_v63 = vrot.slane %v226_v40, %v935_v49 }
  0x38   : > { %v4465_v19 = vld [vmem:[%s4390_s4 + $0x98] sm:$0xff]  ;;  %v4468_v20 = vld [vmem:[%s4390_s4 + $0x90] sm:$0xff]  ;;  %v4473_v21 = vld [vmem:[%s4390_s4 + $0xa8] sm:$0xff]  ;;  %v948_v0 = vrot.slane %v226_v40, %v939_v50  ;;  %v968_v38 = vrot.slane %v229_v43, %v935_v49  ;;  %v4573_v44 = vrot.slane %v418_v51, %v397_v37  ;;  %v4575_v45 = vrot.slane %v422_v52, %v397_v37 }
  0x39   : > { %v4476_v22 = vld [vmem:[%s4390_s4 + $0xa0] sm:$0xff]  ;;  %v4481_v23 = vld [vmem:[%s4390_s4 + $0xb8] sm:$0xff]  ;;  %v4484_v24 = vld [vmem:[%s4390_s4 + $0xb0] sm:$0xff]  ;;  %v4577_v46 = vrot.slane %v426_v53, %v397_v37  ;;  %v4579_v47 = vrot.slane %v430_v54, %v397_v37  ;;  %v4581_v39 = vrot.slane %v434_v55, %v397_v37  ;;  %v4583_v48 = vrot.slane %v936_v61, %v935_v49 }
  0x3a   : > { %v4489_v25 = vld [vmem:[%s4390_s4 + $0xc8] sm:$0xff]  ;;  %v4492_v26 = vld [vmem:[%s4390_s4 + $0xc0] sm:$0xff]  ;;  %v4497_v27 = vld [vmem:[%s4390_s4 + $0xd8] sm:$0xff]  ;;  %v4599_v37 = vrot.slane %v968_v38, %v935_v49 }
  0x3b   : > { %257 = vperm.xlu1 %4234, %v4409_v5   ;;  %252 = vperm.xlu0 %4233, %v4412_v6   ;;  %v4500_v28 = vld [vmem:[%s4390_s4 + $0xd0] sm:$0xff]  ;;  %v4505_v29 = vld [vmem:[%s4390_s4 + $0xe8] sm:$0xff]  ;;  %v4508_v30 = vld [vmem:[%s4390_s4 + $0xe0] sm:$0xff]  ;;  %8537 = vst [vmem:[#allocation6_spill] sm:$0xff] %v4579_v47 }
  0x3c   : > { %v4513_v31 = vld [vmem:[%s4390_s4 + $0xf8] sm:$0xff]  ;;  %v4516_v32 = vld [vmem:[%s4390_s4 + $0xf0] sm:$0xff]  ;;  %8538 = vst [vmem:[#allocation7_spill] sm:$0xff] %v4581_v39  ;;  %8539 = vst [vmem:[#allocation8_spill] sm:$0xff] %v4583_v48 }
  0x3d   : > { %8547 = vst [vmem:[#allocation16_spill] sm:$0xff] %v4599_v37 }
  0x3f   : > { %267 = vperm.xlu1 %4234, %v4417_v7   ;;  %262 = vperm.xlu0 %4233, %v4420_v8  }
  0x43   : > { %277 = vperm.xlu1 %4234, %v4425_v9   ;;  %272 = vperm.xlu0 %4233, %v4428_v10  }
  0x47   : > { %287 = vperm.xlu1 %4234, %v4433_v11   ;;  %282 = vperm.xlu0 %4233, %v4436_v12  }
  0x4b   : > { %297 = vperm.xlu1 %4234, %v4441_v13   ;;  %292 = vperm.xlu0 %4233, %v4444_v14  }
  0x4f   : > { %307 = vperm.xlu1 %4234, %v4449_v15   ;;  %302 = vperm.xlu0 %4233, %v4452_v16  }
  0x53   : > { %317 = vperm.xlu1 %4234, %v4457_v17   ;;  %312 = vperm.xlu0 %4233, %v4460_v18  }
  0x57   : > { %327 = vperm.xlu1 %4234, %v4465_v19   ;;  %322 = vperm.xlu0 %4233, %v4468_v20  }
  0x5b   : > { %337 = vperm.xlu1 %4234, %v4473_v21   ;;  %332 = vperm.xlu0 %4233, %v4476_v22  }
  0x5f   : > { %347 = vperm.xlu1 %4234, %v4481_v23   ;;  %342 = vperm.xlu0 %4233, %v4484_v24  }
  0x63   : > { %357 = vperm.xlu1 %4234, %v4489_v25   ;;  %352 = vperm.xlu0 %4233, %v4492_v26  }
  0x67   : > { %367 = vperm.xlu1 %4234, %v4497_v27   ;;  %362 = vperm.xlu0 %4233, %v4500_v28  }
  0x6b   : > { %377 = vperm.xlu1 %4234, %v4505_v29   ;;  %372 = vperm.xlu0 %4233, %v4508_v30  }
  0x6f   : > { %387 = vperm.xlu1 %4234, %v4513_v31   ;;  %382 = vperm.xlu0 %4233, %v4516_v32  }
  0x73   : > { %4236 = vset.pattern.permute.xlu1 %v8460_v33  ;;  %4235 = vset.pattern.permute.xlu0 %v8460_v33 }
  0x74   : > { %810 = vperm.xlu1 %4236, %v4404_v4   ;;  %806 = vperm.xlu0 %4235, %v4396_v2  }
  0x78   : > { %814 = vperm.xlu1 %4236, %v4393_v1   ;;  %818 = vperm.xlu0 %4235, %v4401_v3  }
  0x7c   : > { %822 = vperm.xlu1 %4236, %v4412_v6   ;;  %826 = vperm.xlu0 %4235, %v4409_v5  }
  0x80   : > { %830 = vperm.xlu1 %4236, %v4420_v8   ;;  %834 = vperm.xlu0 %4235, %v4417_v7  }
  0x84   : > { %838 = vperm.xlu1 %4236, %v4428_v10   ;;  %842 = vperm.xlu0 %4235, %v4425_v9  }
  0x88   : > { %846 = vperm.xlu1 %4236, %v4436_v12   ;;  %850 = vperm.xlu0 %4235, %v4433_v11  }
  0x8c   : > { %854 = vperm.xlu1 %4236, %v4444_v14   ;;  %858 = vperm.xlu0 %4235, %v4441_v13  }
  0x90   : > { %862 = vperm.xlu1 %4236, %v4452_v16   ;;  %866 = vperm.xlu0 %4235, %v4449_v15  }
  0x94   : > { %870 = vperm.xlu1 %4236, %v4460_v18   ;;  %874 = vperm.xlu0 %4235, %v4457_v17  }
  0x98   : > { %878 = vperm.xlu1 %4236, %v4468_v20   ;;  %882 = vperm.xlu0 %4235, %v4465_v19  }
  0x9c   : > { %886 = vperm.xlu1 %4236, %v4476_v22   ;;  %890 = vperm.xlu0 %4235, %v4473_v21  }
  0xa0   : > { %894 = vperm.xlu1 %4236, %v4484_v24   ;;  %898 = vperm.xlu0 %4235, %v4481_v23  }
  0xa4   : > { %902 = vperm.xlu1 %4236, %v4492_v26   ;;  %4237 = vset.pattern.permute.xlu0 %v8459_v36 }
  0xa5   : > { %1664 = vperm.xlu0 %4237, %v4396_v2   ;;  %v952_v2 = vrot.slane %v227_v41, %v935_v49 }
  0xa8   : > { %4238 = vset.pattern.permute.xlu1 %v8459_v36 }
  0xa9   : > { %1668 = vperm.xlu1 %4238, %v4404_v4   ;;  %1676 = vperm.xlu0 %4237, %v4401_v3   ;;  %v956_v3 = vrot.slane %v227_v41, %v939_v50  ;;  %v960_v4 = vrot.slane %v228_v42, %v935_v49 }
  0xab   : > { %v4595_v51 = vrot.slane %v960_v4, %v935_v49 }
  0xad   : > { %1672 = vperm.xlu1 %4238, %v4393_v1   ;;  %1684 = vperm.xlu0 %4237, %v4409_v5   ;;  %v964_v1 = vrot.slane %v228_v42, %v939_v50  ;;  %v972_v5 = vrot.slane %v229_v43, %v939_v50  ;;  %v4585_v42 = vrot.slane %v940_v62, %v935_v49 }
  0xae   : > { %v4587_v43 = vrot.slane %v944_v63, %v935_v49  ;;  %v4593_v50 = vrot.slane %v956_v3, %v935_v49  ;;  %8545 = vst [vmem:[#allocation14_spill] sm:$0xff] %v4595_v51 }
  0xaf   : > { %8540 = vst [vmem:[#allocation9_spill] sm:$0xff] %v4585_v42  ;;  %v4597_v52 = vrot.slane %v964_v1, %v935_v49  ;;  %v4601_v53 = vrot.slane %v972_v5, %v935_v49 }
  0xb0   : > { %8541 = vst [vmem:[#allocation10_spill] sm:$0xff] %v4587_v43  ;;  %8544 = vst [vmem:[#allocation13_spill] sm:$0xff] %v4593_v50 }
  0xb1   : > { %1680 = vperm.xlu1 %4238, %v4412_v6   ;;  %1692 = vperm.xlu0 %4237, %v4417_v7   ;;  %v4589_v6 = vrot.slane %v948_v0, %v935_v49  ;;  %v4591_v7 = vrot.slane %v952_v2, %v935_v49  ;;  %8546 = vst [vmem:[#allocation15_spill] sm:$0xff] %v4597_v52  ;;  %8548 = vst [vmem:[#allocation17_spill] sm:$0xff] %v4601_v53 }
  0xb2   : > { %v243_v40 = vpop.permute.xlu1 %242  ;;  %v233_v41 = vpop.permute.xlu0 %232 }
  0xb3   : > { %8542 = vst [vmem:[#allocation11_spill] sm:$0xff] %v4589_v6  ;;  %8543 = vst [vmem:[#allocation12_spill] sm:$0xff] %v4591_v7  ;;  %v4604_v54 = vmul.f32 %v4561_v56, %v243_v40  ;;  %v4607_v55 = vmul.f32 %v4563_v57, %v243_v40  ;;  %v4610_v61 = vmul.f32 %v4565_v58, %v243_v40 }
  0xb4   : > { %v4613_v62 = vmul.f32 %v4567_v59, %v243_v40  ;;  %v4617_v63 = vmul.f32 %v4569_v60, %v243_v40  ;;  %v4620_v49 = vmul.f32 %v4573_v44, %v243_v40  ;;  %v4623_v0 = vmul.f32 %v4575_v45, %v243_v40 }
  0xb5   : > { %8549 = vst [vmem:[#allocation18_spill] sm:$0xff] %v4604_v54  ;;  %8550 = vst [vmem:[#allocation19_spill] sm:$0xff] %v4607_v55  ;;  %1688 = vperm.xlu1 %4238, %v4420_v8   ;;  %v4626_v2 = vmul.f32 %v4577_v46, %v243_v40  ;;  %1700 = vperm.xlu0 %4237, %v4425_v9   ;;  %v4630_v1 = vmul.f32 %v4579_v47, %v243_v40 }
  0xb6   : > { %8551 = vst [vmem:[#allocation20_spill] sm:$0xff] %v4610_v61  ;;  %8552 = vst [vmem:[#allocation21_spill] sm:$0xff] %v4613_v62  ;;  %v248_v3 = vpop.permute.xlu1 %247  ;;  %v238_v4 = vpop.permute.xlu0 %237  ;;  %v4633_v8 = vmul.f32 %v4581_v39, %v243_v40  ;;  %v4636_v38 = vmul.f32 %v4561_v56, %v233_v41  ;;  %v4639_v5 = vmul.f32 %v4563_v57, %v233_v41 }
  0xb7   : > { %8553 = vst [vmem:[#allocation22_spill] sm:$0xff] %v4617_v63  ;;  %8554 = vst [vmem:[#allocation23_spill] sm:$0xff] %v4620_v49  ;;  %v4642_v34 = vmul.f32 %v4565_v58, %v233_v41  ;;  %v4645_v36 = vmul.f32 %v4567_v59, %v233_v41  ;;  %v4648_v9 = vmul.f32 %v4569_v60, %v233_v41 }
  0xb8   : > { %8555 = vst [vmem:[#allocation24_spill] sm:$0xff] %v4623_v0  ;;  %8556 = vst [vmem:[#allocation25_spill] sm:$0xff] %v4626_v2  ;;  %v4651_v33 = vmul.f32 %v4573_v44, %v233_v41  ;;  %v4654_v40 = vmul.f32 %v4575_v45, %v233_v41  ;;  %v4657_v35 = vmul.f32 %v4577_v46, %v233_v41 }
  0xb9   : > { %8557 = vst [vmem:[#allocation26_spill] sm:$0xff] %v4630_v1  ;;  %8558 = vst [vmem:[#allocation27_spill] sm:$0xff] %v4633_v8  ;;  %v4660_v8 = vmul.f32 %v4579_v47, %v233_v41  ;;  %1696 = vperm.xlu1 %4238, %v4428_v10   ;;  %1708 = vperm.xlu0 %4237, %v4433_v11   ;;  %v4683_v10 = vmul.f32 %v4573_v44, %v248_v3 }
  0xba   : > { %8559 = vst [vmem:[#allocation28_spill] sm:$0xff] %v4642_v34  ;;  %8560 = vst [vmem:[#allocation29_spill] sm:$0xff] %v4645_v36  ;;  %v4663_v34 = vmul.f32 %v4581_v39, %v233_v41  ;;  %v4667_v36 = vmul.f32 %v4561_v56, %v248_v3  ;;  %v253_v1 = vpop.permute.xlu0 %252  ;;  %v4680_v41 = vmul.f32 %v4569_v60, %v248_v3 }
  0xbb   : > { %8561 = vst [vmem:[#allocation30_spill] sm:$0xff] %v4648_v9  ;;  %8562 = vst [vmem:[#allocation31_spill] sm:$0xff] %v4651_v33  ;;  %v4670_v9 = vmul.f32 %v4563_v57, %v248_v3  ;;  %v4673_v33 = vmul.f32 %v4565_v58, %v248_v3  ;;  %v4698_v11 = vmul.f32 %v4561_v56, %v238_v4 }
  0xbc   : > { %8563 = vst [vmem:[#allocation32_spill] sm:$0xff] %v4654_v40  ;;  %8564 = vst [vmem:[#allocation33_spill] sm:$0xff] %v4657_v35  ;;  %v4676_v40 = vmul.f32 %v4567_v59, %v248_v3  ;;  %v258_v35 = vpop.permute.xlu1 %257  ;;  %v4723_v2 = vmul.f32 %v4579_v47, %v238_v4  ;;  %v4726_v0 = vmul.f32 %v4581_v39, %v238_v4 }
  0xbd   : > { %8565 = vst [vmem:[#allocation34_spill] sm:$0xff] %v4667_v36  ;;  %8566 = vst [vmem:[#allocation35_spill] sm:$0xff] %v4670_v9  ;;  %v4686_v36 = vmul.f32 %v4575_v45, %v248_v3  ;;  %v4689_v9 = vmul.f32 %v4577_v46, %v248_v3  ;;  %1704 = vperm.xlu1 %4238, %v4436_v12   ;;  %1716 = vperm.xlu0 %4237, %v4441_v13  }
  0xbe   : > { %8567 = vst [vmem:[#allocation36_spill] sm:$0xff] %v4673_v33  ;;  %8568 = vst [vmem:[#allocation37_spill] sm:$0xff] %v4676_v40  ;;  %v4692_v33 = vmul.f32 %v4579_v47, %v248_v3  ;;  %v4695_v40 = vmul.f32 %v4581_v39, %v248_v3  ;;  %v4717_v3 = vmul.f32 %v4575_v45, %v238_v4  ;;  %v263_v63 = vpop.permute.xlu0 %262 }
  0xbf   : > { %8569 = vst [vmem:[#allocation38_spill] sm:$0xff] %v4680_v41  ;;  %8570 = vst [vmem:[#allocation39_spill] sm:$0xff] %v4683_v10  ;;  %v4701_v41 = vmul.f32 %v4563_v57, %v238_v4  ;;  %v4704_v10 = vmul.f32 %v4565_v58, %v238_v4  ;;  %v4730_v62 = vmul.f32 %v4561_v56, %v258_v35 }
  0xc0   : > { %8571 = vst [vmem:[#allocation40_spill] sm:$0xff] %v4686_v36  ;;  %8572 = vst [vmem:[#allocation41_spill] sm:$0xff] %v4689_v9  ;;  %v4707_v36 = vmul.f32 %v4567_v59, %v238_v4  ;;  %v4710_v9 = vmul.f32 %v4569_v60, %v238_v4  ;;  %v268_v49 = vpop.permute.xlu1 %267  ;;  %v4733_v12 = vmul.f32 %v4563_v57, %v258_v35 }
  0xc1   : > { %8573 = vst [vmem:[#allocation42_spill] sm:$0xff] %v4692_v33  ;;  %8574 = vst [vmem:[#allocation43_spill] sm:$0xff] %v4695_v40  ;;  %v4713_v33 = vmul.f32 %v4573_v44, %v238_v4  ;;  %v4720_v40 = vmul.f32 %v4577_v46, %v238_v4  ;;  %v4736_v61 = vmul.f32 %v4565_v58, %v258_v35  ;;  %1712 = vperm.xlu1 %4238, %v4444_v14  }
  0xc2   : > { %8575 = vst [vmem:[#allocation44_spill] sm:$0xff] %v4730_v62  ;;  %8576 = vst [vmem:[#allocation45_spill] sm:$0xff] %v4733_v12  ;;  %v4739_v55 = vmul.f32 %v4567_v59, %v258_v35  ;;  %v4742_v54 = vmul.f32 %v4569_v60, %v258_v35  ;;  %v4745_v4 = vmul.f32 %v4573_v44, %v258_v35  ;;  %1724 = vperm.xlu0 %4237, %v4449_v15  }
  0xc3   : > { %8577 = vst [vmem:[#allocation46_spill] sm:$0xff] %v4736_v61  ;;  %v4748_v13 = vmul.f32 %v4575_v45, %v258_v35  ;;  %v4751_v62 = vmul.f32 %v4577_v46, %v258_v35  ;;  %v4754_v12 = vmul.f32 %v4579_v47, %v258_v35  ;;  %v4757_v61 = vmul.f32 %v4581_v39, %v258_v35 }
  0xc4   : > { %8578 = vst [vmem:[#allocation47_spill] sm:$0xff] %v4739_v55  ;;  %8579 = vst [vmem:[#allocation48_spill] sm:$0xff] %v4742_v54  ;;  %v4760_v55 = vmul.f32 %v4561_v56, %v253_v1  ;;  %v4763_v54 = vmul.f32 %v4563_v57, %v253_v1  ;;  %v4776_v35 = vmul.f32 %v4573_v44, %v253_v1 }
  0xc5   : > { %8580 = vst [vmem:[#allocation49_spill] sm:$0xff] %v4745_v4  ;;  %8581 = vst [vmem:[#allocation50_spill] sm:$0xff] %v4748_v13  ;;  %v4767_v4 = vmul.f32 %v4565_v58, %v253_v1  ;;  %v4770_v13 = vmul.f32 %v4567_v59, %v253_v1  ;;  %v4783_v14 = vmul.f32 %v4577_v46, %v253_v1  ;;  %1720 = vperm.xlu1 %4238, %v4452_v16  }
  0xc6   : > { %8582 = vst [vmem:[#allocation51_spill] sm:$0xff] %v4751_v62  ;;  %8583 = vst [vmem:[#allocation52_spill] sm:$0xff] %v4754_v12  ;;  %v4773_v62 = vmul.f32 %v4569_v60, %v253_v1  ;;  %v273_v12 = vpop.permute.xlu0 %272  ;;  %v4798_v15 = vmul.f32 %v4565_v58, %v268_v49  ;;  %1732 = vperm.xlu0 %4237, %v4457_v17   ;;  %v4833_v16 = vmul.f32 %v4567_v59, %v263_v63 }
  0xc7   : > { %8584 = vst [vmem:[#allocation53_spill] sm:$0xff] %v4757_v61  ;;  %8585 = vst [vmem:[#allocation54_spill] sm:$0xff] %v4763_v54  ;;  %v278_v61 = vpop.permute.xlu1 %277  ;;  %v4780_v54 = vmul.f32 %v4575_v45, %v253_v1  ;;  %v4848_v17 = vmul.f32 %v4579_v47, %v263_v63 }
  0xc8   : > { %8586 = vst [vmem:[#allocation55_spill] sm:$0xff] %v4767_v4  ;;  %8587 = vst [vmem:[#allocation56_spill] sm:$0xff] %v4770_v13  ;;  %v4786_v4 = vmul.f32 %v4579_v47, %v253_v1  ;;  %v4789_v13 = vmul.f32 %v4581_v39, %v253_v1  ;;  %v4810_v1 = vmul.f32 %v4575_v45, %v268_v49 }
  0xc9   : > { %8588 = vst [vmem:[#allocation57_spill] sm:$0xff] %v4773_v62  ;;  %8589 = vst [vmem:[#allocation58_spill] sm:$0xff] %v4776_v35  ;;  %v4792_v62 = vmul.f32 %v4561_v56, %v268_v49  ;;  %v4795_v35 = vmul.f32 %v4563_v57, %v268_v49  ;;  %1728 = vperm.xlu1 %4238, %v4460_v18   ;;  %v4885_v18 = vmul.f32 %v4581_v39, %v278_v61 }
  0xca   : > { %8590 = vst [vmem:[#allocation59_spill] sm:$0xff] %v4780_v54  ;;  %8591 = vst [vmem:[#allocation60_spill] sm:$0xff] %v4783_v14  ;;  %v4801_v54 = vmul.f32 %v4567_v59, %v268_v49  ;;  %v4804_v14 = vmul.f32 %v4569_v60, %v268_v49  ;;  %1740 = vperm.xlu0 %4237, %v4465_v19   ;;  %v4897_v19 = vmul.f32 %v4567_v59, %v273_v12 }
  0xcb   : > { %8592 = vst [vmem:[#allocation61_spill] sm:$0xff] %v4786_v4  ;;  %8593 = vst [vmem:[#allocation62_spill] sm:$0xff] %v4792_v62  ;;  %v4807_v4 = vmul.f32 %v4573_v44, %v268_v49  ;;  %v4813_v62 = vmul.f32 %v4577_v46, %v268_v49 }
  0xcc   : > { %8594 = vst [vmem:[#allocation63_spill] sm:$0xff] %v4795_v35  ;;  %8595 = vst [vmem:[#allocation64_spill] sm:$0xff] %v4798_v15  ;;  %v4817_v35 = vmul.f32 %v4579_v47, %v268_v49  ;;  %v4820_v15 = vmul.f32 %v4581_v39, %v268_v49  ;;  %v4839_v49 = vmul.f32 %v4573_v44, %v263_v63 }
  0xcd   : > { %8596 = vst [vmem:[#allocation65_spill] sm:$0xff] %v4801_v54  ;;  %8597 = vst [vmem:[#allocation66_spill] sm:$0xff] %v4804_v14  ;;  %v4823_v54 = vmul.f32 %v4561_v56, %v263_v63  ;;  %v4826_v14 = vmul.f32 %v4563_v57, %v263_v63  ;;  %1736 = vperm.xlu1 %4238, %v4468_v20  }
  0xce   : > { %8598 = vst [vmem:[#allocation67_spill] sm:$0xff] %v4807_v4  ;;  %8599 = vst [vmem:[#allocation68_spill] sm:$0xff] %v4810_v1  ;;  %v288_v1 = vpop.permute.xlu1 %287  ;;  %v283_v4 = vpop.permute.xlu0 %282  ;;  %1748 = vperm.xlu0 %4237, %v4473_v21  }
  0xcf   : > { %8600 = vst [vmem:[#allocation69_spill] sm:$0xff] %v4813_v62  ;;  %8601 = vst [vmem:[#allocation70_spill] sm:$0xff] %v4817_v35  ;;  %v4830_v62 = vmul.f32 %v4565_v58, %v263_v63  ;;  %v4836_v35 = vmul.f32 %v4569_v60, %v263_v63  ;;  %v4935_v20 = vmul.f32 %v4573_v44, %v288_v1 }
  0xd0   : > { %8602 = vst [vmem:[#allocation71_spill] sm:$0xff] %v4820_v15  ;;  %8603 = vst [vmem:[#allocation72_spill] sm:$0xff] %v4826_v14  ;;  %v4842_v15 = vmul.f32 %v4575_v45, %v263_v63  ;;  %v4845_v14 = vmul.f32 %v4577_v46, %v263_v63  ;;  %v4949_v21 = vmul.f32 %v4581_v39, %v288_v1 }
  0xd1   : > { %8604 = vst [vmem:[#allocation73_spill] sm:$0xff] %v4830_v62  ;;  %8605 = vst [vmem:[#allocation74_spill] sm:$0xff] %v4833_v16  ;;  %v4851_v62 = vmul.f32 %v4581_v39, %v263_v63  ;;  %v4854_v16 = vmul.f32 %v4561_v56, %v278_v61  ;;  %v4870_v63 = vmul.f32 %v4573_v44, %v278_v61  ;;  %1744 = vperm.xlu1 %4238, %v4476_v22  }
  0xd2   : > { %8606 = vst [vmem:[#allocation75_spill] sm:$0xff] %v4836_v35  ;;  %8607 = vst [vmem:[#allocation76_spill] sm:$0xff] %v4839_v49  ;;  %v4857_v35 = vmul.f32 %v4563_v57, %v278_v61  ;;  %v4860_v49 = vmul.f32 %v4565_v58, %v278_v61  ;;  %1756 = vperm.xlu0 %4237, %v4481_v23  }
  0xd3   : > { %8608 = vst [vmem:[#allocation77_spill] sm:$0xff] %v4842_v15  ;;  %8609 = vst [vmem:[#allocation78_spill] sm:$0xff] %v4845_v14  ;;  %v4863_v15 = vmul.f32 %v4567_v59, %v278_v61  ;;  %v4867_v14 = vmul.f32 %v4569_v60, %v278_v61 }
  0xd4   : > { %8610 = vst [vmem:[#allocation79_spill] sm:$0xff] %v4851_v62  ;;  %8611 = vst [vmem:[#allocation80_spill] sm:$0xff] %v4854_v16  ;;  %v4873_v62 = vmul.f32 %v4575_v45, %v278_v61  ;;  %v4876_v16 = vmul.f32 %v4577_v46, %v278_v61 }
  0xd5   : > { %8612 = vst [vmem:[#allocation81_spill] sm:$0xff] %v4857_v35  ;;  %8613 = vst [vmem:[#allocation82_spill] sm:$0xff] %v4860_v49  ;;  %v298_v49 = vpop.permute.xlu1 %297  ;;  %v4879_v35 = vpop.permute.xlu0 %292  ;;  %1752 = vperm.xlu1 %4238, %v4484_v24  }
  0xd6   : > { %8614 = vst [vmem:[#allocation83_spill] sm:$0xff] %v4863_v15  ;;  %8615 = vst [vmem:[#allocation84_spill] sm:$0xff] %v4867_v14  ;;  %v4882_v15 = vmul.f32 %v4579_v47, %v278_v61  ;;  %v4888_v14 = vmul.f32 %v4561_v56, %v273_v12  ;;  %v4906_v61 = vmul.f32 %v4575_v45, %v273_v12  ;;  %1760 = vperm.xlu0 %4237, %v4492_v26  }
  0xd7   : > { %8616 = vst [vmem:[#allocation85_spill] sm:$0xff] %v4870_v63  ;;  %8617 = vst [vmem:[#allocation86_spill] sm:$0xff] %v4873_v62  ;;  %v4891_v63 = vmul.f32 %v4563_v57, %v273_v12  ;;  %v4894_v62 = vmul.f32 %v4565_v58, %v273_v12  ;;  %v4987_v22 = vmul.f32 %v4563_v57, %v298_v49 }
  0xd8   : > { %8618 = vst [vmem:[#allocation87_spill] sm:$0xff] %v4876_v16  ;;  %8619 = vst [vmem:[#allocation88_spill] sm:$0xff] %v4882_v15  ;;  %v4900_v16 = vmul.f32 %v4569_v60, %v273_v12  ;;  %v4903_v15 = vmul.f32 %v4573_v44, %v273_v12  ;;  %v5002_v23 = vmul.f32 %v4575_v45, %v298_v49 }
  0xd9   : > { %8620 = vst [vmem:[#allocation89_spill] sm:$0xff] %v4885_v18  ;;  %8621 = vst [vmem:[#allocation90_spill] sm:$0xff] %v4891_v63  ;;  %v4909_v18 = vmul.f32 %v4577_v46, %v273_v12  ;;  %v4912_v63 = vmul.f32 %v4579_v47, %v273_v12  ;;  %v5043_v24 = vmul.f32 %v4575_v45, %v4879_v35 }
  0xda   : > { %8622 = vst [vmem:[#allocation91_spill] sm:$0xff] %v4894_v62  ;;  %8623 = vst [vmem:[#allocation92_spill] sm:$0xff] %v4897_v19  ;;  %v4915_v62 = vmul.f32 %v4581_v39, %v273_v12  ;;  %v4919_v19 = vmul.f32 %v4561_v56, %v288_v1  ;;  %v4932_v12 = vmul.f32 %v4569_v60, %v288_v1  ;;  %1764 = vperm.xlu0 %4237, %v4489_v25  }
  0xdb   : > { %8624 = vst [vmem:[#allocation93_spill] sm:$0xff] %v4900_v16  ;;  %8625 = vst [vmem:[#allocation94_spill] sm:$0xff] %v4903_v15  ;;  %v4922_v16 = vmul.f32 %v4563_v57, %v288_v1  ;;  %v4925_v15 = vmul.f32 %v4565_v58, %v288_v1 }
  0xdc   : > { %8626 = vst [vmem:[#allocation95_spill] sm:$0xff] %v4906_v61  ;;  %8627 = vst [vmem:[#allocation96_spill] sm:$0xff] %v4912_v63  ;;  %v4928_v61 = vmul.f32 %v4567_v59, %v288_v1  ;;  %v308_v63 = vpop.permute.xlu1 %307 }
  0xdd   : > { %8628 = vst [vmem:[#allocation97_spill] sm:$0xff] %v4915_v62  ;;  %8629 = vst [vmem:[#allocation98_spill] sm:$0xff] %v4919_v19  ;;  %v4938_v19 = vmul.f32 %v4575_v45, %v288_v1  ;;  %v4943_v62 = vpop.permute.xlu0 %302  ;;  %v5058_v26 = vmul.f32 %v4561_v56, %v308_v63 }
  0xde   : > { %8630 = vst [vmem:[#allocation99_spill] sm:$0xff] %v4922_v16  ;;  %8631 = vst [vmem:[#allocation100_spill] sm:$0xff] %v4925_v15  ;;  %v4941_v16 = vmul.f32 %v4577_v46, %v288_v1  ;;  %v4946_v15 = vmul.f32 %v4579_v47, %v288_v1  ;;  %v4971_v1 = vmul.f32 %v4575_v45, %v283_v4  ;;  %1768 = vperm.xlu0 %4237, %v4500_v28  }
  0xdf   : > { %8632 = vst [vmem:[#allocation101_spill] sm:$0xff] %v4928_v61  ;;  %8633 = vst [vmem:[#allocation102_spill] sm:$0xff] %v4932_v12  ;;  %v4952_v61 = vmul.f32 %v4561_v56, %v283_v4  ;;  %v4955_v12 = vmul.f32 %v4563_v57, %v283_v4 }
  0xe0   : > { %8634 = vst [vmem:[#allocation103_spill] sm:$0xff] %v4935_v20  ;;  %8635 = vst [vmem:[#allocation104_spill] sm:$0xff] %v4938_v19  ;;  %v4958_v20 = vmul.f32 %v4565_v58, %v283_v4  ;;  %v4961_v19 = vmul.f32 %v4567_v59, %v283_v4 }
  0xe1   : > { %8636 = vst [vmem:[#allocation105_spill] sm:$0xff] %v4941_v16  ;;  %8637 = vst [vmem:[#allocation106_spill] sm:$0xff] %v4946_v15  ;;  %v4964_v16 = vmul.f32 %v4569_v60, %v283_v4  ;;  %v4967_v15 = vmul.f32 %v4573_v44, %v283_v4 }
  0xe2   : > { %8638 = vst [vmem:[#allocation107_spill] sm:$0xff] %v4949_v21  ;;  %8639 = vst [vmem:[#allocation108_spill] sm:$0xff] %v4955_v12  ;;  %v4974_v21 = vmul.f32 %v4577_v46, %v283_v4  ;;  %v4977_v12 = vmul.f32 %v4579_v47, %v283_v4  ;;  %1772 = vperm.xlu0 %4237, %v4497_v27  }
  0xe3   : > { %8640 = vst [vmem:[#allocation109_spill] sm:$0xff] %v4958_v20  ;;  %8641 = vst [vmem:[#allocation110_spill] sm:$0xff] %v4961_v19  ;;  %v4980_v20 = vmul.f32 %v4581_v39, %v283_v4  ;;  %v4984_v19 = vmul.f32 %v4561_v56, %v298_v49  ;;  %v4999_v4 = vmul.f32 %v4573_v44, %v298_v49 }
  0xe4   : > { %8642 = vst [vmem:[#allocation111_spill] sm:$0xff] %v4964_v16  ;;  %8643 = vst [vmem:[#allocation112_spill] sm:$0xff] %v4971_v1  ;;  %v318_v16 = vpop.permute.xlu1 %317  ;;  %v4990_v1 = vmul.f32 %v4565_v58, %v298_v49 }
  0xe5   : > { %8644 = vst [vmem:[#allocation113_spill] sm:$0xff] %v4974_v21  ;;  %8645 = vst [vmem:[#allocation114_spill] sm:$0xff] %v4977_v12  ;;  %v4993_v21 = vmul.f32 %v4567_v59, %v298_v49  ;;  %v4996_v12 = vmul.f32 %v4569_v60, %v298_v49 }
  0xe6   : > { %8646 = vst [vmem:[#allocation115_spill] sm:$0xff] %v4984_v19  ;;  %8647 = vst [vmem:[#allocation116_spill] sm:$0xff] %v4987_v22  ;;  %v5005_v19 = vmul.f32 %v4577_v46, %v298_v49  ;;  %v5008_v22 = vmul.f32 %v4579_v47, %v298_v49  ;;  %1776 = vperm.xlu0 %4237, %v4508_v30  }
  0xe7   : > { %8648 = vst [vmem:[#allocation117_spill] sm:$0xff] %v4990_v1  ;;  %8649 = vst [vmem:[#allocation118_spill] sm:$0xff] %v4993_v21  ;;  %v5011_v1 = vmul.f32 %v4581_v39, %v298_v49  ;;  %v5015_v21 = vmul.f32 %v4561_v56, %v4879_v35  ;;  %v5032_v49 = vmul.f32 %v4569_v60, %v4879_v35 }
  0xe8   : > { %8650 = vst [vmem:[#allocation119_spill] sm:$0xff] %v4996_v12  ;;  %8651 = vst [vmem:[#allocation120_spill] sm:$0xff] %v4999_v4  ;;  %v5019_v12 = vmul.f32 %v4563_v57, %v4879_v35  ;;  %v313_v4 = vpop.permute.xlu0 %312 }
  0xe9   : > { %8652 = vst [vmem:[#allocation121_spill] sm:$0xff] %v5002_v23  ;;  %8653 = vst [vmem:[#allocation122_spill] sm:$0xff] %v5005_v19  ;;  %v5024_v19 = vmul.f32 %v4565_v58, %v4879_v35  ;;  %v5028_v23 = vmul.f32 %v4567_v59, %v4879_v35 }
  0xea   : > { %8654 = vst [vmem:[#allocation123_spill] sm:$0xff] %v5008_v22  ;;  %8655 = vst [vmem:[#allocation124_spill] sm:$0xff] %v5011_v1  ;;  %v5036_v1 = vmul.f32 %v4573_v44, %v4879_v35  ;;  %v5039_v22 = vpop.permute.xlu1 %327  ;;  %1780 = vperm.xlu0 %4237, %v4505_v29  }
  0xeb   : > { %8656 = vst [vmem:[#allocation125_spill] sm:$0xff] %v5019_v12  ;;  %8657 = vst [vmem:[#allocation126_spill] sm:$0xff] %v5024_v19  ;;  %v5047_v19 = vmul.f32 %v4577_v46, %v4879_v35  ;;  %v5067_v12 = vmul.f32 %v4567_v59, %v308_v63 }
  0xec   : > { %8658 = vst [vmem:[#allocation127_spill] sm:$0xff] %v5028_v23  ;;  %8659 = vst [vmem:[#allocation128_spill] sm:$0xff] %v5032_v49  ;;  %v5051_v23 = vmul.f32 %v4579_v47, %v4879_v35  ;;  %v5055_v49 = vmul.f32 %v4581_v39, %v4879_v35  ;;  %v5076_v35 = vmul.f32 %v4575_v45, %v308_v63 }
  0xed   : > { %8660 = vst [vmem:[#allocation129_spill] sm:$0xff] %v5036_v1  ;;  %8661 = vst [vmem:[#allocation130_spill] sm:$0xff] %v5043_v24  ;;  %v5061_v1 = vmul.f32 %v4563_v57, %v308_v63  ;;  %v5064_v24 = vmul.f32 %v4565_v58, %v308_v63 }
  0xee   : > { %8662 = vst [vmem:[#allocation131_spill] sm:$0xff] %v5047_v19  ;;  %8663 = vst [vmem:[#allocation132_spill] sm:$0xff] %v5051_v23  ;;  %v5070_v19 = vmul.f32 %v4569_v60, %v308_v63  ;;  %v5073_v23 = vmul.f32 %v4573_v44, %v308_v63  ;;  %1784 = vperm.xlu0 %4237, %v4516_v32  }
  0xef   : > { %8664 = vst [vmem:[#allocation133_spill] sm:$0xff] %v5055_v49  ;;  %8665 = vst [vmem:[#allocation134_spill] sm:$0xff] %v5058_v26  ;;  %v5079_v26 = vmul.f32 %v4577_v46, %v308_v63  ;;  %v8673_v49 = vmov 1  }
  0xf0   : > { %8666 = vst [vmem:[#allocation135_spill] sm:$0xff] %v5061_v1  ;;  %8667 = vst [vmem:[#allocation136_spill] sm:$0xff] %v5064_v24  ;;  %4239 = vset.pattern.permute.xlu1 %v8673_v49  ;;  %v5083_v1 = vmul.f32 %v4579_v47, %v308_v63  ;;  %v5086_v24 = vmul.f32 %v4581_v39, %v308_v63  ;;  %v5103_v49 = vmul.f32 %v4567_v59, %v4943_v62 }
  0xf1   : > { %8668 = vst [vmem:[#allocation137_spill] sm:$0xff] %v5067_v12  ;;  %8669 = vst [vmem:[#allocation138_spill] sm:$0xff] %v5070_v19  ;;  %v5090_v19 = vmul.f32 %v4561_v56, %v4943_v62  ;;  %v5107_v63 = vmul.f32 %v4569_v60, %v4943_v62  ;;  %v323_v12 = vpop.permute.xlu0 %322  ;;  %906 = vperm.xlu1 %4239, %v4489_v25   ;;  %v5134_v25 = vmul.f32 %v4563_v57, %v318_v16 }
  0xf2   : > { %8670 = vst [vmem:[#allocation139_spill] sm:$0xff] %v5073_v23  ;;  %8671 = vst [vmem:[#allocation140_spill] sm:$0xff] %v5076_v35  ;;  %v5094_v23 = vmul.f32 %v4563_v57, %v4943_v62  ;;  %v5111_v35 = vmul.f32 %v4573_v44, %v4943_v62 }
  0xf3   : > { %8672 = vst [vmem:[#allocation141_spill] sm:$0xff] %v5079_v26  ;;  %8674 = vst [vmem:[#allocation142_spill] sm:$0xff] %v5083_v1  ;;  %v5099_v26 = vmul.f32 %v4565_v58, %v4943_v62  ;;  %v5120_v1 = vmul.f32 %v4577_v46, %v4943_v62 }
  0xf4   : > { %8675 = vst [vmem:[#allocation143_spill] sm:$0xff] %v5086_v24  ;;  %8676 = vst [vmem:[#allocation144_spill] sm:$0xff] %v5094_v23  ;;  %v5116_v24 = vmul.f32 %v4575_v45, %v4943_v62  ;;  %v5143_v23 = vmul.f32 %v4569_v60, %v318_v16 }
  0xf5   : > { %8677 = vst [vmem:[#allocation145_spill] sm:$0xff] %v5099_v26  ;;  %8678 = vst [vmem:[#allocation146_spill] sm:$0xff] %v5103_v49  ;;  %v5124_v49 = vmul.f32 %v4579_v47, %v4943_v62  ;;  %v5131_v26 = vmul.f32 %v4561_v56, %v318_v16  ;;  %910 = vperm.xlu1 %4239, %v4500_v28   ;;  %v5187_v28 = vmul.f32 %v4579_v47, %v313_v4 }
  0xf6   : > { %8679 = vst [vmem:[#allocation147_spill] sm:$0xff] %v5107_v63  ;;  %8680 = vst [vmem:[#allocation148_spill] sm:$0xff] %v5111_v35  ;;  %v5128_v63 = vmul.f32 %v4581_v39, %v4943_v62  ;;  %v338_v35 = vpop.permute.xlu1 %337  ;;  %v5149_v62 = vmul.f32 %v4575_v45, %v318_v16 }
  0xf7   : > { %8681 = vst [vmem:[#allocation149_spill] sm:$0xff] %v5116_v24  ;;  %8682 = vst [vmem:[#allocation150_spill] sm:$0xff] %v5120_v1  ;;  %v5137_v24 = vmul.f32 %v4565_v58, %v318_v16  ;;  %v5140_v1 = vmul.f32 %v4567_v59, %v318_v16 }
  0xf8   : > { %8683 = vst [vmem:[#allocation151_spill] sm:$0xff] %v5124_v49  ;;  %8684 = vst [vmem:[#allocation152_spill] sm:$0xff] %v5131_v26  ;;  %v5146_v49 = vmul.f32 %v4573_v44, %v318_v16  ;;  %v5152_v26 = vmul.f32 %v4577_v46, %v318_v16 }
  0xf9   : > { %8685 = vst [vmem:[#allocation153_spill] sm:$0xff] %v5134_v25  ;;  %8686 = vst [vmem:[#allocation154_spill] sm:$0xff] %v5137_v24  ;;  %v5156_v25 = vmul.f32 %v4579_v47, %v318_v16  ;;  %v5159_v24 = vmul.f32 %v4581_v39, %v318_v16  ;;  %v5178_v16 = vmul.f32 %v4573_v44, %v313_v4  ;;  %914 = vperm.xlu1 %4239, %v4497_v27  }
  0xfa   : > { %8687 = vst [vmem:[#allocation155_spill] sm:$0xff] %v5140_v1  ;;  %8688 = vst [vmem:[#allocation156_spill] sm:$0xff] %v5143_v23  ;;  %v5162_v1 = vmul.f32 %v4561_v56, %v313_v4  ;;  %v5165_v23 = vmul.f32 %v4563_v57, %v313_v4  ;;  %v5247_v27 = vmul.f32 %v4569_v60, %v323_v12 }
  0xfb   : > { %8689 = vst [vmem:[#allocation157_spill] sm:$0xff] %v5146_v49  ;;  %8690 = vst [vmem:[#allocation158_spill] sm:$0xff] %v5149_v62  ;;  %v5169_v62 = vmul.f32 %v4565_v58, %v313_v4  ;;  %v5175_v49 = vmul.f32 %v4569_v60, %v313_v4 }
  0xfc   : > { %8691 = vst [vmem:[#allocation159_spill] sm:$0xff] %v5152_v26  ;;  %8692 = vst [vmem:[#allocation160_spill] sm:$0xff] %v5156_v25  ;;  %v5172_v26 = vmul.f32 %v4567_v59, %v313_v4  ;;  %v5184_v25 = vmul.f32 %v4577_v46, %v313_v4 }
  0xfd   : > { %8693 = vst [vmem:[#allocation161_spill] sm:$0xff] %v5159_v24  ;;  %8694 = vst [vmem:[#allocation162_spill] sm:$0xff] %v5165_v23  ;;  %v5181_v24 = vmul.f32 %v4575_v45, %v313_v4  ;;  %v333_v23 = vpop.permute.xlu0 %332  ;;  %918 = vperm.xlu1 %4239, %v4508_v30  }
  0xfe   : > { %8695 = vst [vmem:[#allocation163_spill] sm:$0xff] %v5169_v62  ;;  %8696 = vst [vmem:[#allocation164_spill] sm:$0xff] %v5172_v26  ;;  %v5190_v62 = vmul.f32 %v4581_v39, %v313_v4  ;;  %v5194_v26 = vmul.f32 %v4561_v56, %v5039_v22  ;;  %v5211_v4 = vmul.f32 %v4569_v60, %v5039_v22 }
  0xff   : > { %8697 = vst [vmem:[#allocation165_spill] sm:$0xff] %v5178_v16  ;;  %8698 = vst [vmem:[#allocation166_spill] sm:$0xff] %v5181_v24  ;;  %v5198_v16 = vmul.f32 %v4563_v57, %v5039_v22  ;;  %v5202_v24 = vmul.f32 %v4565_v58, %v5039_v22  ;;  %v5297_v30 = vmul.f32 %v4561_v56, %v333_v23 }
 0x100   : > { %8699 = vst [vmem:[#allocation167_spill] sm:$0xff] %v5184_v25  ;;  %8700 = vst [vmem:[#allocation168_spill] sm:$0xff] %v5187_v28  ;;  %v5206_v25 = vmul.f32 %v4567_v59, %v5039_v22  ;;  %v348_v28 = vpop.permute.xlu1 %347 }
 0x101   : > { %8701 = vst [vmem:[#allocation169_spill] sm:$0xff] %v5190_v62  ;;  %8702 = vst [vmem:[#allocation170_spill] sm:$0xff] %v5194_v26  ;;  %v5215_v26 = vmul.f32 %v4573_v44, %v5039_v22  ;;  %v5238_v62 = vmul.f32 %v4563_v57, %v323_v12  ;;  %922 = vperm.xlu1 %4239, %v4505_v29   ;;  %v5347_v29 = vmul.f32 %v4575_v45, %v348_v28 }
 0x102   : > { %8703 = vst [vmem:[#allocation171_spill] sm:$0xff] %v5198_v16  ;;  %8704 = vst [vmem:[#allocation172_spill] sm:$0xff] %v5202_v24  ;;  %v5219_v16 = vmul.f32 %v4575_v45, %v5039_v22  ;;  %v5223_v24 = vmul.f32 %v4577_v46, %v5039_v22 }
 0x103   : > { %8705 = vst [vmem:[#allocation173_spill] sm:$0xff] %v5206_v25  ;;  %8706 = vst [vmem:[#allocation174_spill] sm:$0xff] %v5211_v4  ;;  %v5228_v25 = vmul.f32 %v4579_v47, %v5039_v22  ;;  %v5232_v4 = vmul.f32 %v4581_v39, %v5039_v22  ;;  %v5253_v22 = vmul.f32 %v4575_v45, %v323_v12 }
 0x104   : > { %8707 = vst [vmem:[#allocation175_spill] sm:$0xff] %v5215_v26  ;;  %8708 = vst [vmem:[#allocation176_spill] sm:$0xff] %v5219_v16  ;;  %v5235_v26 = vmul.f32 %v4561_v56, %v323_v12  ;;  %v5241_v16 = vmul.f32 %v4565_v58, %v323_v12 }
 0x105   : > { %8709 = vst [vmem:[#allocation177_spill] sm:$0xff] %v5223_v24  ;;  %8710 = vst [vmem:[#allocation178_spill] sm:$0xff] %v5228_v25  ;;  %v5244_v24 = vmul.f32 %v4567_v59, %v323_v12  ;;  %v5250_v25 = vmul.f32 %v4573_v44, %v323_v12  ;;  %926 = vperm.xlu1 %4239, %v4516_v32  }
 0x106   : > { %8711 = vst [vmem:[#allocation179_spill] sm:$0xff] %v5232_v4  ;;  %8712 = vst [vmem:[#allocation180_spill] sm:$0xff] %v5238_v62  ;;  %v5256_v4 = vmul.f32 %v4577_v46, %v323_v12  ;;  %v5259_v62 = vmul.f32 %v4579_v47, %v323_v12 }
 0x107   : > { %8713 = vst [vmem:[#allocation181_spill] sm:$0xff] %v5241_v16  ;;  %8714 = vst [vmem:[#allocation182_spill] sm:$0xff] %v5244_v24  ;;  %v5262_v16 = vmul.f32 %v4581_v39, %v323_v12  ;;  %v5266_v24 = vmul.f32 %v4561_v56, %v338_v35  ;;  %v5279_v12 = vmul.f32 %v4569_v60, %v338_v35 }
 0x108   : > { %8715 = vst [vmem:[#allocation183_spill] sm:$0xff] %v5247_v27  ;;  %8716 = vst [vmem:[#allocation184_spill] sm:$0xff] %v5250_v25  ;;  %v5269_v27 = vmul.f32 %v4563_v57, %v338_v35  ;;  %v5272_v25 = vmul.f32 %v4565_v58, %v338_v35 }
 0x109   : > { %8717 = vst [vmem:[#allocation185_spill] sm:$0xff] %v5253_v22  ;;  %8718 = vst [vmem:[#allocation186_spill] sm:$0xff] %v5256_v4  ;;  %v5275_v22 = vmul.f32 %v4567_v59, %v338_v35  ;;  %v343_v4 = vpop.permute.xlu0 %342  ;;  %930 = vperm.xlu1 %4239, %v4513_v31  }
 0x10a   : > { %8719 = vst [vmem:[#allocation187_spill] sm:$0xff] %v5259_v62  ;;  %8720 = vst [vmem:[#allocation188_spill] sm:$0xff] %v5262_v16  ;;  %v5282_v16 = vmul.f32 %v4573_v44, %v338_v35  ;;  %v358_v62 = vpop.permute.xlu1 %357 }
 0x10b   : > { %8721 = vst [vmem:[#allocation189_spill] sm:$0xff] %v5266_v24  ;;  %8722 = vst [vmem:[#allocation190_spill] sm:$0xff] %v5269_v27  ;;  %v5285_v24 = vmul.f32 %v4575_v45, %v338_v35  ;;  %v5288_v27 = vmul.f32 %v4577_v46, %v338_v35  ;;  %v5397_v32 = vmul.f32 %v4565_v58, %v358_v62 }
 0x10c   : > { %8723 = vst [vmem:[#allocation191_spill] sm:$0xff] %v5272_v25  ;;  %8724 = vst [vmem:[#allocation192_spill] sm:$0xff] %v5275_v22  ;;  %v5291_v25 = vmul.f32 %v4579_v47, %v338_v35  ;;  %v5294_v22 = vmul.f32 %v4581_v39, %v338_v35  ;;  %v5316_v35 = vmul.f32 %v4575_v45, %v333_v23 }
 0x10d   : > { %8725 = vst [vmem:[#allocation193_spill] sm:$0xff] %v5279_v12  ;;  %8726 = vst [vmem:[#allocation194_spill] sm:$0xff] %v5282_v16  ;;  %v5300_v12 = vmul.f32 %v4563_v57, %v333_v23  ;;  %v5303_v16 = vmul.f32 %v4565_v58, %v333_v23 }
 0x10e   : > { %8727 = vst [vmem:[#allocation195_spill] sm:$0xff] %v5285_v24  ;;  %8728 = vst [vmem:[#allocation196_spill] sm:$0xff] %v5288_v27  ;;  %v5306_v24 = vmul.f32 %v4567_v59, %v333_v23  ;;  %v5309_v27 = vmul.f32 %v4569_v60, %v333_v23 }
 0x10f   : > { %8729 = vst [vmem:[#allocation197_spill] sm:$0xff] %v5291_v25  ;;  %8730 = vst [vmem:[#allocation198_spill] sm:$0xff] %v5294_v22  ;;  %v5312_v25 = vmul.f32 %v4573_v44, %v333_v23  ;;  %v5319_v22 = vmul.f32 %v4577_v46, %v333_v23 }
 0x110   : > { %8731 = vst [vmem:[#allocation199_spill] sm:$0xff] %v5297_v30  ;;  %8732 = vst [vmem:[#allocation200_spill] sm:$0xff] %v5300_v12  ;;  %v5322_v12 = vmul.f32 %v4579_v47, %v333_v23 }
 0x111   : > { %8733 = vst [vmem:[#allocation201_spill] sm:$0xff] %v5303_v16  ;;  %8734 = vst [vmem:[#allocation202_spill] sm:$0xff] %v5306_v24  ;;  %v5325_v16 = vmul.f32 %v4581_v39, %v333_v23  ;;  %v5335_v24 = vmul.f32 %v4565_v58, %v348_v28  ;;  %v5344_v23 = vmul.f32 %v4573_v44, %v348_v28 }
 0x112   : > { %8735 = vst [vmem:[#allocation203_spill] sm:$0xff] %v5309_v27  ;;  %8736 = vst [vmem:[#allocation204_spill] sm:$0xff] %v5312_v25  ;;  %v5329_v27 = vmul.f32 %v4561_v56, %v348_v28  ;;  %v5332_v25 = vmul.f32 %v4563_v57, %v348_v28 }
 0x113   : > { %8737 = vst [vmem:[#allocation205_spill] sm:$0xff] %v5316_v35  ;;  %8738 = vst [vmem:[#allocation206_spill] sm:$0xff] %v5319_v22  ;;  %v5338_v35 = vmul.f32 %v4567_v59, %v348_v28  ;;  %v5341_v22 = vmul.f32 %v4569_v60, %v348_v28 }
 0x114   : > { %8739 = vst [vmem:[#allocation207_spill] sm:$0xff] %v5322_v12  ;;  %8740 = vst [vmem:[#allocation208_spill] sm:$0xff] %v5325_v16  ;;  %v353_v16 = vpop.permute.xlu0 %352 }
 0x115   : > { %8741 = vst [vmem:[#allocation209_spill] sm:$0xff] %v5329_v27  ;;  %8742 = vst [vmem:[#allocation210_spill] sm:$0xff] %v5332_v25  ;;  %v5350_v27 = vmul.f32 %v4577_v46, %v348_v28  ;;  %v5353_v25 = vmul.f32 %v4579_v47, %v348_v28 }
 0x116   : > { %8743 = vst [vmem:[#allocation211_spill] sm:$0xff] %v5335_v24  ;;  %8744 = vst [vmem:[#allocation212_spill] sm:$0xff] %v5338_v35  ;;  %v5356_v24 = vmul.f32 %v4581_v39, %v348_v28  ;;  %v5359_v35 = vmul.f32 %v4561_v56, %v343_v4  ;;  %v5375_v28 = vmul.f32 %v4573_v44, %v343_v4 }
 0x117   : > { %8745 = vst [vmem:[#allocation213_spill] sm:$0xff] %v5341_v22  ;;  %8746 = vst [vmem:[#allocation214_spill] sm:$0xff] %v5344_v23  ;;  %v5362_v22 = vmul.f32 %v4563_v57, %v343_v4  ;;  %v368_v23 = vpop.permute.xlu1 %367 }
 0x118   : > { %8747 = vst [vmem:[#allocation215_spill] sm:$0xff] %v5347_v29  ;;  %8748 = vst [vmem:[#allocation216_spill] sm:$0xff] %v5350_v27  ;;  %v5366_v29 = vmul.f32 %v4565_v58, %v343_v4  ;;  %v5369_v27 = vmul.f32 %v4567_v59, %v343_v4 }
 0x119   : > { %8749 = vst [vmem:[#allocation217_spill] sm:$0xff] %v5353_v25  ;;  %8750 = vst [vmem:[#allocation218_spill] sm:$0xff] %v5356_v24  ;;  %v5372_v25 = vmul.f32 %v4569_v60, %v343_v4  ;;  %v5379_v24 = vmul.f32 %v4575_v45, %v343_v4 }
 0x11a   : > { %8751 = vst [vmem:[#allocation219_spill] sm:$0xff] %v5359_v35  ;;  %8752 = vst [vmem:[#allocation220_spill] sm:$0xff] %v5362_v22  ;;  %v5382_v22 = vmul.f32 %v4577_v46, %v343_v4  ;;  %v5385_v35 = vmul.f32 %v4579_v47, %v343_v4 }
 0x11b   : > { %8753 = vst [vmem:[#allocation221_spill] sm:$0xff] %v5366_v29  ;;  %8754 = vst [vmem:[#allocation222_spill] sm:$0xff] %v5369_v27  ;;  %v5388_v29 = vmul.f32 %v4581_v39, %v343_v4  ;;  %v5391_v27 = vmul.f32 %v4561_v56, %v358_v62  ;;  %v5409_v4 = vmul.f32 %v4575_v45, %v358_v62 }
 0x11c   : > { %8755 = vst [vmem:[#allocation223_spill] sm:$0xff] %v5372_v25  ;;  %8756 = vst [vmem:[#allocation224_spill] sm:$0xff] %v5375_v28  ;;  %v5394_v25 = vmul.f32 %v4563_v57, %v358_v62 }
 0x11d   : > { %8757 = vst [vmem:[#allocation225_spill] sm:$0xff] %v5379_v24  ;;  %8758 = vst [vmem:[#allocation226_spill] sm:$0xff] %v5382_v22  ;;  %v5400_v24 = vmul.f32 %v4567_v59, %v358_v62  ;;  %v5403_v22 = vmul.f32 %v4569_v60, %v358_v62 }
 0x11e   : > { %8759 = vst [vmem:[#allocation227_spill] sm:$0xff] %v5385_v35  ;;  %8760 = vst [vmem:[#allocation228_spill] sm:$0xff] %v5388_v29  ;;  %v5406_v35 = vmul.f32 %v4573_v44, %v358_v62  ;;  %v363_v29 = vpop.permute.xlu0 %362 }
 0x11f   : > { %8761 = vst [vmem:[#allocation229_spill] sm:$0xff] %v5391_v27  ;;  %8762 = vst [vmem:[#allocation230_spill] sm:$0xff] %v5394_v25  ;;  %v5412_v27 = vmul.f32 %v4577_v46, %v358_v62  ;;  %v5415_v25 = vmul.f32 %v4579_v47, %v358_v62 }
 0x120   : > { %8763 = vst [vmem:[#allocation231_spill] sm:$0xff] %v5397_v32  ;;  %8764 = vst [vmem:[#allocation232_spill] sm:$0xff] %v5400_v24  ;;  %v5418_v32 = vmul.f32 %v4581_v39, %v358_v62  ;;  %v5421_v24 = vmul.f32 %v4561_v56, %v353_v16  ;;  %v5437_v62 = vmul.f32 %v4573_v44, %v353_v16 }
 0x121   : > { %8765 = vst [vmem:[#allocation233_spill] sm:$0xff] %v5403_v22  ;;  %8766 = vst [vmem:[#allocation234_spill] sm:$0xff] %v5406_v35  ;;  %v5424_v22 = vmul.f32 %v4563_v57, %v353_v16  ;;  %v5440_v35 = vmul.f32 %v4575_v45, %v353_v16 }
 0x122   : > { %8767 = vst [vmem:[#allocation235_spill] sm:$0xff] %v5409_v4  ;;  %8768 = vst [vmem:[#allocation236_spill] sm:$0xff] %v5412_v27  ;;  %v5428_v4 = vmul.f32 %v4565_v58, %v353_v16  ;;  %v5431_v27 = vmul.f32 %v4567_v59, %v353_v16 }
 0x123   : > { %8769 = vst [vmem:[#allocation237_spill] sm:$0xff] %v5415_v25  ;;  %8770 = vst [vmem:[#allocation238_spill] sm:$0xff] %v5418_v32  ;;  %v5434_v25 = vmul.f32 %v4569_v60, %v353_v16  ;;  %v378_v32 = vpop.permute.xlu1 %377 }
 0x124   : > { %8771 = vst [vmem:[#allocation239_spill] sm:$0xff] %v5421_v24  ;;  %8772 = vst [vmem:[#allocation240_spill] sm:$0xff] %v5424_v22  ;;  %v5443_v22 = vmul.f32 %v4577_v46, %v353_v16  ;;  %v5446_v24 = vmul.f32 %v4579_v47, %v353_v16 }
 0x125   : > { %8773 = vst [vmem:[#allocation241_spill] sm:$0xff] %v5428_v4  ;;  %8774 = vst [vmem:[#allocation242_spill] sm:$0xff] %v5431_v27  ;;  %v5449_v4 = vmul.f32 %v4581_v39, %v353_v16  ;;  %v5452_v27 = vmul.f32 %v4561_v56, %v368_v23  ;;  %v5470_v16 = vmul.f32 %v4575_v45, %v368_v23 }
 0x126   : > { %8775 = vst [vmem:[#allocation243_spill] sm:$0xff] %v5434_v25  ;;  %8776 = vst [vmem:[#allocation244_spill] sm:$0xff] %v5437_v62  ;;  %v5455_v25 = vmul.f32 %v4563_v57, %v368_v23  ;;  %v5458_v62 = vmul.f32 %v4565_v58, %v368_v23 }
 0x127   : > { %8777 = vst [vmem:[#allocation245_spill] sm:$0xff] %v5440_v35  ;;  %8778 = vst [vmem:[#allocation246_spill] sm:$0xff] %v5443_v22  ;;  %v5461_v35 = vmul.f32 %v4567_v59, %v368_v23  ;;  %v5464_v22 = vmul.f32 %v4569_v60, %v368_v23 }
 0x128   : > { %8779 = vst [vmem:[#allocation247_spill] sm:$0xff] %v5446_v24  ;;  %8780 = vst [vmem:[#allocation248_spill] sm:$0xff] %v5449_v4  ;;  %v5467_v24 = vmul.f32 %v4573_v44, %v368_v23  ;;  %v8789_v4 = vmov 2  }
 0x129   : > { %8781 = vst [vmem:[#allocation249_spill] sm:$0xff] %v5452_v27  ;;  %8782 = vst [vmem:[#allocation250_spill] sm:$0xff] %v5455_v25  ;;  %v5473_v27 = vmul.f32 %v4577_v46, %v368_v23  ;;  %4240 = vset.pattern.permute.xlu1 %v8789_v4  ;;  %v5477_v25 = vmul.f32 %v4579_v47, %v368_v23  ;;  %v5496_v4 = vmul.f32 %v4569_v60, %v363_v29 }
 0x12a   : > { %8783 = vst [vmem:[#allocation251_spill] sm:$0xff] %v5458_v62  ;;  %8784 = vst [vmem:[#allocation252_spill] sm:$0xff] %v5461_v35  ;;  %v5480_v62 = vmul.f32 %v4581_v39, %v368_v23  ;;  %v5483_v35 = vmul.f32 %v4561_v56, %v363_v29  ;;  %1788 = vperm.xlu1 %4240, %v4513_v31   ;;  %v5499_v23 = vmul.f32 %v4573_v44, %v363_v29 }
 0x12b   : > { %8785 = vst [vmem:[#allocation253_spill] sm:$0xff] %v5464_v22  ;;  %8786 = vst [vmem:[#allocation254_spill] sm:$0xff] %v5467_v24  ;;  %v5486_v22 = vmul.f32 %v4563_v57, %v363_v29  ;;  %v5505_v24 = vmul.f32 %v4577_v46, %v363_v29  ;;  %v5508_v31 = vmul.f32 %v4579_v47, %v363_v29 }
 0x12c   : > { %8787 = vst [vmem:[#allocation255_spill] sm:$0xff] %v5470_v16  ;;  %8788 = vst [vmem:[#allocation256_spill] sm:$0xff] %v5473_v27  ;;  %v5490_v16 = vmul.f32 %v4565_v58, %v363_v29  ;;  %v5493_v27 = vmul.f32 %v4567_v59, %v363_v29 }
 0x12d   : > { %8790 = vst [vmem:[#allocation257_spill] sm:$0xff] %v5477_v25  ;;  %8791 = vst [vmem:[#allocation258_spill] sm:$0xff] %v5480_v62  ;;  %v373_v62 = vpop.permute.xlu0 %372  ;;  %v5502_v25 = vmul.f32 %v4575_v45, %v363_v29 }
 0x12e   : > { %8792 = vst [vmem:[#allocation259_spill] sm:$0xff] %v5483_v35  ;;  %8793 = vst [vmem:[#allocation260_spill] sm:$0xff] %v5486_v22  ;;  %v5514_v22 = vmul.f32 %v4561_v56, %v378_v32 }
 0x12f   : > { %8794 = vst [vmem:[#allocation261_spill] sm:$0xff] %v5490_v16  ;;  %8795 = vst [vmem:[#allocation262_spill] sm:$0xff] %v5493_v27  ;;  %v5511_v16 = vmul.f32 %v4581_v39, %v363_v29  ;;  %v388_v27 = vpop.permute.xlu1 %387  ;;  %v5532_v29 = vmul.f32 %v4575_v45, %v378_v32 }
 0x130   : > { %8796 = vst [vmem:[#allocation263_spill] sm:$0xff] %v5496_v4  ;;  %8797 = vst [vmem:[#allocation264_spill] sm:$0xff] %v5499_v23  ;;  %v5517_v4 = vmul.f32 %v4563_v57, %v378_v32  ;;  %v5520_v23 = vmul.f32 %v4565_v58, %v378_v32 }
 0x131   : > { %8798 = vst [vmem:[#allocation265_spill] sm:$0xff] %v5502_v25  ;;  %8799 = vst [vmem:[#allocation266_spill] sm:$0xff] %v5505_v24  ;;  %v5523_v25 = vmul.f32 %v4567_v59, %v378_v32  ;;  %v5526_v24 = vmul.f32 %v4569_v60, %v378_v32 }
 0x132   : > { %8800 = vst [vmem:[#allocation267_spill] sm:$0xff] %v5508_v31  ;;  %8801 = vst [vmem:[#allocation268_spill] sm:$0xff] %v5511_v16  ;;  %v5529_v31 = vmul.f32 %v4573_v44, %v378_v32 }
 0x133   : > { %8802 = vst [vmem:[#allocation269_spill] sm:$0xff] %v5514_v22  ;;  %8803 = vst [vmem:[#allocation270_spill] sm:$0xff] %v5517_v4  ;;  %v5535_v22 = vmul.f32 %v4577_v46, %v378_v32  ;;  %v5538_v4 = vmul.f32 %v4579_v47, %v378_v32 }
 0x134   : > { %8804 = vst [vmem:[#allocation271_spill] sm:$0xff] %v5520_v23  ;;  %8805 = vst [vmem:[#allocation272_spill] sm:$0xff] %v5523_v25  ;;  %v5541_v23 = vmul.f32 %v4581_v39, %v378_v32  ;;  %v5544_v25 = vmul.f32 %v4561_v56, %v373_v62  ;;  %v5562_v32 = vmul.f32 %v4575_v45, %v373_v62 }
 0x135   : > { %8806 = vst [vmem:[#allocation273_spill] sm:$0xff] %v5526_v24  ;;  %8807 = vst [vmem:[#allocation274_spill] sm:$0xff] %v5529_v31  ;;  %v5547_v24 = vmul.f32 %v4563_v57, %v373_v62  ;;  %v5550_v31 = vmul.f32 %v4565_v58, %v373_v62 }
 0x136   : > { %8808 = vst [vmem:[#allocation275_spill] sm:$0xff] %v5532_v29  ;;  %8809 = vst [vmem:[#allocation276_spill] sm:$0xff] %v5535_v22  ;;  %v5553_v29 = vmul.f32 %v4567_v59, %v373_v62  ;;  %v5556_v22 = vmul.f32 %v4569_v60, %v373_v62 }
 0x137   : > { %8810 = vst [vmem:[#allocation277_spill] sm:$0xff] %v5538_v4  ;;  %8811 = vst [vmem:[#allocation278_spill] sm:$0xff] %v5541_v23  ;;  %v5559_v4 = vmul.f32 %v4573_v44, %v373_v62  ;;  %v5565_v23 = vmul.f32 %v4577_v46, %v373_v62 }
 0x138   : > { %8812 = vst [vmem:[#allocation279_spill] sm:$0xff] %v5544_v25  ;;  %8813 = vst [vmem:[#allocation280_spill] sm:$0xff] %v5547_v24  ;;  %v5568_v24 = vmul.f32 %v4579_v47, %v373_v62  ;;  %v5573_v25 = vpop.permute.xlu0 %382 }
 0x139   : > { %8814 = vst [vmem:[#allocation281_spill] sm:$0xff] %v5550_v31  ;;  %8815 = vst [vmem:[#allocation282_spill] sm:$0xff] %v5553_v29  ;;  %v5571_v31 = vmul.f32 %v4581_v39, %v373_v62  ;;  %v5576_v29 = vmul.f32 %v4561_v56, %v388_v27  ;;  %v5591_v62 = vmul.f32 %v4573_v44, %v388_v27 }
 0x13a   : > { %8816 = vst [vmem:[#allocation283_spill] sm:$0xff] %v5556_v22  ;;  %8817 = vst [vmem:[#allocation284_spill] sm:$0xff] %v5559_v4  ;;  %v5579_v22 = vmul.f32 %v4563_v57, %v388_v27  ;;  %v5582_v4 = vmul.f32 %v4565_v58, %v388_v27 }
 0x13b   : > { %8818 = vst [vmem:[#allocation285_spill] sm:$0xff] %v5562_v32  ;;  %8819 = vst [vmem:[#allocation286_spill] sm:$0xff] %v5565_v23  ;;  %v5585_v32 = vmul.f32 %v4567_v59, %v388_v27  ;;  %v811_v23 = vpop.permute.xlu1 %810 }
 0x13c   : > { %8820 = vst [vmem:[#allocation287_spill] sm:$0xff] %v5568_v24  ;;  %8821 = vst [vmem:[#allocation288_spill] sm:$0xff] %v5571_v31  ;;  %v5588_v24 = vmul.f32 %v4569_v60, %v388_v27  ;;  %v5594_v31 = vmul.f32 %v4575_v45, %v388_v27  ;;  %v807_v16 = vpop.permute.xlu0 %806 }
 0x13d   : > { %8822 = vst [vmem:[#allocation289_spill] sm:$0xff] %v5573_v25  ;;  %8823 = vst [vmem:[#allocation290_spill] sm:$0xff] %v5576_v29  ;;  %v5597_v29 = vmul.f32 %v4577_v46, %v388_v27 }
 0x13e   : > { %8824 = vst [vmem:[#allocation291_spill] sm:$0xff] %v5579_v22  ;;  %8825 = vst [vmem:[#allocation292_spill] sm:$0xff] %v5582_v4  ;;  %v5600_v22 = vmul.f32 %v4579_v47, %v388_v27  ;;  %v5603_v4 = vmul.f32 %v4581_v39, %v388_v27  ;;  %v1036_v47 = vmul.f32 %v4589_v6, %v811_v23 }
 0x13f   : > { %8826 = vst [vmem:[#allocation293_spill] sm:$0xff] %v5585_v32  ;;  %8827 = vst [vmem:[#allocation294_spill] sm:$0xff] %v5588_v24  ;;  %v5607_v32 = vmul.f32 %v4561_v56, %v5573_v25  ;;  %v5611_v24 = vmul.f32 %v4563_v57, %v5573_v25  ;;  %v1038_v27 = vmul.f32 %v4593_v50, %v811_v23 }
 0x140   : > { %8828 = vst [vmem:[#allocation295_spill] sm:$0xff] %v5591_v62  ;;  %8829 = vst [vmem:[#allocation296_spill] sm:$0xff] %v5594_v31  ;;  %v1033_v62 = vmul.f32 %v4583_v48, %v811_v23  ;;  %v1034_v31 = vmul.f32 %v4585_v42, %v811_v23  ;;  %v1040_v56 = vmul.f32 %v4597_v52, %v811_v23 }
 0x141   : > { %8830 = vst [vmem:[#allocation297_spill] sm:$0xff] %v5597_v29  ;;  %8831 = vst [vmem:[#allocation298_spill] sm:$0xff] %v5600_v22  ;;  %v1035_v29 = vmul.f32 %v4587_v43, %v811_v23  ;;  %v1037_v22 = vmul.f32 %v4591_v7, %v811_v23  ;;  %v1042_v57 = vmul.f32 %v4601_v53, %v811_v23 }
 0x142   : > { %8832 = vst [vmem:[#allocation299_spill] sm:$0xff] %v5603_v4  ;;  %8833 = vst [vmem:[#allocation300_spill] sm:$0xff] %v5607_v32  ;;  %v1039_v4 = vmul.f32 %v4595_v51, %v811_v23  ;;  %v1041_v32 = vmul.f32 %v4599_v37, %v811_v23  ;;  %v5627_v39 = vadd.f32 %v1034_v31, %v4701_v41 }
 0x143   : > { %8834 = vst [vmem:[#allocation301_spill] sm:$0xff] %v5611_v24  ;;  %v5624_v24 = vadd.f32 %v1033_v62, %v4698_v11  ;;  %v5630_v35 = vadd.f32 %v1035_v29, %v4704_v10  ;;  %v5633_v28 = vadd.f32 %v1036_v47, %v4707_v36  ;;  %v5636_v12 = vadd.f32 %v1037_v22, %v4710_v9 }
 0x144   : > { %8836 = vst [vmem:[#allocation303_spill] sm:$0xff] %v5627_v39  ;;  %v5639_v30 = vadd.f32 %v1038_v27, %v4713_v33  ;;  %v5642_v23 = vadd.f32 %v1039_v4, %v4717_v3  ;;  %v5645_v11 = vadd.f32 %v1040_v56, %v4720_v40  ;;  %v5648_v41 = vadd.f32 %v1041_v32, %v4723_v2  ;;  %v815_v4 = vpop.permute.xlu1 %814  ;;  %v8895_v39 = vld [vmem:[#allocation58_spill] sm:$0xff] }
 0x145   : > { %8835 = vst [vmem:[#allocation302_spill] sm:$0xff] %v5624_v24  ;;  %8837 = vst [vmem:[#allocation304_spill] sm:$0xff] %v5630_v35  ;;  %v5651_v10 = vadd.f32 %v1042_v57, %v4726_v0  ;;  %v5655_v36 = vmul.f32 %v4565_v58, %v5573_v25  ;;  %v5659_v33 = vmul.f32 %v4567_v59, %v5573_v25 }
 0x146   : > { %8838 = vst [vmem:[#allocation305_spill] sm:$0xff] %v5633_v28  ;;  %8839 = vst [vmem:[#allocation306_spill] sm:$0xff] %v5636_v12  ;;  %v1023_v47 = vmul.f32 %v4583_v48, %v807_v16  ;;  %v1024_v9 = vmul.f32 %v4585_v42, %v807_v16  ;;  %v5665_v40 = vmul.f32 %v4569_v60, %v5573_v25  ;;  %v8893_v28 = vld [vmem:[#allocation57_spill] sm:$0xff] }
 0x147   : > { %8840 = vst [vmem:[#allocation307_spill] sm:$0xff] %v5639_v30  ;;  %8841 = vst [vmem:[#allocation308_spill] sm:$0xff] %v5642_v23  ;;  %v5669_v0 = vmul.f32 %v4573_v44, %v5573_v25  ;;  %v5673_v58 = vmul.f32 %v4575_v45, %v5573_v25  ;;  %v5677_v59 = vmul.f32 %v4577_v46, %v5573_v25  ;;  %v8858_v25 = vld [vmem:[#allocation21_spill] sm:$0xff]  ;;  %v8862_v23 = vld [vmem:[#allocation23_spill] sm:$0xff] }
 0x148   : > { %8842 = vst [vmem:[#allocation309_spill] sm:$0xff] %v5645_v11  ;;  %8843 = vst [vmem:[#allocation310_spill] sm:$0xff] %v5648_v41  ;;  %v1025_v2 = vmul.f32 %v4587_v43, %v807_v16  ;;  %v1026_v3 = vmul.f32 %v4589_v6, %v807_v16  ;;  %v1031_v22 = vmul.f32 %v4599_v37, %v807_v16  ;;  %v8860_v41 = vld [vmem:[#allocation22_spill] sm:$0xff] }
 0x149   : > { %8844 = vst [vmem:[#allocation311_spill] sm:$0xff] %v5651_v10  ;;  %8845 = vst [vmem:[#allocation312_spill] sm:$0xff] %v5655_v36  ;;  %v1032_v60 = vmul.f32 %v4601_v53, %v807_v16  ;;  %v1027_v44 = vmul.f32 %v4591_v7, %v807_v16  ;;  %v1028_v31 = vmul.f32 %v4593_v50, %v807_v16 }
 0x14a   : > { %8846 = vst [vmem:[#allocation313_spill] sm:$0xff] %v5659_v33  ;;  %8847 = vst [vmem:[#allocation314_spill] sm:$0xff] %v5665_v40  ;;  %v1029_v45 = vmul.f32 %v4595_v51, %v807_v16  ;;  %v1030_v29 = vmul.f32 %v4597_v52, %v807_v16  ;;  %v5688_v46 = vadd.f32 %v1023_v47, %v4636_v38  ;;  %v819_v40 = vpop.permute.xlu0 %818  ;;  %v8856_v33 = vld [vmem:[#allocation20_spill] sm:$0xff] }
 0x14b   : > { %8848 = vst [vmem:[#allocation315_spill] sm:$0xff] %v5669_v0  ;;  %8849 = vst [vmem:[#allocation316_spill] sm:$0xff] %v5673_v58  ;;  %v5691_v32 = vadd.f32 %v1024_v9, %v4639_v5  ;;  %v5694_v62 = vadd.f32 %v1031_v22, %v4660_v8  ;;  %v5697_v27 = vadd.f32 %v1032_v60, %v4663_v34  ;;  %v8852_v22 = vld [vmem:[#allocation18_spill] sm:$0xff]  ;;  %v8854_v58 = vld [vmem:[#allocation19_spill] sm:$0xff] }
 0x14c   : > { %8850 = vst [vmem:[#allocation317_spill] sm:$0xff] %v5677_v59  ;;  %v1043_v56 = vmul.f32 %v4583_v48, %v815_v4  ;;  %v1044_v57 = vmul.f32 %v4585_v42, %v815_v4  ;;  %v1045_v59 = vmul.f32 %v4587_v43, %v815_v4  ;;  %v1046_v16 = vmul.f32 %v4589_v6, %v815_v4 }
 0x14d   : > { %8851 = vst [vmem:[#allocation318_spill] sm:$0xff] %v5697_v27  ;;  %v1047_v38 = vmul.f32 %v4591_v7, %v815_v4  ;;  %v1048_v47 = vmul.f32 %v4593_v50, %v815_v4  ;;  %v1049_v5 = vmul.f32 %v4595_v51, %v815_v4  ;;  %v1050_v8 = vmul.f32 %v4597_v52, %v815_v4 }
 0x14e   : > { %v1051_v9 = vmul.f32 %v4599_v37, %v815_v4  ;;  %v1052_v34 = vmul.f32 %v4601_v53, %v815_v4  ;;  %v5710_v60 = vadd.f32 %v1043_v56, %v8852_v22  ;;  %v5713_v0 = vadd.f32 %v1044_v57, %v8854_v58  ;;  %v8864_v4 = vld [vmem:[#allocation24_spill] sm:$0xff]  ;;  %v8866_v56 = vld [vmem:[#allocation25_spill] sm:$0xff]  ;;  %v8868_v58 = vld [vmem:[#allocation26_spill] sm:$0xff] }
 0x14f   : > { %v5716_v36 = vadd.f32 %v1045_v59, %v8856_v33  ;;  %v5719_v10 = vadd.f32 %v1046_v16, %v8858_v25  ;;  %v5722_v11 = vadd.f32 %v1047_v38, %v8860_v41  ;;  %v5725_v30 = vadd.f32 %v1048_v47, %v8862_v23  ;;  %v8870_v33 = vld [vmem:[#allocation27_spill] sm:$0xff]  ;;  %v8872_v25 = vld [vmem:[#allocation28_spill] sm:$0xff]  ;;  %v8873_v41 = vld [vmem:[#allocation29_spill] sm:$0xff] }
 0x150   : > { %8853 = vst [vmem:[#allocation18_spill] sm:$0xff] %v5710_v60  ;;  %8855 = vst [vmem:[#allocation19_spill] sm:$0xff] %v5713_v0  ;;  %v5728_v12 = vadd.f32 %v1049_v5, %v8864_v4  ;;  %v5731_v22 = vadd.f32 %v1050_v8, %v8866_v56  ;;  %v5734_v57 = vadd.f32 %v1051_v9, %v8868_v58  ;;  %v8874_v5 = vld [vmem:[#allocation30_spill] sm:$0xff]  ;;  %v8875_v8 = vld [vmem:[#allocation31_spill] sm:$0xff]  ;;  %v827_v60 = vpop.permute.xlu0 %826 }
 0x151   : > { %8857 = vst [vmem:[#allocation20_spill] sm:$0xff] %v5716_v36  ;;  %8859 = vst [vmem:[#allocation21_spill] sm:$0xff] %v5719_v10  ;;  %v5737_v59 = vadd.f32 %v1052_v34, %v8870_v33  ;;  %v5740_v16 = vadd.f32 %v1025_v2, %v8872_v25  ;;  %v5743_v38 = vadd.f32 %v1026_v3, %v8873_v41  ;;  %v8876_v9 = vld [vmem:[#allocation32_spill] sm:$0xff]  ;;  %v8877_v34 = vld [vmem:[#allocation33_spill] sm:$0xff] }
 0x152   : > { %8861 = vst [vmem:[#allocation22_spill] sm:$0xff] %v5722_v11  ;;  %8863 = vst [vmem:[#allocation23_spill] sm:$0xff] %v5725_v30  ;;  %v1053_v23 = vmul.f32 %v4583_v48, %v819_v40  ;;  %v1054_v47 = vmul.f32 %v4585_v42, %v819_v40  ;;  %v5748_v4 = vadd.f32 %v1027_v44, %v8874_v5 }
 0x153   : > { %8865 = vst [vmem:[#allocation24_spill] sm:$0xff] %v5728_v12  ;;  %8867 = vst [vmem:[#allocation25_spill] sm:$0xff] %v5731_v22  ;;  %v5751_v56 = vadd.f32 %v1028_v31, %v8875_v8  ;;  %v5754_v58 = vadd.f32 %v1029_v45, %v8876_v9  ;;  %v5757_v33 = vadd.f32 %v1030_v29, %v8877_v34  ;;  %v8878_v8 = vld [vmem:[#allocation34_spill] sm:$0xff]  ;;  %v8880_v9 = vld [vmem:[#allocation35_spill] sm:$0xff] }
 0x154   : > { %8869 = vst [vmem:[#allocation26_spill] sm:$0xff] %v5734_v57  ;;  %8871 = vst [vmem:[#allocation27_spill] sm:$0xff] %v5737_v59  ;;  %v1055_v2 = vmul.f32 %v4587_v43, %v819_v40  ;;  %v1056_v3 = vmul.f32 %v4589_v6, %v819_v40  ;;  %v1061_v25 = vmul.f32 %v4599_v37, %v819_v40  ;;  %v823_v59 = vpop.permute.xlu1 %822  ;;  %v8882_v57 = vld [vmem:[#allocation42_spill] sm:$0xff]  ;;  %v8884_v12 = vld [vmem:[#allocation43_spill] sm:$0xff] }
 0x155   : > { %v1062_v41 = vmul.f32 %v4601_v53, %v819_v40  ;;  %v1057_v44 = vmul.f32 %v4591_v7, %v819_v40  ;;  %v1058_v31 = vmul.f32 %v4593_v50, %v819_v40  ;;  %v1059_v5 = vmul.f32 %v4595_v51, %v819_v40 }
 0x156   : > { %v1060_v45 = vmul.f32 %v4597_v52, %v819_v40  ;;  %v5768_v29 = vadd.f32 %v1053_v23, %v8878_v8  ;;  %v5771_v34 = vadd.f32 %v1054_v47, %v8880_v9  ;;  %v5774_v22 = vadd.f32 %v1061_v25, %v8882_v57  ;;  %v8887_v9 = vld [vmem:[#allocation54_spill] sm:$0xff] }
 0x157   : > { %v5777_v30 = vadd.f32 %v1062_v41, %v8884_v12  ;;  %v1063_v11 = vmul.f32 %v4583_v48, %v823_v59  ;;  %v1064_v10 = vmul.f32 %v4585_v42, %v823_v59  ;;  %v1065_v36 = vmul.f32 %v4587_v43, %v823_v59 }
 0x158   : > { %8879 = vst [vmem:[#allocation28_spill] sm:$0xff] %v5768_v29  ;;  %8881 = vst [vmem:[#allocation29_spill] sm:$0xff] %v5771_v34  ;;  %v1066_v40 = vmul.f32 %v4589_v6, %v823_v59  ;;  %v1067_v23 = vmul.f32 %v4591_v7, %v823_v59  ;;  %v1068_v8 = vmul.f32 %v4593_v50, %v823_v59  ;;  %v8891_v34 = vld [vmem:[#allocation56_spill] sm:$0xff] }
 0x159   : > { %8883 = vst [vmem:[#allocation30_spill] sm:$0xff] %v5774_v22  ;;  %8885 = vst [vmem:[#allocation31_spill] sm:$0xff] %v5777_v30  ;;  %v1069_v47 = vmul.f32 %v4595_v51, %v823_v59  ;;  %v1070_v57 = vmul.f32 %v4597_v52, %v823_v59  ;;  %v1071_v25 = vmul.f32 %v4599_v37, %v823_v59  ;;  %v8889_v30 = vld [vmem:[#allocation55_spill] sm:$0xff] }
 0x15a   : > { %v1072_v12 = vmul.f32 %v4601_v53, %v823_v59  ;;  %v5790_v41 = vadd.f32 %v1063_v11, %v4760_v55  ;;  %v5793_v0 = vadd.f32 %v1064_v10, %v8887_v9  ;;  %v5796_v22 = vadd.f32 %v1065_v36, %v8889_v30  ;;  %v8897_v59 = vld [vmem:[#allocation59_spill] sm:$0xff]  ;;  %v8899_v55 = vld [vmem:[#allocation60_spill] sm:$0xff]  ;;  %v8901_v10 = vld [vmem:[#allocation61_spill] sm:$0xff] }
 0x15b   : > { %v5799_v29 = vadd.f32 %v1066_v40, %v8891_v34  ;;  %v5802_v35 = vadd.f32 %v1067_v23, %v8893_v28  ;;  %v5805_v24 = vadd.f32 %v1068_v8, %v8895_v39  ;;  %v5808_v27 = vadd.f32 %v1069_v47, %v8897_v59  ;;  %v8904_v36 = vld [vmem:[#allocation36_spill] sm:$0xff]  ;;  %v8905_v28 = vld [vmem:[#allocation37_spill] sm:$0xff]  ;;  %v8906_v8 = vld [vmem:[#allocation38_spill] sm:$0xff] }
 0x15c   : > { %8886 = vst [vmem:[#allocation32_spill] sm:$0xff] %v5790_v41  ;;  %8888 = vst [vmem:[#allocation33_spill] sm:$0xff] %v5793_v0  ;;  %v5811_v11 = vadd.f32 %v1070_v57, %v8899_v55  ;;  %v5814_v9 = vadd.f32 %v1071_v25, %v8901_v10  ;;  %v5817_v30 = vadd.f32 %v1072_v12, %v4789_v13  ;;  %v8908_v57 = vld [vmem:[#allocation39_spill] sm:$0xff]  ;;  %v8910_v25 = vld [vmem:[#allocation40_spill] sm:$0xff]  ;;  %v835_v0 = vpop.permute.xlu0 %834 }
 0x15d   : > { %8890 = vst [vmem:[#allocation34_spill] sm:$0xff] %v5796_v22  ;;  %8892 = vst [vmem:[#allocation35_spill] sm:$0xff] %v5799_v29  ;;  %v5820_v34 = vadd.f32 %v1055_v2, %v8904_v36  ;;  %v5823_v40 = vadd.f32 %v1056_v3, %v8905_v28  ;;  %v1073_v39 = vmul.f32 %v4583_v48, %v827_v60  ;;  %v8912_v13 = vld [vmem:[#allocation41_spill] sm:$0xff]  ;;  %v831_v28 = vpop.permute.xlu1 %830 }
 0x15e   : > { %8894 = vst [vmem:[#allocation42_spill] sm:$0xff] %v5802_v35  ;;  %8896 = vst [vmem:[#allocation43_spill] sm:$0xff] %v5805_v24  ;;  %v1074_v23 = vmul.f32 %v4585_v42, %v827_v60  ;;  %v5828_v47 = vadd.f32 %v1057_v44, %v8906_v8  ;;  %v5831_v59 = vadd.f32 %v1058_v31, %v8908_v57  ;;  %v8914_v57 = vld [vmem:[#allocation44_spill] sm:$0xff]  ;;  %v8925_v41 = vld [vmem:[#allocation73_spill] sm:$0xff] }
 0x15f   : > { %8898 = vst [vmem:[#allocation54_spill] sm:$0xff] %v5808_v27  ;;  %8900 = vst [vmem:[#allocation55_spill] sm:$0xff] %v5811_v11  ;;  %v5834_v55 = vadd.f32 %v1059_v5, %v8910_v25  ;;  %v5837_v12 = vadd.f32 %v1060_v45, %v8912_v13  ;;  %v1075_v2 = vmul.f32 %v4587_v43, %v827_v60  ;;  %v8916_v25 = vld [vmem:[#allocation45_spill] sm:$0xff] }
 0x160   : > { %8902 = vst [vmem:[#allocation56_spill] sm:$0xff] %v5814_v9  ;;  %8903 = vst [vmem:[#allocation57_spill] sm:$0xff] %v5817_v30  ;;  %v1076_v3 = vmul.f32 %v4589_v6, %v827_v60  ;;  %v1081_v10 = vmul.f32 %v4599_v37, %v827_v60  ;;  %v1082_v36 = vmul.f32 %v4601_v53, %v827_v60  ;;  %v8918_v30 = vld [vmem:[#allocation52_spill] sm:$0xff]  ;;  %v8920_v11 = vld [vmem:[#allocation53_spill] sm:$0xff] }
 0x161   : > { %8907 = vst [vmem:[#allocation58_spill] sm:$0xff] %v5828_v47  ;;  %8909 = vst [vmem:[#allocation59_spill] sm:$0xff] %v5831_v59  ;;  %v1077_v44 = vmul.f32 %v4591_v7, %v827_v60  ;;  %v1078_v31 = vmul.f32 %v4593_v50, %v827_v60  ;;  %v1079_v8 = vmul.f32 %v4595_v51, %v827_v60 }
 0x162   : > { %8911 = vst [vmem:[#allocation60_spill] sm:$0xff] %v5834_v55  ;;  %8913 = vst [vmem:[#allocation61_spill] sm:$0xff] %v5837_v12  ;;  %v1080_v5 = vmul.f32 %v4597_v52, %v827_v60  ;;  %v5848_v45 = vadd.f32 %v1073_v39, %v8914_v57  ;;  %v5851_v13 = vadd.f32 %v1074_v23, %v8916_v25  ;;  %v8923_v25 = vld [vmem:[#allocation72_spill] sm:$0xff] }
 0x163   : > { %v5854_v9 = vadd.f32 %v1081_v10, %v8918_v30  ;;  %v5857_v27 = vadd.f32 %v1082_v36, %v8920_v11  ;;  %v1083_v24 = vmul.f32 %v4583_v48, %v831_v28  ;;  %v1084_v35 = vmul.f32 %v4585_v42, %v831_v28  ;;  %v8931_v55 = vld [vmem:[#allocation76_spill] sm:$0xff] }
 0x164   : > { %8915 = vst [vmem:[#allocation36_spill] sm:$0xff] %v5848_v45  ;;  %8917 = vst [vmem:[#allocation37_spill] sm:$0xff] %v5851_v13  ;;  %v1085_v29 = vmul.f32 %v4587_v43, %v831_v28  ;;  %v1086_v60 = vmul.f32 %v4589_v6, %v831_v28  ;;  %v1087_v39 = vmul.f32 %v4591_v7, %v831_v28  ;;  %v8929_v45 = vld [vmem:[#allocation75_spill] sm:$0xff] }
 0x165   : > { %8919 = vst [vmem:[#allocation38_spill] sm:$0xff] %v5854_v9  ;;  %8921 = vst [vmem:[#allocation39_spill] sm:$0xff] %v5857_v27  ;;  %v1088_v57 = vmul.f32 %v4593_v50, %v831_v28  ;;  %v1089_v23 = vmul.f32 %v4595_v51, %v831_v28  ;;  %v1090_v30 = vmul.f32 %v4597_v52, %v831_v28  ;;  %v8927_v9 = vld [vmem:[#allocation74_spill] sm:$0xff] }
 0x166   : > { %v1091_v10 = vmul.f32 %v4599_v37, %v831_v28  ;;  %v1092_v11 = vmul.f32 %v4601_v53, %v831_v28  ;;  %v5870_v36 = vadd.f32 %v1083_v24, %v4823_v54  ;;  %v5873_v22 = vadd.f32 %v1084_v35, %v8923_v25  ;;  %v8933_v28 = vld [vmem:[#allocation77_spill] sm:$0xff]  ;;  %v8935_v54 = vld [vmem:[#allocation78_spill] sm:$0xff] }
 0x167   : > { %v5876_v27 = vadd.f32 %v1085_v29, %v8925_v41  ;;  %v5879_v13 = vadd.f32 %v1086_v60, %v8927_v9  ;;  %v5882_v12 = vadd.f32 %v1087_v39, %v8929_v45  ;;  %v5885_v59 = vadd.f32 %v1088_v57, %v8931_v55  ;;  %v8938_v29 = vld [vmem:[#allocation79_spill] sm:$0xff]  ;;  %v8940_v9 = vld [vmem:[#allocation46_spill] sm:$0xff] }
 0x168   : > { %8922 = vst [vmem:[#allocation40_spill] sm:$0xff] %v5870_v36  ;;  %8924 = vst [vmem:[#allocation41_spill] sm:$0xff] %v5873_v22  ;;  %v5888_v47 = vadd.f32 %v1089_v23, %v8933_v28  ;;  %v5891_v24 = vadd.f32 %v1090_v30, %v8935_v54  ;;  %v5894_v35 = vadd.f32 %v1091_v10, %v4848_v17  ;;  %v8941_v45 = vld [vmem:[#allocation47_spill] sm:$0xff]  ;;  %v8942_v23 = vld [vmem:[#allocation48_spill] sm:$0xff]  ;;  %v843_v22 = vpop.permute.xlu0 %842 }
 0x169   : > { %8926 = vst [vmem:[#allocation44_spill] sm:$0xff] %v5876_v27  ;;  %8928 = vst [vmem:[#allocation45_spill] sm:$0xff] %v5879_v13  ;;  %v5897_v41 = vadd.f32 %v1092_v11, %v8938_v29  ;;  %v5900_v60 = vadd.f32 %v1075_v2, %v8940_v9  ;;  %v5903_v39 = vadd.f32 %v1076_v3, %v8941_v45  ;;  %v8944_v30 = vld [vmem:[#allocation49_spill] sm:$0xff]  ;;  %v8946_v17 = vld [vmem:[#allocation50_spill] sm:$0xff]  ;;  %v839_v45 = vpop.permute.xlu1 %838 }
 0x16a   : > { %8930 = vst [vmem:[#allocation52_spill] sm:$0xff] %v5882_v12  ;;  %8932 = vst [vmem:[#allocation53_spill] sm:$0xff] %v5885_v59  ;;  %v1093_v55 = vmul.f32 %v4583_v48, %v835_v0  ;;  %v1094_v57 = vmul.f32 %v4585_v42, %v835_v0  ;;  %v5908_v25 = vadd.f32 %v1077_v44, %v8942_v23  ;;  %v8948_v11 = vld [vmem:[#allocation51_spill] sm:$0xff] }
 0x16b   : > { %8934 = vst [vmem:[#allocation72_spill] sm:$0xff] %v5888_v47  ;;  %8936 = vst [vmem:[#allocation73_spill] sm:$0xff] %v5891_v24  ;;  %v5911_v28 = vadd.f32 %v1078_v31, %v8944_v30  ;;  %v5914_v10 = vadd.f32 %v1079_v8, %v8946_v17  ;;  %v5917_v54 = vadd.f32 %v1080_v5, %v8948_v11  ;;  %v8950_v30 = vld [vmem:[#allocation62_spill] sm:$0xff]  ;;  %v8952_v17 = vld [vmem:[#allocation63_spill] sm:$0xff] }
 0x16c   : > { %8937 = vst [vmem:[#allocation74_spill] sm:$0xff] %v5894_v35  ;;  %8939 = vst [vmem:[#allocation75_spill] sm:$0xff] %v5897_v41  ;;  %v1095_v2 = vmul.f32 %v4587_v43, %v835_v0  ;;  %v1096_v3 = vmul.f32 %v4589_v6, %v835_v0  ;;  %v1101_v29 = vmul.f32 %v4599_v37, %v835_v0  ;;  %v8954_v41 = vld [vmem:[#allocation70_spill] sm:$0xff]  ;;  %v8956_v24 = vld [vmem:[#allocation71_spill] sm:$0xff] }
 0x16d   : > { %8943 = vst [vmem:[#allocation76_spill] sm:$0xff] %v5908_v25  ;;  %8945 = vst [vmem:[#allocation77_spill] sm:$0xff] %v5911_v28  ;;  %v1102_v9 = vmul.f32 %v4601_v53, %v835_v0  ;;  %v1097_v44 = vmul.f32 %v4591_v7, %v835_v0  ;;  %v1098_v31 = vmul.f32 %v4593_v50, %v835_v0  ;;  %v8961_v36 = vld [vmem:[#allocation91_spill] sm:$0xff] }
 0x16e   : > { %8947 = vst [vmem:[#allocation78_spill] sm:$0xff] %v5914_v10  ;;  %8949 = vst [vmem:[#allocation79_spill] sm:$0xff] %v5917_v54  ;;  %v1099_v23 = vmul.f32 %v4595_v51, %v835_v0  ;;  %v1100_v8 = vmul.f32 %v4597_v52, %v835_v0  ;;  %v5928_v5 = vadd.f32 %v1093_v55, %v8950_v30  ;;  %v8967_v10 = vld [vmem:[#allocation94_spill] sm:$0xff] }
 0x16f   : > { %v5931_v11 = vadd.f32 %v1094_v57, %v8952_v17  ;;  %v5934_v35 = vadd.f32 %v1101_v29, %v8954_v41  ;;  %v5937_v47 = vadd.f32 %v1102_v9, %v8956_v24  ;;  %v1103_v59 = vmul.f32 %v4583_v48, %v839_v45  ;;  %v8959_v17 = vld [vmem:[#allocation90_spill] sm:$0xff] }
 0x170   : > { %8951 = vst [vmem:[#allocation46_spill] sm:$0xff] %v5928_v5  ;;  %v1104_v12 = vmul.f32 %v4585_v42, %v839_v45  ;;  %v1105_v13 = vmul.f32 %v4587_v43, %v839_v45  ;;  %v1106_v0 = vmul.f32 %v4589_v6, %v839_v45  ;;  %v1107_v55 = vmul.f32 %v4591_v7, %v839_v45  ;;  %v8965_v5 = vld [vmem:[#allocation93_spill] sm:$0xff] }
 0x171   : > { %8953 = vst [vmem:[#allocation47_spill] sm:$0xff] %v5931_v11  ;;  %8955 = vst [vmem:[#allocation48_spill] sm:$0xff] %v5934_v35  ;;  %v1108_v30 = vmul.f32 %v4593_v50, %v839_v45  ;;  %v1109_v57 = vmul.f32 %v4595_v51, %v839_v45  ;;  %v1110_v41 = vmul.f32 %v4597_v52, %v839_v45  ;;  %v8963_v35 = vld [vmem:[#allocation92_spill] sm:$0xff] }
 0x172   : > { %8957 = vst [vmem:[#allocation49_spill] sm:$0xff] %v5937_v47  ;;  %v1111_v29 = vmul.f32 %v4599_v37, %v839_v45  ;;  %v1112_v24 = vmul.f32 %v4601_v53, %v839_v45  ;;  %v5950_v9 = vadd.f32 %v1103_v59, %v4888_v14  ;;  %v5953_v27 = vadd.f32 %v1104_v12, %v8959_v17  ;;  %v8969_v45 = vld [vmem:[#allocation95_spill] sm:$0xff]  ;;  %v8972_v59 = vld [vmem:[#allocation96_spill] sm:$0xff] }
 0x173   : > { %v5956_v47 = vadd.f32 %v1105_v13, %v8961_v36  ;;  %v5959_v11 = vadd.f32 %v1106_v0, %v8963_v35  ;;  %v5962_v54 = vadd.f32 %v1107_v55, %v8965_v5  ;;  %v5965_v28 = vadd.f32 %v1108_v30, %v8967_v10  ;;  %v8974_v13 = vld [vmem:[#allocation97_spill] sm:$0xff]  ;;  %v8976_v35 = vld [vmem:[#allocation64_spill] sm:$0xff] }
 0x174   : > { %8958 = vst [vmem:[#allocation50_spill] sm:$0xff] %v5950_v9  ;;  %8960 = vst [vmem:[#allocation51_spill] sm:$0xff] %v5953_v27  ;;  %v5968_v25 = vadd.f32 %v1109_v57, %v8969_v45  ;;  %v5971_v14 = vadd.f32 %v1110_v41, %v4909_v18  ;;  %v5974_v12 = vadd.f32 %v1111_v29, %v8972_v59  ;;  %v8978_v5 = vld [vmem:[#allocation65_spill] sm:$0xff]  ;;  %v8980_v57 = vld [vmem:[#allocation66_spill] sm:$0xff]  ;;  %v851_v27 = vpop.permute.xlu0 %850 }
 0x175   : > { %8962 = vst [vmem:[#allocation62_spill] sm:$0xff] %v5956_v47  ;;  %8964 = vst [vmem:[#allocation63_spill] sm:$0xff] %v5959_v11  ;;  %v5977_v36 = vadd.f32 %v1112_v24, %v8974_v13  ;;  %v5980_v0 = vadd.f32 %v1095_v2, %v8976_v35  ;;  %v5983_v55 = vadd.f32 %v1096_v3, %v8978_v5  ;;  %v8982_v18 = vld [vmem:[#allocation67_spill] sm:$0xff]  ;;  %v8984_v29 = vld [vmem:[#allocation68_spill] sm:$0xff]  ;;  %v847_v5 = vpop.permute.xlu1 %846 }
 0x176   : > { %8966 = vst [vmem:[#allocation70_spill] sm:$0xff] %v5962_v54  ;;  %8968 = vst [vmem:[#allocation71_spill] sm:$0xff] %v5965_v28  ;;  %v1113_v10 = vmul.f32 %v4583_v48, %v843_v22  ;;  %v1114_v30 = vmul.f32 %v4585_v42, %v843_v22  ;;  %v5988_v17 = vadd.f32 %v1097_v44, %v8980_v57  ;;  %v8986_v24 = vld [vmem:[#allocation69_spill] sm:$0xff] }
 0x177   : > { %8970 = vst [vmem:[#allocation90_spill] sm:$0xff] %v5968_v25  ;;  %8971 = vst [vmem:[#allocation91_spill] sm:$0xff] %v5971_v14  ;;  %v5991_v41 = vadd.f32 %v1098_v31, %v8982_v18  ;;  %v5994_v45 = vadd.f32 %v1099_v23, %v8984_v29  ;;  %v5997_v59 = vadd.f32 %v1100_v8, %v8986_v24  ;;  %v8988_v18 = vld [vmem:[#allocation80_spill] sm:$0xff]  ;;  %v8990_v29 = vld [vmem:[#allocation81_spill] sm:$0xff] }
 0x178   : > { %8973 = vst [vmem:[#allocation92_spill] sm:$0xff] %v5974_v12  ;;  %8975 = vst [vmem:[#allocation93_spill] sm:$0xff] %v5977_v36  ;;  %v1115_v2 = vmul.f32 %v4587_v43, %v843_v22  ;;  %v1116_v3 = vmul.f32 %v4589_v6, %v843_v22  ;;  %v1121_v13 = vmul.f32 %v4599_v37, %v843_v22  ;;  %v8992_v36 = vld [vmem:[#allocation88_spill] sm:$0xff]  ;;  %v8994_v14 = vld [vmem:[#allocation89_spill] sm:$0xff] }
 0x179   : > { %8977 = vst [vmem:[#allocation94_spill] sm:$0xff] %v5980_v0  ;;  %8979 = vst [vmem:[#allocation95_spill] sm:$0xff] %v5983_v55  ;;  %v1122_v35 = vmul.f32 %v4601_v53, %v843_v22  ;;  %v1117_v44 = vmul.f32 %v4591_v7, %v843_v22  ;;  %v1118_v31 = vmul.f32 %v4593_v50, %v843_v22  ;;  %v8999_v9 = vld [vmem:[#allocation109_spill] sm:$0xff]  ;;  %v9340_v0 = vld [vmem:[#allocation23_spill] sm:$0xff] }
 0x17a   : > { %8981 = vst [vmem:[#allocation96_spill] sm:$0xff] %v5988_v17  ;;  %8983 = vst [vmem:[#allocation97_spill] sm:$0xff] %v5991_v41  ;;  %v1119_v57 = vmul.f32 %v4595_v51, %v843_v22  ;;  %v1120_v23 = vmul.f32 %v4597_v52, %v843_v22  ;;  %v6008_v8 = vadd.f32 %v1113_v10, %v8988_v18  ;;  %v9325_v17 = vld [vmem:[#allocation31_spill] sm:$0xff] }
 0x17b   : > { %8985 = vst [vmem:[#allocation64_spill] sm:$0xff] %v5994_v45  ;;  %8987 = vst [vmem:[#allocation65_spill] sm:$0xff] %v5997_v59  ;;  %v6011_v24 = vadd.f32 %v1114_v30, %v8990_v29  ;;  %v6014_v12 = vadd.f32 %v1121_v13, %v8992_v36  ;;  %v6017_v25 = vadd.f32 %v1122_v35, %v8994_v14  ;;  %v8997_v29 = vld [vmem:[#allocation108_spill] sm:$0xff] }
 0x17c   : > { %8989 = vst [vmem:[#allocation66_spill] sm:$0xff] %v6008_v8  ;;  %v1123_v28 = vmul.f32 %v4583_v48, %v847_v5  ;;  %v1124_v54 = vmul.f32 %v4585_v42, %v847_v5  ;;  %v1125_v11 = vmul.f32 %v4587_v43, %v847_v5  ;;  %v1126_v22 = vmul.f32 %v4589_v6, %v847_v5  ;;  %v9003_v8 = vld [vmem:[#allocation111_spill] sm:$0xff] }
 0x17d   : > { %8991 = vst [vmem:[#allocation67_spill] sm:$0xff] %v6011_v24  ;;  %8993 = vst [vmem:[#allocation68_spill] sm:$0xff] %v6014_v12  ;;  %v1127_v10 = vmul.f32 %v4591_v7, %v847_v5  ;;  %v1128_v18 = vmul.f32 %v4593_v50, %v847_v5  ;;  %v1129_v30 = vmul.f32 %v4595_v51, %v847_v5  ;;  %v9001_v12 = vld [vmem:[#allocation110_spill] sm:$0xff] }
 0x17e   : > { %8995 = vst [vmem:[#allocation69_spill] sm:$0xff] %v6017_v25  ;;  %v1130_v36 = vmul.f32 %v4597_v52, %v847_v5  ;;  %v1131_v13 = vmul.f32 %v4599_v37, %v847_v5  ;;  %v1132_v14 = vmul.f32 %v4601_v53, %v847_v5  ;;  %v6030_v35 = vadd.f32 %v1123_v28, %v4952_v61  ;;  %v9006_v5 = vld [vmem:[#allocation112_spill] sm:$0xff]  ;;  %v9008_v61 = vld [vmem:[#allocation113_spill] sm:$0xff] }
 0x17f   : > { %v6033_v47 = vadd.f32 %v1124_v54, %v8997_v29  ;;  %v6036_v25 = vadd.f32 %v1125_v11, %v8999_v9  ;;  %v6039_v24 = vadd.f32 %v1126_v22, %v9001_v12  ;;  %v6042_v59 = vadd.f32 %v1127_v10, %v9003_v8  ;;  %v9010_v54 = vld [vmem:[#allocation114_spill] sm:$0xff]  ;;  %v9015_v8 = vld [vmem:[#allocation83_spill] sm:$0xff] }
 0x180   : > { %8996 = vst [vmem:[#allocation80_spill] sm:$0xff] %v6030_v35  ;;  %v6045_v45 = vadd.f32 %v1128_v18, %v4967_v15  ;;  %v6048_v41 = vadd.f32 %v1129_v30, %v9006_v5  ;;  %v6051_v28 = vadd.f32 %v1130_v36, %v9008_v61  ;;  %v6054_v29 = vadd.f32 %v1131_v13, %v9010_v54  ;;  %v9013_v9 = vld [vmem:[#allocation82_spill] sm:$0xff]  ;;  %v9017_v18 = vld [vmem:[#allocation84_spill] sm:$0xff]  ;;  %v9019_v36 = vld [vmem:[#allocation85_spill] sm:$0xff] }
 0x181   : > { %8998 = vst [vmem:[#allocation81_spill] sm:$0xff] %v6033_v47  ;;  %9000 = vst [vmem:[#allocation88_spill] sm:$0xff] %v6036_v25  ;;  %v6057_v11 = vadd.f32 %v1132_v14, %v4980_v20  ;;  %v6060_v12 = vadd.f32 %v1115_v2, %v9013_v9  ;;  %v6063_v22 = vadd.f32 %v1116_v3, %v9015_v8  ;;  %v9021_v13 = vld [vmem:[#allocation86_spill] sm:$0xff]  ;;  %v9023_v20 = vld [vmem:[#allocation87_spill] sm:$0xff]  ;;  %v855_v8 = vpop.permute.xlu1 %854  ;;  %v859_v47 = vpop.permute.xlu0 %858 }
 0x182   : > { %9002 = vst [vmem:[#allocation89_spill] sm:$0xff] %v6039_v24  ;;  %9004 = vst [vmem:[#allocation108_spill] sm:$0xff] %v6042_v59  ;;  %v1133_v15 = vmul.f32 %v4583_v48, %v851_v27  ;;  %v1134_v10 = vmul.f32 %v4585_v42, %v851_v27  ;;  %v6068_v30 = vadd.f32 %v1117_v44, %v9017_v18  ;;  %v9036_v35 = vld [vmem:[#allocation126_spill] sm:$0xff] }
 0x183   : > { %9005 = vst [vmem:[#allocation109_spill] sm:$0xff] %v6045_v45  ;;  %9007 = vst [vmem:[#allocation110_spill] sm:$0xff] %v6048_v41  ;;  %v6071_v5 = vadd.f32 %v1118_v31, %v9019_v36  ;;  %v6074_v61 = vadd.f32 %v1119_v57, %v9021_v13  ;;  %v6077_v14 = vadd.f32 %v1120_v23, %v9023_v20  ;;  %v9025_v36 = vld [vmem:[#allocation98_spill] sm:$0xff]  ;;  %v9027_v13 = vld [vmem:[#allocation99_spill] sm:$0xff] }
 0x184   : > { %9009 = vst [vmem:[#allocation111_spill] sm:$0xff] %v6051_v28  ;;  %9011 = vst [vmem:[#allocation112_spill] sm:$0xff] %v6054_v29  ;;  %v1135_v2 = vmul.f32 %v4587_v43, %v851_v27  ;;  %v1136_v3 = vmul.f32 %v4589_v6, %v851_v27  ;;  %v1141_v54 = vmul.f32 %v4599_v37, %v851_v27  ;;  %v9031_v28 = vld [vmem:[#allocation107_spill] sm:$0xff] }
 0x185   : > { %9012 = vst [vmem:[#allocation113_spill] sm:$0xff] %v6057_v11  ;;  %9014 = vst [vmem:[#allocation114_spill] sm:$0xff] %v6060_v12  ;;  %v1142_v9 = vmul.f32 %v4601_v53, %v851_v27  ;;  %v1137_v44 = vmul.f32 %v4591_v7, %v851_v27  ;;  %v1138_v31 = vmul.f32 %v4593_v50, %v851_v27  ;;  %v9029_v11 = vld [vmem:[#allocation106_spill] sm:$0xff] }
 0x186   : > { %9016 = vst [vmem:[#allocation82_spill] sm:$0xff] %v6063_v22  ;;  %9018 = vst [vmem:[#allocation83_spill] sm:$0xff] %v6068_v30  ;;  %v1139_v18 = vmul.f32 %v4595_v51, %v851_v27  ;;  %v1140_v57 = vmul.f32 %v4597_v52, %v851_v27  ;;  %v6088_v23 = vadd.f32 %v1133_v15, %v9025_v36  ;;  %v9324_v22 = vld [vmem:[#allocation30_spill] sm:$0xff] }
 0x187   : > { %9020 = vst [vmem:[#allocation84_spill] sm:$0xff] %v6071_v5  ;;  %9022 = vst [vmem:[#allocation85_spill] sm:$0xff] %v6074_v61  ;;  %v6091_v20 = vadd.f32 %v1134_v10, %v9027_v13  ;;  %v6094_v29 = vadd.f32 %v1141_v54, %v9029_v11  ;;  %v6097_v41 = vadd.f32 %v1142_v9, %v9031_v28  ;;  %v9034_v13 = vld [vmem:[#allocation125_spill] sm:$0xff] }
 0x188   : > { %9024 = vst [vmem:[#allocation86_spill] sm:$0xff] %v6077_v14  ;;  %9026 = vst [vmem:[#allocation87_spill] sm:$0xff] %v6088_v23  ;;  %v1143_v45 = vmul.f32 %v4583_v48, %v855_v8  ;;  %v1144_v59 = vmul.f32 %v4585_v42, %v855_v8  ;;  %v1145_v24 = vmul.f32 %v4587_v43, %v855_v8  ;;  %v9040_v23 = vld [vmem:[#allocation128_spill] sm:$0xff]  ;;  %v9042_v61 = vld [vmem:[#allocation129_spill] sm:$0xff] }
 0x189   : > { %9028 = vst [vmem:[#allocation98_spill] sm:$0xff] %v6091_v20  ;;  %9030 = vst [vmem:[#allocation99_spill] sm:$0xff] %v6094_v29  ;;  %v1146_v27 = vmul.f32 %v4589_v6, %v855_v8  ;;  %v1147_v15 = vmul.f32 %v4591_v7, %v855_v8  ;;  %v1148_v36 = vmul.f32 %v4593_v50, %v855_v8  ;;  %v9038_v29 = vld [vmem:[#allocation127_spill] sm:$0xff] }
 0x18a   : > { %9032 = vst [vmem:[#allocation106_spill] sm:$0xff] %v6097_v41  ;;  %v1149_v10 = vmul.f32 %v4595_v51, %v855_v8  ;;  %v1150_v11 = vmul.f32 %v4597_v52, %v855_v8  ;;  %v1151_v54 = vmul.f32 %v4599_v37, %v855_v8  ;;  %v1152_v28 = vmul.f32 %v4601_v53, %v855_v8  ;;  %v9044_v8 = vld [vmem:[#allocation130_spill] sm:$0xff] }
 0x18b   : > { %v6110_v9 = vadd.f32 %v1143_v45, %v5015_v21  ;;  %v6113_v25 = vadd.f32 %v1144_v59, %v9034_v13  ;;  %v6116_v41 = vadd.f32 %v1145_v24, %v9036_v35  ;;  %v6119_v20 = vadd.f32 %v1146_v27, %v9038_v29  ;;  %v9046_v21 = vld [vmem:[#allocation131_spill] sm:$0xff]  ;;  %v9048_v59 = vld [vmem:[#allocation132_spill] sm:$0xff]  ;;  %v9050_v24 = vld [vmem:[#allocation133_spill] sm:$0xff] }
 0x18c   : > { %v6122_v14 = vadd.f32 %v1147_v15, %v9040_v23  ;;  %v6125_v5 = vadd.f32 %v1148_v36, %v9042_v61  ;;  %v6128_v30 = vadd.f32 %v1149_v10, %v9044_v8  ;;  %v6131_v45 = vadd.f32 %v1150_v11, %v9046_v21  ;;  %v9052_v29 = vld [vmem:[#allocation100_spill] sm:$0xff]  ;;  %v9054_v23 = vld [vmem:[#allocation101_spill] sm:$0xff]  ;;  %v9056_v10 = vld [vmem:[#allocation102_spill] sm:$0xff] }
 0x18d   : > { %9033 = vst [vmem:[#allocation107_spill] sm:$0xff] %v6110_v9  ;;  %9035 = vst [vmem:[#allocation125_spill] sm:$0xff] %v6113_v25  ;;  %v6134_v13 = vadd.f32 %v1151_v54, %v9048_v59  ;;  %v6137_v35 = vadd.f32 %v1152_v28, %v9050_v24  ;;  %v6140_v27 = vadd.f32 %v1135_v2, %v9052_v29  ;;  %v9058_v11 = vld [vmem:[#allocation103_spill] sm:$0xff]  ;;  %v9060_v54 = vld [vmem:[#allocation104_spill] sm:$0xff]  ;;  %v867_v9 = vpop.permute.xlu0 %866 }
 0x18e   : > { %9037 = vst [vmem:[#allocation126_spill] sm:$0xff] %v6116_v41  ;;  %9039 = vst [vmem:[#allocation127_spill] sm:$0xff] %v6119_v20  ;;  %v6143_v15 = vadd.f32 %v1136_v3, %v9054_v23  ;;  %v1153_v61 = vmul.f32 %v4583_v48, %v859_v47  ;;  %v1154_v36 = vmul.f32 %v4585_v42, %v859_v47  ;;  %v9062_v28 = vld [vmem:[#allocation105_spill] sm:$0xff] }
 0x18f   : > { %9041 = vst [vmem:[#allocation128_spill] sm:$0xff] %v6122_v14  ;;  %9043 = vst [vmem:[#allocation129_spill] sm:$0xff] %v6125_v5  ;;  %v6148_v8 = vadd.f32 %v1137_v44, %v9056_v10  ;;  %v6151_v21 = vadd.f32 %v1138_v31, %v9058_v11  ;;  %v6154_v59 = vadd.f32 %v1139_v18, %v9060_v54  ;;  %v9064_v11 = vld [vmem:[#allocation115_spill] sm:$0xff]  ;;  %v9066_v54 = vld [vmem:[#allocation116_spill] sm:$0xff] }
 0x190   : > { %9045 = vst [vmem:[#allocation130_spill] sm:$0xff] %v6128_v30  ;;  %9047 = vst [vmem:[#allocation131_spill] sm:$0xff] %v6131_v45  ;;  %v6157_v24 = vadd.f32 %v1140_v57, %v9062_v28  ;;  %v1155_v2 = vmul.f32 %v4587_v43, %v859_v47  ;;  %v1156_v3 = vmul.f32 %v4589_v6, %v859_v47  ;;  %v9070_v30 = vld [vmem:[#allocation124_spill] sm:$0xff] }
 0x191   : > { %9049 = vst [vmem:[#allocation132_spill] sm:$0xff] %v6134_v13  ;;  %9051 = vst [vmem:[#allocation133_spill] sm:$0xff] %v6137_v35  ;;  %v1161_v29 = vmul.f32 %v4599_v37, %v859_v47  ;;  %v1162_v23 = vmul.f32 %v4601_v53, %v859_v47  ;;  %v863_v35 = vpop.permute.xlu1 %862  ;;  %v1157_v44 = vmul.f32 %v4591_v7, %v859_v47  ;;  %v9068_v13 = vld [vmem:[#allocation123_spill] sm:$0xff] }
 0x192   : > { %9053 = vst [vmem:[#allocation100_spill] sm:$0xff] %v6140_v27  ;;  %9055 = vst [vmem:[#allocation101_spill] sm:$0xff] %v6143_v15  ;;  %v1158_v31 = vmul.f32 %v4593_v50, %v859_v47  ;;  %v1159_v10 = vmul.f32 %v4595_v51, %v859_v47  ;;  %v1160_v18 = vmul.f32 %v4597_v52, %v859_v47 }
 0x193   : > { %9057 = vst [vmem:[#allocation102_spill] sm:$0xff] %v6148_v8  ;;  %9059 = vst [vmem:[#allocation103_spill] sm:$0xff] %v6151_v21  ;;  %v6168_v57 = vadd.f32 %v1153_v61, %v9064_v11  ;;  %v6171_v28 = vadd.f32 %v1154_v36, %v9066_v54  ;;  %v6174_v45 = vadd.f32 %v1161_v29, %v9068_v13  ;;  %v9073_v54 = vld [vmem:[#allocation144_spill] sm:$0xff] }
 0x194   : > { %9061 = vst [vmem:[#allocation104_spill] sm:$0xff] %v6154_v59  ;;  %9063 = vst [vmem:[#allocation105_spill] sm:$0xff] %v6157_v24  ;;  %v6177_v5 = vadd.f32 %v1162_v23, %v9070_v30  ;;  %v1163_v14 = vmul.f32 %v4583_v48, %v863_v35  ;;  %v1164_v20 = vmul.f32 %v4585_v42, %v863_v35  ;;  %v9079_v24 = vld [vmem:[#allocation147_spill] sm:$0xff]  ;;  %v9081_v21 = vld [vmem:[#allocation148_spill] sm:$0xff] }
 0x195   : > { %9065 = vst [vmem:[#allocation115_spill] sm:$0xff] %v6168_v57  ;;  %9067 = vst [vmem:[#allocation116_spill] sm:$0xff] %v6171_v28  ;;  %v1165_v41 = vmul.f32 %v4587_v43, %v863_v35  ;;  %v1166_v47 = vmul.f32 %v4589_v6, %v863_v35  ;;  %v1167_v61 = vmul.f32 %v4591_v7, %v863_v35  ;;  %v9077_v28 = vld [vmem:[#allocation146_spill] sm:$0xff] }
 0x196   : > { %9069 = vst [vmem:[#allocation123_spill] sm:$0xff] %v6174_v45  ;;  %9071 = vst [vmem:[#allocation124_spill] sm:$0xff] %v6177_v5  ;;  %v1168_v11 = vmul.f32 %v4593_v50, %v863_v35  ;;  %v1169_v36 = vmul.f32 %v4595_v51, %v863_v35  ;;  %v1170_v13 = vmul.f32 %v4597_v52, %v863_v35  ;;  %v9075_v5 = vld [vmem:[#allocation145_spill] sm:$0xff] }
 0x197   : > { %v1171_v29 = vmul.f32 %v4599_v37, %v863_v35  ;;  %v1172_v30 = vmul.f32 %v4601_v53, %v863_v35  ;;  %v6190_v23 = vadd.f32 %v1163_v14, %v5090_v19  ;;  %v6193_v25 = vadd.f32 %v1164_v20, %v9073_v54  ;;  %v9083_v35 = vld [vmem:[#allocation149_spill] sm:$0xff]  ;;  %v9085_v19 = vld [vmem:[#allocation150_spill] sm:$0xff]  ;;  %v9087_v20 = vld [vmem:[#allocation151_spill] sm:$0xff] }
 0x198   : > { %v6196_v45 = vadd.f32 %v1165_v41, %v9075_v5  ;;  %v6199_v57 = vadd.f32 %v1166_v47, %v9077_v28  ;;  %v6202_v59 = vadd.f32 %v1167_v61, %v9079_v24  ;;  %v6205_v8 = vadd.f32 %v1168_v11, %v9081_v21  ;;  %v9090_v5 = vld [vmem:[#allocation117_spill] sm:$0xff]  ;;  %v9092_v24 = vld [vmem:[#allocation118_spill] sm:$0xff]  ;;  %v9094_v11 = vld [vmem:[#allocation119_spill] sm:$0xff] }
 0x199   : > { %9072 = vst [vmem:[#allocation319_spill] sm:$0xff] %v6190_v23  ;;  %9074 = vst [vmem:[#allocation144_spill] sm:$0xff] %v6193_v25  ;;  %v6208_v15 = vadd.f32 %v1169_v36, %v9083_v35  ;;  %v6211_v14 = vadd.f32 %v1170_v13, %v9085_v19  ;;  %v6214_v54 = vadd.f32 %v1171_v29, %v9087_v20  ;;  %v9096_v13 = vld [vmem:[#allocation120_spill] sm:$0xff]  ;;  %v9098_v29 = vld [vmem:[#allocation121_spill] sm:$0xff]  ;;  %v875_v25 = vpop.permute.xlu0 %874 }
 0x19a   : > { %9076 = vst [vmem:[#allocation145_spill] sm:$0xff] %v6196_v45  ;;  %9078 = vst [vmem:[#allocation146_spill] sm:$0xff] %v6199_v57  ;;  %v6217_v41 = vadd.f32 %v1172_v30, %v5128_v63  ;;  %v6220_v28 = vadd.f32 %v1155_v2, %v9090_v5  ;;  %v6223_v47 = vadd.f32 %v1156_v3, %v9092_v24  ;;  %v9100_v63 = vld [vmem:[#allocation122_spill] sm:$0xff]  ;;  %v871_v24 = vpop.permute.xlu1 %870  ;;  %v9113_v23 = vld [vmem:[#allocation163_spill] sm:$0xff] }
 0x19b   : > { %9080 = vst [vmem:[#allocation147_spill] sm:$0xff] %v6202_v59  ;;  %9082 = vst [vmem:[#allocation148_spill] sm:$0xff] %v6205_v8  ;;  %v1173_v21 = vmul.f32 %v4583_v48, %v867_v9  ;;  %v1174_v61 = vmul.f32 %v4585_v42, %v867_v9  ;;  %v6228_v36 = vadd.f32 %v1157_v44, %v9094_v11 }
 0x19c   : > { %9084 = vst [vmem:[#allocation149_spill] sm:$0xff] %v6208_v15  ;;  %9086 = vst [vmem:[#allocation150_spill] sm:$0xff] %v6211_v14  ;;  %v6231_v35 = vadd.f32 %v1158_v31, %v9096_v13  ;;  %v6234_v19 = vadd.f32 %v1159_v10, %v9098_v29  ;;  %v6237_v30 = vadd.f32 %v1160_v18, %v9100_v63  ;;  %v9102_v13 = vld [vmem:[#allocation134_spill] sm:$0xff]  ;;  %v9104_v29 = vld [vmem:[#allocation135_spill] sm:$0xff] }
 0x19d   : > { %9088 = vst [vmem:[#allocation151_spill] sm:$0xff] %v6214_v54  ;;  %9089 = vst [vmem:[#allocation320_spill] sm:$0xff] %v6217_v41  ;;  %v1175_v2 = vmul.f32 %v4587_v43, %v867_v9  ;;  %v1176_v3 = vmul.f32 %v4589_v6, %v867_v9  ;;  %v1181_v20 = vmul.f32 %v4599_v37, %v867_v9  ;;  %v9106_v41 = vld [vmem:[#allocation142_spill] sm:$0xff]  ;;  %v9108_v14 = vld [vmem:[#allocation143_spill] sm:$0xff] }
 0x19e   : > { %9091 = vst [vmem:[#allocation117_spill] sm:$0xff] %v6220_v28  ;;  %9093 = vst [vmem:[#allocation118_spill] sm:$0xff] %v6223_v47  ;;  %v1182_v5 = vmul.f32 %v4601_v53, %v867_v9  ;;  %v1177_v44 = vmul.f32 %v4591_v7, %v867_v9  ;;  %v1178_v31 = vmul.f32 %v4593_v50, %v867_v9  ;;  %v9323_v28 = vld [vmem:[#allocation61_spill] sm:$0xff] }
 0x19f   : > { %9095 = vst [vmem:[#allocation119_spill] sm:$0xff] %v6228_v36  ;;  %9097 = vst [vmem:[#allocation120_spill] sm:$0xff] %v6231_v35  ;;  %v1179_v11 = vmul.f32 %v4595_v51, %v867_v9  ;;  %v1180_v10 = vmul.f32 %v4597_v52, %v867_v9  ;;  %v6248_v18 = vadd.f32 %v1173_v21, %v9102_v13  ;;  %v9322_v36 = vld [vmem:[#allocation60_spill] sm:$0xff] }
 0x1a0   : > { %9099 = vst [vmem:[#allocation121_spill] sm:$0xff] %v6234_v19  ;;  %9101 = vst [vmem:[#allocation122_spill] sm:$0xff] %v6237_v30  ;;  %v6251_v63 = vadd.f32 %v1174_v61, %v9104_v29  ;;  %v6254_v54 = vadd.f32 %v1181_v20, %v9106_v41  ;;  %v6257_v15 = vadd.f32 %v1182_v5, %v9108_v14  ;;  %v9111_v29 = vld [vmem:[#allocation162_spill] sm:$0xff]  ;;  %v9118_v30 = vld [vmem:[#allocation165_spill] sm:$0xff] }
 0x1a1   : > { %9103 = vst [vmem:[#allocation134_spill] sm:$0xff] %v6248_v18  ;;  %v1183_v8 = vmul.f32 %v4583_v48, %v871_v24  ;;  %v1184_v59 = vmul.f32 %v4585_v42, %v871_v24  ;;  %v1185_v57 = vmul.f32 %v4587_v43, %v871_v24  ;;  %v1186_v9 = vmul.f32 %v4589_v6, %v871_v24 }
 0x1a2   : > { %9105 = vst [vmem:[#allocation135_spill] sm:$0xff] %v6251_v63  ;;  %9107 = vst [vmem:[#allocation142_spill] sm:$0xff] %v6254_v54  ;;  %v1187_v21 = vmul.f32 %v4591_v7, %v871_v24  ;;  %v1188_v13 = vmul.f32 %v4593_v50, %v871_v24  ;;  %v1189_v61 = vmul.f32 %v4595_v51, %v871_v24  ;;  %v9115_v54 = vld [vmem:[#allocation164_spill] sm:$0xff] }
 0x1a3   : > { %9109 = vst [vmem:[#allocation143_spill] sm:$0xff] %v6257_v15  ;;  %v1190_v41 = vmul.f32 %v4597_v52, %v871_v24  ;;  %v1191_v20 = vmul.f32 %v4599_v37, %v871_v24  ;;  %v1192_v14 = vmul.f32 %v4601_v53, %v871_v24  ;;  %v6270_v5 = vadd.f32 %v1183_v8, %v5162_v1  ;;  %v9120_v24 = vld [vmem:[#allocation166_spill] sm:$0xff]  ;;  %v9122_v1 = vld [vmem:[#allocation167_spill] sm:$0xff] }
 0x1a4   : > { %v6273_v45 = vadd.f32 %v1184_v59, %v9111_v29  ;;  %v6276_v15 = vadd.f32 %v1185_v57, %v9113_v23  ;;  %v6279_v63 = vadd.f32 %v1186_v9, %v9115_v54  ;;  %v6282_v18 = vadd.f32 %v1187_v21, %v5175_v49  ;;  %v9124_v59 = vld [vmem:[#allocation168_spill] sm:$0xff]  ;;  %v9126_v57 = vld [vmem:[#allocation169_spill] sm:$0xff] }
 0x1a5   : > { %9110 = vst [vmem:[#allocation321_spill] sm:$0xff] %v6270_v5  ;;  %v6285_v19 = vadd.f32 %v1188_v13, %v9118_v30  ;;  %v6288_v35 = vadd.f32 %v1189_v61, %v9120_v24  ;;  %v6291_v8 = vadd.f32 %v1190_v41, %v9122_v1  ;;  %v6294_v29 = vadd.f32 %v1191_v20, %v9124_v59  ;;  %v9128_v21 = vld [vmem:[#allocation136_spill] sm:$0xff]  ;;  %v9130_v61 = vld [vmem:[#allocation137_spill] sm:$0xff]  ;;  %v9132_v24 = vld [vmem:[#allocation138_spill] sm:$0xff] }
 0x1a6   : > { %9112 = vst [vmem:[#allocation162_spill] sm:$0xff] %v6273_v45  ;;  %9114 = vst [vmem:[#allocation163_spill] sm:$0xff] %v6276_v15  ;;  %v6297_v23 = vadd.f32 %v1192_v14, %v9126_v57  ;;  %v1193_v54 = vmul.f32 %v4583_v48, %v875_v25  ;;  %v1194_v49 = vmul.f32 %v4585_v42, %v875_v25  ;;  %v9134_v1 = vld [vmem:[#allocation139_spill] sm:$0xff] }
 0x1a7   : > { %9116 = vst [vmem:[#allocation164_spill] sm:$0xff] %v6279_v63  ;;  %9117 = vst [vmem:[#allocation322_spill] sm:$0xff] %v6282_v18  ;;  %v1195_v9 = vmul.f32 %v4587_v43, %v875_v25  ;;  %v1196_v30 = vmul.f32 %v4589_v6, %v875_v25  ;;  %v6304_v13 = vadd.f32 %v1175_v2, %v9128_v21  ;;  %v9136_v2 = vld [vmem:[#allocation140_spill] sm:$0xff]  ;;  %v9144_v18 = vld [vmem:[#allocation154_spill] sm:$0xff] }
 0x1a8   : > { %9119 = vst [vmem:[#allocation165_spill] sm:$0xff] %v6285_v19  ;;  %9121 = vst [vmem:[#allocation166_spill] sm:$0xff] %v6288_v35  ;;  %v6307_v41 = vadd.f32 %v1176_v3, %v9130_v61  ;;  %v6310_v20 = vadd.f32 %v1177_v44, %v9132_v24  ;;  %v6313_v14 = vadd.f32 %v1178_v31, %v9134_v1  ;;  %v9138_v3 = vld [vmem:[#allocation141_spill] sm:$0xff]  ;;  %v9140_v24 = vld [vmem:[#allocation152_spill] sm:$0xff] }
 0x1a9   : > { %9123 = vst [vmem:[#allocation167_spill] sm:$0xff] %v6291_v8  ;;  %9125 = vst [vmem:[#allocation168_spill] sm:$0xff] %v6294_v29  ;;  %v1197_v59 = vmul.f32 %v4591_v7, %v875_v25  ;;  %v1198_v57 = vmul.f32 %v4593_v50, %v875_v25  ;;  %v1200_v29 = vmul.f32 %v4597_v52, %v875_v25  ;;  %v879_v8 = vpop.permute.xlu1 %878  ;;  %v9142_v35 = vld [vmem:[#allocation153_spill] sm:$0xff]  ;;  %v9146_v15 = vld [vmem:[#allocation155_spill] sm:$0xff] }
 0x1aa   : > { %9127 = vst [vmem:[#allocation169_spill] sm:$0xff] %v6297_v23  ;;  %9129 = vst [vmem:[#allocation136_spill] sm:$0xff] %v6304_v13  ;;  %v1199_v23 = vmul.f32 %v4595_v51, %v875_v25  ;;  %v6320_v21 = vadd.f32 %v1179_v11, %v9136_v2  ;;  %v6323_v61 = vadd.f32 %v1180_v10, %v9138_v3  ;;  %v9148_v3 = vld [vmem:[#allocation156_spill] sm:$0xff] }
 0x1ab   : > { %9131 = vst [vmem:[#allocation137_spill] sm:$0xff] %v6307_v41  ;;  %9133 = vst [vmem:[#allocation138_spill] sm:$0xff] %v6310_v20  ;;  %v1201_v44 = vmul.f32 %v4599_v37, %v875_v25  ;;  %v1202_v31 = vmul.f32 %v4601_v53, %v875_v25  ;;  %v6328_v1 = vadd.f32 %v1193_v54, %v9140_v24  ;;  %v9150_v24 = vld [vmem:[#allocation157_spill] sm:$0xff]  ;;  %v9317_v41 = vld [vmem:[#allocation311_spill] sm:$0xff] }
 0x1ac   : > { %9135 = vst [vmem:[#allocation139_spill] sm:$0xff] %v6313_v14  ;;  %9137 = vst [vmem:[#allocation140_spill] sm:$0xff] %v6320_v21  ;;  %v6331_v19 = vadd.f32 %v1194_v49, %v9142_v35  ;;  %v6334_v63 = vadd.f32 %v1195_v9, %v9144_v18  ;;  %v6337_v45 = vadd.f32 %v1196_v30, %v9146_v15  ;;  %v9152_v49 = vld [vmem:[#allocation158_spill] sm:$0xff]  ;;  %v9154_v9 = vld [vmem:[#allocation159_spill] sm:$0xff] }
 0x1ad   : > { %9139 = vst [vmem:[#allocation141_spill] sm:$0xff] %v6323_v61  ;;  %9141 = vst [vmem:[#allocation152_spill] sm:$0xff] %v6328_v1  ;;  %v1203_v11 = vmul.f32 %v4583_v48, %v879_v8  ;;  %v1204_v10 = vmul.f32 %v4585_v42, %v879_v8  ;;  %v1205_v2 = vmul.f32 %v4587_v43, %v879_v8  ;;  %v9315_v61 = vld [vmem:[#allocation309_spill] sm:$0xff]  ;;  %v9316_v14 = vld [vmem:[#allocation310_spill] sm:$0xff] }
 0x1ae   : > { %9143 = vst [vmem:[#allocation153_spill] sm:$0xff] %v6331_v19  ;;  %9145 = vst [vmem:[#allocation154_spill] sm:$0xff] %v6334_v63  ;;  %v1206_v25 = vmul.f32 %v4589_v6, %v879_v8  ;;  %v6344_v54 = vadd.f32 %v1197_v59, %v9148_v3  ;;  %v6347_v35 = vadd.f32 %v1198_v57, %v9150_v24  ;;  %v883_v19 = vpop.permute.xlu0 %882  ;;  %v9156_v59 = vld [vmem:[#allocation160_spill] sm:$0xff]  ;;  %v9158_v57 = vld [vmem:[#allocation161_spill] sm:$0xff] }
 0x1af   : > { %9147 = vst [vmem:[#allocation155_spill] sm:$0xff] %v6337_v45  ;;  %v6350_v18 = vadd.f32 %v1199_v23, %v9152_v49  ;;  %v6353_v15 = vadd.f32 %v1200_v29, %v9154_v9  ;;  %v1207_v30 = vmul.f32 %v4591_v7, %v879_v8  ;;  %v1208_v5 = vmul.f32 %v4593_v50, %v879_v8  ;;  %v9161_v9 = vld [vmem:[#allocation180_spill] sm:$0xff] }
 0x1b0   : > { %9149 = vst [vmem:[#allocation156_spill] sm:$0xff] %v6344_v54  ;;  %9151 = vst [vmem:[#allocation157_spill] sm:$0xff] %v6347_v35  ;;  %v1209_v45 = vmul.f32 %v4595_v51, %v879_v8  ;;  %v1210_v63 = vmul.f32 %v4597_v52, %v879_v8  ;;  %v6360_v3 = vadd.f32 %v1201_v44, %v9156_v59  ;;  %v9165_v54 = vld [vmem:[#allocation182_spill] sm:$0xff] }
 0x1b1   : > { %9153 = vst [vmem:[#allocation158_spill] sm:$0xff] %v6350_v18  ;;  %9155 = vst [vmem:[#allocation159_spill] sm:$0xff] %v6353_v15  ;;  %v6363_v24 = vadd.f32 %v1202_v31, %v9158_v57  ;;  %v1211_v23 = vmul.f32 %v4599_v37, %v879_v8  ;;  %v1212_v29 = vmul.f32 %v4601_v53, %v879_v8  ;;  %v9163_v18 = vld [vmem:[#allocation181_spill] sm:$0xff]  ;;  %v9167_v57 = vld [vmem:[#allocation183_spill] sm:$0xff] }
 0x1b2   : > { %9157 = vst [vmem:[#allocation160_spill] sm:$0xff] %v6360_v3  ;;  %v6368_v49 = vadd.f32 %v1203_v11, %v5235_v26  ;;  %v6371_v15 = vadd.f32 %v1204_v10, %v9161_v9  ;;  %v6374_v35 = vadd.f32 %v1205_v2, %v9163_v18  ;;  %v6377_v1 = vadd.f32 %v1206_v25, %v9165_v54  ;;  %v9169_v11 = vld [vmem:[#allocation184_spill] sm:$0xff]  ;;  %v9171_v9 = vld [vmem:[#allocation185_spill] sm:$0xff]  ;;  %v9173_v18 = vld [vmem:[#allocation186_spill] sm:$0xff] }
 0x1b3   : > { %9159 = vst [vmem:[#allocation161_spill] sm:$0xff] %v6363_v24  ;;  %v1213_v44 = vmul.f32 %v4583_v48, %v883_v19  ;;  %v1214_v31 = vmul.f32 %v4585_v42, %v883_v19  ;;  %v1215_v59 = vmul.f32 %v4587_v43, %v883_v19  ;;  %v1216_v8 = vmul.f32 %v4589_v6, %v883_v19  ;;  %v9185_v24 = vld [vmem:[#allocation173_spill] sm:$0xff] }
 0x1b4   : > { %9160 = vst [vmem:[#allocation323_spill] sm:$0xff] %v6368_v49  ;;  %9162 = vst [vmem:[#allocation180_spill] sm:$0xff] %v6371_v15  ;;  %v6384_v26 = vadd.f32 %v1207_v30, %v9167_v57  ;;  %v6387_v10 = vadd.f32 %v1208_v5, %v9169_v11  ;;  %v6390_v2 = vadd.f32 %v1209_v45, %v9171_v9  ;;  %v887_v49 = vpop.permute.xlu1 %886  ;;  %v9175_v30 = vld [vmem:[#allocation187_spill] sm:$0xff]  ;;  %v9177_v5 = vld [vmem:[#allocation188_spill] sm:$0xff] }
 0x1b5   : > { %9164 = vst [vmem:[#allocation181_spill] sm:$0xff] %v6374_v35  ;;  %9166 = vst [vmem:[#allocation182_spill] sm:$0xff] %v6377_v1  ;;  %v6393_v25 = vadd.f32 %v1210_v63, %v9173_v18  ;;  %v1217_v54 = vmul.f32 %v4591_v7, %v883_v19  ;;  %v1218_v1 = vmul.f32 %v4593_v50, %v883_v19  ;;  %v9179_v9 = vld [vmem:[#allocation170_spill] sm:$0xff] }
 0x1b6   : > { %9168 = vst [vmem:[#allocation183_spill] sm:$0xff] %v6384_v26  ;;  %9170 = vst [vmem:[#allocation184_spill] sm:$0xff] %v6387_v10  ;;  %v1219_v35 = vmul.f32 %v4595_v51, %v883_v19  ;;  %v1220_v15 = vmul.f32 %v4597_v52, %v883_v19  ;;  %v6400_v57 = vadd.f32 %v1211_v23, %v9175_v30  ;;  %v9183_v10 = vld [vmem:[#allocation172_spill] sm:$0xff] }
 0x1b7   : > { %9172 = vst [vmem:[#allocation185_spill] sm:$0xff] %v6390_v2  ;;  %9174 = vst [vmem:[#allocation186_spill] sm:$0xff] %v6393_v25  ;;  %v6403_v11 = vadd.f32 %v1212_v29, %v9177_v5  ;;  %v1221_v45 = vmul.f32 %v4599_v37, %v883_v19  ;;  %v1222_v63 = vmul.f32 %v4601_v53, %v883_v19  ;;  %v9181_v25 = vld [vmem:[#allocation171_spill] sm:$0xff]  ;;  %v9187_v5 = vld [vmem:[#allocation174_spill] sm:$0xff] }
 0x1b8   : > { %9176 = vst [vmem:[#allocation187_spill] sm:$0xff] %v6400_v57  ;;  %v6408_v18 = vadd.f32 %v1213_v44, %v9179_v9  ;;  %v6411_v2 = vadd.f32 %v1214_v31, %v9181_v25  ;;  %v6414_v26 = vadd.f32 %v1215_v59, %v9183_v10  ;;  %v6417_v3 = vadd.f32 %v1216_v8, %v9185_v24  ;;  %v9189_v9 = vld [vmem:[#allocation175_spill] sm:$0xff]  ;;  %v9191_v25 = vld [vmem:[#allocation176_spill] sm:$0xff]  ;;  %v9193_v10 = vld [vmem:[#allocation177_spill] sm:$0xff] }
 0x1b9   : > { %9178 = vst [vmem:[#allocation188_spill] sm:$0xff] %v6403_v11  ;;  %v1223_v23 = vmul.f32 %v4583_v48, %v887_v49  ;;  %v1224_v29 = vmul.f32 %v4585_v42, %v887_v49  ;;  %v1225_v30 = vmul.f32 %v4587_v43, %v887_v49  ;;  %v1226_v19 = vmul.f32 %v4589_v6, %v887_v49 }
 0x1ba   : > { %9180 = vst [vmem:[#allocation170_spill] sm:$0xff] %v6408_v18  ;;  %9182 = vst [vmem:[#allocation171_spill] sm:$0xff] %v6411_v2  ;;  %v6424_v44 = vadd.f32 %v1217_v54, %v9187_v5  ;;  %v6427_v31 = vadd.f32 %v1218_v1, %v9189_v9  ;;  %v6430_v59 = vadd.f32 %v1219_v35, %v9191_v25  ;;  %v9195_v54 = vld [vmem:[#allocation178_spill] sm:$0xff]  ;;  %v9197_v1 = vld [vmem:[#allocation179_spill] sm:$0xff] }
 0x1bb   : > { %9184 = vst [vmem:[#allocation172_spill] sm:$0xff] %v6414_v26  ;;  %9186 = vst [vmem:[#allocation173_spill] sm:$0xff] %v6417_v3  ;;  %v6433_v24 = vadd.f32 %v1220_v15, %v9193_v10  ;;  %v1227_v8 = vmul.f32 %v4591_v7, %v887_v49  ;;  %v1228_v11 = vmul.f32 %v4593_v50, %v887_v49  ;;  %v891_v26 = vpop.permute.xlu0 %890  ;;  %v9199_v25 = vld [vmem:[#allocation199_spill] sm:$0xff]  ;;  %v9205_v2 = vld [vmem:[#allocation202_spill] sm:$0xff] }
 0x1bc   : > { %9188 = vst [vmem:[#allocation174_spill] sm:$0xff] %v6424_v44  ;;  %9190 = vst [vmem:[#allocation175_spill] sm:$0xff] %v6427_v31  ;;  %v1229_v57 = vmul.f32 %v4595_v51, %v887_v49  ;;  %v1230_v3 = vmul.f32 %v4597_v52, %v887_v49  ;;  %v6440_v5 = vadd.f32 %v1221_v45, %v9195_v54  ;;  %v9203_v31 = vld [vmem:[#allocation201_spill] sm:$0xff] }
 0x1bd   : > { %9192 = vst [vmem:[#allocation176_spill] sm:$0xff] %v6430_v59  ;;  %9194 = vst [vmem:[#allocation177_spill] sm:$0xff] %v6433_v24  ;;  %v6443_v9 = vadd.f32 %v1222_v63, %v9197_v1  ;;  %v1231_v35 = vmul.f32 %v4599_v37, %v887_v49  ;;  %v1232_v15 = vmul.f32 %v4601_v53, %v887_v49  ;;  %v9201_v24 = vld [vmem:[#allocation200_spill] sm:$0xff]  ;;  %v9207_v1 = vld [vmem:[#allocation203_spill] sm:$0xff] }
 0x1be   : > { %9196 = vst [vmem:[#allocation178_spill] sm:$0xff] %v6440_v5  ;;  %v6448_v10 = vadd.f32 %v1223_v23, %v9199_v25  ;;  %v6451_v59 = vadd.f32 %v1224_v29, %v9201_v24  ;;  %v6454_v44 = vadd.f32 %v1225_v30, %v9203_v31  ;;  %v6457_v18 = vadd.f32 %v1226_v19, %v9205_v2  ;;  %v9209_v25 = vld [vmem:[#allocation204_spill] sm:$0xff]  ;;  %v9211_v24 = vld [vmem:[#allocation205_spill] sm:$0xff]  ;;  %v9213_v31 = vld [vmem:[#allocation206_spill] sm:$0xff] }
 0x1bf   : > { %9198 = vst [vmem:[#allocation179_spill] sm:$0xff] %v6443_v9  ;;  %v1233_v45 = vmul.f32 %v4583_v48, %v891_v26  ;;  %v1234_v63 = vmul.f32 %v4585_v42, %v891_v26  ;;  %v1235_v54 = vmul.f32 %v4587_v43, %v891_v26  ;;  %v1236_v49 = vmul.f32 %v4589_v6, %v891_v26  ;;  %v9225_v9 = vld [vmem:[#allocation192_spill] sm:$0xff] }
 0x1c0   : > { %9200 = vst [vmem:[#allocation199_spill] sm:$0xff] %v6448_v10  ;;  %9202 = vst [vmem:[#allocation200_spill] sm:$0xff] %v6451_v59  ;;  %v6464_v23 = vadd.f32 %v1227_v8, %v9207_v1  ;;  %v6467_v29 = vadd.f32 %v1228_v11, %v9209_v25  ;;  %v6470_v30 = vadd.f32 %v1229_v57, %v9211_v24  ;;  %v895_v10 = vpop.permute.xlu1 %894  ;;  %v9215_v8 = vld [vmem:[#allocation207_spill] sm:$0xff]  ;;  %v9217_v11 = vld [vmem:[#allocation208_spill] sm:$0xff] }
 0x1c1   : > { %9204 = vst [vmem:[#allocation201_spill] sm:$0xff] %v6454_v44  ;;  %9206 = vst [vmem:[#allocation202_spill] sm:$0xff] %v6457_v18  ;;  %v6473_v2 = vadd.f32 %v1230_v3, %v9213_v31  ;;  %v1237_v19 = vmul.f32 %v4591_v7, %v891_v26  ;;  %v1238_v18 = vmul.f32 %v4593_v50, %v891_v26  ;;  %v9219_v24 = vld [vmem:[#allocation189_spill] sm:$0xff] }
 0x1c2   : > { %9208 = vst [vmem:[#allocation203_spill] sm:$0xff] %v6464_v23  ;;  %9210 = vst [vmem:[#allocation204_spill] sm:$0xff] %v6467_v29  ;;  %v1239_v44 = vmul.f32 %v4595_v51, %v891_v26  ;;  %v1240_v59 = vmul.f32 %v4597_v52, %v891_v26  ;;  %v6480_v1 = vadd.f32 %v1231_v35, %v9215_v8  ;;  %v9223_v29 = vld [vmem:[#allocation191_spill] sm:$0xff] }
 0x1c3   : > { %9212 = vst [vmem:[#allocation205_spill] sm:$0xff] %v6470_v30  ;;  %9214 = vst [vmem:[#allocation206_spill] sm:$0xff] %v6473_v2  ;;  %v6483_v25 = vadd.f32 %v1232_v15, %v9217_v11  ;;  %v1241_v57 = vmul.f32 %v4599_v37, %v891_v26  ;;  %v1242_v3 = vmul.f32 %v4601_v53, %v891_v26  ;;  %v9221_v2 = vld [vmem:[#allocation190_spill] sm:$0xff]  ;;  %v9227_v11 = vld [vmem:[#allocation193_spill] sm:$0xff] }
 0x1c4   : > { %9216 = vst [vmem:[#allocation207_spill] sm:$0xff] %v6480_v1  ;;  %v6488_v31 = vadd.f32 %v1233_v45, %v9219_v24  ;;  %v6491_v30 = vadd.f32 %v1234_v63, %v9221_v2  ;;  %v6494_v23 = vadd.f32 %v1235_v54, %v9223_v29  ;;  %v6497_v5 = vadd.f32 %v1236_v49, %v9225_v9  ;;  %v9229_v24 = vld [vmem:[#allocation194_spill] sm:$0xff]  ;;  %v9231_v2 = vld [vmem:[#allocation195_spill] sm:$0xff]  ;;  %v9233_v29 = vld [vmem:[#allocation196_spill] sm:$0xff] }
 0x1c5   : > { %9218 = vst [vmem:[#allocation208_spill] sm:$0xff] %v6483_v25  ;;  %v1243_v35 = vmul.f32 %v4583_v48, %v895_v10  ;;  %v1244_v15 = vmul.f32 %v4585_v42, %v895_v10  ;;  %v1245_v8 = vmul.f32 %v4587_v43, %v895_v10  ;;  %v1246_v26 = vmul.f32 %v4589_v6, %v895_v10 }
 0x1c6   : > { %9220 = vst [vmem:[#allocation189_spill] sm:$0xff] %v6488_v31  ;;  %9222 = vst [vmem:[#allocation190_spill] sm:$0xff] %v6491_v30  ;;  %v6504_v45 = vadd.f32 %v1237_v19, %v9227_v11  ;;  %v6507_v63 = vadd.f32 %v1238_v18, %v9229_v24  ;;  %v6510_v54 = vadd.f32 %v1239_v44, %v9231_v2  ;;  %v9235_v19 = vld [vmem:[#allocation197_spill] sm:$0xff]  ;;  %v9237_v18 = vld [vmem:[#allocation198_spill] sm:$0xff] }
 0x1c7   : > { %9224 = vst [vmem:[#allocation191_spill] sm:$0xff] %v6494_v23  ;;  %9226 = vst [vmem:[#allocation192_spill] sm:$0xff] %v6497_v5  ;;  %v6513_v9 = vadd.f32 %v1240_v59, %v9233_v29  ;;  %v1247_v49 = vmul.f32 %v4591_v7, %v895_v10  ;;  %v1248_v25 = vmul.f32 %v4593_v50, %v895_v10  ;;  %v899_v23 = vpop.permute.xlu0 %898  ;;  %v9239_v2 = vld [vmem:[#allocation219_spill] sm:$0xff]  ;;  %v9245_v30 = vld [vmem:[#allocation222_spill] sm:$0xff] }
 0x1c8   : > { %9228 = vst [vmem:[#allocation193_spill] sm:$0xff] %v6504_v45  ;;  %9230 = vst [vmem:[#allocation194_spill] sm:$0xff] %v6507_v63  ;;  %v1249_v1 = vmul.f32 %v4595_v51, %v895_v10  ;;  %v1250_v5 = vmul.f32 %v4597_v52, %v895_v10  ;;  %v6520_v11 = vadd.f32 %v1241_v57, %v9235_v19  ;;  %v9243_v63 = vld [vmem:[#allocation221_spill] sm:$0xff] }
 0x1c9   : > { %9232 = vst [vmem:[#allocation195_spill] sm:$0xff] %v6510_v54  ;;  %9234 = vst [vmem:[#allocation196_spill] sm:$0xff] %v6513_v9  ;;  %v6523_v24 = vadd.f32 %v1242_v3, %v9237_v18  ;;  %v1251_v44 = vmul.f32 %v4599_v37, %v895_v10  ;;  %v1252_v59 = vmul.f32 %v4601_v53, %v895_v10  ;;  %v9241_v9 = vld [vmem:[#allocation220_spill] sm:$0xff]  ;;  %v9247_v18 = vld [vmem:[#allocation223_spill] sm:$0xff] }
 0x1ca   : > { %9236 = vst [vmem:[#allocation197_spill] sm:$0xff] %v6520_v11  ;;  %v6528_v29 = vadd.f32 %v1243_v35, %v9239_v2  ;;  %v6531_v54 = vadd.f32 %v1244_v15, %v9241_v9  ;;  %v6534_v45 = vadd.f32 %v1245_v8, %v9243_v63  ;;  %v6537_v31 = vadd.f32 %v1246_v26, %v9245_v30  ;;  %v9249_v2 = vld [vmem:[#allocation224_spill] sm:$0xff]  ;;  %v9251_v9 = vld [vmem:[#allocation225_spill] sm:$0xff]  ;;  %v9253_v63 = vld [vmem:[#allocation226_spill] sm:$0xff] }
 0x1cb   : > { %9238 = vst [vmem:[#allocation198_spill] sm:$0xff] %v6523_v24  ;;  %v1253_v57 = vmul.f32 %v4583_v48, %v899_v23  ;;  %v1254_v3 = vmul.f32 %v4585_v42, %v899_v23  ;;  %v1255_v19 = vmul.f32 %v4587_v43, %v899_v23  ;;  %v1256_v10 = vmul.f32 %v4589_v6, %v899_v23  ;;  %v9255_v26 = vld [vmem:[#allocation227_spill] sm:$0xff]  ;;  %v9314_v24 = vld [vmem:[#allocation308_spill] sm:$0xff] }
 0x1cc   : > { %9240 = vst [vmem:[#allocation219_spill] sm:$0xff] %v6528_v29  ;;  %9242 = vst [vmem:[#allocation220_spill] sm:$0xff] %v6531_v54  ;;  %v6544_v35 = vadd.f32 %v1247_v49, %v9247_v18  ;;  %v6547_v15 = vadd.f32 %v1248_v25, %v9249_v2  ;;  %v6550_v8 = vadd.f32 %v1249_v1, %v9251_v9  ;;  %v903_v18 = vpop.permute.xlu1 %902  ;;  %v9259_v9 = vld [vmem:[#allocation209_spill] sm:$0xff] }
 0x1cd   : > { %9244 = vst [vmem:[#allocation221_spill] sm:$0xff] %v6534_v45  ;;  %9246 = vst [vmem:[#allocation222_spill] sm:$0xff] %v6537_v31  ;;  %v6553_v30 = vadd.f32 %v1250_v5, %v9253_v63  ;;  %v6556_v31 = vadd.f32 %v1251_v44, %v9255_v26  ;;  %v9257_v45 = vld [vmem:[#allocation228_spill] sm:$0xff]  ;;  %v1257_v29 = vmul.f32 %v4591_v7, %v899_v23  ;;  %v9261_v44 = vld [vmem:[#allocation210_spill] sm:$0xff] }
 0x1ce   : > { %9248 = vst [vmem:[#allocation223_spill] sm:$0xff] %v6544_v35  ;;  %9250 = vst [vmem:[#allocation224_spill] sm:$0xff] %v6547_v15  ;;  %v6559_v54 = vadd.f32 %v1252_v59, %v9257_v45  ;;  %v1258_v49 = vmul.f32 %v4593_v50, %v899_v23  ;;  %v1259_v25 = vmul.f32 %v4595_v51, %v899_v23  ;;  %v9263_v45 = vld [vmem:[#allocation211_spill] sm:$0xff]  ;;  %v9267_v35 = vld [vmem:[#allocation213_spill] sm:$0xff] }
 0x1cf   : > { %9252 = vst [vmem:[#allocation225_spill] sm:$0xff] %v6550_v8  ;;  %9254 = vst [vmem:[#allocation226_spill] sm:$0xff] %v6553_v30  ;;  %v1260_v2 = vmul.f32 %v4597_v52, %v899_v23  ;;  %v1261_v1 = vmul.f32 %v4599_v37, %v899_v23  ;;  %v1262_v5 = vmul.f32 %v4601_v53, %v899_v23 }
 0x1d0   : > { %9256 = vst [vmem:[#allocation227_spill] sm:$0xff] %v6556_v31  ;;  %9258 = vst [vmem:[#allocation228_spill] sm:$0xff] %v6559_v54  ;;  %v6568_v63 = vadd.f32 %v1253_v57, %v9259_v9  ;;  %v6571_v26 = vadd.f32 %v1254_v3, %v9261_v44  ;;  %v6574_v59 = vadd.f32 %v1255_v19, %v9263_v45  ;;  %v9265_v54 = vld [vmem:[#allocation212_spill] sm:$0xff]  ;;  %v9269_v9 = vld [vmem:[#allocation214_spill] sm:$0xff] }
 0x1d1   : > { %v6577_v31 = vadd.f32 %v1256_v10, %v9265_v54  ;;  %v1263_v30 = vmul.f32 %v4583_v48, %v903_v18  ;;  %v1264_v8 = vmul.f32 %v4585_v42, %v903_v18  ;;  %v1265_v15 = vmul.f32 %v4587_v43, %v903_v18  ;;  %v9271_v42 = vld [vmem:[#allocation215_spill] sm:$0xff] }
 0x1d2   : > { %9260 = vst [vmem:[#allocation209_spill] sm:$0xff] %v6568_v63  ;;  %9262 = vst [vmem:[#allocation210_spill] sm:$0xff] %v6571_v26  ;;  %v1266_v23 = vmul.f32 %v4589_v6, %v903_v18  ;;  %v6584_v57 = vadd.f32 %v1257_v29, %v9267_v35  ;;  %v6587_v3 = vadd.f32 %v1258_v49, %v9269_v9  ;;  %v9273_v29 = vld [vmem:[#allocation216_spill] sm:$0xff]  ;;  %v9275_v49 = vld [vmem:[#allocation217_spill] sm:$0xff] }
 0x1d3   : > { %9264 = vst [vmem:[#allocation211_spill] sm:$0xff] %v6574_v59  ;;  %9266 = vst [vmem:[#allocation212_spill] sm:$0xff] %v6577_v31  ;;  %v1267_v19 = vmul.f32 %v4591_v7, %v903_v18  ;;  %v1268_v44 = vmul.f32 %v4593_v50, %v903_v18  ;;  %v1269_v54 = vmul.f32 %v4595_v51, %v903_v18  ;;  %v9277_v7 = vld [vmem:[#allocation218_spill] sm:$0xff]  ;;  %v9279_v50 = vld [vmem:[#allocation239_spill] sm:$0xff] }
 0x1d4   : > { %9268 = vst [vmem:[#allocation213_spill] sm:$0xff] %v6584_v57  ;;  %9270 = vst [vmem:[#allocation214_spill] sm:$0xff] %v6587_v3  ;;  %v1270_v10 = vmul.f32 %v4597_v52, %v903_v18  ;;  %v1271_v45 = vmul.f32 %v4599_v37, %v903_v18  ;;  %v1272_v43 = vmul.f32 %v4601_v53, %v903_v18  ;;  %v9281_v52 = vld [vmem:[#allocation240_spill] sm:$0xff]  ;;  %v9283_v37 = vld [vmem:[#allocation241_spill] sm:$0xff] }
 0x1d5   : > { %v6596_v6 = vadd.f32 %v1259_v25, %v9271_v42  ;;  %v6599_v35 = vadd.f32 %v1260_v2, %v9273_v29  ;;  %v6602_v9 = vadd.f32 %v1261_v1, %v9275_v49  ;;  %v6605_v48 = vadd.f32 %v1262_v5, %v9277_v7  ;;  %v9285_v42 = vld [vmem:[#allocation242_spill] sm:$0xff]  ;;  %v9287_v2 = vld [vmem:[#allocation243_spill] sm:$0xff]  ;;  %v9289_v1 = vld [vmem:[#allocation244_spill] sm:$0xff] }
 0x1d6   : > { %v6608_v51 = vadd.f32 %v1263_v30, %v9279_v50  ;;  %v6611_v3 = vadd.f32 %v1264_v8, %v9281_v52  ;;  %v6614_v18 = vadd.f32 %v1265_v15, %v9283_v37  ;;  %v6617_v25 = vadd.f32 %v1266_v23, %v9285_v42  ;;  %v9291_v7 = vld [vmem:[#allocation5_spill] sm:$0xff]  ;;  %v9294_v52 = vld [vmem:[#allocation246_spill] sm:$0xff]  ;;  %v9296_v37 = vld [vmem:[#allocation247_spill] sm:$0xff] }
 0x1d7   : > { %9272 = vst [vmem:[#allocation215_spill] sm:$0xff] %v6596_v6  ;;  %9274 = vst [vmem:[#allocation216_spill] sm:$0xff] %v6599_v35  ;;  %v6620_v29 = vadd.f32 %v1267_v19, %v9287_v2  ;;  %v6623_v49 = vadd.f32 %v1268_v44, %v9289_v1  ;;  %v1793_v5 = vsub.s32 2, %v9291_v7  ;;  %v1797_v50 = vsub.s32 6, %v9291_v7  ;;  %v9292_v30 = vld [vmem:[#allocation245_spill] sm:$0xff]  ;;  %v9298_v23 = vld [vmem:[#allocation248_spill] sm:$0xff] }
 0x1d8   : > { %9276 = vst [vmem:[#allocation217_spill] sm:$0xff] %v6602_v9  ;;  %9278 = vst [vmem:[#allocation218_spill] sm:$0xff] %v6605_v48  ;;  %v6628_v53 = vadd.f32 %v1269_v54, %v9292_v30  ;;  %v6631_v8 = vadd.f32 %v1270_v10, %v9294_v52  ;;  %v6634_v15 = vadd.f32 %v1271_v45, %v9296_v37  ;;  %v4241_v19 = vld [vmem:[#allocation2] sm:$0x77]  ;;  %v4242_v1 = vld [vmem:[#allocation2 + $0x8] sm:$0x77] }
 0x1d9   : > { %9280 = vst [vmem:[#allocation239_spill] sm:$0xff] %v6608_v51  ;;  %9282 = vst [vmem:[#allocation240_spill] sm:$0xff] %v6611_v3  ;;  %v6637_v42 = vadd.f32 %v1272_v43, %v9298_v23  ;;  %v1794_v2 = vrot.slane %v4241_v19, %v1793_v5  ;;  %v1798_v44 = vrot.slane %v4241_v19, %v1797_v50  ;;  %v4244_v54 = vld [vmem:[#allocation2 + $0x18] sm:$0x77]  ;;  %v4245_v10 = vld [vmem:[#allocation2 + $0x20] sm:$0x77]  ;;  %v1665_v43 = vpop.permute.xlu0 %1664 }
 0x1da   : > { %9284 = vst [vmem:[#allocation241_spill] sm:$0xff] %v6614_v18  ;;  %9286 = vst [vmem:[#allocation242_spill] sm:$0xff] %v6617_v25  ;;  %v4243_v25 = vld [vmem:[#allocation2 + $0x10] sm:$0x77]  ;;  %v1818_v30 = vrot.slane %v4244_v54, %v1793_v5  ;;  %v1826_v52 = vrot.slane %v4245_v10, %v1793_v5  ;;  %v9313_v26 = vld [vmem:[#allocation307_spill] sm:$0xff] }
 0x1db   : > { %9288 = vst [vmem:[#allocation243_spill] sm:$0xff] %v6620_v29  ;;  %9290 = vst [vmem:[#allocation244_spill] sm:$0xff] %v6623_v49  ;;  %v1802_v49 = vrot.slane %v4242_v1, %v1793_v5  ;;  %v1806_v29 = vrot.slane %v4242_v1, %v1797_v50  ;;  %v1810_v7 = vrot.slane %v4243_v25, %v1793_v5  ;;  %v9307_v31 = vld [vmem:[#allocation318_spill] sm:$0xff] }
 0x1dc   : > { %9293 = vst [vmem:[#allocation245_spill] sm:$0xff] %v6628_v53  ;;  %9295 = vst [vmem:[#allocation246_spill] sm:$0xff] %v6631_v8  ;;  %v1814_v18 = vrot.slane %v4243_v25, %v1797_v50  ;;  %v1822_v53 = vrot.slane %v4244_v54, %v1797_v50  ;;  %v1830_v8 = vrot.slane %v4245_v10, %v1797_v50 }
 0x1dd   : > { %9297 = vst [vmem:[#allocation247_spill] sm:$0xff] %v6634_v15  ;;  %9299 = vst [vmem:[#allocation248_spill] sm:$0xff] %v6637_v42  ;;  %v6639_v45 = vrot.slane %v1794_v2, %v1793_v5  ;;  %v6641_v37 = vrot.slane %v1798_v44, %v1793_v5  ;;  %v6643_v23 = vrot.slane %v1802_v49, %v1793_v5 }
 0x1de   : > { %v6645_v19 = vrot.slane %v1806_v29, %v1793_v5  ;;  %v6647_v42 = vrot.slane %v1810_v7, %v1793_v5  ;;  %v6649_v1 = vrot.slane %v1814_v18, %v1793_v5  ;;  %v6651_v25 = vrot.slane %v1818_v30, %v1793_v5 }
 0x1df   : > { %v6653_v15 = vrot.slane %v1822_v53, %v1793_v5  ;;  %v6655_v54 = vrot.slane %v1826_v52, %v1793_v5  ;;  %v6657_v50 = vrot.slane %v1830_v8, %v1793_v5  ;;  %v1881_v2 = vmul.f32 %v6639_v45, %v1665_v43 }
 0x1e0   : > { %9300 = vst [vmem:[#allocation324_spill] sm:$0xff] %v6645_v19  ;;  %9301 = vst [vmem:[#allocation325_spill] sm:$0xff] %v6647_v42  ;;  %v1882_v44 = vmul.f32 %v6641_v37, %v1665_v43  ;;  %v1883_v49 = vmul.f32 %v6643_v23, %v1665_v43  ;;  %v1884_v29 = vmul.f32 %v6645_v19, %v1665_v43 }
 0x1e1   : > { %9302 = vst [vmem:[#allocation326_spill] sm:$0xff] %v6649_v1  ;;  %9303 = vst [vmem:[#allocation327_spill] sm:$0xff] %v6651_v25  ;;  %v1885_v7 = vmul.f32 %v6647_v42, %v1665_v43  ;;  %v1886_v18 = vmul.f32 %v6649_v1, %v1665_v43  ;;  %v1887_v30 = vmul.f32 %v6651_v25, %v1665_v43 }
 0x1e2   : > { %9304 = vst [vmem:[#allocation328_spill] sm:$0xff] %v6653_v15  ;;  %9305 = vst [vmem:[#allocation329_spill] sm:$0xff] %v6655_v54  ;;  %v1888_v53 = vmul.f32 %v6653_v15, %v1665_v43  ;;  %v1889_v10 = vmul.f32 %v6655_v54, %v1665_v43  ;;  %v1890_v5 = vmul.f32 %v6657_v50, %v1665_v43 }
 0x1e3   : > { %9306 = vst [vmem:[#allocation330_spill] sm:$0xff] %v6657_v50  ;;  %v2201_v8 = vadd.f32 %v1881_v2, %v5688_v46  ;;  %v2202_v52 = vadd.f32 %v1882_v44, %v5691_v32  ;;  %v2203_v3 = vadd.f32 %v1883_v49, %v5740_v16  ;;  %v2204_v51 = vadd.f32 %v1884_v29, %v5743_v38 }
 0x1e4   : > { %v2205_v48 = vadd.f32 %v1885_v7, %v5748_v4  ;;  %v2206_v9 = vadd.f32 %v1886_v18, %v5751_v56  ;;  %v2207_v35 = vadd.f32 %v1887_v30, %v5754_v58  ;;  %v2208_v6 = vadd.f32 %v1888_v53, %v5757_v33  ;;  %v1669_v58 = vpop.permute.xlu1 %1668 }
 0x1e5   : > { %v2209_v57 = vadd.f32 %v1889_v10, %v5694_v62  ;;  %v2210_v43 = vadd.f32 %v1890_v5, %v9307_v31  ;;  %v2521_v59 = vmax.f32 %v2201_v8, 0.0  ;;  %v2522_v46 = vmax.f32 %v2202_v52, 0.0 }
 0x1e6   : > { %v2523_v2 = vmax.f32 %v2203_v3, 0.0  ;;  %v2524_v32 = vmax.f32 %v2204_v51, 0.0  ;;  %v2525_v44 = vmax.f32 %v2205_v48, 0.0  ;;  %v2526_v16 = vmax.f32 %v2206_v9, 0.0 }
 0x1e7   : > { %v2527_v49 = vmax.f32 %v2207_v35, 0.0  ;;  %v2528_v38 = vmax.f32 %v2208_v6, 0.0  ;;  %v2529_v29 = vmax.f32 %v2209_v57, 0.0  ;;  %v2530_v4 = vmax.f32 %v2210_v43, 0.0  ;;  %v9308_v43 = vld [vmem:[#allocation302_spill] sm:$0xff] }
 0x1e8   : > { %v6679_v7 = vmin.f32 %v2521_v59, 6.0  ;;  %v6681_v56 = vmin.f32 %v2522_v46, 6.0  ;;  %v6683_v33 = vmin.f32 %v2523_v2, 6.0  ;;  %v6685_v62 = vmin.f32 %v2524_v32, 6.0  ;;  %v9309_v2 = vld [vmem:[#allocation303_spill] sm:$0xff] }
 0x1e9   : > { %v6687_v31 = vmin.f32 %v2525_v44, 6.0  ;;  %v6689_v18 = vmin.f32 %v2526_v16, 6.0  ;;  %v6691_v51 = vmin.f32 %v2527_v49, 6.0  ;;  %v6693_v48 = vmin.f32 %v2528_v38, 6.0  ;;  %v9310_v44 = vld [vmem:[#allocation304_spill] sm:$0xff]  ;;  %v9311_v49 = vld [vmem:[#allocation305_spill] sm:$0xff] }
 0x1ea   : > { %v6695_v6 = vmin.f32 %v2529_v29, 6.0  ;;  %v6697_v57 = vmin.f32 %v2530_v4, 6.0  ;;  %v1891_v59 = vmul.f32 %v6639_v45, %v1669_v58  ;;  %v1892_v3 = vmul.f32 %v6641_v37, %v1669_v58  ;;  %v9312_v29 = vld [vmem:[#allocation306_spill] sm:$0xff] }
 0x1eb   : > { %v1893_v35 = vmul.f32 %v6643_v23, %v1669_v58  ;;  %v1894_v9 = vmul.f32 %v6645_v19, %v1669_v58  ;;  %v1895_v30 = vmul.f32 %v6647_v42, %v1669_v58  ;;  %v1896_v53 = vmul.f32 %v6649_v1, %v1669_v58 }
 0x1ec   : > { %v1897_v10 = vmul.f32 %v6651_v25, %v1669_v58  ;;  %v1898_v5 = vmul.f32 %v6653_v15, %v1669_v58  ;;  %v1899_v8 = vmul.f32 %v6655_v54, %v1669_v58  ;;  %v1900_v52 = vmul.f32 %v6657_v50, %v1669_v58 }
 0x1ed   : > { %v2211_v46 = vadd.f32 %v1891_v59, %v9308_v43  ;;  %v2212_v32 = vadd.f32 %v1892_v3, %v9309_v2  ;;  %v2213_v16 = vadd.f32 %v1893_v35, %v9310_v44  ;;  %v2214_v38 = vadd.f32 %v1894_v9, %v9311_v49 }
 0x1ee   : > { %v2215_v4 = vadd.f32 %v1895_v30, %v9312_v29  ;;  %v2216_v63 = vadd.f32 %v1896_v53, %v9313_v26  ;;  %v2217_v11 = vadd.f32 %v1897_v10, %v9314_v24  ;;  %v2218_v21 = vadd.f32 %v1898_v5, %v9315_v61 }
 0x1ef   : > { %v2219_v20 = vadd.f32 %v1899_v8, %v9316_v14  ;;  %v2220_v58 = vadd.f32 %v1900_v52, %v9317_v41  ;;  %v2531_v13 = vmax.f32 %v2211_v46, 0.0  ;;  %v2532_v59 = vmax.f32 %v2212_v32, 0.0  ;;  %v9320_v8 = vld [vmem:[#allocation58_spill] sm:$0xff] }
 0x1f0   : > { %v2533_v43 = vmax.f32 %v2213_v16, 0.0  ;;  %v2534_v3 = vmax.f32 %v2214_v38, 0.0  ;;  %v2535_v2 = vmax.f32 %v2215_v4, 0.0  ;;  %v2536_v35 = vmax.f32 %v2216_v63, 0.0  ;;  %v9318_v4 = vld [vmem:[#allocation28_spill] sm:$0xff]  ;;  %v9319_v16 = vld [vmem:[#allocation29_spill] sm:$0xff] }
 0x1f1   : > { %v2537_v44 = vmax.f32 %v2217_v11, 0.0  ;;  %v2538_v9 = vmax.f32 %v2218_v21, 0.0  ;;  %v2539_v49 = vmax.f32 %v2219_v20, 0.0  ;;  %v2540_v30 = vmax.f32 %v2220_v58, 0.0  ;;  %v9321_v63 = vld [vmem:[#allocation59_spill] sm:$0xff] }
 0x1f2   : > { %v6719_v29 = vmin.f32 %v2531_v13, 6.0  ;;  %v6721_v26 = vmin.f32 %v2532_v59, 6.0  ;;  %v6723_v24 = vmin.f32 %v2533_v43, 6.0  ;;  %v6725_v61 = vmin.f32 %v2534_v3, 6.0  ;;  %v1677_v13 = vpop.permute.xlu0 %1676 }
 0x1f3   : > { %v6727_v14 = vmin.f32 %v2535_v2, 6.0  ;;  %v6729_v41 = vmin.f32 %v2536_v35, 6.0  ;;  %v6731_v53 = vmin.f32 %v2537_v44, 6.0  ;;  %v6733_v10 = vmin.f32 %v2538_v9, 6.0 }
 0x1f4   : > { %v6735_v11 = vmin.f32 %v2539_v49, 6.0  ;;  %v6737_v20 = vmin.f32 %v2540_v30, 6.0  ;;  %v1911_v58 = vmul.f32 %v6639_v45, %v1677_v13  ;;  %v1912_v59 = vmul.f32 %v6641_v37, %v1677_v13 }
 0x1f5   : > { %v1913_v43 = vmul.f32 %v6643_v23, %v1677_v13  ;;  %v1914_v3 = vmul.f32 %v6645_v19, %v1677_v13  ;;  %v1915_v2 = vmul.f32 %v6647_v42, %v1677_v13  ;;  %v1916_v35 = vmul.f32 %v6649_v1, %v1677_v13 }
 0x1f6   : > { %v1917_v44 = vmul.f32 %v6651_v25, %v1677_v13  ;;  %v1918_v9 = vmul.f32 %v6653_v15, %v1677_v13  ;;  %v1919_v49 = vmul.f32 %v6655_v54, %v1677_v13  ;;  %v1920_v30 = vmul.f32 %v6657_v50, %v1677_v13 }
 0x1f7   : > { %v2231_v38 = vadd.f32 %v1911_v58, %v9318_v4  ;;  %v2232_v32 = vadd.f32 %v1912_v59, %v9319_v16  ;;  %v2233_v46 = vadd.f32 %v1913_v43, %v5820_v34  ;;  %v2234_v52 = vadd.f32 %v1914_v3, %v5823_v40 }
 0x1f8   : > { %v2235_v5 = vadd.f32 %v1915_v2, %v9320_v8  ;;  %v2236_v21 = vadd.f32 %v1916_v35, %v9321_v63  ;;  %v2237_v47 = vadd.f32 %v1917_v44, %v9322_v36  ;;  %v2238_v27 = vadd.f32 %v1918_v9, %v9323_v28  ;;  %v1673_v2 = vpop.permute.xlu1 %1672 }
 0x1f9   : > { %v2239_v12 = vadd.f32 %v1919_v49, %v9324_v22  ;;  %v2240_v13 = vadd.f32 %v1920_v30, %v9325_v17  ;;  %v2551_v55 = vmax.f32 %v2231_v38, 0.0  ;;  %v2552_v4 = vmax.f32 %v2232_v32, 0.0 }
 0x1fa   : > { %v2553_v58 = vmax.f32 %v2233_v46, 0.0  ;;  %v2554_v16 = vmax.f32 %v2234_v52, 0.0  ;;  %v2555_v59 = vmax.f32 %v2235_v5, 0.0  ;;  %v2556_v34 = vmax.f32 %v2236_v21, 0.0 }
 0x1fb   : > { %v2557_v43 = vmax.f32 %v2237_v47, 0.0  ;;  %v2558_v40 = vmax.f32 %v2238_v27, 0.0  ;;  %v2559_v3 = vmax.f32 %v2239_v12, 0.0  ;;  %v2560_v8 = vmax.f32 %v2240_v13, 0.0  ;;  %v9335_v13 = vld [vmem:[#allocation18_spill] sm:$0xff] }
 0x1fc   : > { %v6779_v63 = vmin.f32 %v2551_v55, 6.0  ;;  %v6781_v36 = vmin.f32 %v2552_v4, 6.0  ;;  %v6783_v28 = vmin.f32 %v2553_v58, 6.0  ;;  %v6785_v22 = vmin.f32 %v2554_v16, 6.0  ;;  %v9336_v58 = vld [vmem:[#allocation19_spill] sm:$0xff] }
 0x1fd   : > { %v6787_v17 = vmin.f32 %v2555_v59, 6.0  ;;  %v6789_v32 = vmin.f32 %v2556_v34, 6.0  ;;  %v6791_v52 = vmin.f32 %v2557_v43, 6.0  ;;  %v6793_v21 = vmin.f32 %v2558_v40, 6.0  ;;  %v9337_v59 = vld [vmem:[#allocation20_spill] sm:$0xff]  ;;  %v9338_v43 = vld [vmem:[#allocation21_spill] sm:$0xff] }
 0x1fe   : > { %9326 = vst [vmem:[#allocation318_spill] sm:$0xff] %v6781_v36  ;;  %9327 = vst [vmem:[#allocation302_spill] sm:$0xff] %v6783_v28  ;;  %v6795_v27 = vmin.f32 %v2559_v3, 6.0  ;;  %v6797_v12 = vmin.f32 %v2560_v8, 6.0  ;;  %v1901_v55 = vmul.f32 %v6639_v45, %v1673_v2  ;;  %v1902_v47 = vmul.f32 %v6641_v37, %v1673_v2  ;;  %v9339_v3 = vld [vmem:[#allocation22_spill] sm:$0xff]  ;;  %v9344_v28 = vld [vmem:[#allocation27_spill] sm:$0xff] }
 0x1ff   : > { %9328 = vst [vmem:[#allocation303_spill] sm:$0xff] %v6785_v22  ;;  %9329 = vst [vmem:[#allocation304_spill] sm:$0xff] %v6787_v17  ;;  %v1903_v5 = vmul.f32 %v6643_v23, %v1673_v2  ;;  %v1904_v46 = vmul.f32 %v6645_v19, %v1673_v2  ;;  %v1905_v38 = vmul.f32 %v6647_v42, %v1673_v2  ;;  %v9343_v17 = vld [vmem:[#allocation26_spill] sm:$0xff] }
 0x200   : > { %9330 = vst [vmem:[#allocation305_spill] sm:$0xff] %v6789_v32  ;;  %9331 = vst [vmem:[#allocation306_spill] sm:$0xff] %v6791_v52  ;;  %v1906_v35 = vmul.f32 %v6649_v1, %v1673_v2  ;;  %v1907_v44 = vmul.f32 %v6651_v25, %v1673_v2  ;;  %v1908_v9 = vmul.f32 %v6653_v15, %v1673_v2  ;;  %v9342_v52 = vld [vmem:[#allocation25_spill] sm:$0xff] }
 0x201   : > { %9332 = vst [vmem:[#allocation307_spill] sm:$0xff] %v6793_v21  ;;  %9333 = vst [vmem:[#allocation308_spill] sm:$0xff] %v6795_v27  ;;  %v1909_v49 = vmul.f32 %v6655_v54, %v1673_v2  ;;  %v1910_v30 = vmul.f32 %v6657_v50, %v1673_v2  ;;  %v2221_v4 = vadd.f32 %v1901_v55, %v9335_v13  ;;  %v9341_v27 = vld [vmem:[#allocation24_spill] sm:$0xff] }
 0x202   : > { %9334 = vst [vmem:[#allocation309_spill] sm:$0xff] %v6797_v12  ;;  %v2222_v16 = vadd.f32 %v1902_v47, %v9336_v58  ;;  %v2223_v34 = vadd.f32 %v1903_v5, %v9337_v59  ;;  %v2224_v40 = vadd.f32 %v1904_v46, %v9338_v43  ;;  %v2225_v8 = vadd.f32 %v1905_v38, %v9339_v3 }
 0x203   : > { %v2226_v12 = vadd.f32 %v1906_v35, %v9340_v0  ;;  %v2227_v21 = vadd.f32 %v1907_v44, %v9341_v27  ;;  %v2228_v32 = vadd.f32 %v1908_v9, %v9342_v52  ;;  %v2229_v22 = vadd.f32 %v1909_v49, %v9343_v17 }
 0x204   : > { %v2230_v2 = vadd.f32 %v1910_v30, %v9344_v28  ;;  %v2541_v36 = vmax.f32 %v2221_v4, 0.0  ;;  %v2542_v55 = vmax.f32 %v2222_v16, 0.0  ;;  %v2543_v13 = vmax.f32 %v2223_v34, 0.0 }
 0x205   : > { %v2544_v47 = vmax.f32 %v2224_v40, 0.0  ;;  %v2545_v58 = vmax.f32 %v2225_v8, 0.0  ;;  %v2546_v5 = vmax.f32 %v2226_v12, 0.0  ;;  %v2547_v59 = vmax.f32 %v2227_v21, 0.0 }
 0x206   : > { %v2548_v46 = vmax.f32 %v2228_v32, 0.0  ;;  %v2549_v43 = vmax.f32 %v2229_v22, 0.0  ;;  %v2550_v38 = vmax.f32 %v2230_v2, 0.0  ;;  %v2861_v3 = vmin.f32 %v2541_v36, 6.0  ;;  %v1685_v36 = vpop.permute.xlu0 %1684  ;;  %v9355_v2 = vld [vmem:[#allocation36_spill] sm:$0xff] }
 0x207   : > { %v2862_v0 = vmin.f32 %v2542_v55, 6.0  ;;  %v2863_v35 = vmin.f32 %v2543_v13, 6.0  ;;  %v2864_v27 = vmin.f32 %v2544_v47, 6.0  ;;  %v2865_v44 = vmin.f32 %v2545_v58, 6.0  ;;  %v9356_v13 = vld [vmem:[#allocation37_spill] sm:$0xff] }
 0x208   : > { %v2866_v52 = vmin.f32 %v2546_v5, 6.0  ;;  %v2867_v9 = vmin.f32 %v2547_v59, 6.0  ;;  %v2868_v17 = vmin.f32 %v2548_v46, 6.0  ;;  %v2869_v49 = vmin.f32 %v2549_v43, 6.0  ;;  %v9357_v59 = vld [vmem:[#allocation76_spill] sm:$0xff]  ;;  %v9358_v43 = vld [vmem:[#allocation77_spill] sm:$0xff] }
 0x209   : > { %v2870_v28 = vmin.f32 %v2550_v38, 6.0  ;;  %v9345_v30 = vmax.f32 %v6679_v7, %v6719_v29  ;;  %v9346_v32 = vmax.f32 %v6681_v56, %v6721_v26  ;;  %v9347_v21 = vmax.f32 %v6683_v33, %v6723_v24 }
 0x20a   : > { %v9348_v16 = vmax.f32 %v6685_v62, %v6725_v61  ;;  %v9349_v7 = vmax.f32 %v6687_v31, %v6727_v14  ;;  %v9350_v56 = vmax.f32 %v6689_v18, %v6729_v41  ;;  %v9351_v33 = vmax.f32 %v6691_v51, %v6731_v53 }
 0x20b   : > { %v6822_v4 = vmax.f32 %v9345_v30, %v2861_v3  ;;  %v6827_v22 = vmax.f32 %v9346_v32, %v2862_v0  ;;  %v6832_v12 = vmax.f32 %v9347_v21, %v2863_v35  ;;  %v9352_v62 = vmax.f32 %v6693_v48, %v6733_v10  ;;  %v9359_v3 = vld [vmem:[#allocation78_spill] sm:$0xff]  ;;  %v9360_v35 = vld [vmem:[#allocation79_spill] sm:$0xff] }
 0x20c   : > { %v6837_v34 = vmax.f32 %v9348_v16, %v2864_v27  ;;  %v6842_v29 = vmax.f32 %v9349_v7, %v2865_v44  ;;  %v6847_v26 = vmax.f32 %v9350_v56, %v2866_v52  ;;  %v6852_v24 = vmax.f32 %v9351_v33, %v2867_v9  ;;  %v9361_v44 = vld [vmem:[#allocation38_spill] sm:$0xff]  ;;  %v9362_v9 = vld [vmem:[#allocation39_spill] sm:$0xff] }
 0x20d   : > { %v6857_v61 = vmax.f32 %v9352_v62, %v2868_v17  ;;  %v9353_v31 = vmax.f32 %v6695_v6, %v6735_v11  ;;  %v9354_v18 = vmax.f32 %v6697_v57, %v6737_v20  ;;  %v1931_v40 = vmul.f32 %v6639_v45, %v1685_v36  ;;  %v1681_v62 = vpop.permute.xlu1 %1680 }
 0x20e   : > { %v1932_v51 = vmul.f32 %v6641_v37, %v1685_v36  ;;  %v1933_v53 = vmul.f32 %v6643_v23, %v1685_v36  ;;  %v1934_v48 = vmul.f32 %v6645_v19, %v1685_v36  ;;  %v1935_v10 = vmul.f32 %v6647_v42, %v1685_v36 }
 0x20f   : > { %v6862_v14 = vmax.f32 %v9353_v31, %v2869_v49  ;;  %v6867_v41 = vmax.f32 %v9354_v18, %v2870_v28  ;;  %v1936_v8 = vmul.f32 %v6649_v1, %v1685_v36  ;;  %v1937_v6 = vmul.f32 %v6651_v25, %v1685_v36 }
 0x210   : > { %v1938_v11 = vmul.f32 %v6653_v15, %v1685_v36  ;;  %v1939_v57 = vmul.f32 %v6655_v54, %v1685_v36  ;;  %v1940_v20 = vmul.f32 %v6657_v50, %v1685_v36  ;;  %v2251_v55 = vadd.f32 %v1931_v40, %v9355_v2 }
 0x211   : > { %v2252_v47 = vadd.f32 %v1932_v51, %v9356_v13  ;;  %v2253_v58 = vadd.f32 %v1933_v53, %v5900_v60  ;;  %v2254_v5 = vadd.f32 %v1934_v48, %v5903_v39  ;;  %v2255_v46 = vadd.f32 %v1935_v10, %v9357_v59  ;;  %v9363_v59 = vld [vmem:[#allocation32_spill] sm:$0xff] }
 0x212   : > { %v2256_v38 = vadd.f32 %v1936_v8, %v9358_v43  ;;  %v2257_v0 = vadd.f32 %v1937_v6, %v9359_v3  ;;  %v2258_v27 = vadd.f32 %v1938_v11, %v9360_v35  ;;  %v2259_v52 = vadd.f32 %v1939_v57, %v9361_v44  ;;  %v9364_v43 = vld [vmem:[#allocation33_spill] sm:$0xff]  ;;  %v9365_v3 = vld [vmem:[#allocation34_spill] sm:$0xff]  ;;  %v9366_v35 = vld [vmem:[#allocation35_spill] sm:$0xff] }
 0x213   : > { %v2260_v17 = vadd.f32 %v1940_v20, %v9362_v9  ;;  %v2571_v49 = vmax.f32 %v2251_v55, 0.0  ;;  %v2572_v28 = vmax.f32 %v2252_v47, 0.0  ;;  %v2573_v30 = vmax.f32 %v2253_v58, 0.0  ;;  %v9367_v44 = vld [vmem:[#allocation42_spill] sm:$0xff]  ;;  %v9368_v9 = vld [vmem:[#allocation43_spill] sm:$0xff] }
 0x214   : > { %v2574_v32 = vmax.f32 %v2254_v5, 0.0  ;;  %v2575_v36 = vmax.f32 %v2255_v46, 0.0  ;;  %v2576_v60 = vmax.f32 %v2256_v38, 0.0  ;;  %v2577_v21 = vmax.f32 %v2257_v0, 0.0 }
 0x215   : > { %v2578_v39 = vmax.f32 %v2258_v27, 0.0  ;;  %v2579_v16 = vmax.f32 %v2259_v52, 0.0  ;;  %v2580_v7 = vmax.f32 %v2260_v17, 0.0  ;;  %v6889_v56 = vmin.f32 %v2571_v49, 6.0  ;;  %v9369_v49 = vld [vmem:[#allocation54_spill] sm:$0xff] }
 0x216   : > { %v6891_v33 = vmin.f32 %v2572_v28, 6.0  ;;  %v6893_v31 = vmin.f32 %v2573_v30, 6.0  ;;  %v6895_v18 = vmin.f32 %v2574_v32, 6.0  ;;  %v6897_v40 = vmin.f32 %v2575_v36, 6.0  ;;  %v9370_v30 = vld [vmem:[#allocation55_spill] sm:$0xff]  ;;  %v9371_v36 = vld [vmem:[#allocation56_spill] sm:$0xff] }
 0x217   : > { %v6899_v51 = vmin.f32 %v2576_v60, 6.0  ;;  %v6901_v53 = vmin.f32 %v2577_v21, 6.0  ;;  %v6903_v48 = vmin.f32 %v2578_v39, 6.0  ;;  %v6905_v10 = vmin.f32 %v2579_v16, 6.0  ;;  %v9372_v21 = vld [vmem:[#allocation57_spill] sm:$0xff] }
 0x218   : > { %v6907_v8 = vmin.f32 %v2580_v7, 6.0  ;;  %v1921_v6 = vmul.f32 %v6639_v45, %v1681_v62  ;;  %v1922_v11 = vmul.f32 %v6641_v37, %v1681_v62  ;;  %v1923_v57 = vmul.f32 %v6643_v23, %v1681_v62 }
 0x219   : > { %v1924_v20 = vmul.f32 %v6645_v19, %v1681_v62  ;;  %v1925_v2 = vmul.f32 %v6647_v42, %v1681_v62  ;;  %v1926_v55 = vmul.f32 %v6649_v1, %v1681_v62  ;;  %v1927_v13 = vmul.f32 %v6651_v25, %v1681_v62 }
 0x21a   : > { %v1928_v47 = vmul.f32 %v6653_v15, %v1681_v62  ;;  %v1929_v58 = vmul.f32 %v6655_v54, %v1681_v62  ;;  %v1930_v5 = vmul.f32 %v6657_v50, %v1681_v62  ;;  %v2241_v46 = vadd.f32 %v1921_v6, %v9363_v59 }
 0x21b   : > { %v2242_v38 = vadd.f32 %v1922_v11, %v9364_v43  ;;  %v2243_v0 = vadd.f32 %v1923_v57, %v9365_v3  ;;  %v2244_v27 = vadd.f32 %v1924_v20, %v9366_v35  ;;  %v2245_v52 = vadd.f32 %v1925_v2, %v9367_v44 }
 0x21c   : > { %v2246_v17 = vadd.f32 %v1926_v55, %v9368_v9  ;;  %v2247_v28 = vadd.f32 %v1927_v13, %v9369_v49  ;;  %v2248_v32 = vadd.f32 %v1928_v47, %v9370_v30  ;;  %v2249_v60 = vadd.f32 %v1929_v58, %v9371_v36  ;;  %v9376_v30 = vld [vmem:[#allocation304_spill] sm:$0xff]  ;;  %v9377_v36 = vld [vmem:[#allocation305_spill] sm:$0xff] }
 0x21d   : > { %v2250_v39 = vadd.f32 %v1930_v5, %v9372_v21  ;;  %v2561_v16 = vmax.f32 %v2241_v46, 0.0  ;;  %v2562_v7 = vmax.f32 %v2242_v38, 0.0  ;;  %v2563_v62 = vmax.f32 %v2243_v0, 0.0  ;;  %v9373_v38 = vld [vmem:[#allocation318_spill] sm:$0xff] }
 0x21e   : > { %v2564_v6 = vmax.f32 %v2244_v27, 0.0  ;;  %v2565_v11 = vmax.f32 %v2245_v52, 0.0  ;;  %v2566_v57 = vmax.f32 %v2246_v17, 0.0  ;;  %v2567_v59 = vmax.f32 %v2247_v28, 0.0  ;;  %v9374_v27 = vld [vmem:[#allocation302_spill] sm:$0xff]  ;;  %v9375_v17 = vld [vmem:[#allocation303_spill] sm:$0xff] }
 0x21f   : > { %v2568_v20 = vmax.f32 %v2248_v32, 0.0  ;;  %v2569_v43 = vmax.f32 %v2249_v60, 0.0  ;;  %v2570_v2 = vmax.f32 %v2250_v39, 0.0  ;;  %v2881_v3 = vmin.f32 %v2561_v16, 6.0  ;;  %v9378_v21 = vld [vmem:[#allocation306_spill] sm:$0xff]  ;;  %v9379_v16 = vld [vmem:[#allocation307_spill] sm:$0xff] }
 0x220   : > { %v2882_v55 = vmin.f32 %v2562_v7, 6.0  ;;  %v2883_v35 = vmin.f32 %v2563_v62, 6.0  ;;  %v2884_v13 = vmin.f32 %v2564_v6, 6.0  ;;  %v2885_v44 = vmin.f32 %v2565_v11, 6.0  ;;  %v9381_v11 = vld [vmem:[#allocation309_spill] sm:$0xff] }
 0x221   : > { %v2886_v47 = vmin.f32 %v2566_v57, 6.0  ;;  %v2887_v9 = vmin.f32 %v2567_v59, 6.0  ;;  %v2888_v58 = vmin.f32 %v2568_v20, 6.0  ;;  %v2889_v49 = vmin.f32 %v2569_v43, 6.0 }
 0x222   : > { %v2890_v5 = vmin.f32 %v2570_v2, 6.0  ;;  %v3648_v46 = vmax.f32 %v6822_v4, %v6779_v63  ;;  %v3685_v0 = vmax.f32 %v6827_v22, %v9373_v38  ;;  %v3722_v52 = vmax.f32 %v6832_v12, %v9374_v27  ;;  %v1693_v4 = vpop.permute.xlu0 %1692 }
 0x223   : > { %v3759_v28 = vmax.f32 %v6837_v34, %v9375_v17  ;;  %v3796_v32 = vmax.f32 %v6842_v29, %v9376_v30  ;;  %v3833_v60 = vmax.f32 %v6847_v26, %v9377_v36  ;;  %v3870_v39 = vmax.f32 %v6852_v24, %v9378_v21  ;;  %v9380_v24 = vld [vmem:[#allocation308_spill] sm:$0xff] }
 0x224   : > { %v3907_v63 = vmax.f32 %v6857_v61, %v9379_v16  ;;  %v6945_v22 = vmax.f32 %v3648_v46, %v2881_v3  ;;  %v6947_v7 = vmax.f32 %v3685_v0, %v2882_v55  ;;  %v6949_v12 = vmax.f32 %v3722_v52, %v2883_v35  ;;  %v9383_v46 = vld [vmem:[#allocation47_spill] sm:$0xff]  ;;  %v9384_v0 = vld [vmem:[#allocation94_spill] sm:$0xff] }
 0x225   : > { %v6951_v34 = vmax.f32 %v3759_v28, %v2884_v13  ;;  %v6953_v62 = vmax.f32 %v3796_v32, %v2885_v44  ;;  %v6955_v29 = vmax.f32 %v3833_v60, %v2886_v47  ;;  %v6957_v26 = vmax.f32 %v3870_v39, %v2887_v9  ;;  %v9382_v9 = vld [vmem:[#allocation46_spill] sm:$0xff]  ;;  %v9385_v52 = vld [vmem:[#allocation95_spill] sm:$0xff]  ;;  %v9388_v32 = vld [vmem:[#allocation64_spill] sm:$0xff] }
 0x226   : > { %v6959_v6 = vmax.f32 %v3907_v63, %v2888_v58  ;;  %v3944_v61 = vmax.f32 %v6862_v14, %v9380_v24  ;;  %v3981_v57 = vmax.f32 %v6867_v41, %v9381_v11  ;;  %v1951_v59 = vmul.f32 %v6639_v45, %v1693_v4  ;;  %v9389_v60 = vld [vmem:[#allocation65_spill] sm:$0xff]  ;;  %v9390_v39 = vld [vmem:[#allocation48_spill] sm:$0xff] }
 0x227   : > { %v1952_v20 = vmul.f32 %v6641_v37, %v1693_v4  ;;  %v1953_v43 = vmul.f32 %v6643_v23, %v1693_v4  ;;  %v1954_v2 = vmul.f32 %v6645_v19, %v1693_v4  ;;  %v1955_v3 = vmul.f32 %v6647_v42, %v1693_v4  ;;  %v9391_v63 = vld [vmem:[#allocation49_spill] sm:$0xff] }
 0x228   : > { %v1956_v55 = vmul.f32 %v6649_v1, %v1693_v4  ;;  %v6971_v35 = vmax.f32 %v3944_v61, %v2889_v49  ;;  %v6973_v13 = vmax.f32 %v3981_v57, %v2890_v5  ;;  %v1957_v14 = vmul.f32 %v6651_v25, %v1693_v4  ;;  %v9386_v49 = vld [vmem:[#allocation96_spill] sm:$0xff]  ;;  %v9387_v5 = vld [vmem:[#allocation97_spill] sm:$0xff] }
 0x229   : > { %v1958_v41 = vmul.f32 %v6653_v15, %v1693_v4  ;;  %v1959_v44 = vmul.f32 %v6655_v54, %v1693_v4  ;;  %v1960_v47 = vmul.f32 %v6657_v50, %v1693_v4  ;;  %v2271_v58 = vadd.f32 %v1951_v59, %v9382_v9 }
 0x22a   : > { %v2272_v38 = vadd.f32 %v1952_v20, %v9383_v46  ;;  %v2273_v27 = vadd.f32 %v1953_v43, %v9384_v0  ;;  %v2274_v17 = vadd.f32 %v1954_v2, %v9385_v52  ;;  %v2275_v28 = vadd.f32 %v1955_v3, %v9386_v49 }
 0x22b   : > { %v2276_v30 = vadd.f32 %v1956_v55, %v9387_v5  ;;  %v2277_v36 = vadd.f32 %v1957_v14, %v9388_v32  ;;  %v2278_v21 = vadd.f32 %v1958_v41, %v9389_v60  ;;  %v2279_v16 = vadd.f32 %v1959_v44, %v9390_v39  ;;  %v1689_v14 = vpop.permute.xlu1 %1688 }
 0x22c   : > { %v2280_v4 = vadd.f32 %v1960_v47, %v9391_v63  ;;  %v2591_v24 = vmax.f32 %v2271_v58, 0.0  ;;  %v2592_v61 = vmax.f32 %v2272_v38, 0.0  ;;  %v2593_v11 = vmax.f32 %v2273_v27, 0.0 }
 0x22d   : > { %v2594_v57 = vmax.f32 %v2274_v17, 0.0  ;;  %v2595_v59 = vmax.f32 %v2275_v28, 0.0  ;;  %v2596_v20 = vmax.f32 %v2276_v30, 0.0  ;;  %v2597_v43 = vmax.f32 %v2277_v36, 0.0 }
 0x22e   : > { %v2598_v2 = vmax.f32 %v2278_v21, 0.0  ;;  %v2599_v9 = vmax.f32 %v2279_v16, 0.0  ;;  %v2600_v3 = vmax.f32 %v2280_v4, 0.0  ;;  %v6989_v46 = vmin.f32 %v2591_v24, 6.0  ;;  %v9399_v16 = vld [vmem:[#allocation40_spill] sm:$0xff]  ;;  %v9400_v4 = vld [vmem:[#allocation41_spill] sm:$0xff] }
 0x22f   : > { %v6991_v55 = vmin.f32 %v2592_v61, 6.0  ;;  %v6993_v41 = vmin.f32 %v2593_v11, 6.0  ;;  %v6995_v44 = vmin.f32 %v2594_v57, 6.0  ;;  %v6997_v47 = vmin.f32 %v2595_v59, 6.0  ;;  %v9401_v61 = vld [vmem:[#allocation44_spill] sm:$0xff]  ;;  %v9402_v57 = vld [vmem:[#allocation45_spill] sm:$0xff] }
 0x230   : > { %v6999_v58 = vmin.f32 %v2596_v20, 6.0  ;;  %v7001_v38 = vmin.f32 %v2597_v43, 6.0  ;;  %v7003_v0 = vmin.f32 %v2598_v2, 6.0  ;;  %v7005_v27 = vmin.f32 %v2599_v9, 6.0  ;;  %v9403_v20 = vld [vmem:[#allocation52_spill] sm:$0xff]  ;;  %v9404_v2 = vld [vmem:[#allocation53_spill] sm:$0xff] }
 0x231   : > { %9392 = vst [vmem:[#allocation310_spill] sm:$0xff] %v6995_v44  ;;  %9393 = vst [vmem:[#allocation311_spill] sm:$0xff] %v6997_v47  ;;  %v7007_v52 = vmin.f32 %v2600_v3, 6.0  ;;  %v1941_v17 = vmul.f32 %v6639_v45, %v1689_v14  ;;  %v1942_v49 = vmul.f32 %v6641_v37, %v1689_v14  ;;  %v1943_v28 = vmul.f32 %v6643_v23, %v1689_v14  ;;  %v9405_v3 = vld [vmem:[#allocation72_spill] sm:$0xff]  ;;  %v9408_v47 = vld [vmem:[#allocation75_spill] sm:$0xff] }
 0x232   : > { %9394 = vst [vmem:[#allocation28_spill] sm:$0xff] %v6999_v58  ;;  %9395 = vst [vmem:[#allocation29_spill] sm:$0xff] %v7001_v38  ;;  %v1944_v5 = vmul.f32 %v6645_v19, %v1689_v14  ;;  %v1945_v30 = vmul.f32 %v6647_v42, %v1689_v14  ;;  %v1946_v32 = vmul.f32 %v6649_v1, %v1689_v14  ;;  %v9407_v38 = vld [vmem:[#allocation74_spill] sm:$0xff] }
 0x233   : > { %9396 = vst [vmem:[#allocation58_spill] sm:$0xff] %v7003_v0  ;;  %9397 = vst [vmem:[#allocation59_spill] sm:$0xff] %v7005_v27  ;;  %v1947_v36 = vmul.f32 %v6651_v25, %v1689_v14  ;;  %v1948_v60 = vmul.f32 %v6653_v15, %v1689_v14  ;;  %v1949_v21 = vmul.f32 %v6655_v54, %v1689_v14  ;;  %v9406_v27 = vld [vmem:[#allocation73_spill] sm:$0xff] }
 0x234   : > { %9398 = vst [vmem:[#allocation60_spill] sm:$0xff] %v7007_v52  ;;  %v1950_v39 = vmul.f32 %v6657_v50, %v1689_v14  ;;  %v2261_v63 = vadd.f32 %v1941_v17, %v9399_v16  ;;  %v2262_v24 = vadd.f32 %v1942_v49, %v9400_v4  ;;  %v2263_v11 = vadd.f32 %v1943_v28, %v9401_v61 }
 0x235   : > { %v2264_v59 = vadd.f32 %v1944_v5, %v9402_v57  ;;  %v2265_v43 = vadd.f32 %v1945_v30, %v9403_v20  ;;  %v2266_v9 = vadd.f32 %v1946_v32, %v9404_v2  ;;  %v2267_v52 = vadd.f32 %v1947_v36, %v9405_v3 }
 0x236   : > { %v2268_v0 = vadd.f32 %v1948_v60, %v9406_v27  ;;  %v2269_v58 = vadd.f32 %v1949_v21, %v9407_v38  ;;  %v2270_v14 = vadd.f32 %v1950_v39, %v9408_v47  ;;  %v2581_v44 = vmax.f32 %v2261_v63, 0.0 }
 0x237   : > { %v2582_v17 = vmax.f32 %v2262_v24, 0.0  ;;  %v2583_v16 = vmax.f32 %v2263_v11, 0.0  ;;  %v2584_v49 = vmax.f32 %v2264_v59, 0.0  ;;  %v2585_v4 = vmax.f32 %v2265_v43, 0.0 }
 0x238   : > { %v2586_v28 = vmax.f32 %v2266_v9, 0.0  ;;  %v2587_v61 = vmax.f32 %v2267_v52, 0.0  ;;  %v2588_v5 = vmax.f32 %v2268_v0, 0.0  ;;  %v2589_v57 = vmax.f32 %v2269_v58, 0.0 }
 0x239   : > { %v2590_v30 = vmax.f32 %v2270_v14, 0.0  ;;  %v2901_v20 = vmin.f32 %v2581_v44, 6.0  ;;  %v2902_v32 = vmin.f32 %v2582_v17, 6.0  ;;  %v2903_v2 = vmin.f32 %v2583_v16, 6.0  ;;  %v9409_v14 = vld [vmem:[#allocation66_spill] sm:$0xff]  ;;  %v9410_v16 = vld [vmem:[#allocation67_spill] sm:$0xff] }
 0x23a   : > { %v2904_v36 = vmin.f32 %v2584_v49, 6.0  ;;  %v2905_v3 = vmin.f32 %v2585_v4, 6.0  ;;  %v2906_v27 = vmin.f32 %v2586_v28, 6.0  ;;  %v2907_v60 = vmin.f32 %v2587_v61, 6.0  ;;  %v9411_v4 = vld [vmem:[#allocation114_spill] sm:$0xff] }
 0x23b   : > { %v2908_v38 = vmin.f32 %v2588_v5, 6.0  ;;  %v2909_v21 = vmin.f32 %v2589_v57, 6.0  ;;  %v2910_v47 = vmin.f32 %v2590_v30, 6.0  ;;  %v3650_v39 = vmax.f32 %v6945_v22, %v6889_v56  ;;  %v1701_v22 = vpop.permute.xlu0 %1700  ;;  %v9412_v61 = vld [vmem:[#allocation82_spill] sm:$0xff]  ;;  %v9413_v57 = vld [vmem:[#allocation83_spill] sm:$0xff] }
 0x23c   : > { %v3687_v63 = vmax.f32 %v6947_v7, %v6891_v33  ;;  %v3724_v58 = vmax.f32 %v6949_v12, %v6893_v31  ;;  %v3761_v44 = vmax.f32 %v6951_v34, %v6895_v18  ;;  %v3798_v0 = vmax.f32 %v6953_v62, %v6897_v40 }
 0x23d   : > { %v3835_v52 = vmax.f32 %v6955_v29, %v6899_v51  ;;  %v3872_v24 = vmax.f32 %v6957_v26, %v6901_v53  ;;  %v3909_v56 = vmax.f32 %v6959_v6, %v6903_v48  ;;  %v7045_v33 = vmax.f32 %v3650_v39, %v2901_v20  ;;  %v9414_v20 = vld [vmem:[#allocation84_spill] sm:$0xff] }
 0x23e   : > { %v7047_v7 = vmax.f32 %v3687_v63, %v2902_v32  ;;  %v7049_v31 = vmax.f32 %v3724_v58, %v2903_v2  ;;  %v7051_v18 = vmax.f32 %v3761_v44, %v2904_v36  ;;  %v7053_v12 = vmax.f32 %v3798_v0, %v2905_v3  ;;  %v9415_v2 = vld [vmem:[#allocation85_spill] sm:$0xff]  ;;  %v9416_v3 = vld [vmem:[#allocation86_spill] sm:$0xff] }
 0x23f   : > { %v7055_v40 = vmax.f32 %v3835_v52, %v2906_v27  ;;  %v7057_v51 = vmax.f32 %v3872_v24, %v2907_v60  ;;  %v7059_v34 = vmax.f32 %v3909_v56, %v2908_v38  ;;  %v3946_v53 = vmax.f32 %v6971_v35, %v6905_v10  ;;  %v9417_v60 = vld [vmem:[#allocation68_spill] sm:$0xff] }
 0x240   : > { %v3983_v48 = vmax.f32 %v6973_v13, %v6907_v8  ;;  %v1971_v62 = vmul.f32 %v6639_v45, %v1701_v22  ;;  %v1972_v29 = vmul.f32 %v6641_v37, %v1701_v22  ;;  %v1973_v26 = vmul.f32 %v6643_v23, %v1701_v22 }
 0x241   : > { %v1974_v6 = vmul.f32 %v6645_v19, %v1701_v22  ;;  %v1975_v11 = vmul.f32 %v6647_v42, %v1701_v22  ;;  %v1976_v59 = vmul.f32 %v6649_v1, %v1701_v22  ;;  %v7071_v43 = vmax.f32 %v3946_v53, %v2909_v21  ;;  %v9418_v21 = vld [vmem:[#allocation69_spill] sm:$0xff] }
 0x242   : > { %v7073_v9 = vmax.f32 %v3983_v48, %v2910_v47  ;;  %v1977_v10 = vmul.f32 %v6651_v25, %v1701_v22  ;;  %v1978_v8 = vmul.f32 %v6653_v15, %v1701_v22  ;;  %v1979_v35 = vmul.f32 %v6655_v54, %v1701_v22 }
 0x243   : > { %v1980_v13 = vmul.f32 %v6657_v50, %v1701_v22  ;;  %v2291_v17 = vadd.f32 %v1971_v62, %v9409_v14  ;;  %v2292_v49 = vadd.f32 %v1972_v29, %v9410_v16  ;;  %v2293_v28 = vadd.f32 %v1973_v26, %v9411_v4  ;;  %v1697_v29 = vpop.permute.xlu1 %1696 }
 0x244   : > { %v2294_v5 = vadd.f32 %v1974_v6, %v9412_v61  ;;  %v2295_v30 = vadd.f32 %v1975_v11, %v9413_v57  ;;  %v2296_v32 = vadd.f32 %v1976_v59, %v9414_v20  ;;  %v2297_v36 = vadd.f32 %v1977_v10, %v9415_v2  ;;  %v9419_v20 = vld [vmem:[#allocation50_spill] sm:$0xff]  ;;  %v9420_v2 = vld [vmem:[#allocation51_spill] sm:$0xff] }
 0x245   : > { %v2298_v27 = vadd.f32 %v1978_v8, %v9416_v3  ;;  %v2299_v38 = vadd.f32 %v1979_v35, %v9417_v60  ;;  %v2300_v47 = vadd.f32 %v1980_v13, %v9418_v21  ;;  %v2611_v39 = vmax.f32 %v2291_v17, 0.0  ;;  %v9421_v3 = vld [vmem:[#allocation62_spill] sm:$0xff]  ;;  %v9422_v60 = vld [vmem:[#allocation63_spill] sm:$0xff] }
 0x246   : > { %v2612_v63 = vmax.f32 %v2292_v49, 0.0  ;;  %v2613_v58 = vmax.f32 %v2293_v28, 0.0  ;;  %v2614_v44 = vmax.f32 %v2294_v5, 0.0  ;;  %v2615_v0 = vmax.f32 %v2295_v30, 0.0  ;;  %v9423_v21 = vld [vmem:[#allocation70_spill] sm:$0xff] }
 0x247   : > { %v2616_v52 = vmax.f32 %v2296_v32, 0.0  ;;  %v2617_v24 = vmax.f32 %v2297_v36, 0.0  ;;  %v2618_v56 = vmax.f32 %v2298_v27, 0.0  ;;  %v2619_v22 = vmax.f32 %v2299_v38, 0.0 }
 0x248   : > { %v2620_v53 = vmax.f32 %v2300_v47, 0.0  ;;  %v7089_v48 = vmin.f32 %v2611_v39, 6.0  ;;  %v7091_v62 = vmin.f32 %v2612_v63, 6.0  ;;  %v7093_v26 = vmin.f32 %v2613_v58, 6.0  ;;  %v9424_v39 = vld [vmem:[#allocation71_spill] sm:$0xff]  ;;  %v9425_v58 = vld [vmem:[#allocation90_spill] sm:$0xff] }
 0x249   : > { %v7095_v6 = vmin.f32 %v2614_v44, 6.0  ;;  %v7097_v11 = vmin.f32 %v2615_v0, 6.0  ;;  %v7099_v59 = vmin.f32 %v2616_v52, 6.0  ;;  %v7101_v10 = vmin.f32 %v2617_v24, 6.0  ;;  %v9426_v0 = vld [vmem:[#allocation91_spill] sm:$0xff]  ;;  %v9427_v24 = vld [vmem:[#allocation92_spill] sm:$0xff] }
 0x24a   : > { %v7103_v8 = vmin.f32 %v2618_v56, 6.0  ;;  %v7105_v35 = vmin.f32 %v2619_v22, 6.0  ;;  %v7107_v13 = vmin.f32 %v2620_v53, 6.0  ;;  %v1961_v14 = vmul.f32 %v6639_v45, %v1697_v29  ;;  %v9428_v22 = vld [vmem:[#allocation93_spill] sm:$0xff] }
 0x24b   : > { %v1962_v17 = vmul.f32 %v6641_v37, %v1697_v29  ;;  %v1963_v16 = vmul.f32 %v6643_v23, %v1697_v29  ;;  %v1964_v49 = vmul.f32 %v6645_v19, %v1697_v29  ;;  %v1965_v4 = vmul.f32 %v6647_v42, %v1697_v29 }
 0x24c   : > { %v1966_v28 = vmul.f32 %v6649_v1, %v1697_v29  ;;  %v1967_v61 = vmul.f32 %v6651_v25, %v1697_v29  ;;  %v1968_v5 = vmul.f32 %v6653_v15, %v1697_v29  ;;  %v1969_v57 = vmul.f32 %v6655_v54, %v1697_v29 }
 0x24d   : > { %v1970_v30 = vmul.f32 %v6657_v50, %v1697_v29  ;;  %v2281_v32 = vadd.f32 %v1961_v14, %v9419_v20  ;;  %v2282_v36 = vadd.f32 %v1962_v17, %v9420_v2  ;;  %v2283_v27 = vadd.f32 %v1963_v16, %v9421_v3 }
 0x24e   : > { %v2284_v38 = vadd.f32 %v1964_v49, %v9422_v60  ;;  %v2285_v47 = vadd.f32 %v1965_v4, %v9423_v21  ;;  %v2286_v63 = vadd.f32 %v1966_v28, %v9424_v39  ;;  %v2287_v44 = vadd.f32 %v1967_v61, %v9425_v58 }
 0x24f   : > { %v2288_v52 = vadd.f32 %v1968_v5, %v9426_v0  ;;  %v2289_v56 = vadd.f32 %v1969_v57, %v9427_v24  ;;  %v2290_v53 = vadd.f32 %v1970_v30, %v9428_v22  ;;  %v2601_v29 = vmax.f32 %v2281_v32, 0.0  ;;  %v9432_v22 = vld [vmem:[#allocation29_spill] sm:$0xff] }
 0x250   : > { %v2602_v14 = vmax.f32 %v2282_v36, 0.0  ;;  %v2603_v20 = vmax.f32 %v2283_v27, 0.0  ;;  %v2604_v17 = vmax.f32 %v2284_v38, 0.0  ;;  %v2605_v2 = vmax.f32 %v2285_v47, 0.0  ;;  %v9429_v38 = vld [vmem:[#allocation310_spill] sm:$0xff] }
 0x251   : > { %v2606_v16 = vmax.f32 %v2286_v63, 0.0  ;;  %v2607_v3 = vmax.f32 %v2287_v44, 0.0  ;;  %v2608_v49 = vmax.f32 %v2288_v52, 0.0  ;;  %v2609_v60 = vmax.f32 %v2289_v56, 0.0  ;;  %v9430_v63 = vld [vmem:[#allocation311_spill] sm:$0xff]  ;;  %v9431_v52 = vld [vmem:[#allocation28_spill] sm:$0xff] }
 0x252   : > { %v2610_v4 = vmax.f32 %v2290_v53, 0.0  ;;  %v2921_v21 = vmin.f32 %v2601_v29, 6.0  ;;  %v2922_v28 = vmin.f32 %v2602_v14, 6.0  ;;  %v2923_v39 = vmin.f32 %v2603_v20, 6.0  ;;  %v9433_v29 = vld [vmem:[#allocation58_spill] sm:$0xff]  ;;  %v9435_v20 = vld [vmem:[#allocation60_spill] sm:$0xff] }
 0x253   : > { %v2924_v61 = vmin.f32 %v2604_v17, 6.0  ;;  %v2925_v58 = vmin.f32 %v2605_v2, 6.0  ;;  %v2926_v5 = vmin.f32 %v2606_v16, 6.0  ;;  %v2927_v0 = vmin.f32 %v2607_v3, 6.0 }
 0x254   : > { %v2928_v57 = vmin.f32 %v2608_v49, 6.0  ;;  %v2929_v24 = vmin.f32 %v2609_v60, 6.0  ;;  %v2930_v30 = vmin.f32 %v2610_v4, 6.0  ;;  %v3652_v32 = vmax.f32 %v7045_v33, %v6989_v46  ;;  %v1709_v33 = vpop.permute.xlu0 %1708 }
 0x255   : > { %v3689_v36 = vmax.f32 %v7047_v7, %v6991_v55  ;;  %v3726_v27 = vmax.f32 %v7049_v31, %v6993_v41  ;;  %v3763_v47 = vmax.f32 %v7051_v18, %v9429_v38  ;;  %v3800_v44 = vmax.f32 %v7053_v12, %v9430_v63 }
 0x256   : > { %v3837_v56 = vmax.f32 %v7055_v40, %v9431_v52  ;;  %v3874_v53 = vmax.f32 %v7057_v51, %v9432_v22  ;;  %v3911_v46 = vmax.f32 %v7059_v34, %v9433_v29  ;;  %v7145_v55 = vmax.f32 %v3652_v32, %v2921_v21  ;;  %v9434_v51 = vld [vmem:[#allocation59_spill] sm:$0xff]  ;;  %v9438_v32 = vld [vmem:[#allocation100_spill] sm:$0xff] }
 0x257   : > { %v7147_v7 = vmax.f32 %v3689_v36, %v2922_v28  ;;  %v7149_v41 = vmax.f32 %v3726_v27, %v2923_v39  ;;  %v7151_v31 = vmax.f32 %v3763_v47, %v2924_v61  ;;  %v7153_v18 = vmax.f32 %v3800_v44, %v2925_v58  ;;  %v9436_v58 = vld [vmem:[#allocation87_spill] sm:$0xff]  ;;  %v9439_v27 = vld [vmem:[#allocation101_spill] sm:$0xff]  ;;  %v9442_v44 = vld [vmem:[#allocation104_spill] sm:$0xff] }
 0x258   : > { %v7155_v12 = vmax.f32 %v3837_v56, %v2926_v5  ;;  %v7157_v40 = vmax.f32 %v3874_v53, %v2927_v0  ;;  %v7159_v14 = vmax.f32 %v3911_v46, %v2928_v57  ;;  %v3948_v34 = vmax.f32 %v7071_v43, %v9434_v51  ;;  %v9437_v0 = vld [vmem:[#allocation98_spill] sm:$0xff]  ;;  %v9443_v56 = vld [vmem:[#allocation105_spill] sm:$0xff]  ;;  %v9444_v53 = vld [vmem:[#allocation99_spill] sm:$0xff] }
 0x259   : > { %v3985_v17 = vmax.f32 %v7073_v9, %v9435_v20  ;;  %v1991_v2 = vmul.f32 %v6639_v45, %v1709_v33  ;;  %v1992_v16 = vmul.f32 %v6641_v37, %v1709_v33  ;;  %v1993_v3 = vmul.f32 %v6643_v23, %v1709_v33  ;;  %v9445_v46 = vld [vmem:[#allocation106_spill] sm:$0xff] }
 0x25a   : > { %v1994_v49 = vmul.f32 %v6645_v19, %v1709_v33  ;;  %v1995_v60 = vmul.f32 %v6647_v42, %v1709_v33  ;;  %v1996_v4 = vmul.f32 %v6649_v1, %v1709_v33  ;;  %v7171_v21 = vmax.f32 %v3948_v34, %v2929_v24  ;;  %v9440_v24 = vld [vmem:[#allocation102_spill] sm:$0xff] }
 0x25b   : > { %v7173_v28 = vmax.f32 %v3985_v17, %v2930_v30  ;;  %v1997_v43 = vmul.f32 %v6651_v25, %v1709_v33  ;;  %v1998_v9 = vmul.f32 %v6653_v15, %v1709_v33  ;;  %v1999_v39 = vmul.f32 %v6655_v54, %v1709_v33  ;;  %v9441_v30 = vld [vmem:[#allocation103_spill] sm:$0xff] }
 0x25c   : > { %v2000_v61 = vmul.f32 %v6657_v50, %v1709_v33  ;;  %v2311_v5 = vadd.f32 %v1991_v2, %v9436_v58  ;;  %v2312_v57 = vadd.f32 %v1992_v16, %v9437_v0  ;;  %v2313_v36 = vadd.f32 %v1993_v3, %v9438_v32 }
 0x25d   : > { %v2314_v38 = vadd.f32 %v1994_v49, %v9439_v27  ;;  %v2315_v47 = vadd.f32 %v1995_v60, %v9440_v24  ;;  %v2316_v63 = vadd.f32 %v1996_v4, %v9441_v30  ;;  %v2317_v52 = vadd.f32 %v1997_v43, %v9442_v44  ;;  %v1705_v43 = vpop.permute.xlu1 %1704 }
 0x25e   : > { %v2318_v22 = vadd.f32 %v1998_v9, %v9443_v56  ;;  %v2319_v29 = vadd.f32 %v1999_v39, %v9444_v53  ;;  %v2320_v33 = vadd.f32 %v2000_v61, %v9445_v46  ;;  %v2631_v51 = vmax.f32 %v2311_v5, 0.0 }
 0x25f   : > { %v2632_v34 = vmax.f32 %v2312_v57, 0.0  ;;  %v2633_v20 = vmax.f32 %v2313_v36, 0.0  ;;  %v2634_v17 = vmax.f32 %v2314_v38, 0.0  ;;  %v2635_v2 = vmax.f32 %v2315_v47, 0.0 }
 0x260   : > { %v2636_v16 = vmax.f32 %v2316_v63, 0.0  ;;  %v2637_v3 = vmax.f32 %v2317_v52, 0.0  ;;  %v2638_v49 = vmax.f32 %v2318_v22, 0.0  ;;  %v2639_v58 = vmax.f32 %v2319_v29, 0.0  ;;  %v9453_v29 = vld [vmem:[#allocation80_spill] sm:$0xff] }
 0x261   : > { %v2640_v60 = vmax.f32 %v2320_v33, 0.0  ;;  %v7189_v0 = vmin.f32 %v2631_v51, 6.0  ;;  %v7191_v4 = vmin.f32 %v2632_v34, 6.0  ;;  %v7193_v9 = vmin.f32 %v2633_v20, 6.0  ;;  %v9454_v33 = vld [vmem:[#allocation81_spill] sm:$0xff]  ;;  %v9455_v34 = vld [vmem:[#allocation88_spill] sm:$0xff] }
 0x262   : > { %v7195_v39 = vmin.f32 %v2634_v17, 6.0  ;;  %v7197_v61 = vmin.f32 %v2635_v2, 6.0  ;;  %v7199_v5 = vmin.f32 %v2636_v16, 6.0  ;;  %v7201_v57 = vmin.f32 %v2637_v3, 6.0  ;;  %v9456_v17 = vld [vmem:[#allocation89_spill] sm:$0xff]  ;;  %v9457_v16 = vld [vmem:[#allocation108_spill] sm:$0xff] }
 0x263   : > { %v7203_v32 = vmin.f32 %v2638_v49, 6.0  ;;  %v7205_v36 = vmin.f32 %v2639_v58, 6.0  ;;  %v7207_v27 = vmin.f32 %v2640_v60, 6.0  ;;  %v1981_v38 = vmul.f32 %v6639_v45, %v1705_v43  ;;  %v9458_v49 = vld [vmem:[#allocation109_spill] sm:$0xff]  ;;  %v9459_v60 = vld [vmem:[#allocation110_spill] sm:$0xff] }
 0x264   : > { %9446 = vst [vmem:[#allocation61_spill] sm:$0xff] %v7195_v39  ;;  %9447 = vst [vmem:[#allocation30_spill] sm:$0xff] %v7197_v61  ;;  %v1982_v24 = vmul.f32 %v6641_v37, %v1705_v43  ;;  %v1983_v47 = vmul.f32 %v6643_v23, %v1705_v43  ;;  %v1984_v30 = vmul.f32 %v6645_v19, %v1705_v43  ;;  %v9462_v61 = vld [vmem:[#allocation113_spill] sm:$0xff] }
 0x265   : > { %9448 = vst [vmem:[#allocation31_spill] sm:$0xff] %v7199_v5  ;;  %9449 = vst [vmem:[#allocation18_spill] sm:$0xff] %v7201_v57  ;;  %v1985_v63 = vmul.f32 %v6647_v42, %v1705_v43  ;;  %v1986_v44 = vmul.f32 %v6649_v1, %v1705_v43  ;;  %v1987_v52 = vmul.f32 %v6651_v25, %v1705_v43  ;;  %v9461_v57 = vld [vmem:[#allocation112_spill] sm:$0xff] }
 0x266   : > { %9450 = vst [vmem:[#allocation19_spill] sm:$0xff] %v7203_v32  ;;  %9451 = vst [vmem:[#allocation20_spill] sm:$0xff] %v7205_v36  ;;  %v1988_v56 = vmul.f32 %v6653_v15, %v1705_v43  ;;  %v1989_v22 = vmul.f32 %v6655_v54, %v1705_v43  ;;  %v1990_v53 = vmul.f32 %v6657_v50, %v1705_v43  ;;  %v9460_v36 = vld [vmem:[#allocation111_spill] sm:$0xff] }
 0x267   : > { %9452 = vst [vmem:[#allocation21_spill] sm:$0xff] %v7207_v27  ;;  %v2301_v46 = vadd.f32 %v1981_v38, %v9453_v29  ;;  %v2302_v51 = vadd.f32 %v1982_v24, %v9454_v33  ;;  %v2303_v20 = vadd.f32 %v1983_v47, %v9455_v34  ;;  %v2304_v2 = vadd.f32 %v1984_v30, %v9456_v17 }
 0x268   : > { %v2305_v3 = vadd.f32 %v1985_v63, %v9457_v16  ;;  %v2306_v58 = vadd.f32 %v1986_v44, %v9458_v49  ;;  %v2307_v27 = vadd.f32 %v1987_v52, %v9459_v60  ;;  %v2308_v32 = vadd.f32 %v1988_v56, %v9460_v36 }
 0x269   : > { %v2309_v5 = vadd.f32 %v1989_v22, %v9461_v57  ;;  %v2310_v43 = vadd.f32 %v1990_v53, %v9462_v61  ;;  %v2621_v39 = vmax.f32 %v2301_v46, 0.0  ;;  %v2622_v38 = vmax.f32 %v2302_v51, 0.0 }
 0x26a   : > { %v2623_v29 = vmax.f32 %v2303_v20, 0.0  ;;  %v2624_v24 = vmax.f32 %v2304_v2, 0.0  ;;  %v2625_v33 = vmax.f32 %v2305_v3, 0.0  ;;  %v2626_v47 = vmax.f32 %v2306_v58, 0.0 }
 0x26b   : > { %v2627_v34 = vmax.f32 %v2307_v27, 0.0  ;;  %v2628_v30 = vmax.f32 %v2308_v32, 0.0  ;;  %v2629_v17 = vmax.f32 %v2309_v5, 0.0  ;;  %v2630_v63 = vmax.f32 %v2310_v43, 0.0  ;;  %v9463_v43 = vld [vmem:[#allocation115_spill] sm:$0xff] }
 0x26c   : > { %v2941_v16 = vmin.f32 %v2621_v39, 6.0  ;;  %v2942_v44 = vmin.f32 %v2622_v38, 6.0  ;;  %v2943_v49 = vmin.f32 %v2623_v29, 6.0  ;;  %v2944_v52 = vmin.f32 %v2624_v24, 6.0  ;;  %v9464_v29 = vld [vmem:[#allocation116_spill] sm:$0xff] }
 0x26d   : > { %v2945_v60 = vmin.f32 %v2625_v33, 6.0  ;;  %v2946_v36 = vmin.f32 %v2626_v47, 6.0  ;;  %v2947_v56 = vmin.f32 %v2627_v34, 6.0  ;;  %v2948_v57 = vmin.f32 %v2628_v30, 6.0  ;;  %v9465_v33 = vld [vmem:[#allocation117_spill] sm:$0xff]  ;;  %v9466_v34 = vld [vmem:[#allocation118_spill] sm:$0xff] }
 0x26e   : > { %v2949_v22 = vmin.f32 %v2629_v17, 6.0  ;;  %v2950_v61 = vmin.f32 %v2630_v63, 6.0  ;;  %v3654_v53 = vmax.f32 %v7145_v55, %v7089_v48  ;;  %v3691_v46 = vmax.f32 %v7147_v7, %v7091_v62  ;;  %v1717_v55 = vpop.permute.xlu0 %1716  ;;  %v9467_v17 = vld [vmem:[#allocation119_spill] sm:$0xff] }
 0x26f   : > { %v3728_v5 = vmax.f32 %v7149_v41, %v7093_v26  ;;  %v3765_v39 = vmax.f32 %v7151_v31, %v7095_v6  ;;  %v3802_v32 = vmax.f32 %v7153_v18, %v7097_v11  ;;  %v3839_v27 = vmax.f32 %v7155_v12, %v7099_v59 }
 0x270   : > { %v3876_v51 = vmax.f32 %v7157_v40, %v7101_v10  ;;  %v3913_v48 = vmax.f32 %v7159_v14, %v7103_v8  ;;  %v7245_v62 = vmax.f32 %v3654_v53, %v2941_v16  ;;  %v7247_v7 = vmax.f32 %v3691_v46, %v2942_v44  ;;  %v9468_v16 = vld [vmem:[#allocation120_spill] sm:$0xff] }
 0x271   : > { %v7249_v26 = vmax.f32 %v3728_v5, %v2943_v49  ;;  %v7251_v6 = vmax.f32 %v3765_v39, %v2944_v52  ;;  %v7253_v41 = vmax.f32 %v3802_v32, %v2945_v60  ;;  %v7255_v11 = vmax.f32 %v3839_v27, %v2946_v36  ;;  %v9469_v49 = vld [vmem:[#allocation121_spill] sm:$0xff]  ;;  %v9470_v60 = vld [vmem:[#allocation122_spill] sm:$0xff] }
 0x272   : > { %v7257_v59 = vmax.f32 %v3876_v51, %v2947_v56  ;;  %v7259_v31 = vmax.f32 %v3913_v48, %v2948_v57  ;;  %v3950_v10 = vmax.f32 %v7171_v21, %v7105_v35  ;;  %v3987_v8 = vmax.f32 %v7173_v28, %v7107_v13  ;;  %v9471_v56 = vld [vmem:[#allocation123_spill] sm:$0xff] }
 0x273   : > { %v2011_v18 = vmul.f32 %v6639_v45, %v1717_v55  ;;  %v2012_v12 = vmul.f32 %v6641_v37, %v1717_v55  ;;  %v2013_v40 = vmul.f32 %v6643_v23, %v1717_v55  ;;  %v2014_v14 = vmul.f32 %v6645_v19, %v1717_v55 }
 0x274   : > { %v2015_v20 = vmul.f32 %v6647_v42, %v1717_v55  ;;  %v2016_v2 = vmul.f32 %v6649_v1, %v1717_v55  ;;  %v7271_v3 = vmax.f32 %v3950_v10, %v2949_v22  ;;  %v7273_v58 = vmax.f32 %v3987_v8, %v2950_v61  ;;  %v9472_v22 = vld [vmem:[#allocation124_spill] sm:$0xff] }
 0x275   : > { %v2017_v35 = vmul.f32 %v6651_v25, %v1717_v55  ;;  %v2018_v13 = vmul.f32 %v6653_v15, %v1717_v55  ;;  %v2019_v21 = vmul.f32 %v6655_v54, %v1717_v55  ;;  %v2020_v28 = vmul.f32 %v6657_v50, %v1717_v55 }
 0x276   : > { %v2331_v38 = vadd.f32 %v2011_v18, %v9463_v43  ;;  %v2332_v24 = vadd.f32 %v2012_v12, %v9464_v29  ;;  %v2333_v47 = vadd.f32 %v2013_v40, %v9465_v33  ;;  %v2334_v30 = vadd.f32 %v2014_v14, %v9466_v34  ;;  %v1713_v12 = vpop.permute.xlu1 %1712 }
 0x277   : > { %v2335_v63 = vadd.f32 %v2015_v20, %v9467_v17  ;;  %v2336_v44 = vadd.f32 %v2016_v2, %v9468_v16  ;;  %v2337_v52 = vadd.f32 %v2017_v35, %v9469_v49  ;;  %v2338_v36 = vadd.f32 %v2018_v13, %v9470_v60  ;;  %v9473_v16 = vld [vmem:[#allocation107_spill] sm:$0xff]  ;;  %v9474_v49 = vld [vmem:[#allocation125_spill] sm:$0xff]  ;;  %v9475_v60 = vld [vmem:[#allocation126_spill] sm:$0xff] }
 0x278   : > { %v2339_v57 = vadd.f32 %v2019_v21, %v9471_v56  ;;  %v2340_v61 = vadd.f32 %v2020_v28, %v9472_v22  ;;  %v2651_v53 = vmax.f32 %v2331_v38, 0.0  ;;  %v2652_v46 = vmax.f32 %v2332_v24, 0.0  ;;  %v9476_v56 = vld [vmem:[#allocation127_spill] sm:$0xff]  ;;  %v9477_v22 = vld [vmem:[#allocation128_spill] sm:$0xff] }
 0x279   : > { %v2653_v5 = vmax.f32 %v2333_v47, 0.0  ;;  %v2654_v39 = vmax.f32 %v2334_v30, 0.0  ;;  %v2655_v32 = vmax.f32 %v2335_v63, 0.0  ;;  %v2656_v27 = vmax.f32 %v2336_v44, 0.0 }
 0x27a   : > { %v2657_v51 = vmax.f32 %v2337_v52, 0.0  ;;  %v2658_v48 = vmax.f32 %v2338_v36, 0.0  ;;  %v2659_v55 = vmax.f32 %v2339_v57, 0.0  ;;  %v2660_v10 = vmax.f32 %v2340_v61, 0.0 }
 0x27b   : > { %v7289_v8 = vmin.f32 %v2651_v53, 6.0  ;;  %v7291_v18 = vmin.f32 %v2652_v46, 6.0  ;;  %v7293_v40 = vmin.f32 %v2653_v5, 6.0  ;;  %v7295_v14 = vmin.f32 %v2654_v39, 6.0  ;;  %v9478_v53 = vld [vmem:[#allocation129_spill] sm:$0xff]  ;;  %v9479_v5 = vld [vmem:[#allocation130_spill] sm:$0xff] }
 0x27c   : > { %v7297_v20 = vmin.f32 %v2655_v32, 6.0  ;;  %v7299_v2 = vmin.f32 %v2656_v27, 6.0  ;;  %v7301_v35 = vmin.f32 %v2657_v51, 6.0  ;;  %v7303_v13 = vmin.f32 %v2658_v48, 6.0  ;;  %v9480_v32 = vld [vmem:[#allocation131_spill] sm:$0xff]  ;;  %v9481_v51 = vld [vmem:[#allocation132_spill] sm:$0xff] }
 0x27d   : > { %v7305_v21 = vmin.f32 %v2659_v55, 6.0  ;;  %v7307_v28 = vmin.f32 %v2660_v10, 6.0  ;;  %v2001_v43 = vmul.f32 %v6639_v45, %v1713_v12  ;;  %v2002_v38 = vmul.f32 %v6641_v37, %v1713_v12  ;;  %v9482_v55 = vld [vmem:[#allocation133_spill] sm:$0xff] }
 0x27e   : > { %v2003_v29 = vmul.f32 %v6643_v23, %v1713_v12  ;;  %v2004_v24 = vmul.f32 %v6645_v19, %v1713_v12  ;;  %v2005_v33 = vmul.f32 %v6647_v42, %v1713_v12  ;;  %v2006_v47 = vmul.f32 %v6649_v1, %v1713_v12 }
 0x27f   : > { %v2007_v34 = vmul.f32 %v6651_v25, %v1713_v12  ;;  %v2008_v30 = vmul.f32 %v6653_v15, %v1713_v12  ;;  %v2009_v17 = vmul.f32 %v6655_v54, %v1713_v12  ;;  %v2010_v63 = vmul.f32 %v6657_v50, %v1713_v12 }
 0x280   : > { %v2321_v44 = vadd.f32 %v2001_v43, %v9473_v16  ;;  %v2322_v52 = vadd.f32 %v2002_v38, %v9474_v49  ;;  %v2323_v36 = vadd.f32 %v2003_v29, %v9475_v60  ;;  %v2324_v57 = vadd.f32 %v2004_v24, %v9476_v56 }
 0x281   : > { %v2325_v61 = vadd.f32 %v2005_v33, %v9477_v22  ;;  %v2326_v46 = vadd.f32 %v2006_v47, %v9478_v53  ;;  %v2327_v39 = vadd.f32 %v2007_v34, %v9479_v5  ;;  %v2328_v27 = vadd.f32 %v2008_v30, %v9480_v32 }
 0x282   : > { %v2329_v48 = vadd.f32 %v2009_v17, %v9481_v51  ;;  %v2330_v10 = vadd.f32 %v2010_v63, %v9482_v55  ;;  %v2641_v12 = vmax.f32 %v2321_v44, 0.0  ;;  %v2642_v43 = vmax.f32 %v2322_v52, 0.0  ;;  %v9486_v55 = vld [vmem:[#allocation18_spill] sm:$0xff] }
 0x283   : > { %v2643_v16 = vmax.f32 %v2323_v36, 0.0  ;;  %v2644_v38 = vmax.f32 %v2324_v57, 0.0  ;;  %v2645_v49 = vmax.f32 %v2325_v61, 0.0  ;;  %v2646_v29 = vmax.f32 %v2326_v46, 0.0  ;;  %v9483_v57 = vld [vmem:[#allocation61_spill] sm:$0xff]  ;;  %v9484_v46 = vld [vmem:[#allocation30_spill] sm:$0xff] }
 0x284   : > { %v2647_v60 = vmax.f32 %v2327_v39, 0.0  ;;  %v2648_v24 = vmax.f32 %v2328_v27, 0.0  ;;  %v2649_v56 = vmax.f32 %v2329_v48, 0.0  ;;  %v2650_v33 = vmax.f32 %v2330_v10, 0.0  ;;  %v9485_v27 = vld [vmem:[#allocation31_spill] sm:$0xff] }
 0x285   : > { %v2961_v22 = vmin.f32 %v2641_v12, 6.0  ;;  %v2962_v47 = vmin.f32 %v2642_v43, 6.0  ;;  %v2963_v53 = vmin.f32 %v2643_v16, 6.0  ;;  %v2964_v34 = vmin.f32 %v2644_v38, 6.0  ;;  %v9487_v12 = vld [vmem:[#allocation19_spill] sm:$0xff]  ;;  %v9489_v16 = vld [vmem:[#allocation21_spill] sm:$0xff] }
 0x286   : > { %v2965_v5 = vmin.f32 %v2645_v49, 6.0  ;;  %v2966_v30 = vmin.f32 %v2646_v29, 6.0  ;;  %v2967_v32 = vmin.f32 %v2647_v60, 6.0  ;;  %v2968_v17 = vmin.f32 %v2648_v24, 6.0 }
 0x287   : > { %v2969_v51 = vmin.f32 %v2649_v56, 6.0  ;;  %v2970_v63 = vmin.f32 %v2650_v33, 6.0  ;;  %v3656_v44 = vmax.f32 %v7245_v62, %v7189_v0  ;;  %v3693_v52 = vmax.f32 %v7247_v7, %v7191_v4  ;;  %v1725_v62 = vpop.permute.xlu0 %1724 }
 0x288   : > { %v3730_v36 = vmax.f32 %v7249_v26, %v7193_v9  ;;  %v3767_v61 = vmax.f32 %v7251_v6, %v9483_v57  ;;  %v3804_v39 = vmax.f32 %v7253_v41, %v9484_v46  ;;  %v3841_v48 = vmax.f32 %v7255_v11, %v9485_v27 }
 0x289   : > { %v3878_v10 = vmax.f32 %v7257_v59, %v9486_v55  ;;  %v3915_v0 = vmax.f32 %v7259_v31, %v9487_v12  ;;  %v7345_v4 = vmax.f32 %v3656_v44, %v2961_v22  ;;  %v7347_v7 = vmax.f32 %v3693_v52, %v2962_v47  ;;  %v9488_v59 = vld [vmem:[#allocation20_spill] sm:$0xff] }
 0x28a   : > { %v7349_v9 = vmax.f32 %v3730_v36, %v2963_v53  ;;  %v7351_v26 = vmax.f32 %v3767_v61, %v2964_v34  ;;  %v7353_v6 = vmax.f32 %v3804_v39, %v2965_v5  ;;  %v7355_v41 = vmax.f32 %v3841_v48, %v2966_v30  ;;  %v9490_v5 = vld [vmem:[#allocation134_spill] sm:$0xff]  ;;  %v9492_v44 = vld [vmem:[#allocation136_spill] sm:$0xff]  ;;  %v9493_v36 = vld [vmem:[#allocation137_spill] sm:$0xff] }
 0x28b   : > { %v7357_v11 = vmax.f32 %v3878_v10, %v2967_v32  ;;  %v7359_v43 = vmax.f32 %v3915_v0, %v2968_v17  ;;  %v3952_v31 = vmax.f32 %v7271_v3, %v9488_v59  ;;  %v3989_v38 = vmax.f32 %v7273_v58, %v9489_v16  ;;  %v9491_v32 = vld [vmem:[#allocation135_spill] sm:$0xff]  ;;  %v9496_v39 = vld [vmem:[#allocation140_spill] sm:$0xff]  ;;  %v9497_v48 = vld [vmem:[#allocation141_spill] sm:$0xff] }
 0x28c   : > { %v2031_v49 = vmul.f32 %v6639_v45, %v1725_v62  ;;  %v2032_v29 = vmul.f32 %v6641_v37, %v1725_v62  ;;  %v2033_v60 = vmul.f32 %v6643_v23, %v1725_v62  ;;  %v2034_v24 = vmul.f32 %v6645_v19, %v1725_v62  ;;  %v9498_v10 = vld [vmem:[#allocation142_spill] sm:$0xff]  ;;  %v9499_v0 = vld [vmem:[#allocation143_spill] sm:$0xff] }
 0x28d   : > { %v2035_v56 = vmul.f32 %v6647_v42, %v1725_v62  ;;  %v2036_v33 = vmul.f32 %v6649_v1, %v1725_v62  ;;  %v7371_v22 = vmax.f32 %v3952_v31, %v2969_v51  ;;  %v7373_v47 = vmax.f32 %v3989_v38, %v2970_v63  ;;  %v9494_v51 = vld [vmem:[#allocation138_spill] sm:$0xff]  ;;  %v9495_v63 = vld [vmem:[#allocation139_spill] sm:$0xff] }
 0x28e   : > { %v2037_v3 = vmul.f32 %v6651_v25, %v1725_v62  ;;  %v2038_v58 = vmul.f32 %v6653_v15, %v1725_v62  ;;  %v2039_v53 = vmul.f32 %v6655_v54, %v1725_v62  ;;  %v2040_v34 = vmul.f32 %v6657_v50, %v1725_v62 }
 0x28f   : > { %v2351_v30 = vadd.f32 %v2031_v49, %v9490_v5  ;;  %v2352_v17 = vadd.f32 %v2032_v29, %v9491_v32  ;;  %v2353_v52 = vadd.f32 %v2033_v60, %v9492_v44  ;;  %v2354_v57 = vadd.f32 %v2034_v24, %v9493_v36 }
 0x290   : > { %v2355_v61 = vadd.f32 %v2035_v56, %v9494_v51  ;;  %v2356_v46 = vadd.f32 %v2036_v33, %v9495_v63  ;;  %v2357_v27 = vadd.f32 %v2037_v3, %v9496_v39  ;;  %v2358_v55 = vadd.f32 %v2038_v58, %v9497_v48  ;;  %v1721_v3 = vpop.permute.xlu1 %1720 }
 0x291   : > { %v2359_v12 = vadd.f32 %v2039_v53, %v9498_v10  ;;  %v2360_v62 = vadd.f32 %v2040_v34, %v9499_v0  ;;  %v2671_v59 = vmax.f32 %v2351_v30, 0.0  ;;  %v2672_v31 = vmax.f32 %v2352_v17, 0.0 }
 0x292   : > { %v2673_v16 = vmax.f32 %v2353_v52, 0.0  ;;  %v2674_v38 = vmax.f32 %v2354_v57, 0.0  ;;  %v2675_v49 = vmax.f32 %v2355_v61, 0.0  ;;  %v2676_v29 = vmax.f32 %v2356_v46, 0.0 }
 0x293   : > { %v2677_v60 = vmax.f32 %v2357_v27, 0.0  ;;  %v2678_v24 = vmax.f32 %v2358_v55, 0.0  ;;  %v2679_v5 = vmax.f32 %v2359_v12, 0.0  ;;  %v2680_v56 = vmax.f32 %v2360_v62, 0.0  ;;  %v9507_v12 = vld [vmem:[#allocation319_spill] sm:$0xff]  ;;  %v9508_v62 = vld [vmem:[#allocation144_spill] sm:$0xff] }
 0x294   : > { %v7389_v32 = vmin.f32 %v2671_v59, 6.0  ;;  %v7391_v33 = vmin.f32 %v2672_v31, 6.0  ;;  %v7393_v58 = vmin.f32 %v2673_v16, 6.0  ;;  %v7395_v53 = vmin.f32 %v2674_v38, 6.0  ;;  %v9509_v31 = vld [vmem:[#allocation145_spill] sm:$0xff]  ;;  %v9510_v38 = vld [vmem:[#allocation146_spill] sm:$0xff] }
 0x295   : > { %v7397_v34 = vmin.f32 %v2675_v49, 6.0  ;;  %v7399_v30 = vmin.f32 %v2676_v29, 6.0  ;;  %v7401_v17 = vmin.f32 %v2677_v60, 6.0  ;;  %v7403_v44 = vmin.f32 %v2678_v24, 6.0  ;;  %v9511_v29 = vld [vmem:[#allocation147_spill] sm:$0xff]  ;;  %v9512_v24 = vld [vmem:[#allocation148_spill] sm:$0xff] }
 0x296   : > { %9500 = vst [vmem:[#allocation22_spill] sm:$0xff] %v7395_v53  ;;  %v7405_v52 = vmin.f32 %v2679_v5, 6.0  ;;  %v7407_v36 = vmin.f32 %v2680_v56, 6.0  ;;  %v2021_v57 = vmul.f32 %v6639_v45, %v1721_v3  ;;  %v2022_v51 = vmul.f32 %v6641_v37, %v1721_v3  ;;  %v9513_v56 = vld [vmem:[#allocation149_spill] sm:$0xff] }
 0x297   : > { %9501 = vst [vmem:[#allocation23_spill] sm:$0xff] %v7397_v34  ;;  %9502 = vst [vmem:[#allocation24_spill] sm:$0xff] %v7399_v30  ;;  %v2023_v61 = vmul.f32 %v6643_v23, %v1721_v3  ;;  %v2024_v63 = vmul.f32 %v6645_v19, %v1721_v3  ;;  %v2025_v46 = vmul.f32 %v6647_v42, %v1721_v3  ;;  %v9516_v34 = vld [vmem:[#allocation320_spill] sm:$0xff] }
 0x298   : > { %9503 = vst [vmem:[#allocation25_spill] sm:$0xff] %v7401_v17  ;;  %9504 = vst [vmem:[#allocation26_spill] sm:$0xff] %v7403_v44  ;;  %v2026_v39 = vmul.f32 %v6649_v1, %v1721_v3  ;;  %v2027_v27 = vmul.f32 %v6651_v25, %v1721_v3  ;;  %v2028_v48 = vmul.f32 %v6653_v15, %v1721_v3  ;;  %v9515_v17 = vld [vmem:[#allocation151_spill] sm:$0xff] }
 0x299   : > { %9505 = vst [vmem:[#allocation27_spill] sm:$0xff] %v7405_v52  ;;  %9506 = vst [vmem:[#allocation36_spill] sm:$0xff] %v7407_v36  ;;  %v2029_v55 = vmul.f32 %v6655_v54, %v1721_v3  ;;  %v2030_v10 = vmul.f32 %v6657_v50, %v1721_v3  ;;  %v2341_v0 = vadd.f32 %v2021_v57, %v9507_v12  ;;  %v9514_v52 = vld [vmem:[#allocation150_spill] sm:$0xff] }
 0x29a   : > { %v2342_v59 = vadd.f32 %v2022_v51, %v9508_v62  ;;  %v2343_v16 = vadd.f32 %v2023_v61, %v9509_v31  ;;  %v2344_v49 = vadd.f32 %v2024_v63, %v9510_v38  ;;  %v2345_v60 = vadd.f32 %v2025_v46, %v9511_v29 }
 0x29b   : > { %v2346_v5 = vadd.f32 %v2026_v39, %v9512_v24  ;;  %v2347_v36 = vadd.f32 %v2027_v27, %v9513_v56  ;;  %v2348_v44 = vadd.f32 %v2028_v48, %v9514_v52  ;;  %v2349_v30 = vadd.f32 %v2029_v55, %v9515_v17 }
 0x29c   : > { %v2350_v3 = vadd.f32 %v2030_v10, %v9516_v34  ;;  %v2661_v53 = vmax.f32 %v2341_v0, 0.0  ;;  %v2662_v57 = vmax.f32 %v2342_v59, 0.0  ;;  %v2663_v12 = vmax.f32 %v2343_v16, 0.0 }
 0x29d   : > { %v2664_v51 = vmax.f32 %v2344_v49, 0.0  ;;  %v2665_v62 = vmax.f32 %v2345_v60, 0.0  ;;  %v2666_v61 = vmax.f32 %v2346_v5, 0.0  ;;  %v2667_v31 = vmax.f32 %v2347_v36, 0.0 }
 0x29e   : > { %v2668_v63 = vmax.f32 %v2348_v44, 0.0  ;;  %v2669_v38 = vmax.f32 %v2349_v30, 0.0  ;;  %v2670_v46 = vmax.f32 %v2350_v3, 0.0  ;;  %v2981_v29 = vmin.f32 %v2661_v53, 6.0  ;;  %v9517_v3 = vld [vmem:[#allocation152_spill] sm:$0xff] }
 0x29f   : > { %v2982_v39 = vmin.f32 %v2662_v57, 6.0  ;;  %v2983_v24 = vmin.f32 %v2663_v12, 6.0  ;;  %v2984_v27 = vmin.f32 %v2664_v51, 6.0  ;;  %v2985_v56 = vmin.f32 %v2665_v62, 6.0  ;;  %v9518_v12 = vld [vmem:[#allocation153_spill] sm:$0xff]  ;;  %v9519_v62 = vld [vmem:[#allocation154_spill] sm:$0xff] }
 0x2a0   : > { %v2986_v52 = vmin.f32 %v2666_v61, 6.0  ;;  %v2987_v48 = vmin.f32 %v2667_v31, 6.0  ;;  %v2988_v17 = vmin.f32 %v2668_v63, 6.0  ;;  %v2989_v55 = vmin.f32 %v2669_v38, 6.0  ;;  %v9520_v31 = vld [vmem:[#allocation155_spill] sm:$0xff]  ;;  %v9521_v38 = vld [vmem:[#allocation156_spill] sm:$0xff] }
 0x2a1   : > { %v2990_v34 = vmin.f32 %v2670_v46, 6.0  ;;  %v3658_v10 = vmax.f32 %v7345_v4, %v7289_v8  ;;  %v3695_v0 = vmax.f32 %v7347_v7, %v7291_v18  ;;  %v3732_v30 = vmax.f32 %v7349_v9, %v7293_v40  ;;  %v1733_v4 = vpop.permute.xlu0 %1732 }
 0x2a2   : > { %v3769_v53 = vmax.f32 %v7351_v26, %v7295_v14  ;;  %v3806_v44 = vmax.f32 %v7353_v6, %v7297_v20  ;;  %v3843_v36 = vmax.f32 %v7355_v41, %v7299_v2  ;;  %v3880_v59 = vmax.f32 %v7357_v11, %v7301_v35 }
 0x2a3   : > { %v3917_v8 = vmax.f32 %v7359_v43, %v7303_v13  ;;  %v7445_v18 = vmax.f32 %v3658_v10, %v2981_v29  ;;  %v7447_v7 = vmax.f32 %v3695_v0, %v2982_v39  ;;  %v7449_v40 = vmax.f32 %v3732_v30, %v2983_v24  ;;  %v9522_v29 = vld [vmem:[#allocation157_spill] sm:$0xff]  ;;  %v9523_v24 = vld [vmem:[#allocation158_spill] sm:$0xff] }
 0x2a4   : > { %v7451_v14 = vmax.f32 %v3769_v53, %v2984_v27  ;;  %v7453_v9 = vmax.f32 %v3806_v44, %v2985_v56  ;;  %v7455_v20 = vmax.f32 %v3843_v36, %v2986_v52  ;;  %v7457_v2 = vmax.f32 %v3880_v59, %v2987_v48  ;;  %v9524_v56 = vld [vmem:[#allocation159_spill] sm:$0xff]  ;;  %v9525_v48 = vld [vmem:[#allocation160_spill] sm:$0xff] }
 0x2a5   : > { %v7459_v26 = vmax.f32 %v3917_v8, %v2988_v17  ;;  %v3954_v35 = vmax.f32 %v7371_v22, %v7305_v21  ;;  %v3991_v13 = vmax.f32 %v7373_v47, %v7307_v28  ;;  %v2051_v6 = vmul.f32 %v6639_v45, %v1733_v4 }
 0x2a6   : > { %v2052_v41 = vmul.f32 %v6641_v37, %v1733_v4  ;;  %v2053_v11 = vmul.f32 %v6643_v23, %v1733_v4  ;;  %v2054_v43 = vmul.f32 %v6645_v19, %v1733_v4  ;;  %v2055_v16 = vmul.f32 %v6647_v42, %v1733_v4 }
 0x2a7   : > { %v2056_v49 = vmul.f32 %v6649_v1, %v1733_v4  ;;  %v7471_v60 = vmax.f32 %v3954_v35, %v2989_v55  ;;  %v7473_v5 = vmax.f32 %v3991_v13, %v2990_v34  ;;  %v2057_v21 = vmul.f32 %v6651_v25, %v1733_v4  ;;  %v9526_v55 = vld [vmem:[#allocation161_spill] sm:$0xff] }
 0x2a8   : > { %v2058_v28 = vmul.f32 %v6653_v15, %v1733_v4  ;;  %v2059_v22 = vmul.f32 %v6655_v54, %v1733_v4  ;;  %v2060_v47 = vmul.f32 %v6657_v50, %v1733_v4  ;;  %v2371_v57 = vadd.f32 %v2051_v6, %v9517_v3 }
 0x2a9   : > { %v2372_v51 = vadd.f32 %v2052_v41, %v9518_v12  ;;  %v2373_v61 = vadd.f32 %v2053_v11, %v9519_v62  ;;  %v2374_v63 = vadd.f32 %v2054_v43, %v9520_v31  ;;  %v2375_v46 = vadd.f32 %v2055_v16, %v9521_v38  ;;  %v1729_v41 = vpop.permute.xlu1 %1728 }
 0x2aa   : > { %v2376_v39 = vadd.f32 %v2056_v49, %v9522_v29  ;;  %v2377_v27 = vadd.f32 %v2057_v21, %v9523_v24  ;;  %v2378_v52 = vadd.f32 %v2058_v28, %v9524_v56  ;;  %v2379_v17 = vadd.f32 %v2059_v22, %v9525_v48  ;;  %v9527_v29 = vld [vmem:[#allocation321_spill] sm:$0xff]  ;;  %v9528_v24 = vld [vmem:[#allocation162_spill] sm:$0xff]  ;;  %v9529_v56 = vld [vmem:[#allocation163_spill] sm:$0xff] }
 0x2ab   : > { %v2380_v34 = vadd.f32 %v2060_v47, %v9526_v55  ;;  %v2691_v10 = vmax.f32 %v2371_v57, 0.0  ;;  %v2692_v0 = vmax.f32 %v2372_v51, 0.0  ;;  %v2693_v30 = vmax.f32 %v2373_v61, 0.0  ;;  %v9530_v48 = vld [vmem:[#allocation164_spill] sm:$0xff]  ;;  %v9531_v55 = vld [vmem:[#allocation322_spill] sm:$0xff] }
 0x2ac   : > { %v2694_v53 = vmax.f32 %v2374_v63, 0.0  ;;  %v2695_v44 = vmax.f32 %v2375_v46, 0.0  ;;  %v2696_v36 = vmax.f32 %v2376_v39, 0.0  ;;  %v2697_v59 = vmax.f32 %v2377_v27, 0.0 }
 0x2ad   : > { %v2698_v8 = vmax.f32 %v2378_v52, 0.0  ;;  %v2699_v4 = vmax.f32 %v2379_v17, 0.0  ;;  %v2700_v35 = vmax.f32 %v2380_v34, 0.0  ;;  %v7489_v13 = vmin.f32 %v2691_v10, 6.0  ;;  %v9532_v10 = vld [vmem:[#allocation165_spill] sm:$0xff] }
 0x2ae   : > { %v7491_v6 = vmin.f32 %v2692_v0, 6.0  ;;  %v7493_v11 = vmin.f32 %v2693_v30, 6.0  ;;  %v7495_v43 = vmin.f32 %v2694_v53, 6.0  ;;  %v7497_v16 = vmin.f32 %v2695_v44, 6.0  ;;  %v9533_v30 = vld [vmem:[#allocation166_spill] sm:$0xff]  ;;  %v9534_v44 = vld [vmem:[#allocation167_spill] sm:$0xff] }
 0x2af   : > { %v7499_v49 = vmin.f32 %v2696_v36, 6.0  ;;  %v7501_v21 = vmin.f32 %v2697_v59, 6.0  ;;  %v7503_v28 = vmin.f32 %v2698_v8, 6.0  ;;  %v7505_v22 = vmin.f32 %v2699_v4, 6.0  ;;  %v9535_v59 = vld [vmem:[#allocation168_spill] sm:$0xff]  ;;  %v9536_v4 = vld [vmem:[#allocation169_spill] sm:$0xff] }
 0x2b0   : > { %v7507_v47 = vmin.f32 %v2700_v35, 6.0  ;;  %v2041_v3 = vmul.f32 %v6639_v45, %v1729_v41  ;;  %v2042_v57 = vmul.f32 %v6641_v37, %v1729_v41  ;;  %v2043_v12 = vmul.f32 %v6643_v23, %v1729_v41 }
 0x2b1   : > { %v2044_v51 = vmul.f32 %v6645_v19, %v1729_v41  ;;  %v2045_v62 = vmul.f32 %v6647_v42, %v1729_v41  ;;  %v2046_v61 = vmul.f32 %v6649_v1, %v1729_v41  ;;  %v2047_v31 = vmul.f32 %v6651_v25, %v1729_v41 }
 0x2b2   : > { %v2048_v63 = vmul.f32 %v6653_v15, %v1729_v41  ;;  %v2049_v38 = vmul.f32 %v6655_v54, %v1729_v41  ;;  %v2050_v46 = vmul.f32 %v6657_v50, %v1729_v41  ;;  %v2361_v39 = vadd.f32 %v2041_v3, %v9527_v29 }
 0x2b3   : > { %v2362_v27 = vadd.f32 %v2042_v57, %v9528_v24  ;;  %v2363_v52 = vadd.f32 %v2043_v12, %v9529_v56  ;;  %v2364_v17 = vadd.f32 %v2044_v51, %v9530_v48  ;;  %v2365_v34 = vadd.f32 %v2045_v62, %v9531_v55 }
 0x2b4   : > { %v2366_v0 = vadd.f32 %v2046_v61, %v9532_v10  ;;  %v2367_v53 = vadd.f32 %v2047_v31, %v9533_v30  ;;  %v2368_v36 = vadd.f32 %v2048_v63, %v9534_v44  ;;  %v2369_v8 = vadd.f32 %v2049_v38, %v9535_v59 }
 0x2b5   : > { %v2370_v35 = vadd.f32 %v2050_v46, %v9536_v4  ;;  %v2681_v41 = vmax.f32 %v2361_v39, 0.0  ;;  %v2682_v3 = vmax.f32 %v2362_v27, 0.0  ;;  %v2683_v29 = vmax.f32 %v2363_v52, 0.0  ;;  %v9540_v4 = vld [vmem:[#allocation25_spill] sm:$0xff] }
 0x2b6   : > { %v2684_v57 = vmax.f32 %v2364_v17, 0.0  ;;  %v2685_v24 = vmax.f32 %v2365_v34, 0.0  ;;  %v2686_v12 = vmax.f32 %v2366_v0, 0.0  ;;  %v2687_v56 = vmax.f32 %v2367_v53, 0.0  ;;  %v9537_v17 = vld [vmem:[#allocation22_spill] sm:$0xff]  ;;  %v9538_v0 = vld [vmem:[#allocation23_spill] sm:$0xff] }
 0x2b7   : > { %v2688_v51 = vmax.f32 %v2368_v36, 0.0  ;;  %v2689_v48 = vmax.f32 %v2369_v8, 0.0  ;;  %v2690_v62 = vmax.f32 %v2370_v35, 0.0  ;;  %v3001_v55 = vmin.f32 %v2681_v41, 6.0  ;;  %v9539_v36 = vld [vmem:[#allocation24_spill] sm:$0xff]  ;;  %v9541_v41 = vld [vmem:[#allocation26_spill] sm:$0xff] }
 0x2b8   : > { %v3002_v61 = vmin.f32 %v2682_v3, 6.0  ;;  %v3003_v10 = vmin.f32 %v2683_v29, 6.0  ;;  %v3004_v31 = vmin.f32 %v2684_v57, 6.0  ;;  %v3005_v30 = vmin.f32 %v2685_v24, 6.0  ;;  %v9543_v29 = vld [vmem:[#allocation36_spill] sm:$0xff] }
 0x2b9   : > { %v3006_v63 = vmin.f32 %v2686_v12, 6.0  ;;  %v3007_v44 = vmin.f32 %v2687_v56, 6.0  ;;  %v3008_v38 = vmin.f32 %v2688_v51, 6.0  ;;  %v3009_v59 = vmin.f32 %v2689_v48, 6.0 }
 0x2ba   : > { %v3010_v46 = vmin.f32 %v2690_v62, 6.0  ;;  %v3660_v39 = vmax.f32 %v7445_v18, %v7389_v32  ;;  %v3697_v27 = vmax.f32 %v7447_v7, %v7391_v33  ;;  %v3734_v52 = vmax.f32 %v7449_v40, %v7393_v58  ;;  %v1741_v18 = vpop.permute.xlu0 %1740 }
 0x2bb   : > { %v3771_v34 = vmax.f32 %v7451_v14, %v9537_v17  ;;  %v3808_v53 = vmax.f32 %v7453_v9, %v9538_v0  ;;  %v3845_v8 = vmax.f32 %v7455_v20, %v9539_v36  ;;  %v3882_v35 = vmax.f32 %v7457_v2, %v9540_v4  ;;  %v9542_v2 = vld [vmem:[#allocation27_spill] sm:$0xff] }
 0x2bc   : > { %v3919_v32 = vmax.f32 %v7459_v26, %v9541_v41  ;;  %v7545_v33 = vmax.f32 %v3660_v39, %v3001_v55  ;;  %v7547_v7 = vmax.f32 %v3697_v27, %v3002_v61  ;;  %v7549_v58 = vmax.f32 %v3734_v52, %v3003_v10  ;;  %v9546_v39 = vld [vmem:[#allocation172_spill] sm:$0xff]  ;;  %v9547_v52 = vld [vmem:[#allocation173_spill] sm:$0xff] }
 0x2bd   : > { %v7551_v40 = vmax.f32 %v3771_v34, %v3004_v31  ;;  %v7553_v14 = vmax.f32 %v3808_v53, %v3005_v30  ;;  %v7555_v9 = vmax.f32 %v3845_v8, %v3006_v63  ;;  %v7557_v20 = vmax.f32 %v3882_v35, %v3007_v44  ;;  %v9544_v30 = vld [vmem:[#allocation170_spill] sm:$0xff]  ;;  %v9545_v44 = vld [vmem:[#allocation171_spill] sm:$0xff]  ;;  %v9550_v53 = vld [vmem:[#allocation176_spill] sm:$0xff] }
 0x2be   : > { %v7559_v3 = vmax.f32 %v3919_v32, %v3008_v38  ;;  %v3956_v26 = vmax.f32 %v7471_v60, %v9542_v2  ;;  %v3993_v57 = vmax.f32 %v7473_v5, %v9543_v29  ;;  %v2071_v24 = vmul.f32 %v6639_v45, %v1741_v18  ;;  %v9551_v8 = vld [vmem:[#allocation177_spill] sm:$0xff]  ;;  %v9552_v35 = vld [vmem:[#allocation178_spill] sm:$0xff]  ;;  %v9553_v32 = vld [vmem:[#allocation179_spill] sm:$0xff] }
 0x2bf   : > { %v2072_v12 = vmul.f32 %v6641_v37, %v1741_v18  ;;  %v2073_v56 = vmul.f32 %v6643_v23, %v1741_v18  ;;  %v2074_v51 = vmul.f32 %v6645_v19, %v1741_v18  ;;  %v2075_v48 = vmul.f32 %v6647_v42, %v1741_v18 }
 0x2c0   : > { %v2076_v62 = vmul.f32 %v6649_v1, %v1741_v18  ;;  %v7571_v55 = vmax.f32 %v3956_v26, %v3009_v59  ;;  %v7573_v61 = vmax.f32 %v3993_v57, %v3010_v46  ;;  %v2077_v60 = vmul.f32 %v6651_v25, %v1741_v18  ;;  %v9548_v59 = vld [vmem:[#allocation174_spill] sm:$0xff]  ;;  %v9549_v46 = vld [vmem:[#allocation175_spill] sm:$0xff] }
 0x2c1   : > { %v2078_v5 = vmul.f32 %v6653_v15, %v1741_v18  ;;  %v2079_v10 = vmul.f32 %v6655_v54, %v1741_v18  ;;  %v2080_v31 = vmul.f32 %v6657_v50, %v1741_v18  ;;  %v2391_v63 = vadd.f32 %v2071_v24, %v9544_v30 }
 0x2c2   : > { %v2392_v38 = vadd.f32 %v2072_v12, %v9545_v44  ;;  %v2393_v27 = vadd.f32 %v2073_v56, %v9546_v39  ;;  %v2394_v17 = vadd.f32 %v2074_v51, %v9547_v52  ;;  %v2395_v34 = vadd.f32 %v2075_v48, %v9548_v59 }
 0x2c3   : > { %v2396_v0 = vadd.f32 %v2076_v62, %v9549_v46  ;;  %v2397_v36 = vadd.f32 %v2077_v60, %v9550_v53  ;;  %v2398_v4 = vadd.f32 %v2078_v5, %v9551_v8  ;;  %v2399_v41 = vadd.f32 %v2079_v10, %v9552_v35  ;;  %v1737_v60 = vpop.permute.xlu1 %1736 }
 0x2c4   : > { %v2400_v18 = vadd.f32 %v2080_v31, %v9553_v32  ;;  %v2711_v2 = vmax.f32 %v2391_v63, 0.0  ;;  %v2712_v26 = vmax.f32 %v2392_v38, 0.0  ;;  %v2713_v29 = vmax.f32 %v2393_v27, 0.0 }
 0x2c5   : > { %v2714_v57 = vmax.f32 %v2394_v17, 0.0  ;;  %v2715_v24 = vmax.f32 %v2395_v34, 0.0  ;;  %v2716_v12 = vmax.f32 %v2396_v0, 0.0  ;;  %v2717_v56 = vmax.f32 %v2397_v36, 0.0 }
 0x2c6   : > { %v2718_v51 = vmax.f32 %v2398_v4, 0.0  ;;  %v2719_v30 = vmax.f32 %v2399_v41, 0.0  ;;  %v2720_v48 = vmax.f32 %v2400_v18, 0.0  ;;  %v7589_v44 = vmin.f32 %v2711_v2, 6.0  ;;  %v9561_v41 = vld [vmem:[#allocation323_spill] sm:$0xff]  ;;  %v9562_v18 = vld [vmem:[#allocation180_spill] sm:$0xff] }
 0x2c7   : > { %v7591_v62 = vmin.f32 %v2712_v26, 6.0  ;;  %v7593_v5 = vmin.f32 %v2713_v29, 6.0  ;;  %v7595_v10 = vmin.f32 %v2714_v57, 6.0  ;;  %v7597_v31 = vmin.f32 %v2715_v24, 6.0  ;;  %v9563_v26 = vld [vmem:[#allocation181_spill] sm:$0xff]  ;;  %v9564_v57 = vld [vmem:[#allocation182_spill] sm:$0xff] }
 0x2c8   : > { %v7599_v63 = vmin.f32 %v2716_v12, 6.0  ;;  %v7601_v38 = vmin.f32 %v2717_v56, 6.0  ;;  %v7603_v39 = vmin.f32 %v2718_v51, 6.0  ;;  %v7605_v27 = vmin.f32 %v2719_v30, 6.0  ;;  %v9565_v12 = vld [vmem:[#allocation183_spill] sm:$0xff]  ;;  %v9566_v51 = vld [vmem:[#allocation184_spill] sm:$0xff] }
 0x2c9   : > { %9554 = vst [vmem:[#allocation37_spill] sm:$0xff] %v7595_v10  ;;  %9555 = vst [vmem:[#allocation76_spill] sm:$0xff] %v7597_v31  ;;  %v7607_v52 = vmin.f32 %v2720_v48, 6.0  ;;  %v2061_v17 = vmul.f32 %v6639_v45, %v1737_v60  ;;  %v2062_v59 = vmul.f32 %v6641_v37, %v1737_v60  ;;  %v2063_v34 = vmul.f32 %v6643_v23, %v1737_v60  ;;  %v9567_v48 = vld [vmem:[#allocation185_spill] sm:$0xff]  ;;  %v9570_v31 = vld [vmem:[#allocation188_spill] sm:$0xff] }
 0x2ca   : > { %9556 = vst [vmem:[#allocation77_spill] sm:$0xff] %v7599_v63  ;;  %9557 = vst [vmem:[#allocation78_spill] sm:$0xff] %v7601_v38  ;;  %v2064_v46 = vmul.f32 %v6645_v19, %v1737_v60  ;;  %v2065_v0 = vmul.f32 %v6647_v42, %v1737_v60  ;;  %v2066_v53 = vmul.f32 %v6649_v1, %v1737_v60  ;;  %v9569_v38 = vld [vmem:[#allocation187_spill] sm:$0xff] }
 0x2cb   : > { %9558 = vst [vmem:[#allocation79_spill] sm:$0xff] %v7603_v39  ;;  %9559 = vst [vmem:[#allocation38_spill] sm:$0xff] %v7605_v27  ;;  %v2067_v36 = vmul.f32 %v6651_v25, %v1737_v60  ;;  %v2068_v8 = vmul.f32 %v6653_v15, %v1737_v60  ;;  %v2069_v4 = vmul.f32 %v6655_v54, %v1737_v60  ;;  %v9568_v27 = vld [vmem:[#allocation186_spill] sm:$0xff] }
 0x2cc   : > { %9560 = vst [vmem:[#allocation39_spill] sm:$0xff] %v7607_v52  ;;  %v2070_v35 = vmul.f32 %v6657_v50, %v1737_v60  ;;  %v2381_v32 = vadd.f32 %v2061_v17, %v9561_v41  ;;  %v2382_v2 = vadd.f32 %v2062_v59, %v9562_v18  ;;  %v2383_v29 = vadd.f32 %v2063_v34, %v9563_v26 }
 0x2cd   : > { %v2384_v24 = vadd.f32 %v2064_v46, %v9564_v57  ;;  %v2385_v56 = vadd.f32 %v2065_v0, %v9565_v12  ;;  %v2386_v30 = vadd.f32 %v2066_v53, %v9566_v51  ;;  %v2387_v52 = vadd.f32 %v2067_v36, %v9567_v48 }
 0x2ce   : > { %v2388_v39 = vadd.f32 %v2068_v8, %v9568_v27  ;;  %v2389_v63 = vadd.f32 %v2069_v4, %v9569_v38  ;;  %v2390_v60 = vadd.f32 %v2070_v35, %v9570_v31  ;;  %v2701_v10 = vmax.f32 %v2381_v32, 0.0 }
 0x2cf   : > { %v2702_v17 = vmax.f32 %v2382_v2, 0.0  ;;  %v2703_v41 = vmax.f32 %v2383_v29, 0.0  ;;  %v2704_v59 = vmax.f32 %v2384_v24, 0.0  ;;  %v2705_v18 = vmax.f32 %v2385_v56, 0.0 }
 0x2d0   : > { %v2706_v34 = vmax.f32 %v2386_v30, 0.0  ;;  %v2707_v26 = vmax.f32 %v2387_v52, 0.0  ;;  %v2708_v46 = vmax.f32 %v2388_v39, 0.0  ;;  %v2709_v57 = vmax.f32 %v2389_v63, 0.0 }
 0x2d1   : > { %v2710_v0 = vmax.f32 %v2390_v60, 0.0  ;;  %v3021_v12 = vmin.f32 %v2701_v10, 6.0  ;;  %v3022_v53 = vmin.f32 %v2702_v17, 6.0  ;;  %v3023_v51 = vmin.f32 %v2703_v41, 6.0  ;;  %v9571_v60 = vld [vmem:[#allocation189_spill] sm:$0xff]  ;;  %v9572_v41 = vld [vmem:[#allocation190_spill] sm:$0xff] }
 0x2d2   : > { %v3024_v36 = vmin.f32 %v2704_v59, 6.0  ;;  %v3025_v48 = vmin.f32 %v2705_v18, 6.0  ;;  %v3026_v27 = vmin.f32 %v2706_v34, 6.0  ;;  %v3027_v8 = vmin.f32 %v2707_v26, 6.0  ;;  %v9573_v18 = vld [vmem:[#allocation191_spill] sm:$0xff]  ;;  %v9574_v26 = vld [vmem:[#allocation192_spill] sm:$0xff] }
 0x2d3   : > { %v3028_v38 = vmin.f32 %v2708_v46, 6.0  ;;  %v3029_v4 = vmin.f32 %v2709_v57, 6.0  ;;  %v3030_v31 = vmin.f32 %v2710_v0, 6.0  ;;  %v3662_v35 = vmax.f32 %v7545_v33, %v7489_v13  ;;  %v1749_v33 = vpop.permute.xlu0 %1748  ;;  %v9575_v57 = vld [vmem:[#allocation193_spill] sm:$0xff] }
 0x2d4   : > { %v3699_v32 = vmax.f32 %v7547_v7, %v7491_v6  ;;  %v3736_v63 = vmax.f32 %v7549_v58, %v7493_v11  ;;  %v3773_v10 = vmax.f32 %v7551_v40, %v7495_v43  ;;  %v3810_v39 = vmax.f32 %v7553_v14, %v7497_v16 }
 0x2d5   : > { %v3847_v52 = vmax.f32 %v7555_v9, %v7499_v49  ;;  %v3884_v2 = vmax.f32 %v7557_v20, %v7501_v21  ;;  %v3921_v13 = vmax.f32 %v7559_v3, %v7503_v28  ;;  %v7645_v6 = vmax.f32 %v3662_v35, %v3021_v12  ;;  %v9576_v12 = vld [vmem:[#allocation194_spill] sm:$0xff] }
 0x2d6   : > { %v7647_v7 = vmax.f32 %v3699_v32, %v3022_v53  ;;  %v7649_v11 = vmax.f32 %v3736_v63, %v3023_v51  ;;  %v7651_v43 = vmax.f32 %v3773_v10, %v3024_v36  ;;  %v7653_v58 = vmax.f32 %v3810_v39, %v3025_v48  ;;  %v9577_v51 = vld [vmem:[#allocation195_spill] sm:$0xff]  ;;  %v9578_v48 = vld [vmem:[#allocation196_spill] sm:$0xff] }
 0x2d7   : > { %v7655_v16 = vmax.f32 %v3847_v52, %v3026_v27  ;;  %v7657_v49 = vmax.f32 %v3884_v2, %v3027_v8  ;;  %v7659_v40 = vmax.f32 %v3921_v13, %v3028_v38  ;;  %v3958_v21 = vmax.f32 %v7571_v55, %v7505_v22  ;;  %v9579_v8 = vld [vmem:[#allocation197_spill] sm:$0xff] }
 0x2d8   : > { %v3995_v28 = vmax.f32 %v7573_v61, %v7507_v47  ;;  %v2091_v14 = vmul.f32 %v6639_v45, %v1749_v33  ;;  %v2092_v9 = vmul.f32 %v6641_v37, %v1749_v33  ;;  %v2093_v20 = vmul.f32 %v6643_v23, %v1749_v33 }
 0x2d9   : > { %v2094_v3 = vmul.f32 %v6645_v19, %v1749_v33  ;;  %v2095_v29 = vmul.f32 %v6647_v42, %v1749_v33  ;;  %v2096_v24 = vmul.f32 %v6649_v1, %v1749_v33  ;;  %v7671_v56 = vmax.f32 %v3958_v21, %v3029_v4  ;;  %v9580_v4 = vld [vmem:[#allocation198_spill] sm:$0xff] }
 0x2da   : > { %v7673_v30 = vmax.f32 %v3995_v28, %v3030_v31  ;;  %v2097_v22 = vmul.f32 %v6651_v25, %v1749_v33  ;;  %v2098_v47 = vmul.f32 %v6653_v15, %v1749_v33  ;;  %v2099_v55 = vmul.f32 %v6655_v54, %v1749_v33 }
 0x2db   : > { %v2100_v61 = vmul.f32 %v6657_v50, %v1749_v33  ;;  %v2411_v17 = vadd.f32 %v2091_v14, %v9571_v60  ;;  %v2412_v59 = vadd.f32 %v2092_v9, %v9572_v41  ;;  %v2413_v34 = vadd.f32 %v2093_v20, %v9573_v18  ;;  %v1745_v9 = vpop.permute.xlu1 %1744 }
 0x2dc   : > { %v2414_v46 = vadd.f32 %v2094_v3, %v9574_v26  ;;  %v2415_v0 = vadd.f32 %v2095_v29, %v9575_v57  ;;  %v2416_v53 = vadd.f32 %v2096_v24, %v9576_v12  ;;  %v2417_v36 = vadd.f32 %v2097_v22, %v9577_v51  ;;  %v9581_v12 = vld [vmem:[#allocation199_spill] sm:$0xff]  ;;  %v9582_v51 = vld [vmem:[#allocation200_spill] sm:$0xff] }
 0x2dd   : > { %v2418_v27 = vadd.f32 %v2098_v47, %v9578_v48  ;;  %v2419_v38 = vadd.f32 %v2099_v55, %v9579_v8  ;;  %v2420_v31 = vadd.f32 %v2100_v61, %v9580_v4  ;;  %v2731_v35 = vmax.f32 %v2411_v17, 0.0  ;;  %v9583_v48 = vld [vmem:[#allocation201_spill] sm:$0xff]  ;;  %v9584_v8 = vld [vmem:[#allocation202_spill] sm:$0xff]  ;;  %v9585_v4 = vld [vmem:[#allocation203_spill] sm:$0xff] }
 0x2de   : > { %v2732_v32 = vmax.f32 %v2412_v59, 0.0  ;;  %v2733_v63 = vmax.f32 %v2413_v34, 0.0  ;;  %v2734_v10 = vmax.f32 %v2414_v46, 0.0  ;;  %v2735_v39 = vmax.f32 %v2415_v0, 0.0 }
 0x2df   : > { %v2736_v52 = vmax.f32 %v2416_v53, 0.0  ;;  %v2737_v2 = vmax.f32 %v2417_v36, 0.0  ;;  %v2738_v13 = vmax.f32 %v2418_v27, 0.0  ;;  %v2739_v33 = vmax.f32 %v2419_v38, 0.0 }
 0x2e0   : > { %v2740_v21 = vmax.f32 %v2420_v31, 0.0  ;;  %v7689_v28 = vmin.f32 %v2731_v35, 6.0  ;;  %v7691_v14 = vmin.f32 %v2732_v32, 6.0  ;;  %v7693_v20 = vmin.f32 %v2733_v63, 6.0  ;;  %v9586_v35 = vld [vmem:[#allocation204_spill] sm:$0xff]  ;;  %v9587_v63 = vld [vmem:[#allocation205_spill] sm:$0xff] }
 0x2e1   : > { %v7695_v3 = vmin.f32 %v2734_v10, 6.0  ;;  %v7697_v29 = vmin.f32 %v2735_v39, 6.0  ;;  %v7699_v24 = vmin.f32 %v2736_v52, 6.0  ;;  %v7701_v22 = vmin.f32 %v2737_v2, 6.0  ;;  %v9588_v39 = vld [vmem:[#allocation206_spill] sm:$0xff]  ;;  %v9589_v2 = vld [vmem:[#allocation207_spill] sm:$0xff] }
 0x2e2   : > { %v7703_v47 = vmin.f32 %v2738_v13, 6.0  ;;  %v7705_v55 = vmin.f32 %v2739_v33, 6.0  ;;  %v7707_v61 = vmin.f32 %v2740_v21, 6.0  ;;  %v2081_v60 = vmul.f32 %v6639_v45, %v1745_v9  ;;  %v9590_v33 = vld [vmem:[#allocation208_spill] sm:$0xff] }
 0x2e3   : > { %v2082_v17 = vmul.f32 %v6641_v37, %v1745_v9  ;;  %v2083_v41 = vmul.f32 %v6643_v23, %v1745_v9  ;;  %v2084_v59 = vmul.f32 %v6645_v19, %v1745_v9  ;;  %v2085_v18 = vmul.f32 %v6647_v42, %v1745_v9 }
 0x2e4   : > { %v2086_v34 = vmul.f32 %v6649_v1, %v1745_v9  ;;  %v2087_v26 = vmul.f32 %v6651_v25, %v1745_v9  ;;  %v2088_v46 = vmul.f32 %v6653_v15, %v1745_v9  ;;  %v2089_v57 = vmul.f32 %v6655_v54, %v1745_v9 }
 0x2e5   : > { %v2090_v0 = vmul.f32 %v6657_v50, %v1745_v9  ;;  %v2401_v53 = vadd.f32 %v2081_v60, %v9581_v12  ;;  %v2402_v36 = vadd.f32 %v2082_v17, %v9582_v51  ;;  %v2403_v27 = vadd.f32 %v2083_v41, %v9583_v48 }
 0x2e6   : > { %v2404_v38 = vadd.f32 %v2084_v59, %v9584_v8  ;;  %v2405_v31 = vadd.f32 %v2085_v18, %v9585_v4  ;;  %v2406_v32 = vadd.f32 %v2086_v34, %v9586_v35  ;;  %v2407_v10 = vadd.f32 %v2087_v26, %v9587_v63 }
 0x2e7   : > { %v2408_v52 = vadd.f32 %v2088_v46, %v9588_v39  ;;  %v2409_v13 = vadd.f32 %v2089_v57, %v9589_v2  ;;  %v2410_v21 = vadd.f32 %v2090_v0, %v9590_v33  ;;  %v2721_v9 = vmax.f32 %v2401_v53, 0.0  ;;  %v9594_v33 = vld [vmem:[#allocation78_spill] sm:$0xff] }
 0x2e8   : > { %v2722_v60 = vmax.f32 %v2402_v36, 0.0  ;;  %v2723_v12 = vmax.f32 %v2403_v27, 0.0  ;;  %v2724_v17 = vmax.f32 %v2404_v38, 0.0  ;;  %v2725_v51 = vmax.f32 %v2405_v31, 0.0  ;;  %v9591_v38 = vld [vmem:[#allocation37_spill] sm:$0xff] }
 0x2e9   : > { %v2726_v41 = vmax.f32 %v2406_v32, 0.0  ;;  %v2727_v48 = vmax.f32 %v2407_v10, 0.0  ;;  %v2728_v59 = vmax.f32 %v2408_v52, 0.0  ;;  %v2729_v8 = vmax.f32 %v2409_v13, 0.0  ;;  %v9592_v32 = vld [vmem:[#allocation76_spill] sm:$0xff]  ;;  %v9593_v52 = vld [vmem:[#allocation77_spill] sm:$0xff] }
 0x2ea   : > { %v2730_v18 = vmax.f32 %v2410_v21, 0.0  ;;  %v3041_v4 = vmin.f32 %v2721_v9, 6.0  ;;  %v3042_v34 = vmin.f32 %v2722_v60, 6.0  ;;  %v3043_v35 = vmin.f32 %v2723_v12, 6.0  ;;  %v9595_v9 = vld [vmem:[#allocation79_spill] sm:$0xff] }
 0x2eb   : > { %v3044_v26 = vmin.f32 %v2724_v17, 6.0  ;;  %v3045_v63 = vmin.f32 %v2725_v51, 6.0  ;;  %v3046_v46 = vmin.f32 %v2726_v41, 6.0  ;;  %v3047_v39 = vmin.f32 %v2727_v48, 6.0  ;;  %v9597_v12 = vld [vmem:[#allocation39_spill] sm:$0xff] }
 0x2ec   : > { %v3048_v57 = vmin.f32 %v2728_v59, 6.0  ;;  %v3049_v2 = vmin.f32 %v2729_v8, 6.0  ;;  %v3050_v0 = vmin.f32 %v2730_v18, 6.0  ;;  %v3664_v53 = vmax.f32 %v7645_v6, %v7589_v44  ;;  %v1757_v6 = vpop.permute.xlu0 %1756 }
 0x2ed   : > { %v3701_v36 = vmax.f32 %v7647_v7, %v7591_v62  ;;  %v3738_v27 = vmax.f32 %v7649_v11, %v7593_v5  ;;  %v3775_v31 = vmax.f32 %v7651_v43, %v9591_v38  ;;  %v3812_v10 = vmax.f32 %v7653_v58, %v9592_v32 }
 0x2ee   : > { %v3849_v13 = vmax.f32 %v7655_v16, %v9593_v52  ;;  %v3886_v21 = vmax.f32 %v7657_v49, %v9594_v33  ;;  %v3923_v44 = vmax.f32 %v7659_v40, %v9595_v9  ;;  %v7745_v62 = vmax.f32 %v3664_v53, %v3041_v4  ;;  %v9596_v49 = vld [vmem:[#allocation38_spill] sm:$0xff]  ;;  %v9600_v53 = vld [vmem:[#allocation211_spill] sm:$0xff] }
 0x2ef   : > { %v7747_v7 = vmax.f32 %v3701_v36, %v3042_v34  ;;  %v7749_v5 = vmax.f32 %v3738_v27, %v3043_v35  ;;  %v7751_v11 = vmax.f32 %v3775_v31, %v3044_v26  ;;  %v7753_v43 = vmax.f32 %v3812_v10, %v3045_v63  ;;  %v9598_v63 = vld [vmem:[#allocation209_spill] sm:$0xff]  ;;  %v9601_v27 = vld [vmem:[#allocation212_spill] sm:$0xff]  ;;  %v9604_v10 = vld [vmem:[#allocation215_spill] sm:$0xff] }
 0x2f0   : > { %v7755_v58 = vmax.f32 %v3849_v13, %v3046_v46  ;;  %v7757_v16 = vmax.f32 %v3886_v21, %v3047_v39  ;;  %v7759_v60 = vmax.f32 %v3923_v44, %v3048_v57  ;;  %v3960_v40 = vmax.f32 %v7671_v56, %v9596_v49  ;;  %v9599_v39 = vld [vmem:[#allocation210_spill] sm:$0xff]  ;;  %v9605_v13 = vld [vmem:[#allocation216_spill] sm:$0xff]  ;;  %v9606_v21 = vld [vmem:[#allocation217_spill] sm:$0xff] }
 0x2f1   : > { %v3997_v17 = vmax.f32 %v7673_v30, %v9597_v12  ;;  %v2111_v51 = vmul.f32 %v6639_v45, %v1757_v6  ;;  %v2112_v41 = vmul.f32 %v6641_v37, %v1757_v6  ;;  %v2113_v48 = vmul.f32 %v6643_v23, %v1757_v6  ;;  %v9607_v44 = vld [vmem:[#allocation218_spill] sm:$0xff] }
 0x2f2   : > { %v2114_v59 = vmul.f32 %v6645_v19, %v1757_v6  ;;  %v2115_v8 = vmul.f32 %v6647_v42, %v1757_v6  ;;  %v2116_v18 = vmul.f32 %v6649_v1, %v1757_v6  ;;  %v7771_v4 = vmax.f32 %v3960_v40, %v3049_v2  ;;  %v9602_v2 = vld [vmem:[#allocation213_spill] sm:$0xff] }
 0x2f3   : > { %v7773_v34 = vmax.f32 %v3997_v17, %v3050_v0  ;;  %v2117_v56 = vmul.f32 %v6651_v25, %v1757_v6  ;;  %v2118_v30 = vmul.f32 %v6653_v15, %v1757_v6  ;;  %v2119_v35 = vmul.f32 %v6655_v54, %v1757_v6  ;;  %v9603_v0 = vld [vmem:[#allocation214_spill] sm:$0xff] }
 0x2f4   : > { %v2120_v26 = vmul.f32 %v6657_v50, %v1757_v6  ;;  %v2431_v46 = vadd.f32 %v2111_v51, %v9598_v63  ;;  %v2432_v57 = vadd.f32 %v2112_v41, %v9599_v39  ;;  %v2433_v36 = vadd.f32 %v2113_v48, %v9600_v53 }
 0x2f5   : > { %v2434_v38 = vadd.f32 %v2114_v59, %v9601_v27  ;;  %v2435_v31 = vadd.f32 %v2115_v8, %v9602_v2  ;;  %v2436_v32 = vadd.f32 %v2116_v18, %v9603_v0  ;;  %v2437_v52 = vadd.f32 %v2117_v56, %v9604_v10  ;;  %v1753_v56 = vpop.permute.xlu1 %1752 }
 0x2f6   : > { %v2438_v33 = vadd.f32 %v2118_v30, %v9605_v13  ;;  %v2439_v9 = vadd.f32 %v2119_v35, %v9606_v21  ;;  %v2440_v6 = vadd.f32 %v2120_v26, %v9607_v44  ;;  %v2751_v49 = vmax.f32 %v2431_v46, 0.0 }
 0x2f7   : > { %v2752_v40 = vmax.f32 %v2432_v57, 0.0  ;;  %v2753_v12 = vmax.f32 %v2433_v36, 0.0  ;;  %v2754_v17 = vmax.f32 %v2434_v38, 0.0  ;;  %v2755_v51 = vmax.f32 %v2435_v31, 0.0 }
 0x2f8   : > { %v2756_v41 = vmax.f32 %v2436_v32, 0.0  ;;  %v2757_v48 = vmax.f32 %v2437_v52, 0.0  ;;  %v2758_v59 = vmax.f32 %v2438_v33, 0.0  ;;  %v2759_v63 = vmax.f32 %v2439_v9, 0.0  ;;  %v9609_v9 = vld [vmem:[#allocation219_spill] sm:$0xff] }
 0x2f9   : > { %v2760_v8 = vmax.f32 %v2440_v6, 0.0  ;;  %v7789_v39 = vmin.f32 %v2751_v49, 6.0  ;;  %v7791_v18 = vmin.f32 %v2752_v40, 6.0  ;;  %v7793_v30 = vmin.f32 %v2753_v12, 6.0  ;;  %v9610_v6 = vld [vmem:[#allocation220_spill] sm:$0xff]  ;;  %v9611_v40 = vld [vmem:[#allocation221_spill] sm:$0xff] }
 0x2fa   : > { %v7795_v35 = vmin.f32 %v2754_v17, 6.0  ;;  %v7797_v26 = vmin.f32 %v2755_v51, 6.0  ;;  %v7799_v46 = vmin.f32 %v2756_v41, 6.0  ;;  %v7801_v57 = vmin.f32 %v2757_v48, 6.0  ;;  %v9612_v17 = vld [vmem:[#allocation222_spill] sm:$0xff]  ;;  %v9613_v41 = vld [vmem:[#allocation223_spill] sm:$0xff] }
 0x2fb   : > { %v7803_v53 = vmin.f32 %v2758_v59, 6.0  ;;  %v7805_v36 = vmin.f32 %v2759_v63, 6.0  ;;  %v7807_v27 = vmin.f32 %v2760_v8, 6.0  ;;  %v2101_v38 = vmul.f32 %v6639_v45, %v1753_v56  ;;  %v9614_v59 = vld [vmem:[#allocation224_spill] sm:$0xff]  ;;  %v9615_v8 = vld [vmem:[#allocation225_spill] sm:$0xff] }
 0x2fc   : > { %v2102_v2 = vmul.f32 %v6641_v37, %v1753_v56  ;;  %v2103_v31 = vmul.f32 %v6643_v23, %v1753_v56  ;;  %v2104_v0 = vmul.f32 %v6645_v19, %v1753_v56  ;;  %v2105_v32 = vmul.f32 %v6647_v42, %v1753_v56  ;;  %v9617_v42 = vld [vmem:[#allocation227_spill] sm:$0xff] }
 0x2fd   : > { %9608 = vst [vmem:[#allocation32_spill] sm:$0xff] %v7807_v27  ;;  %v2106_v10 = vmul.f32 %v6649_v1, %v1753_v56  ;;  %v2107_v52 = vmul.f32 %v6651_v25, %v1753_v56  ;;  %v2108_v13 = vmul.f32 %v6653_v15, %v1753_v56  ;;  %v2109_v33 = vmul.f32 %v6655_v54, %v1753_v56  ;;  %v9616_v1 = vld [vmem:[#allocation226_spill] sm:$0xff]  ;;  %v9618_v27 = vld [vmem:[#allocation228_spill] sm:$0xff] }
 0x2fe   : > { %v2110_v21 = vmul.f32 %v6657_v50, %v1753_v56  ;;  %v2421_v44 = vadd.f32 %v2101_v38, %v9609_v9  ;;  %v2422_v49 = vadd.f32 %v2102_v2, %v9610_v6  ;;  %v2423_v12 = vadd.f32 %v2103_v31, %v9611_v40 }
 0x2ff   : > { %v2424_v51 = vadd.f32 %v2104_v0, %v9612_v17  ;;  %v2425_v48 = vadd.f32 %v2105_v32, %v9613_v41  ;;  %v2426_v63 = vadd.f32 %v2106_v10, %v9614_v59  ;;  %v2427_v25 = vadd.f32 %v2107_v52, %v9615_v8 }
 0x300   : > { %v2428_v15 = vadd.f32 %v2108_v13, %v9616_v1  ;;  %v2429_v54 = vadd.f32 %v2109_v33, %v9617_v42  ;;  %v2430_v56 = vadd.f32 %v2110_v21, %v9618_v27  ;;  %v2741_v50 = vmax.f32 %v2421_v44, 0.0 }
 0x301   : > { %v2742_v38 = vmax.f32 %v2422_v49, 0.0  ;;  %v2743_v9 = vmax.f32 %v2423_v12, 0.0  ;;  %v2744_v2 = vmax.f32 %v2424_v51, 0.0  ;;  %v2745_v6 = vmax.f32 %v2425_v48, 0.0 }
 0x302   : > { %v2746_v31 = vmax.f32 %v2426_v63, 0.0  ;;  %v2747_v40 = vmax.f32 %v2427_v25, 0.0  ;;  %v2748_v0 = vmax.f32 %v2428_v15, 0.0  ;;  %v2749_v17 = vmax.f32 %v2429_v54, 0.0  ;;  %v9620_v63 = vld [vmem:[#allocation325_spill] sm:$0xff] }
 0x303   : > { %v2750_v32 = vmax.f32 %v2430_v56, 0.0  ;;  %v3061_v41 = vmin.f32 %v2741_v50, 6.0  ;;  %v3062_v10 = vmin.f32 %v2742_v38, 6.0  ;;  %v3063_v59 = vmin.f32 %v2743_v9, 6.0  ;;  %v9621_v38 = vld [vmem:[#allocation326_spill] sm:$0xff] }
 0x304   : > { %v3064_v52 = vmin.f32 %v2744_v2, 6.0  ;;  %v3065_v8 = vmin.f32 %v2745_v6, 6.0  ;;  %v3066_v1 = vmin.f32 %v2746_v31, 6.0  ;;  %v3067_v13 = vmin.f32 %v2747_v40, 6.0  ;;  %v9619_v48 = vld [vmem:[#allocation32_spill] sm:$0xff]  ;;  %v9624_v31 = vld [vmem:[#allocation329_spill] sm:$0xff] }
 0x305   : > { %v3068_v42 = vmin.f32 %v2748_v0, 6.0  ;;  %v3069_v33 = vmin.f32 %v2749_v17, 6.0  ;;  %v3070_v27 = vmin.f32 %v2750_v32, 6.0  ;;  %v3666_v21 = vmax.f32 %v7745_v62, %v7689_v28  ;;  %v9623_v6 = vld [vmem:[#allocation328_spill] sm:$0xff]  ;;  %v9625_v0 = vld [vmem:[#allocation330_spill] sm:$0xff]  ;;  %v9626_v32 = vld [vmem:[#allocation239_spill] sm:$0xff] }
 0x306   : > { %v3703_v44 = vmax.f32 %v7747_v7, %v7691_v14  ;;  %v3740_v15 = vmax.f32 %v7749_v5, %v7693_v20  ;;  %v3777_v25 = vmax.f32 %v7751_v11, %v7695_v3  ;;  %v3814_v54 = vmax.f32 %v7753_v43, %v7697_v29 }
 0x307   : > { %v3851_v50 = vmax.f32 %v7755_v58, %v7699_v24  ;;  %v3888_v49 = vmax.f32 %v7757_v16, %v7701_v22  ;;  %v3925_v28 = vmax.f32 %v7759_v60, %v7703_v47  ;;  %v7845_v62 = vmax.f32 %v3666_v21, %v3061_v41  ;;  %v1761_v58 = vpop.permute.xlu0 %1760  ;;  %v9632_v21 = vld [vmem:[#allocation245_spill] sm:$0xff] }
 0x308   : > { %v7847_v14 = vmax.f32 %v3703_v44, %v3062_v10  ;;  %v7849_v20 = vmax.f32 %v3740_v15, %v3063_v59  ;;  %v7851_v7 = vmax.f32 %v3777_v25, %v3064_v52  ;;  %v7853_v3 = vmax.f32 %v3814_v54, %v3065_v8  ;;  %v9627_v10 = vld [vmem:[#allocation240_spill] sm:$0xff]  ;;  %v9628_v52 = vld [vmem:[#allocation241_spill] sm:$0xff]  ;;  %v9629_v8 = vld [vmem:[#allocation242_spill] sm:$0xff] }
 0x309   : > { %v7855_v29 = vmax.f32 %v3851_v50, %v3066_v1  ;;  %v7857_v5 = vmax.f32 %v3888_v49, %v3067_v13  ;;  %v7859_v24 = vmax.f32 %v3925_v28, %v3068_v42  ;;  %v3962_v22 = vmax.f32 %v7771_v4, %v7705_v55  ;;  %v9630_v13 = vld [vmem:[#allocation243_spill] sm:$0xff]  ;;  %v9633_v15 = vld [vmem:[#allocation246_spill] sm:$0xff]  ;;  %v9635_v49 = vld [vmem:[#allocation248_spill] sm:$0xff] }
 0x30a   : > { %v3999_v47 = vmax.f32 %v7773_v34, %v7707_v61  ;;  %v3668_v11 = vmax.f32 %v7845_v62, %v7789_v39  ;;  %v3705_v43 = vmax.f32 %v7847_v14, %v7791_v18  ;;  %v3742_v16 = vmax.f32 %v7849_v20, %v7793_v30  ;;  %v9634_v54 = vld [vmem:[#allocation247_spill] sm:$0xff] }
 0x30b   : > { %v3779_v60 = vmax.f32 %v7851_v7, %v7795_v35  ;;  %v3816_v12 = vmax.f32 %v7853_v3, %v7797_v26  ;;  %v3853_v55 = vmax.f32 %v7855_v29, %v7799_v46  ;;  %v3963_v61 = vmax.f32 %v3962_v22, %v3069_v33  ;;  %v9631_v33 = vld [vmem:[#allocation244_spill] sm:$0xff] }
 0x30c   : > { %v4000_v4 = vmax.f32 %v3999_v47, %v3070_v27  ;;  %v3890_v34 = vmax.f32 %v7857_v5, %v7801_v57  ;;  %v3927_v39 = vmax.f32 %v7859_v24, %v7803_v53  ;;  %v2121_v18 = vmul.f32 %v6639_v45, %v1761_v58  ;;  %v9622_v57 = vld [vmem:[#allocation327_spill] sm:$0xff] }
 0x30d   : > { %v2122_v30 = vmul.f32 %v6641_v37, %v1761_v58  ;;  %v2123_v35 = vmul.f32 %v6643_v23, %v1761_v58  ;;  %v2124_v51 = vmul.f32 %v6645_v19, %v1761_v58  ;;  %v3964_v26 = vmax.f32 %v3963_v61, %v7805_v36 }
 0x30e   : > { %v4001_v46 = vmax.f32 %v4000_v4, %v9619_v48  ;;  %v2125_v56 = vmul.f32 %v9620_v63, %v1761_v58  ;;  %v2126_v9 = vmul.f32 %v9621_v38, %v1761_v58  ;;  %v2127_v2 = vmul.f32 %v9622_v57, %v1761_v58 }
 0x30f   : > { %v2128_v53 = vmul.f32 %v9623_v6, %v1761_v58  ;;  %v2129_v40 = vmul.f32 %v9624_v31, %v1761_v58  ;;  %v2130_v17 = vmul.f32 %v9625_v0, %v1761_v58  ;;  %v2441_v41 = vadd.f32 %v2121_v18, %v9626_v32 }
 0x310   : > { %v2442_v59 = vadd.f32 %v2122_v30, %v9627_v10  ;;  %v2443_v36 = vadd.f32 %v2123_v35, %v9628_v52  ;;  %v2444_v1 = vadd.f32 %v2124_v51, %v9629_v8  ;;  %v2445_v42 = vadd.f32 %v2125_v56, %v9630_v13  ;;  %v9636_v13 = vld [vmem:[#allocation8_spill] sm:$0xff] }
 0x311   : > { %v2446_v27 = vadd.f32 %v2126_v9, %v9631_v33  ;;  %v2447_v44 = vadd.f32 %v2127_v2, %v9632_v21  ;;  %v2448_v25 = vadd.f32 %v2128_v53, %v9633_v15  ;;  %v2449_v50 = vadd.f32 %v2129_v40, %v9634_v54  ;;  %v1765_v40 = vpop.permute.xlu0 %1764  ;;  %v9637_v33 = vld [vmem:[#allocation9_spill] sm:$0xff]  ;;  %v9638_v21 = vld [vmem:[#allocation10_spill] sm:$0xff]  ;;  %v9639_v15 = vld [vmem:[#allocation11_spill] sm:$0xff] }
 0x312   : > { %v2450_v28 = vadd.f32 %v2130_v17, %v9635_v49  ;;  %v2761_v62 = vmax.f32 %v2441_v41, 0.0  ;;  %v2762_v14 = vmax.f32 %v2442_v59, 0.0  ;;  %v2763_v20 = vmax.f32 %v2443_v36, 0.0  ;;  %v9640_v54 = vld [vmem:[#allocation12_spill] sm:$0xff]  ;;  %v9641_v49 = vld [vmem:[#allocation13_spill] sm:$0xff] }
 0x313   : > { %v2764_v7 = vmax.f32 %v2444_v1, 0.0  ;;  %v2765_v3 = vmax.f32 %v2445_v42, 0.0  ;;  %v2766_v29 = vmax.f32 %v2446_v27, 0.0  ;;  %v2767_v5 = vmax.f32 %v2447_v44, 0.0 }
 0x314   : > { %v2768_v24 = vmax.f32 %v2448_v25, 0.0  ;;  %v2769_v22 = vmax.f32 %v2449_v50, 0.0  ;;  %v2770_v47 = vmax.f32 %v2450_v28, 0.0  ;;  %v3081_v58 = vmin.f32 %v2761_v62, 6.0  ;;  %v9642_v62 = vld [vmem:[#allocation14_spill] sm:$0xff] }
 0x315   : > { %v3082_v61 = vmin.f32 %v2762_v14, 6.0  ;;  %v3083_v4 = vmin.f32 %v2763_v20, 6.0  ;;  %v3084_v18 = vmin.f32 %v2764_v7, 6.0  ;;  %v3085_v30 = vmin.f32 %v2765_v3, 6.0  ;;  %v9643_v20 = vld [vmem:[#allocation15_spill] sm:$0xff]  ;;  %v9644_v3 = vld [vmem:[#allocation16_spill] sm:$0xff] }
 0x316   : > { %v3086_v35 = vmin.f32 %v2766_v29, 6.0  ;;  %v3087_v51 = vmin.f32 %v2767_v5, 6.0  ;;  %v3088_v48 = vmin.f32 %v2768_v24, 6.0  ;;  %v3089_v56 = vmin.f32 %v2769_v22, 6.0  ;;  %v9645_v5 = vld [vmem:[#allocation17_spill] sm:$0xff] }
 0x317   : > { %v3090_v9 = vmin.f32 %v2770_v47, 6.0  ;;  %v7903_v2 = vmax.f32 %v3668_v11, %v3081_v58  ;;  %v7905_v53 = vmax.f32 %v3705_v43, %v3082_v61  ;;  %v7907_v17 = vmax.f32 %v3742_v16, %v3083_v4  ;;  %v907_v11 = vpop.permute.xlu1 %906  ;;  %v9646_v22 = vld [vmem:[#allocation229_spill] sm:$0xff]  ;;  %v9647_v58 = vld [vmem:[#allocation230_spill] sm:$0xff]  ;;  %v9648_v4 = vld [vmem:[#allocation231_spill] sm:$0xff] }
 0x318   : > { %v7909_v32 = vmax.f32 %v3779_v60, %v3084_v18  ;;  %v7911_v41 = vmax.f32 %v3816_v12, %v3085_v30  ;;  %v7913_v10 = vmax.f32 %v3853_v55, %v3086_v35  ;;  %v7915_v59 = vmax.f32 %v3890_v34, %v3087_v51  ;;  %v9649_v30 = vld [vmem:[#allocation232_spill] sm:$0xff]  ;;  %v9650_v51 = vld [vmem:[#allocation233_spill] sm:$0xff] }
 0x319   : > { %v7917_v52 = vmax.f32 %v3927_v39, %v3088_v48  ;;  %v7919_v36 = vmax.f32 %v3964_v26, %v3089_v56  ;;  %v7921_v8 = vmax.f32 %v4001_v46, %v3090_v9  ;;  %v2131_v43 = vmul.f32 %v6639_v45, %v1765_v40  ;;  %v9651_v56 = vld [vmem:[#allocation234_spill] sm:$0xff] }
 0x31a   : > { %v2132_v16 = vmul.f32 %v6641_v37, %v1765_v40  ;;  %v2133_v60 = vmul.f32 %v6643_v23, %v1765_v40  ;;  %v2134_v12 = vmul.f32 %v6645_v19, %v1765_v40  ;;  %v2135_v55 = vmul.f32 %v9620_v63, %v1765_v40 }
 0x31b   : > { %v2136_v34 = vmul.f32 %v9621_v38, %v1765_v40  ;;  %v2137_v39 = vmul.f32 %v9622_v57, %v1765_v40  ;;  %v2138_v26 = vmul.f32 %v9623_v6, %v1765_v40  ;;  %v2139_v46 = vmul.f32 %v9624_v31, %v1765_v40 }
 0x31c   : > { %v2140_v1 = vmul.f32 %v9625_v0, %v1765_v40  ;;  %v1273_v42 = vmul.f32 %v9636_v13, %v907_v11  ;;  %v1274_v27 = vmul.f32 %v9637_v33, %v907_v11  ;;  %v1275_v44 = vmul.f32 %v9638_v21, %v907_v11  ;;  %v9652_v40 = vld [vmem:[#allocation235_spill] sm:$0xff] }
 0x31d   : > { %v1276_v25 = vmul.f32 %v9639_v15, %v907_v11  ;;  %v1277_v50 = vmul.f32 %v9640_v54, %v907_v11  ;;  %v1278_v28 = vmul.f32 %v9641_v49, %v907_v11  ;;  %v1279_v14 = vmul.f32 %v9642_v62, %v907_v11  ;;  %v9653_v49 = vld [vmem:[#allocation236_spill] sm:$0xff]  ;;  %v9654_v54 = vld [vmem:[#allocation237_spill] sm:$0xff]  ;;  %v9655_v15 = vld [vmem:[#allocation238_spill] sm:$0xff] }
 0x31e   : > { %v1280_v7 = vmul.f32 %v9643_v20, %v907_v11  ;;  %v1281_v29 = vmul.f32 %v9644_v3, %v907_v11  ;;  %v1282_v24 = vmul.f32 %v9645_v5, %v907_v11  ;;  %v1593_v47 = vadd.f32 %v1273_v42, %v9646_v22 }
 0x31f   : > { %v1594_v61 = vadd.f32 %v1274_v27, %v9647_v58  ;;  %v1595_v18 = vadd.f32 %v1275_v44, %v9648_v4  ;;  %v1596_v35 = vadd.f32 %v1276_v25, %v9649_v30  ;;  %v1597_v48 = vadd.f32 %v1277_v50, %v9650_v51 }
 0x320   : > { %v1598_v9 = vadd.f32 %v1278_v28, %v9651_v56  ;;  %v1599_v62 = vadd.f32 %v1279_v14, %v9652_v40  ;;  %v1600_v20 = vadd.f32 %v1280_v7, %v9653_v49  ;;  %v1601_v3 = vadd.f32 %v1281_v29, %v9654_v54 }
 0x321   : > { %v1602_v11 = vadd.f32 %v1282_v24, %v9655_v15  ;;  %v2451_v5 = vadd.f32 %v2131_v43, %v1593_v47  ;;  %v2452_v42 = vadd.f32 %v2132_v16, %v1594_v61  ;;  %v2453_v22 = vadd.f32 %v2133_v60, %v1595_v18  ;;  %v9661_v61 = vld [vmem:[#allocation16_spill] sm:$0xff]  ;;  %v9662_v24 = vld [vmem:[#allocation17_spill] sm:$0xff] }
 0x322   : > { %v2454_v27 = vadd.f32 %v2134_v12, %v1596_v35  ;;  %v2455_v58 = vadd.f32 %v2135_v55, %v1597_v48  ;;  %v2456_v44 = vadd.f32 %v2136_v34, %v1598_v9  ;;  %v2457_v4 = vadd.f32 %v2137_v39, %v1599_v62  ;;  %v1769_v62 = vpop.permute.xlu0 %1768  ;;  %v9659_v9 = vld [vmem:[#allocation14_spill] sm:$0xff]  ;;  %v9660_v35 = vld [vmem:[#allocation15_spill] sm:$0xff] }
 0x323   : > { %v2458_v25 = vadd.f32 %v2138_v26, %v1600_v20  ;;  %v2459_v30 = vadd.f32 %v2139_v46, %v1601_v3  ;;  %v2460_v50 = vadd.f32 %v2140_v1, %v1602_v11  ;;  %v2771_v51 = vmax.f32 %v2451_v5, 0.0  ;;  %v9663_v5 = vld [vmem:[#allocation259_spill] sm:$0xff]  ;;  %v9664_v20 = vld [vmem:[#allocation260_spill] sm:$0xff] }
 0x324   : > { %v2772_v28 = vmax.f32 %v2452_v42, 0.0  ;;  %v2773_v56 = vmax.f32 %v2453_v22, 0.0  ;;  %v2774_v14 = vmax.f32 %v2454_v27, 0.0  ;;  %v2775_v40 = vmax.f32 %v2455_v58, 0.0  ;;  %v911_v22 = vpop.permute.xlu1 %910 }
 0x325   : > { %v2776_v49 = vmax.f32 %v2456_v44, 0.0  ;;  %v2777_v7 = vmax.f32 %v2457_v4, 0.0  ;;  %v2778_v54 = vmax.f32 %v2458_v25, 0.0  ;;  %v2779_v29 = vmax.f32 %v2459_v30, 0.0 }
 0x326   : > { %v2780_v15 = vmax.f32 %v2460_v50, 0.0  ;;  %v7953_v43 = vmin.f32 %v2771_v51, 6.0  ;;  %v7955_v16 = vmin.f32 %v2772_v28, 6.0  ;;  %v7957_v60 = vmin.f32 %v2773_v56, 6.0 }
 0x327   : > { %v7959_v12 = vmin.f32 %v2774_v14, 6.0  ;;  %v7961_v55 = vmin.f32 %v2775_v40, 6.0  ;;  %v7963_v34 = vmin.f32 %v2776_v49, 6.0  ;;  %v7965_v39 = vmin.f32 %v2777_v7, 6.0  ;;  %v9656_v40 = vld [vmem:[#allocation11_spill] sm:$0xff]  ;;  %v9657_v7 = vld [vmem:[#allocation12_spill] sm:$0xff] }
 0x328   : > { %v7967_v26 = vmin.f32 %v2778_v54, 6.0  ;;  %v7969_v46 = vmin.f32 %v2779_v29, 6.0  ;;  %v7971_v1 = vmin.f32 %v2780_v15, 6.0  ;;  %v2141_v11 = vmul.f32 %v6639_v45, %v1769_v62  ;;  %v9658_v29 = vld [vmem:[#allocation13_spill] sm:$0xff] }
 0x329   : > { %v2142_v42 = vmul.f32 %v6641_v37, %v1769_v62  ;;  %v2143_v27 = vmul.f32 %v6643_v23, %v1769_v62  ;;  %v2144_v58 = vmul.f32 %v6645_v19, %v1769_v62  ;;  %v2145_v44 = vmul.f32 %v9620_v63, %v1769_v62  ;;  %v9671_v63 = vld [vmem:[#allocation267_spill] sm:$0xff]  ;;  %v9672_v19 = vld [vmem:[#allocation268_spill] sm:$0xff] }
 0x32a   : > { %v2146_v4 = vmul.f32 %v9621_v38, %v1769_v62  ;;  %v2147_v25 = vmul.f32 %v9622_v57, %v1769_v62  ;;  %v2148_v30 = vmul.f32 %v9623_v6, %v1769_v62  ;;  %v2149_v50 = vmul.f32 %v9624_v31, %v1769_v62  ;;  %v9667_v31 = vld [vmem:[#allocation263_spill] sm:$0xff]  ;;  %v9668_v6 = vld [vmem:[#allocation264_spill] sm:$0xff]  ;;  %v9669_v57 = vld [vmem:[#allocation265_spill] sm:$0xff] }
 0x32b   : > { %v2150_v51 = vmul.f32 %v9625_v0, %v1769_v62  ;;  %v1283_v28 = vmul.f32 %v9636_v13, %v911_v22  ;;  %v1284_v56 = vmul.f32 %v9637_v33, %v911_v22  ;;  %v1285_v14 = vmul.f32 %v9638_v21, %v911_v22  ;;  %v9665_v13 = vld [vmem:[#allocation261_spill] sm:$0xff]  ;;  %v9666_v0 = vld [vmem:[#allocation262_spill] sm:$0xff] }
 0x32c   : > { %v1286_v49 = vmul.f32 %v9656_v40, %v911_v22  ;;  %v1287_v54 = vmul.f32 %v9657_v7, %v911_v22  ;;  %v1288_v15 = vmul.f32 %v9658_v29, %v911_v22  ;;  %v1289_v48 = vmul.f32 %v9659_v9, %v911_v22  ;;  %v9670_v38 = vld [vmem:[#allocation266_spill] sm:$0xff] }
 0x32d   : > { %v1290_v18 = vmul.f32 %v9660_v35, %v911_v22  ;;  %v1291_v47 = vmul.f32 %v9661_v61, %v911_v22  ;;  %v1292_v62 = vmul.f32 %v9662_v24, %v911_v22  ;;  %v1603_v3 = vadd.f32 %v1283_v28, %v9663_v5 }
 0x32e   : > { %v1604_v33 = vadd.f32 %v1284_v56, %v9664_v20  ;;  %v1605_v21 = vadd.f32 %v1285_v14, %v9665_v13  ;;  %v1606_v40 = vadd.f32 %v1286_v49, %v9666_v0  ;;  %v1607_v7 = vadd.f32 %v1287_v54, %v9667_v31 }
 0x32f   : > { %v1608_v29 = vadd.f32 %v1288_v15, %v9668_v6  ;;  %v1609_v9 = vadd.f32 %v1289_v48, %v9669_v57  ;;  %v1610_v35 = vadd.f32 %v1290_v18, %v9670_v38  ;;  %v1611_v61 = vadd.f32 %v1291_v47, %v9671_v63 }
 0x330   : > { %v1612_v22 = vadd.f32 %v1292_v62, %v9672_v19  ;;  %v2461_v24 = vadd.f32 %v2141_v11, %v1603_v3  ;;  %v2462_v5 = vadd.f32 %v2142_v42, %v1604_v33  ;;  %v2463_v28 = vadd.f32 %v2143_v27, %v1605_v21 }
 0x331   : > { %v2464_v20 = vadd.f32 %v2144_v58, %v1606_v40  ;;  %v2465_v56 = vadd.f32 %v2145_v44, %v1607_v7  ;;  %v2466_v13 = vadd.f32 %v2146_v4, %v1608_v29  ;;  %v2467_v14 = vadd.f32 %v2147_v25, %v1609_v9  ;;  %v915_v29 = vpop.permute.xlu1 %914 }
 0x332   : > { %v2468_v0 = vadd.f32 %v2148_v30, %v1610_v35  ;;  %v2469_v49 = vadd.f32 %v2149_v50, %v1611_v61  ;;  %v2470_v31 = vadd.f32 %v2150_v51, %v1612_v22  ;;  %v2781_v54 = vmax.f32 %v2461_v24, 0.0  ;;  %v1773_v30 = vpop.permute.xlu0 %1772  ;;  %v9694_v22 = vld [vmem:[#allocation325_spill] sm:$0xff] }
 0x333   : > { %v2782_v6 = vmax.f32 %v2462_v5, 0.0  ;;  %v2783_v15 = vmax.f32 %v2463_v28, 0.0  ;;  %v2784_v57 = vmax.f32 %v2464_v20, 0.0  ;;  %v2785_v48 = vmax.f32 %v2465_v56, 0.0  ;;  %v9695_v28 = vld [vmem:[#allocation326_spill] sm:$0xff]  ;;  %v9697_v56 = vld [vmem:[#allocation328_spill] sm:$0xff] }
 0x334   : > { %v2786_v38 = vmax.f32 %v2466_v13, 0.0  ;;  %v2787_v18 = vmax.f32 %v2467_v14, 0.0  ;;  %v2788_v63 = vmax.f32 %v2468_v0, 0.0  ;;  %v2789_v47 = vmax.f32 %v2469_v49, 0.0  ;;  %v9699_v14 = vld [vmem:[#allocation330_spill] sm:$0xff]  ;;  %v9700_v49 = vld [vmem:[#allocation8_spill] sm:$0xff] }
 0x335   : > { %v2790_v19 = vmax.f32 %v2470_v31, 0.0  ;;  %v3101_v3 = vmin.f32 %v2781_v54, 6.0  ;;  %v3102_v33 = vmin.f32 %v2782_v6, 6.0  ;;  %v3103_v21 = vmin.f32 %v2783_v15, 6.0  ;;  %v9701_v54 = vld [vmem:[#allocation9_spill] sm:$0xff]  ;;  %v9702_v15 = vld [vmem:[#allocation10_spill] sm:$0xff] }
 0x336   : > { %v3104_v11 = vmin.f32 %v2784_v57, 6.0  ;;  %v3105_v42 = vmin.f32 %v2785_v48, 6.0  ;;  %v3106_v27 = vmin.f32 %v2786_v38, 6.0  ;;  %v3107_v9 = vmin.f32 %v2787_v18, 6.0  ;;  %v9703_v48 = vld [vmem:[#allocation11_spill] sm:$0xff]  ;;  %v9704_v18 = vld [vmem:[#allocation12_spill] sm:$0xff] }
 0x337   : > { %v3108_v35 = vmin.f32 %v2788_v63, 6.0  ;;  %v3109_v61 = vmin.f32 %v2789_v47, 6.0  ;;  %v3110_v58 = vmin.f32 %v2790_v19, 6.0  ;;  %v9673_v24 = vmax.f32 %v7903_v2, %v7953_v43  ;;  %v9705_v47 = vld [vmem:[#allocation13_spill] sm:$0xff] }
 0x338   : > { %v9675_v4 = vmax.f32 %v7905_v53, %v7955_v16  ;;  %v9677_v50 = vmax.f32 %v7907_v17, %v7957_v60  ;;  %v9679_v40 = vmax.f32 %v7909_v32, %v7959_v12  ;;  %v9681_v2 = vmax.f32 %v7911_v41, %v7961_v55 }
 0x339   : > { %v8026_v44 = vmax.f32 %v9673_v24, %v3101_v3  ;;  %v9683_v53 = vmax.f32 %v7913_v10, %v7963_v34  ;;  %v9685_v17 = vmax.f32 %v7915_v59, %v7965_v39  ;;  %v9687_v32 = vmax.f32 %v7917_v52, %v7967_v26  ;;  %v9693_v52 = vld [vmem:[#allocation324_spill] sm:$0xff]  ;;  %v9706_v3 = vld [vmem:[#allocation14_spill] sm:$0xff] }
 0x33a   : > { %v8031_v25 = vmax.f32 %v9675_v4, %v3102_v33  ;;  %v8036_v51 = vmax.f32 %v9677_v50, %v3103_v21  ;;  %v8041_v7 = vmax.f32 %v9679_v40, %v3104_v11  ;;  %v8046_v43 = vmax.f32 %v9681_v2, %v3105_v42  ;;  %v9707_v21 = vld [vmem:[#allocation15_spill] sm:$0xff]  ;;  %v9708_v42 = vld [vmem:[#allocation16_spill] sm:$0xff]  ;;  %v9711_v24 = vld [vmem:[#allocation250_spill] sm:$0xff] }
 0x33b   : > { %9674 = vst [vmem:[#allocation33_spill] sm:$0xff] %v8026_v44  ;;  %v8051_v16 = vmax.f32 %v9683_v53, %v3106_v27  ;;  %v8056_v60 = vmax.f32 %v9685_v17, %v3107_v9  ;;  %v8061_v12 = vmax.f32 %v9687_v32, %v3108_v35  ;;  %v9689_v41 = vmax.f32 %v7919_v36, %v7969_v46  ;;  %v9696_v46 = vld [vmem:[#allocation327_spill] sm:$0xff]  ;;  %v9709_v9 = vld [vmem:[#allocation17_spill] sm:$0xff]  ;;  %v9713_v40 = vld [vmem:[#allocation252_spill] sm:$0xff] }
 0x33c   : > { %9676 = vst [vmem:[#allocation34_spill] sm:$0xff] %v8031_v25  ;;  %9678 = vst [vmem:[#allocation35_spill] sm:$0xff] %v8036_v51  ;;  %v9691_v10 = vmax.f32 %v7921_v8, %v7971_v1  ;;  %v2151_v59 = vmul.f32 %v6639_v45, %v1773_v30  ;;  %v2152_v39 = vmul.f32 %v6641_v37, %v1773_v30  ;;  %v9698_v8 = vld [vmem:[#allocation329_spill] sm:$0xff]  ;;  %v9715_v32 = vld [vmem:[#allocation254_spill] sm:$0xff] }
 0x33d   : > { %9680 = vst [vmem:[#allocation42_spill] sm:$0xff] %v8041_v7  ;;  %9682 = vst [vmem:[#allocation43_spill] sm:$0xff] %v8046_v43  ;;  %v8066_v55 = vmax.f32 %v9689_v41, %v3109_v61  ;;  %v2153_v62 = vmul.f32 %v6643_v23, %v1773_v30  ;;  %v2154_v26 = vmul.f32 %v9693_v52, %v1773_v30  ;;  %v9710_v61 = vld [vmem:[#allocation249_spill] sm:$0xff]  ;;  %v9744_v43 = vld [vmem:[#allocation286_spill] sm:$0xff] }
 0x33e   : > { %9684 = vst [vmem:[#allocation54_spill] sm:$0xff] %v8051_v16  ;;  %9686 = vst [vmem:[#allocation55_spill] sm:$0xff] %v8056_v60  ;;  %v8071_v34 = vmax.f32 %v9691_v10, %v3110_v58  ;;  %v2155_v5 = vmul.f32 %v9694_v22, %v1773_v30  ;;  %v2156_v36 = vmul.f32 %v9695_v28, %v1773_v30  ;;  %v9714_v53 = vld [vmem:[#allocation253_spill] sm:$0xff]  ;;  %v9716_v10 = vld [vmem:[#allocation255_spill] sm:$0xff] }
 0x33f   : > { %9688 = vst [vmem:[#allocation56_spill] sm:$0xff] %v8061_v12  ;;  %9690 = vst [vmem:[#allocation57_spill] sm:$0xff] %v8066_v55  ;;  %v2157_v20 = vmul.f32 %v9696_v46, %v1773_v30  ;;  %v2158_v13 = vmul.f32 %v9697_v56, %v1773_v30  ;;  %v2159_v1 = vmul.f32 %v9698_v8, %v1773_v30  ;;  %v9740_v55 = vld [vmem:[#allocation282_spill] sm:$0xff]  ;;  %v9741_v12 = vld [vmem:[#allocation283_spill] sm:$0xff] }
 0x340   : > { %9692 = vst [vmem:[#allocation318_spill] sm:$0xff] %v8071_v34  ;;  %v2160_v0 = vmul.f32 %v9699_v14, %v1773_v30  ;;  %v1293_v31 = vmul.f32 %v9700_v49, %v915_v29  ;;  %v1294_v6 = vmul.f32 %v9701_v54, %v915_v29  ;;  %v1295_v57 = vmul.f32 %v9702_v15, %v915_v29  ;;  %v9712_v30 = vld [vmem:[#allocation251_spill] sm:$0xff]  ;;  %v9739_v34 = vld [vmem:[#allocation281_spill] sm:$0xff]  ;;  %v9742_v60 = vld [vmem:[#allocation284_spill] sm:$0xff] }
 0x341   : > { %v1296_v38 = vmul.f32 %v9703_v48, %v915_v29  ;;  %v1297_v63 = vmul.f32 %v9704_v18, %v915_v29  ;;  %v1298_v19 = vmul.f32 %v9705_v47, %v915_v29  ;;  %v1299_v33 = vmul.f32 %v9706_v3, %v915_v29  ;;  %v9717_v47 = vld [vmem:[#allocation256_spill] sm:$0xff]  ;;  %v9718_v18 = vld [vmem:[#allocation257_spill] sm:$0xff]  ;;  %v9719_v48 = vld [vmem:[#allocation258_spill] sm:$0xff] }
 0x342   : > { %v1300_v11 = vmul.f32 %v9707_v21, %v915_v29  ;;  %v1301_v27 = vmul.f32 %v9708_v42, %v915_v29  ;;  %v1302_v35 = vmul.f32 %v9709_v9, %v915_v29  ;;  %v1613_v58 = vadd.f32 %v1293_v31, %v9710_v61  ;;  %v9743_v16 = vld [vmem:[#allocation285_spill] sm:$0xff]  ;;  %v9745_v7 = vld [vmem:[#allocation287_spill] sm:$0xff]  ;;  %v9746_v51 = vld [vmem:[#allocation288_spill] sm:$0xff] }
 0x343   : > { %v1614_v4 = vadd.f32 %v1294_v6, %v9711_v24  ;;  %v1615_v50 = vadd.f32 %v1295_v57, %v9712_v30  ;;  %v1616_v2 = vadd.f32 %v1296_v38, %v9713_v40  ;;  %v1617_v17 = vadd.f32 %v1297_v63, %v9714_v53  ;;  %v9766_v25 = vld [vmem:[#allocation276_spill] sm:$0xff] }
 0x344   : > { %v1618_v41 = vadd.f32 %v1298_v19, %v9715_v32  ;;  %v1619_v3 = vadd.f32 %v1299_v33, %v9716_v10  ;;  %v1620_v21 = vadd.f32 %v1300_v11, %v9717_v47  ;;  %v1621_v42 = vadd.f32 %v1301_v27, %v9718_v18 }
 0x345   : > { %v1622_v29 = vadd.f32 %v1302_v35, %v9719_v48  ;;  %v2471_v9 = vadd.f32 %v2151_v59, %v1613_v58  ;;  %v2472_v31 = vadd.f32 %v2152_v39, %v1614_v4  ;;  %v2473_v61 = vadd.f32 %v2153_v62, %v1615_v50  ;;  %v9735_v4 = vld [vmem:[#allocation16_spill] sm:$0xff]  ;;  %v9736_v35 = vld [vmem:[#allocation17_spill] sm:$0xff] }
 0x346   : > { %v2474_v6 = vadd.f32 %v2154_v26, %v1616_v2  ;;  %v2475_v24 = vadd.f32 %v2155_v5, %v1617_v17  ;;  %v2476_v57 = vadd.f32 %v2156_v36, %v1618_v41  ;;  %v2477_v30 = vadd.f32 %v2157_v20, %v1619_v3  ;;  %v1777_v3 = vpop.permute.xlu0 %1776  ;;  %v9733_v41 = vld [vmem:[#allocation14_spill] sm:$0xff]  ;;  %v9734_v2 = vld [vmem:[#allocation15_spill] sm:$0xff] }
 0x347   : > { %v2478_v38 = vadd.f32 %v2158_v13, %v1620_v21  ;;  %v2479_v40 = vadd.f32 %v2159_v1, %v1621_v42  ;;  %v2480_v63 = vadd.f32 %v2160_v0, %v1622_v29  ;;  %v2791_v53 = vmax.f32 %v2471_v9, 0.0  ;;  %v9737_v9 = vld [vmem:[#allocation279_spill] sm:$0xff]  ;;  %v9738_v21 = vld [vmem:[#allocation280_spill] sm:$0xff] }
 0x348   : > { %v2792_v19 = vmax.f32 %v2472_v31, 0.0  ;;  %v2793_v32 = vmax.f32 %v2473_v61, 0.0  ;;  %v2794_v33 = vmax.f32 %v2474_v6, 0.0  ;;  %v2795_v10 = vmax.f32 %v2475_v24, 0.0  ;;  %v919_v61 = vpop.permute.xlu1 %918 }
 0x349   : > { %v2796_v47 = vmax.f32 %v2476_v57, 0.0  ;;  %v2797_v11 = vmax.f32 %v2477_v30, 0.0  ;;  %v2798_v18 = vmax.f32 %v2478_v38, 0.0  ;;  %v2799_v27 = vmax.f32 %v2479_v40, 0.0 }
 0x34a   : > { %v2800_v48 = vmax.f32 %v2480_v63, 0.0  ;;  %v8103_v59 = vmin.f32 %v2791_v53, 6.0  ;;  %v8105_v39 = vmin.f32 %v2792_v19, 6.0  ;;  %v8107_v62 = vmin.f32 %v2793_v32, 6.0 }
 0x34b   : > { %v8109_v26 = vmin.f32 %v2794_v33, 6.0  ;;  %v8111_v5 = vmin.f32 %v2795_v10, 6.0  ;;  %v8113_v36 = vmin.f32 %v2796_v47, 6.0  ;;  %v8115_v20 = vmin.f32 %v2797_v11, 6.0  ;;  %v9730_v10 = vld [vmem:[#allocation11_spill] sm:$0xff]  ;;  %v9731_v11 = vld [vmem:[#allocation12_spill] sm:$0xff] }
 0x34c   : > { %9720 = vst [vmem:[#allocation302_spill] sm:$0xff] %v8103_v59  ;;  %9721 = vst [vmem:[#allocation303_spill] sm:$0xff] %v8105_v39  ;;  %v8117_v13 = vmin.f32 %v2798_v18, 6.0  ;;  %v8119_v1 = vmin.f32 %v2799_v27, 6.0  ;;  %v8121_v0 = vmin.f32 %v2800_v48, 6.0  ;;  %v2161_v29 = vmul.f32 %v6639_v45, %v1777_v3  ;;  %v9732_v27 = vld [vmem:[#allocation13_spill] sm:$0xff] }
 0x34d   : > { %9722 = vst [vmem:[#allocation304_spill] sm:$0xff] %v8107_v62  ;;  %9723 = vst [vmem:[#allocation305_spill] sm:$0xff] %v8109_v26  ;;  %v2162_v31 = vmul.f32 %v6641_v37, %v1777_v3  ;;  %v2163_v6 = vmul.f32 %v6643_v23, %v1777_v3  ;;  %v2164_v24 = vmul.f32 %v9693_v52, %v1777_v3  ;;  %v9767_v59 = vld [vmem:[#allocation277_spill] sm:$0xff] }
 0x34e   : > { %9724 = vst [vmem:[#allocation306_spill] sm:$0xff] %v8111_v5  ;;  %9725 = vst [vmem:[#allocation307_spill] sm:$0xff] %v8113_v36  ;;  %v2165_v57 = vmul.f32 %v9694_v22, %v1777_v3  ;;  %v2166_v30 = vmul.f32 %v9695_v28, %v1777_v3  ;;  %v2167_v38 = vmul.f32 %v9696_v46, %v1777_v3 }
 0x34f   : > { %9726 = vst [vmem:[#allocation308_spill] sm:$0xff] %v8115_v20  ;;  %9727 = vst [vmem:[#allocation309_spill] sm:$0xff] %v8117_v13  ;;  %v2168_v40 = vmul.f32 %v9697_v56, %v1777_v3  ;;  %v2169_v63 = vmul.f32 %v9698_v8, %v1777_v3  ;;  %v2170_v53 = vmul.f32 %v9699_v14, %v1777_v3 }
 0x350   : > { %9728 = vst [vmem:[#allocation46_spill] sm:$0xff] %v8119_v1  ;;  %9729 = vst [vmem:[#allocation47_spill] sm:$0xff] %v8121_v0  ;;  %v1303_v19 = vmul.f32 %v9700_v49, %v919_v61  ;;  %v1304_v32 = vmul.f32 %v9701_v54, %v919_v61  ;;  %v1305_v33 = vmul.f32 %v9702_v15, %v919_v61 }
 0x351   : > { %v1306_v47 = vmul.f32 %v9730_v10, %v919_v61  ;;  %v1307_v18 = vmul.f32 %v9731_v11, %v919_v61  ;;  %v1308_v48 = vmul.f32 %v9732_v27, %v919_v61  ;;  %v1309_v17 = vmul.f32 %v9733_v41, %v919_v61 }
 0x352   : > { %v1310_v50 = vmul.f32 %v9734_v2, %v919_v61  ;;  %v1311_v58 = vmul.f32 %v9735_v4, %v919_v61  ;;  %v1312_v3 = vmul.f32 %v9736_v35, %v919_v61  ;;  %v1623_v42 = vadd.f32 %v1303_v19, %v9737_v9 }
 0x353   : > { %v1624_v0 = vadd.f32 %v1304_v32, %v9738_v21  ;;  %v1625_v1 = vadd.f32 %v1305_v33, %v9739_v34  ;;  %v1626_v13 = vadd.f32 %v1306_v47, %v9740_v55  ;;  %v1627_v20 = vadd.f32 %v1307_v18, %v9741_v12 }
 0x354   : > { %v1628_v36 = vadd.f32 %v1308_v48, %v9742_v60  ;;  %v1629_v5 = vadd.f32 %v1309_v17, %v9743_v16  ;;  %v1630_v26 = vadd.f32 %v1310_v50, %v9744_v43  ;;  %v1631_v62 = vadd.f32 %v1311_v58, %v9745_v7  ;;  %v9747_v58 = vld [vmem:[#allocation289_spill] sm:$0xff] }
 0x355   : > { %v1632_v61 = vadd.f32 %v1312_v3, %v9746_v51  ;;  %v2481_v39 = vadd.f32 %v2161_v29, %v1623_v42  ;;  %v2482_v9 = vadd.f32 %v2162_v31, %v1624_v0  ;;  %v2483_v19 = vadd.f32 %v2163_v6, %v1625_v1  ;;  %v9748_v51 = vld [vmem:[#allocation6_spill] sm:$0xff] }
 0x356   : > { %v2484_v21 = vadd.f32 %v2164_v24, %v1626_v13  ;;  %v2485_v32 = vadd.f32 %v2165_v57, %v1627_v20  ;;  %v2486_v34 = vadd.f32 %v2166_v30, %v1628_v36  ;;  %v2487_v33 = vadd.f32 %v2167_v38, %v1629_v5  ;;  %v9749_v13 = vld [vmem:[#allocation7_spill] sm:$0xff] }
 0x357   : > { %v2488_v55 = vadd.f32 %v2168_v40, %v1630_v26  ;;  %v8173_v47 = vadd.f32 %v2169_v63, %v1631_v62  ;;  %v8175_v12 = vadd.f32 %v2170_v53, %v1632_v61  ;;  %v2801_v60 = vmax.f32 %v2481_v39, 0.0  ;;  %v1781_v62 = vpop.permute.xlu0 %1780  ;;  %v923_v63 = vpop.permute.xlu1 %922 }
 0x358   : > { %v2802_v16 = vmax.f32 %v2482_v9, 0.0  ;;  %v2803_v17 = vmax.f32 %v2483_v19, 0.0  ;;  %v2804_v43 = vmax.f32 %v2484_v21, 0.0  ;;  %v2805_v50 = vmax.f32 %v2485_v32, 0.0 }
 0x359   : > { %v2806_v7 = vmax.f32 %v2486_v34, 0.0  ;;  %v8179_v42 = vmul.f32 %v9748_v51, %v9747_v58  ;;  %v8183_v20 = vmul.f32 %v9749_v13, %v9747_v58  ;;  %v2807_v5 = vmax.f32 %v2487_v33, 0.0  ;;  %v9760_v58 = vld [vmem:[#allocation270_spill] sm:$0xff]  ;;  %v9761_v13 = vld [vmem:[#allocation271_spill] sm:$0xff] }
 0x35a   : > { %v2808_v26 = vmax.f32 %v2488_v55, 0.0  ;;  %v2809_v36 = vmax.f32 %v8173_v47, 0.0  ;;  %v2810_v39 = vmax.f32 %v8175_v12, 0.0  ;;  %v8187_v1 = vmin.f32 %v2801_v60, 6.0 }
 0x35b   : > { %9750 = vst [vmem:[#allocation94_spill] sm:$0xff] %v8183_v20  ;;  %v8189_v0 = vmin.f32 %v2802_v16, 6.0  ;;  %v8191_v29 = vmin.f32 %v2803_v17, 6.0  ;;  %v8193_v31 = vmin.f32 %v2804_v43, 6.0  ;;  %v8195_v6 = vmin.f32 %v2805_v50, 6.0  ;;  %v9759_v50 = vld [vmem:[#allocation269_spill] sm:$0xff] }
 0x35c   : > { %9751 = vst [vmem:[#allocation95_spill] sm:$0xff] %v8187_v1  ;;  %v8197_v24 = vmin.f32 %v2806_v7, 6.0  ;;  %v8199_v57 = vmin.f32 %v2807_v5, 6.0  ;;  %v8201_v30 = vmin.f32 %v2808_v26, 6.0  ;;  %v2171_v38 = vmul.f32 %v6639_v45, %v1781_v62  ;;  %v9762_v26 = vld [vmem:[#allocation272_spill] sm:$0xff]  ;;  %v9768_v1 = vld [vmem:[#allocation278_spill] sm:$0xff] }
 0x35d   : > { %9752 = vst [vmem:[#allocation96_spill] sm:$0xff] %v8189_v0  ;;  %9753 = vst [vmem:[#allocation97_spill] sm:$0xff] %v8191_v29  ;;  %v2172_v40 = vmul.f32 %v6641_v37, %v1781_v62  ;;  %v2173_v53 = vmul.f32 %v6643_v23, %v1781_v62  ;;  %v2174_v18 = vmul.f32 %v9693_v52, %v1781_v62 }
 0x35e   : > { %9754 = vst [vmem:[#allocation64_spill] sm:$0xff] %v8193_v31  ;;  %9755 = vst [vmem:[#allocation65_spill] sm:$0xff] %v8195_v6  ;;  %v2175_v48 = vmul.f32 %v9694_v22, %v1781_v62  ;;  %v2176_v3 = vmul.f32 %v9695_v28, %v1781_v62  ;;  %v2177_v61 = vmul.f32 %v9696_v46, %v1781_v62  ;;  %v9765_v31 = vld [vmem:[#allocation275_spill] sm:$0xff] }
 0x35f   : > { %9756 = vst [vmem:[#allocation48_spill] sm:$0xff] %v8197_v24  ;;  %9757 = vst [vmem:[#allocation49_spill] sm:$0xff] %v8199_v57  ;;  %v2178_v9 = vmul.f32 %v9697_v56, %v1781_v62  ;;  %v2179_v19 = vmul.f32 %v9698_v8, %v1781_v62  ;;  %v2180_v21 = vmul.f32 %v9699_v14, %v1781_v62  ;;  %v9764_v24 = vld [vmem:[#allocation274_spill] sm:$0xff] }
 0x360   : > { %9758 = vst [vmem:[#allocation40_spill] sm:$0xff] %v8201_v30  ;;  %v1313_v32 = vmul.f32 %v9700_v49, %v923_v63  ;;  %v1314_v34 = vmul.f32 %v9701_v54, %v923_v63  ;;  %v1315_v33 = vmul.f32 %v9702_v15, %v923_v63  ;;  %v1316_v55 = vmul.f32 %v9730_v10, %v923_v63  ;;  %v9763_v30 = vld [vmem:[#allocation273_spill] sm:$0xff] }
 0x361   : > { %v1317_v47 = vmul.f32 %v9731_v11, %v923_v63  ;;  %v1318_v12 = vmul.f32 %v9732_v27, %v923_v63  ;;  %v1319_v60 = vmul.f32 %v9733_v41, %v923_v63  ;;  %v1320_v16 = vmul.f32 %v9734_v2, %v923_v63 }
 0x362   : > { %v1321_v17 = vmul.f32 %v9735_v4, %v923_v63  ;;  %v1322_v43 = vmul.f32 %v9736_v35, %v923_v63  ;;  %v1633_v7 = vadd.f32 %v1313_v32, %v9759_v50  ;;  %v1634_v51 = vadd.f32 %v1314_v34, %v9760_v58 }
 0x363   : > { %v1635_v5 = vadd.f32 %v1315_v33, %v9761_v13  ;;  %v1636_v62 = vadd.f32 %v1316_v55, %v9762_v26  ;;  %v1637_v57 = vadd.f32 %v1317_v47, %v9763_v30  ;;  %v1638_v6 = vadd.f32 %v1318_v12, %v9764_v24 }
 0x364   : > { %v1639_v29 = vadd.f32 %v1319_v60, %v9765_v31  ;;  %v1640_v0 = vadd.f32 %v1320_v16, %v9766_v25  ;;  %v1641_v44 = vadd.f32 %v1321_v17, %v9767_v59  ;;  %v1642_v63 = vadd.f32 %v1322_v43, %v9768_v1 }
 0x365   : > { %v2491_v20 = vadd.f32 %v2171_v38, %v1633_v7  ;;  %v2492_v32 = vadd.f32 %v2172_v40, %v1634_v51  ;;  %v2493_v50 = vadd.f32 %v2173_v53, %v1635_v5  ;;  %v2494_v34 = vadd.f32 %v2174_v18, %v1636_v62 }
 0x366   : > { %v2495_v58 = vadd.f32 %v2175_v48, %v1637_v57  ;;  %v2496_v33 = vadd.f32 %v2176_v3, %v1638_v6  ;;  %v2497_v13 = vadd.f32 %v2177_v61, %v1639_v29  ;;  %v2498_v55 = vadd.f32 %v2178_v9, %v1640_v0  ;;  %v927_v3 = vpop.permute.xlu1 %926 }
 0x367   : > { %v2499_v26 = vadd.f32 %v2179_v19, %v1641_v44  ;;  %v2500_v30 = vadd.f32 %v2180_v21, %v1642_v63  ;;  %v2811_v47 = vmax.f32 %v2491_v20, 0.0  ;;  %v2812_v24 = vmax.f32 %v2492_v32, 0.0  ;;  %v1785_v44 = vpop.permute.xlu0 %1784 }
 0x368   : > { %v2813_v12 = vmax.f32 %v2493_v50, 0.0  ;;  %v2814_v31 = vmax.f32 %v2494_v34, 0.0  ;;  %v2815_v60 = vmax.f32 %v2495_v58, 0.0  ;;  %v2816_v25 = vmax.f32 %v2496_v33, 0.0 }
 0x369   : > { %v2817_v16 = vmax.f32 %v2497_v13, 0.0  ;;  %v2818_v59 = vmax.f32 %v2498_v55, 0.0  ;;  %v2819_v17 = vmax.f32 %v2499_v26, 0.0  ;;  %v2820_v1 = vmax.f32 %v2500_v30, 0.0  ;;  %v9776_v30 = vld [vmem:[#allocation300_spill] sm:$0xff] }
 0x36a   : > { %v8233_v38 = vmin.f32 %v2809_v36, 6.0  ;;  %v8235_v40 = vmin.f32 %v2810_v39, 6.0  ;;  %v8237_v57 = vmin.f32 %v2811_v47, 6.0  ;;  %v8239_v29 = vmin.f32 %v2812_v24, 6.0  ;;  %v9777_v24 = vld [vmem:[#allocation301_spill] sm:$0xff] }
 0x36b   : > { %v8241_v0 = vmin.f32 %v2813_v12, 6.0  ;;  %v8243_v20 = vmin.f32 %v2814_v31, 6.0  ;;  %v8245_v6 = vmin.f32 %v2815_v60, 6.0  ;;  %v8247_v53 = vmin.f32 %v2816_v25, 6.0  ;;  %v9778_v31 = vld [vmem:[#allocation312_spill] sm:$0xff]  ;;  %v9779_v25 = vld [vmem:[#allocation313_spill] sm:$0xff] }
 0x36c   : > { %9769 = vst [vmem:[#allocation41_spill] sm:$0xff] %v8233_v38  ;;  %9770 = vst [vmem:[#allocation44_spill] sm:$0xff] %v8235_v40  ;;  %v8249_v18 = vmin.f32 %v2817_v16, 6.0  ;;  %v8251_v48 = vmin.f32 %v2818_v59, 6.0  ;;  %v8253_v36 = vmin.f32 %v2819_v17, 6.0  ;;  %v8255_v39 = vmin.f32 %v2820_v1, 6.0 }
 0x36d   : > { %9771 = vst [vmem:[#allocation45_spill] sm:$0xff] %v8247_v53  ;;  %v2181_v61 = vmul.f32 %v6639_v45, %v1785_v44  ;;  %v2182_v9 = vmul.f32 %v6641_v37, %v1785_v44  ;;  %v2183_v19 = vmul.f32 %v6643_v23, %v1785_v44  ;;  %v2184_v21 = vmul.f32 %v9693_v52, %v1785_v44  ;;  %v9780_v59 = vld [vmem:[#allocation314_spill] sm:$0xff]  ;;  %v9781_v1 = vld [vmem:[#allocation315_spill] sm:$0xff]  ;;  %v9782_v38 = vld [vmem:[#allocation316_spill] sm:$0xff]  ;;  %v931_v53 = vpop.permute.xlu1 %930 }
 0x36e   : > { %9772 = vst [vmem:[#allocation52_spill] sm:$0xff] %v8249_v18  ;;  %9773 = vst [vmem:[#allocation53_spill] sm:$0xff] %v8251_v48  ;;  %v2185_v43 = vmul.f32 %v9694_v22, %v1785_v44  ;;  %v2186_v7 = vmul.f32 %v9695_v28, %v1785_v44  ;;  %v2187_v51 = vmul.f32 %v9696_v46, %v1785_v44  ;;  %v9783_v18 = vld [vmem:[#allocation317_spill] sm:$0xff] }
 0x36f   : > { %9774 = vst [vmem:[#allocation72_spill] sm:$0xff] %v8253_v36  ;;  %9775 = vst [vmem:[#allocation73_spill] sm:$0xff] %v8255_v39  ;;  %v2188_v5 = vmul.f32 %v9697_v56, %v1785_v44  ;;  %v1323_v62 = vmul.f32 %v9700_v49, %v927_v3  ;;  %v1324_v63 = vmul.f32 %v9701_v54, %v927_v3 }
 0x370   : > { %v1325_v32 = vmul.f32 %v9702_v15, %v927_v3  ;;  %v1326_v50 = vmul.f32 %v9730_v10, %v927_v3  ;;  %v1327_v34 = vmul.f32 %v9731_v11, %v927_v3  ;;  %v1328_v58 = vmul.f32 %v9732_v27, %v927_v3 }
 0x371   : > { %v1329_v33 = vmul.f32 %v9733_v41, %v927_v3  ;;  %v1330_v13 = vmul.f32 %v9734_v2, %v927_v3  ;;  %v1331_v55 = vmul.f32 %v9735_v4, %v927_v3  ;;  %v1332_v26 = vmul.f32 %v9736_v35, %v927_v3 }
 0x372   : > { %v1643_v47 = vadd.f32 %v1323_v62, %v9776_v30  ;;  %v1644_v12 = vadd.f32 %v1324_v63, %v9777_v24  ;;  %v1645_v60 = vadd.f32 %v1325_v32, %v9778_v31  ;;  %v1646_v16 = vadd.f32 %v1326_v50, %v9779_v25  ;;  %v9784_v63 = vld [vmem:[#allocation94_spill] sm:$0xff]  ;;  %v9795_v31 = vld [vmem:[#allocation297_spill] sm:$0xff] }
 0x373   : > { %v1647_v17 = vadd.f32 %v1327_v34, %v9780_v59  ;;  %v1648_v39 = vadd.f32 %v1328_v58, %v9781_v1  ;;  %v2189_v36 = vmul.f32 %v9698_v8, %v1785_v44  ;;  %v2190_v40 = vmul.f32 %v9699_v14, %v1785_v44 }
 0x374   : > { %v1649_v48 = vadd.f32 %v1329_v33, %v9782_v38  ;;  %v1650_v3 = vadd.f32 %v1330_v13, %v9783_v18  ;;  %v1651_v62 = vadd.f32 %v1331_v55, %v8179_v42  ;;  %v1652_v32 = vadd.f32 %v1332_v26, %v9784_v63  ;;  %v9791_v55 = vld [vmem:[#allocation293_spill] sm:$0xff] }
 0x375   : > { %v8288_v30 = vadd.f32 %v2181_v61, %v1643_v47  ;;  %v8290_v50 = vadd.f32 %v2182_v9, %v1644_v12  ;;  %v8292_v34 = vadd.f32 %v2183_v19, %v1645_v60  ;;  %v8294_v58 = vadd.f32 %v2184_v21, %v1646_v16  ;;  %v9794_v47 = vld [vmem:[#allocation296_spill] sm:$0xff] }
 0x376   : > { %v8296_v24 = vadd.f32 %v2185_v43, %v1647_v17  ;;  %v8298_v44 = vadd.f32 %v2186_v7, %v1648_v39  ;;  %v8300_v38 = vadd.f32 %v2187_v51, %v1649_v48  ;;  %v8302_v18 = vadd.f32 %v2188_v5, %v1650_v3  ;;  %v1789_v43 = vpop.permute.xlu1 %1788  ;;  %v9788_v7 = vld [vmem:[#allocation290_spill] sm:$0xff] }
 0x377   : > { %v1333_v42 = vmul.f32 %v9700_v49, %v931_v53  ;;  %v1334_v33 = vmul.f32 %v9701_v54, %v931_v53  ;;  %v1335_v61 = vmul.f32 %v9702_v15, %v931_v53  ;;  %v1336_v9 = vmul.f32 %v9730_v10, %v931_v53 }
 0x378   : > { %v1337_v19 = vmul.f32 %v9731_v11, %v931_v53  ;;  %v1338_v21 = vmul.f32 %v9732_v27, %v931_v53  ;;  %v8315_v48 = vadd.f32 %v2189_v36, %v1651_v62  ;;  %v8317_v39 = vadd.f32 %v2190_v40, %v1652_v32  ;;  %v9789_v36 = vld [vmem:[#allocation291_spill] sm:$0xff]  ;;  %v9790_v40 = vld [vmem:[#allocation292_spill] sm:$0xff] }
 0x379   : > { %v1339_v49 = vmul.f32 %v9733_v41, %v931_v53  ;;  %v1340_v54 = vmul.f32 %v9734_v2, %v931_v53  ;;  %v1341_v15 = vmul.f32 %v9735_v4, %v931_v53  ;;  %v1342_v10 = vmul.f32 %v9736_v35, %v931_v53  ;;  %v9792_v4 = vld [vmem:[#allocation294_spill] sm:$0xff]  ;;  %v9793_v2 = vld [vmem:[#allocation295_spill] sm:$0xff] }
 0x37a   : > { %v9785_v11 = vlaneseq  ;;  %v1653_v51 = vadd.f32 %v1333_v42, %v9788_v7  ;;  %v1654_v5 = vadd.f32 %v1334_v33, %v9789_v36  ;;  %v1655_v13 = vadd.f32 %v1335_v61, %v9790_v40  ;;  %v9796_v61 = vld [vmem:[#allocation298_spill] sm:$0xff] }
 0x37b   : > { %v1656_v41 = vadd.f32 %v1336_v9, %v9791_v55  ;;  %v4306_v26 = vmov -inf   ;;  %v1657_v35 = vadd.f32 %v1337_v19, %v9792_v4  ;;  %v1658_v53 = vadd.f32 %v1338_v21, %v9793_v2  ;;  %v9797_v9 = vld [vmem:[#allocation299_spill] sm:$0xff] }
 0x37c   : > { %vm8324_vm0 = vcmp.lt.s32.totalorder %v9785_v11, 256  ;;  %v1659_v12 = vadd.f32 %v1339_v49, %v9794_v47  ;;  %v1660_v60 = vadd.f32 %v1340_v54, %v9795_v31  ;;  %v2191_v25 = vmul.f32 %v6639_v45, %v1789_v43  ;;  %v9798_v11 = vld [vmem:[#allocation5_spill] sm:$0xff] }
 0x37d   : > { %192 = vst.msk [vmem:[%s8313_s8 + $0x8] sm:$0x3] %vm8324_vm0, %v4306_v26  ;;  %v2192_v16 = vmul.f32 %v6641_v37, %v1789_v43  ;;  %v2193_v59 = vmul.f32 %v6643_v23, %v1789_v43  ;;  %v4307_v17 = vmov 1966171168   ;;  %v2194_v3 = vmul.f32 %v9693_v52, %v1789_v43 }
 0x37e   : > { %v4031_v1 = vunpack.c.l.s4 %v4307_v17  ;;  %v2195_v62 = vmul.f32 %v9694_v22, %v1789_v43  ;;  %v2196_v63 = vmul.f32 %v9695_v28, %v1789_v43  ;;  %v2197_v32 = vmul.f32 %v9696_v46, %v1789_v43 }
 0x37f   : > { %v2198_v42 = vmul.f32 %v9697_v56, %v1789_v43  ;;  %v2199_v33 = vmul.f32 %v9698_v8, %v1789_v43  ;;  %v2200_v45 = vmul.f32 %v9699_v14, %v1789_v43  ;;  %v1661_v37 = vadd.f32 %v1341_v15, %v9796_v61 }
 0x380   : > { %v1662_v23 = vadd.f32 %v1342_v10, %v9797_v9  ;;  %v4032_v19 = vunpack.c.0.s8 %v4031_v1  ;;  %v2511_v21 = vadd.f32 %v2191_v25, %v1653_v51  ;;  %v2512_v49 = vadd.f32 %v2192_v16, %v1654_v5  ;;  %v9803_v9 = vld [vmem:[#allocation96_spill] sm:$0xff] }
 0x381   : > { %v2513_v52 = vadd.f32 %v2193_v59, %v1655_v13  ;;  %v2514_v54 = vadd.f32 %v2194_v3, %v1656_v41  ;;  %v2515_v22 = vadd.f32 %v2195_v62, %v1657_v35  ;;  %v2516_v46 = vadd.f32 %v2196_v63, %v1658_v53 }
 0x382   : > { %v8352_v28 = vsub.s32 %v4032_v19, %v9798_v11  ;;  %v2517_v7 = vadd.f32 %v2197_v32, %v1659_v12  ;;  %v2518_v56 = vadd.f32 %v2198_v42, %v1660_v60  ;;  %v8354_v36 = vadd.f32 %v2199_v33, %v1661_v37  ;;  %v9799_v42 = vld [vmem:[#allocation95_spill] sm:$0xff]  ;;  %v9800_v33 = vld [vmem:[#allocation33_spill] sm:$0xff] }
 0x383   : > { %v8356_v8 = vadd.f32 %v2200_v45, %v1662_v23  ;;  %v2821_v14 = vmax.f32 %v8288_v30, 0.0  ;;  %v2822_v15 = vmax.f32 %v8290_v50, 0.0  ;;  %v2823_v10 = vmax.f32 %v8292_v34, 0.0  ;;  %v9801_v45 = vld [vmem:[#allocation302_spill] sm:$0xff]  ;;  %v9805_v19 = vld [vmem:[#allocation303_spill] sm:$0xff] }
 0x384   : > { %v2824_v43 = vmax.f32 %v8294_v58, 0.0  ;;  %v2825_v51 = vmax.f32 %v8296_v24, 0.0  ;;  %v2826_v5 = vmax.f32 %v8298_v44, 0.0  ;;  %v2827_v40 = vmax.f32 %v8300_v38, 0.0  ;;  %v9804_v23 = vld [vmem:[#allocation34_spill] sm:$0xff] }
 0x385   : > { %v2828_v13 = vmax.f32 %v8302_v18, 0.0  ;;  %v2829_v55 = vmax.f32 %v8315_v48, 0.0  ;;  %v2830_v41 = vmax.f32 %v8317_v39, 0.0  ;;  %v2831_v26 = vmax.f32 %v2511_v21, 0.0 }
 0x386   : > { %v2832_v30 = vmax.f32 %v2512_v49, 0.0  ;;  %v2833_v4 = vmax.f32 %v2513_v52, 0.0  ;;  %v2834_v50 = vmax.f32 %v2514_v54, 0.0  ;;  %v2835_v35 = vmax.f32 %v2515_v22, 0.0  ;;  %v9807_v52 = vld [vmem:[#allocation97_spill] sm:$0xff]  ;;  %v9808_v54 = vld [vmem:[#allocation35_spill] sm:$0xff] }
 0x387   : > { %v2836_v34 = vmax.f32 %v2516_v46, 0.0  ;;  %v2837_v2 = vmax.f32 %v2517_v7, 0.0  ;;  %v2838_v58 = vmax.f32 %v2518_v56, 0.0  ;;  %v2839_v24 = vmax.f32 %v8354_v36, 0.0  ;;  %v9809_v22 = vld [vmem:[#allocation304_spill] sm:$0xff]  ;;  %v9812_v56 = vld [vmem:[#allocation42_spill] sm:$0xff] }
 0x388   : > { %v2840_v44 = vmax.f32 %v8356_v8, 0.0  ;;  %v3141_v53 = vmin.f32 %v2821_v14, 6.0  ;;  %v3142_v38 = vmin.f32 %v2822_v15, 6.0  ;;  %v3143_v47 = vmin.f32 %v2823_v10, 6.0  ;;  %v9811_v7 = vld [vmem:[#allocation64_spill] sm:$0xff]  ;;  %v9813_v14 = vld [vmem:[#allocation305_spill] sm:$0xff] }
 0x389   : > { %v3144_v18 = vmin.f32 %v2824_v43, 6.0  ;;  %v3145_v12 = vmin.f32 %v2825_v51, 6.0  ;;  %v3146_v48 = vmin.f32 %v2826_v5, 6.0  ;;  %v3147_v31 = vmin.f32 %v2827_v40, 6.0  ;;  %v9815_v43 = vld [vmem:[#allocation65_spill] sm:$0xff]  ;;  %v9816_v51 = vld [vmem:[#allocation43_spill] sm:$0xff] }
 0x38a   : > { %v3148_v39 = vmin.f32 %v2828_v13, 6.0  ;;  %v8370_v60 = vmin.f32 %v2829_v55, 6.0  ;;  %v8372_v25 = vmin.f32 %v2830_v41, 6.0  ;;  %v3151_v16 = vmin.f32 %v2831_v26, 6.0  ;;  %v9817_v5 = vld [vmem:[#allocation306_spill] sm:$0xff]  ;;  %v9819_v55 = vld [vmem:[#allocation48_spill] sm:$0xff] }
 0x38b   : > { %v3152_v59 = vmin.f32 %v2832_v30, 6.0  ;;  %v3153_v17 = vmin.f32 %v2833_v4, 6.0  ;;  %v3154_v1 = vmin.f32 %v2834_v50, 6.0  ;;  %v3155_v3 = vmin.f32 %v2835_v35, 6.0  ;;  %v9820_v41 = vld [vmem:[#allocation54_spill] sm:$0xff]  ;;  %v9821_v26 = vld [vmem:[#allocation307_spill] sm:$0xff] }
 0x38c   : > { %v3156_v62 = vmin.f32 %v2836_v34, 6.0  ;;  %v3157_v63 = vmin.f32 %v2837_v2, 6.0  ;;  %v3158_v32 = vmin.f32 %v2838_v58, 6.0  ;;  %v9802_v61 = vmax.f32 %v9800_v33, %v9801_v45  ;;  %v9823_v50 = vld [vmem:[#allocation49_spill] sm:$0xff]  ;;  %v9824_v35 = vld [vmem:[#allocation55_spill] sm:$0xff]  ;;  %v9825_v34 = vld [vmem:[#allocation308_spill] sm:$0xff] }
 0x38d   : > { %v9806_v21 = vmax.f32 %v9804_v23, %v9805_v19  ;;  %v9810_v11 = vmax.f32 %v9808_v54, %v9809_v22  ;;  %v9814_v15 = vmax.f32 %v9812_v56, %v9813_v14  ;;  %v9818_v40 = vmax.f32 %v9816_v51, %v9817_v5  ;;  %v9828_v33 = vld [vmem:[#allocation56_spill] sm:$0xff]  ;;  %v9829_v45 = vld [vmem:[#allocation309_spill] sm:$0xff] }
 0x38e   : > { %v3673_v37 = vmax.f32 %v9802_v61, %v9799_v42  ;;  %v9822_v30 = vmax.f32 %v9820_v41, %v9821_v26  ;;  %v9826_v2 = vmax.f32 %v9824_v35, %v9825_v34  ;;  %v9827_v42 = vld [vmem:[#allocation40_spill] sm:$0xff]  ;;  %v9830_v61 = vmax.f32 %v9828_v33, %v9829_v45  ;;  %v9831_v22 = vld [vmem:[#allocation45_spill] sm:$0xff] }
 0x38f   : > { %v3710_v49 = vmax.f32 %v9806_v21, %v9803_v9  ;;  %v3747_v46 = vmax.f32 %v9810_v11, %v9807_v52  ;;  %v3784_v10 = vmax.f32 %v9814_v15, %v9811_v7  ;;  %v3821_v13 = vmax.f32 %v9818_v40, %v9815_v43  ;;  %v9832_v7 = vld [vmem:[#allocation52_spill] sm:$0xff]  ;;  %v9833_v14 = vld [vmem:[#allocation53_spill] sm:$0xff] }
 0x390   : > { %v3858_v4 = vmax.f32 %v9822_v30, %v9819_v55  ;;  %v3895_v58 = vmax.f32 %v9826_v2, %v9823_v50  ;;  %v3932_v9 = vmax.f32 %v9830_v61, %v9827_v42  ;;  %v3674_v23 = vmax.f32 %v3673_v37, %v8237_v57 }
 0x391   : > { %v3711_v19 = vmax.f32 %v3710_v49, %v8239_v29  ;;  %v3748_v21 = vmax.f32 %v3747_v46, %v8241_v0  ;;  %v3785_v52 = vmax.f32 %v3784_v10, %v8243_v20  ;;  %v3822_v54 = vmax.f32 %v3821_v13, %v8245_v6 }
 0x392   : > { %v3859_v11 = vmax.f32 %v3858_v4, %v9831_v22  ;;  %v3896_v56 = vmax.f32 %v3895_v58, %v9832_v7  ;;  %v3933_v15 = vmax.f32 %v3932_v9, %v9833_v14  ;;  %v3675_v43 = vmax.f32 %v3674_v23, %v3141_v53 }
 0x393   : > { %v3712_v51 = vmax.f32 %v3711_v19, %v3142_v38  ;;  %v3749_v5 = vmax.f32 %v3748_v21, %v3143_v47  ;;  %v3786_v40 = vmax.f32 %v3785_v52, %v3144_v18  ;;  %v3823_v55 = vmax.f32 %v3822_v54, %v3145_v12 }
 0x394   : > { %v3860_v57 = vmax.f32 %v3859_v11, %v3146_v48  ;;  %v3897_v37 = vmax.f32 %v3896_v56, %v3147_v31  ;;  %v3934_v29 = vmax.f32 %v3933_v15, %v3148_v39  ;;  %v3676_v49 = vmax.f32 %v3675_v43, %v3151_v16 }
 0x395   : > { %v3713_v0 = vmax.f32 %v3712_v51, %v3152_v59  ;;  %v3750_v46 = vmax.f32 %v3749_v5, %v3153_v17  ;;  %v3787_v20 = vmax.f32 %v3786_v40, %v3154_v1  ;;  %v3824_v10 = vmax.f32 %v3823_v55, %v3155_v3 }
 0x396   : > { %v3861_v6 = vmax.f32 %v3860_v57, %v3156_v62  ;;  %v3898_v13 = vmax.f32 %v3897_v37, %v3157_v63  ;;  %v3935_v41 = vmax.f32 %v3934_v29, %v3158_v32  ;;  %v3677_v26 = vrot.slane %v3676_v49, 4 }
 0x397   : > { %v3714_v30 = vrot.slane %v3713_v0, 4  ;;  %v3751_v4 = vrot.slane %v3750_v46, 4  ;;  %v3788_v50 = vrot.slane %v3787_v20, 4  ;;  %v3825_v53 = vrot.slane %v3824_v10, 4 }
 0x398   : > { %v3862_v38 = vrot.slane %v3861_v6, 4  ;;  %v3899_v47 = vrot.slane %v3898_v13, 4  ;;  %v3936_v18 = vrot.slane %v3935_v41, 4  ;;  %v3678_v12 = vmax.f32 %v3676_v49, %v3677_v26  ;;  %v9834_v49 = vld [vmem:[#allocation41_spill] sm:$0xff] }
 0x399   : > { %v3715_v48 = vmax.f32 %v3713_v0, %v3714_v30  ;;  %v3752_v31 = vmax.f32 %v3750_v46, %v3751_v4  ;;  %v3789_v39 = vmax.f32 %v3787_v20, %v3788_v50  ;;  %v3826_v16 = vmax.f32 %v3824_v10, %v3825_v53  ;;  %v9835_v0 = vld [vmem:[#allocation57_spill] sm:$0xff]  ;;  %v9836_v46 = vld [vmem:[#allocation46_spill] sm:$0xff] }
 0x39a   : > { %v3863_v59 = vmax.f32 %v3861_v6, %v3862_v38  ;;  %v3900_v17 = vmax.f32 %v3898_v13, %v3899_v47  ;;  %v3937_v1 = vmax.f32 %v3935_v41, %v3936_v18  ;;  %v3679_v3 = vrot.slane %v3678_v12, 2  ;;  %v9838_v6 = vld [vmem:[#allocation44_spill] sm:$0xff]  ;;  %v9839_v13 = vld [vmem:[#allocation318_spill] sm:$0xff]  ;;  %v9840_v41 = vld [vmem:[#allocation47_spill] sm:$0xff] }
 0x39b   : > { %v3716_v62 = vrot.slane %v3715_v48, 2  ;;  %v3753_v63 = vrot.slane %v3752_v31, 2  ;;  %v3790_v32 = vrot.slane %v3789_v39, 2  ;;  %v3827_v35 = vrot.slane %v3826_v16, 2 }
 0x39c   : > { %v3864_v34 = vrot.slane %v3863_v59, 2  ;;  %v3901_v2 = vrot.slane %v3900_v17, 2  ;;  %v3938_v58 = vrot.slane %v3937_v1, 2  ;;  %v3680_v42 = vmax.f32 %v3678_v12, %v3679_v3  ;;  %v9842_v12 = vld [vmem:[#allocation72_spill] sm:$0xff] }
 0x39d   : > { %v3717_v33 = vmax.f32 %v3715_v48, %v3716_v62  ;;  %v3754_v45 = vmax.f32 %v3752_v31, %v3753_v63  ;;  %v3791_v61 = vmax.f32 %v3789_v39, %v3790_v32  ;;  %v3828_v9 = vmax.f32 %v3826_v16, %v3827_v35  ;;  %v9843_v31 = vld [vmem:[#allocation73_spill] sm:$0xff] }
 0x39e   : > { %v3865_v23 = vmax.f32 %v3863_v59, %v3864_v34  ;;  %v3902_v19 = vmax.f32 %v3900_v17, %v3901_v2  ;;  %v3939_v21 = vmax.f32 %v3937_v1, %v3938_v58  ;;  %v3681_v52 = vrot.slane %v3680_v42, 1 }
 0x39f   : > { %v3718_v54 = vrot.slane %v3717_v33, 1  ;;  %v3755_v22 = vrot.slane %v3754_v45, 1  ;;  %v3792_v11 = vrot.slane %v3791_v61, 1  ;;  %v3829_v7 = vrot.slane %v3828_v9, 1 }
 0x3a0   : > { %v3866_v56 = vrot.slane %v3865_v23, 1  ;;  %v3903_v14 = vrot.slane %v3902_v19, 1  ;;  %v3940_v15 = vrot.slane %v3939_v21, 1  ;;  %v3682_v43 = vmax.f32 %v3680_v42, %v3681_v52 }
 0x3a1   : > { %v3719_v51 = vmax.f32 %v3717_v33, %v3718_v54  ;;  %v3756_v5 = vmax.f32 %v3754_v45, %v3755_v22  ;;  %v3793_v40 = vmax.f32 %v3791_v61, %v3792_v11  ;;  %v3830_v55 = vmax.f32 %v3828_v9, %v3829_v7  ;;  %v3645_v54 = vld [vmem:[%s8313_s8 + $0x8] sm:$0x3] }
 0x3a2   : > { %v3867_v57 = vmax.f32 %v3865_v23, %v3866_v56  ;;  %v3904_v37 = vmax.f32 %v3902_v19, %v3903_v14  ;;  %v3941_v29 = vmax.f32 %v3939_v21, %v3940_v15  ;;  %v9837_v20 = vmax.f32 %v9835_v0, %v9836_v46 }
 0x3a3   : > { %v9841_v26 = vmax.f32 %v9839_v13, %v9840_v41  ;;  %v4026_v4 = vcombine.low %v3682_v43, %v3719_v51  ;;  %v4027_v50 = vcombine.low %v3756_v5, %v3793_v40  ;;  %v3159_v53 = vmin.f32 %v2839_v24, 6.0 }
 0x3a4   : > { %v3969_v10 = vmax.f32 %v9837_v20, %v9834_v49  ;;  %v3160_v38 = vmin.f32 %v2840_v44, 6.0  ;;  %v4028_v47 = vcombine.low %v3830_v55, %v3867_v57  ;;  %v4029_v18 = vcombine.low %v3904_v37, %v3941_v29 }
 0x3a5   : > { %v4006_v30 = vmax.f32 %v9841_v26, %v9838_v6  ;;  %v4036_v16 = vrot.slane %v4026_v4, %v8352_v28  ;;  %v4043_v59 = vrot.slane %v4027_v50, %v8352_v28 }
 0x3a6   : > { %v3970_v48 = vmax.f32 %v3969_v10, %v9842_v12  ;;  %v4050_v17 = vrot.slane %v4028_v47, %v8352_v28  ;;  %v4057_v1 = vrot.slane %v4029_v18, %v8352_v28 }
 0x3a7   : > { %v4007_v39 = vmax.f32 %v4006_v30, %v9843_v31  ;;  %v4058_v24 = vcombine.low %v4036_v16, %v4043_v59 }
 0x3a8   : > { %v3971_v36 = vmax.f32 %v3970_v48, %v8370_v60  ;;  %v4059_v44 = vcombine.low %v4050_v17, %v4057_v1 }
 0x3a9   : > { %v4008_v8 = vmax.f32 %v4007_v39, %v8372_v25  ;;  %v4066_v63 = vrot.slane %v4058_v24, %v8352_v28 }
 0x3aa   : > { %v3972_v3 = vmax.f32 %v3971_v36, %v3159_v53  ;;  %v4073_v32 = vrot.slane %v4059_v44, %v8352_v28 }
 0x3ab   : > { %v4009_v62 = vmax.f32 %v4008_v8, %v3160_v38 }
 0x3ac   : > { %v3973_v35 = vrot.slane %v3972_v3, 4  ;;  %v4074_v2 = vcombine.low %v4066_v63, %v4073_v32 }
 0x3ad   : > { %v4010_v34 = vrot.slane %v4009_v62, 4 }
 0x3ae   : > { %v3974_v58 = vmax.f32 %v3972_v3, %v3973_v35  ;;  %4094 = vst [vmem:[%s8313_s8] sm:$0xff] %v4074_v2 }
 0x3af   : > { %v4011_v42 = vmax.f32 %v4009_v62, %v4010_v34 }
 0x3b0   : > { %v3975_v33 = vrot.slane %v3974_v58, 2 }
 0x3b1   : > { %v4012_v45 = vrot.slane %v4011_v42, 2 }
 0x3b2   : > { %v3976_v60 = vmax.f32 %v3974_v58, %v3975_v33 }
 0x3b3   : > { %v4013_v25 = vmax.f32 %v4011_v42, %v4012_v45 }
 0x3b4   : > { %v3977_v61 = vrot.slane %v3976_v60, 1 }
 0x3b5   : > { %v4014_v9 = vrot.slane %v4013_v25, 1 }
 0x3b6   : > { %v3978_v23 = vmax.f32 %v3976_v60, %v3977_v61 }
 0x3b7   : > { %v4015_v19 = vmax.f32 %v4013_v25, %v4014_v9 }
 0x3b9   : > { %v4075_v21 = vcombine.low %v3978_v23, %v4015_v19 }
 0x3bb   : > { %v4082_v52 = vrot.slane %v4075_v21, %v8352_v28 }
 0x3bd   : > { %v4089_v22 = vrot.slane %v4082_v52, %v8352_v28 }
 0x3bf   : > { %v4093_v11 = vmax.f32 %v3645_v54, %v4089_v22 }
 0x3c1   : > { %4099 = vst.msk [vmem:[%s8313_s8 + $0x8] sm:$0x3] %vm8324_vm0, %v4093_v11 }
 0x3c2 PF: > { %s13_s11 = sadd.s32 1, %s4300_s11   ;;  %s9844_s9 = smov %s4296_s10 }
 0x3c3   : > { %p10_p3 = scmp.ge.s32.totalorder %s13_s11, 4   ;;  %s9845_s10 = smov %s9847_s13 }
 0x3c5   :  { %12 = sbr.rel (!%p10_p3) target bundleno = 2 (0x2), region = 67 }
 0x3cc   :  { %4119 = vsyncpa [#allocation3], 1 }
 0x3cd   :  { %4121 = vsyncpa [#allocation3 + $0x1], 1 }

</bundles_post_ra>
